<compile_context>
chip_gen: v6e
topology: v6e:2x2x1
jax: 0.10.0
libtpu: 0.0.40
codegen_flags: <defaults>
</compile_context>

<pallas_src>
import functools

import jax
import jax.numpy as jnp
from jax.experimental import pallas as pl
from jax.experimental.pallas import tpu as pltpu


# ----------------------------------------------------------------------------
# Bilinear 2x upsample weights (align_corners=True), built once on the host.
# Inside the kernel the upsample is a separable row/col contraction done as
# broadcast multiply-accumulates (exact f32, no MXU precision issues).
# ----------------------------------------------------------------------------
def _interp_matrix(out_size, in_size):
    """PyTorch Upsample(mode='bilinear', align_corners=True) weights."""
    if in_size == 1:
        return jnp.ones((out_size, 1), jnp.float32)
    src = jnp.arange(out_size, dtype=jnp.float32) * (in_size - 1) / (out_size - 1)
    i0 = jnp.clip(jnp.floor(src).astype(jnp.int32), 0, in_size - 2)
    frac = src - i0.astype(jnp.float32)
    rows = jnp.arange(out_size)
    a = jnp.zeros((out_size, in_size), jnp.float32)
    a = a.at[rows, i0].add(1.0 - frac)
    a = a.at[rows, i0 + 1].add(frac)
    return a


# ----------------------------------------------------------------------------
# Fused kernel: upsample + pad + concat + (conv3x3+ReLU) x 2, one image/step.
# ----------------------------------------------------------------------------
def _up_fused_kernel(ah_ref, awt_ref, x1_ref, x2_ref,
                     w1_ref, b1_ref, w2_ref, b2_ref,
                     o_ref, cat_ref, mid_ref, *, pad_t, pad_l):
    # ah_ref : (Ho, H1)   row-interpolation matrix (f32, VMEM)
    # awt_ref: (W1, Wo)   transposed col-interpolation matrix (f32, VMEM)
    # x1_ref : (1, C1, H1, W1) VMEM   low-res path
    # x2_ref : (1, C2, H2, W2) VMEM   skip connection
    # w*_ref : (Cout*Cin*9,) SMEM     conv weights, flattened OIHW order
    # b*_ref : (Cout,) SMEM
    # o_ref  : (1, Cout, H2, W2) VMEM
    # cat_ref: (C1+C2, H2+2, W2+2) VMEM scratch (f32, incl. 1-px halo)
    # mid_ref: (Cout,  H2+2, W2+2) VMEM scratch (f32, incl. 1-px halo)
    c1 = x1_ref.shape[1]
    c2 = x2_ref.shape[1]
    c_in = cat_ref.shape[0]
    c_out = o_ref.shape[1]
    h1, w1s = x1_ref.shape[2], x1_ref.shape[3]
    ho, wo = ah_ref.shape[0], awt_ref.shape[1]
    h2, w2s = o_ref.shape[2], o_ref.shape[3]

    # Zero the scratch: conv halo and the F.pad region must be zeros.
    cat_ref[...] = jnp.zeros_like(cat_ref)
    mid_ref[...] = jnp.zeros_like(mid_ref)

    # Skip connection x2 -> cat[0:C2] (inside the 1-px halo).
    for c in range(c2):
        cat_ref[c, 1:1 + h2, 1:1 + w2s] = x2_ref[0, c, :, :].astype(jnp.float32)

    # Bilinear 2x upsample of x1 -> cat[C2:], placed at the F.pad offset.
    ah = ah_ref[...]
    awt = awt_ref[...]
    for c in range(c1):
        xc = x1_ref[0, c, :, :].astype(jnp.float32)            # (H1, W1)
        # rows: t[g, w] = sum_h ah[g, h] * xc[h, w]
        t = jnp.zeros((ho, w1s), jnp.float32)
        for h in range(h1):
            t = t + ah[:, h:h + 1] * xc[h:h + 1, :]
        # cols: y[g, k] = sum_w t[g, w] * awt[w, k]
        y = jnp.zeros((ho, wo), jnp.float32)
        for w in range(w1s):
            y = y + t[:, w:w + 1] * awt[w:w + 1, :]
        cat_ref[c2 + c,
                1 + pad_t:1 + pad_t + ho,
                1 + pad_l:1 + pad_l + wo] = y

    # 3x3 conv (padding=1 via the halo) + bias + ReLU, accumulated in f32.
    def conv3x3_relu(in_ref, n_in, w_flat, b_vec, n_out, store):
        # Hoist the 9 shifted (H2, W2) windows per input channel out of the
        # output-channel loop.
        wins = []
        for ci in range(n_in):
            taps = []
            for dh in range(3):
                for dw in range(3):
                    taps.append(in_ref[ci, dh:dh + h2, dw:dw + w2s])
            wins.append(taps)
        for co in range(n_out):
            acc = jnp.full((h2, w2s), b_vec[co], dtype=jnp.float32)
            for ci in range(n_in):
                base = (co * n_in + ci) * 9
                for tap in range(9):
                    acc = acc + w_flat[base + tap] * wins[ci][tap]
            store(co, jnp.maximum(acc, 0.0))

    def store_mid(co, v):
        mid_ref[co, 1:1 + h2, 1:1 + w2s] = v

    def store_out(co, v):
        o_ref[0, co, :, :] = v.astype(o_ref.dtype)

    conv3x3_relu(cat_ref, c_in, w1_ref, b1_ref, c_out, store_mid)
    conv3x3_relu(mid_ref, c_out, w2_ref, b2_ref, c_out, store_out)


# ----------------------------------------------------------------------------
# Full `Up.forward(x1, x2)` wrapper.
# ----------------------------------------------------------------------------
def up_forward(x1, x2, conv1_w, conv1_b, conv2_w, conv2_b):
    n, c1, h1, w1s = x1.shape
    _, c2, h2, w2s = x2.shape
    c_out = conv1_w.shape[0]
    c_in = c1 + c2
    assert conv1_w.shape == (c_out, c_in, 3, 3)
    assert conv2_w.shape == (c_out, c_out, 3, 3)

    ho, wo = 2 * h1, 2 * w1s
    dy, dx = h2 - ho, w2s - wo
    assert dy >= 0 and dx >= 0, "skip connection must be >= upsampled size"
    pad_t, pad_l = dy // 2, dx // 2

    ah = _interp_matrix(ho, h1)        # (Ho, H1)
    awt = _interp_matrix(wo, w1s).T    # (W1, Wo)

    kernel = functools.partial(_up_fused_kernel, pad_t=pad_t, pad_l=pad_l)

    return pl.pallas_call(
        kernel,
        out_shape=jax.ShapeDtypeStruct((n, c_out, h2, w2s), x1.dtype),
        grid_spec=pltpu.PrefetchScalarGridSpec(
            num_scalar_prefetch=0,
            grid=(n,),
            in_specs=[
                pl.BlockSpec((ho, h1), lambda i: (0, 0)),
                pl.BlockSpec((w1s, wo), lambda i: (0, 0)),
                pl.BlockSpec((1, c1, h1, w1s), lambda i: (i, 0, 0, 0)),
                pl.BlockSpec((1, c2, h2, w2s), lambda i: (i, 0, 0, 0)),
                pl.BlockSpec(memory_space=pltpu.MemorySpace.SMEM),
                pl.BlockSpec(memory_space=pltpu.MemorySpace.SMEM),
                pl.BlockSpec(memory_space=pltpu.MemorySpace.SMEM),
                pl.BlockSpec(memory_space=pltpu.MemorySpace.SMEM),
            ],
            out_specs=pl.BlockSpec((1, c_out, h2, w2s), lambda i: (i, 0, 0, 0)),
            scratch_shapes=[
                pltpu.VMEM((c_in, h2 + 2, w2s + 2), jnp.float32),
                pltpu.VMEM((c_out, h2 + 2, w2s + 2), jnp.float32),
            ],
        ),
        compiler_params=pltpu.CompilerParams(
            dimension_semantics=("parallel",)),
    )(ah, awt, x1, x2,
      conv1_w.reshape(-1).astype(jnp.float32), conv1_b.astype(jnp.float32),
      conv2_w.reshape(-1).astype(jnp.float32), conv2_b.astype(jnp.float32))


# ----------------------------------------------------------------------------
# Pure-JAX reference for correctness checking.
# ----------------------------------------------------------------------------
def _ref_up_forward(x1, x2, w1, b1, w2, b2):
    n, c1, h1, w1s = x1.shape
    h2, w2s = x2.shape[2], x2.shape[3]
    ho, wo = 2 * h1, 2 * w1s
    sy = jnp.arange(ho, dtype=jnp.float32) * (h1 - 1) / (ho - 1)
    sx = jnp.arange(wo, dtype=jnp.float32) * (w1s - 1) / (wo - 1)
    y0 = jnp.clip(jnp.floor(sy).astype(jnp.int32), 0, h1 - 2)
    x0 = jnp.clip(jnp.floor(sx).astype(jnp.int32), 0, w1s - 2)
    fy = (sy - y0.astype(jnp.float32))[:, None]
    fx = (sx - x0.astype(jnp.float32))[None, :]
    yi0 = y0[:, None]
    xi0 = x0[None, :]
    g00 = x1[:, :, yi0, xi0]
    g01 = x1[:, :, yi0, xi0 + 1]
    g10 = x1[:, :, yi0 + 1, xi0]
    g11 = x1[:, :, yi0 + 1, xi0 + 1]
    up = (g00 * (1 - fy) * (1 - fx) + g01 * (1 - fy) * fx
          + g10 * fy * (1 - fx) + g11 * fy * fx)
    dy, dx = h2 - ho, w2s - wo
    up = jnp.pad(up, ((0, 0), (0, 0),
                      (dy // 2, dy - dy // 2), (dx // 2, dx - dx // 2)))
    xcat = jnp.concatenate([x2, up], axis=1)

    def conv_relu(x, w, b):
        y = jax.lax.conv_general_dilated(
            x, w, window_strides=(1, 1), padding=((1, 1), (1, 1)),
            dimension_numbers=("NCHW", "OIHW", "NCHW"),
            precision=jax.lax.Precision.HIGHEST)
        return jax.nn.relu(y + b[None, :, None, None])

    return conv_relu(conv_relu(xcat, w1, b1), w2, b2)


if __name__ == "__main__":
    key = jax.random.PRNGKey(0)
    ks = jax.random.split(key, 6)

    # Small UNet-style shapes: x1 is the low-res path (upsampled 2x), x2 is
    # the skip connection.  Concatenated channels = 4, out channels = 4.
    N, C1, H1, W1 = 2, 2, 8, 8
    C2, H2, W2 = 2, 16, 16
    C_IN = C1 + C2
    C_OUT = 4

    x1 = jax.random.normal(ks[0], (N, C1, H1, W1), dtype=jnp.float32)
    x2 = jax.random.normal(ks[1], (N, C2, H2, W2), dtype=jnp.float32)
    conv1_w = jax.random.normal(ks[2], (C_OUT, C_IN, 3, 3), jnp.float32) * 0.1
    conv1_b = jax.random.normal(ks[3], (C_OUT,), jnp.float32) * 0.1
    conv2_w = jax.random.normal(ks[4], (C_OUT, C_OUT, 3, 3), jnp.float32) * 0.1
    conv2_b = jax.random.normal(ks[5], (C_OUT,), jnp.float32) * 0.1

    up_fn = jax.jit(up_forward)
    out = up_fn(x1, x2, conv1_w, conv1_b, conv2_w, conv2_b)
    out = jax.block_until_ready(out)

    ref = _ref_up_forward(x1, x2, conv1_w, conv1_b, conv2_w, conv2_b)
    assert out.shape == (N, C_OUT, H2, W2), out.shape
    assert jnp.allclose(out, ref, atol=1e-4, rtol=1e-4), \
        float(jnp.max(jnp.abs(out - ref)))

    print("KERNEL_OK")
</pallas_src>

<mosaic_0001>
module attributes {stable_mosaic.version = 11 : i64} {
  func.func private @main(%arg0: i32) attributes {dimension_semantics = [#tpu.dimension_semantics<core_parallel>], iteration_bounds = array<i64: 2>, tpu.core_type = #tpu.core_type<sc_scalar_subcore>, window_params = []} {
    return
  }
}

module attributes {stable_mosaic.version = 11 : i64} {
  func.func private @main(%arg0: i32) attributes {dimension_semantics = [#tpu.dimension_semantics<core_parallel>], iteration_bounds = array<i64: 2>, tpu.core_type = #tpu.core_type<sc_scalar_subcore>, window_params = []} {
    return
  }
}

module attributes {stable_mosaic.version = 11 : i64} {
  func.func @_up_fused_kernel(%arg0: i32, %arg1: memref<16x8xf32, #tpu.memory_space<vmem>>, %arg2: memref<8x16xf32, #tpu.memory_space<vmem>>, %arg3: memref<1x2x8x8xf32, #tpu.memory_space<vmem>>, %arg4: memref<1x2x16x16xf32, #tpu.memory_space<vmem>>, %arg5: memref<144xf32, #tpu.memory_space<smem>>, %arg6: memref<4xf32, #tpu.memory_space<smem>>, %arg7: memref<144xf32, #tpu.memory_space<smem>>, %arg8: memref<4xf32, #tpu.memory_space<smem>>, %arg9: memref<1x4x16x16xf32, #tpu.memory_space<vmem>>, %arg10: memref<4x18x18xf32, #tpu.memory_space<vmem>>, %arg11: memref<4x18x18xf32, #tpu.memory_space<vmem>>) attributes {dimension_semantics = [#tpu.dimension_semantics<parallel>], iteration_bounds = array<i64: 2>, scalar_prefetch = 0 : i64, scratch_operands = 2 : i64, tpu.core_type = #tpu.core_type<tc>, window_params = [{pipeline_mode = #tpu.pipeline_mode<synchronous>, transform_indices = @transform_0, window_bounds = array<i64: 16, 8>}, {pipeline_mode = #tpu.pipeline_mode<synchronous>, transform_indices = @transform_1, window_bounds = array<i64: 8, 16>}, {transform_indices = @transform_2, window_bounds = array<i64: 1, 2, 8, 8>}, {transform_indices = @transform_3, window_bounds = array<i64: 1, 2, 16, 16>}, {transform_indices = @transform_4, window_bounds = array<i64: 144>}, {transform_indices = @transform_5, window_bounds = array<i64: 4>}, {transform_indices = @transform_6, window_bounds = array<i64: 144>}, {transform_indices = @transform_7, window_bounds = array<i64: 4>}, {transform_indices = @transform_8, window_bounds = array<i64: 1, 4, 16, 16>}]} {
    %cst = arith.constant 0.000000e+00 : f32
    %0 = vector.broadcast %cst : f32 to vector<4x18x18xf32>
    %c0 = arith.constant 0 : index
    %c0_0 = arith.constant 0 : index
    %c0_1 = arith.constant 0 : index
    %1 = vector.load %arg10[%c0, %c0_0, %c0_1] : memref<4x18x18xf32, #tpu.memory_space<vmem>>, vector<4x18x18xf32>
    tpu.vector_store %arg10[%c0, %c0_0, %c0_1], %0 {strides = array<i32>} : memref<4x18x18xf32, #tpu.memory_space<vmem>>, vector<4x18x18xf32>,
    %cst_2 = arith.constant 0.000000e+00 : f32
    %2 = vector.broadcast %cst_2 : f32 to vector<4x18x18xf32>
    %c0_3 = arith.constant 0 : index
    %c0_4 = arith.constant 0 : index
    %c0_5 = arith.constant 0 : index
    %3 = vector.load %arg11[%c0_3, %c0_4, %c0_5] : memref<4x18x18xf32, #tpu.memory_space<vmem>>, vector<4x18x18xf32>
    tpu.vector_store %arg11[%c0_3, %c0_4, %c0_5], %2 {strides = array<i32>} : memref<4x18x18xf32, #tpu.memory_space<vmem>>, vector<4x18x18xf32>,
    %c0_6 = arith.constant 0 : index
    %c0_7 = arith.constant 0 : index
    %c0_8 = arith.constant 0 : index
    %c0_9 = arith.constant 0 : index
    %4 = vector.load %arg4[%c0_6, %c0_7, %c0_8, %c0_9] : memref<1x2x16x16xf32, #tpu.memory_space<vmem>>, vector<1x1x16x16xf32>
    %5 = vector.shape_cast %4 : vector<1x1x16x16xf32> to vector<16x16xf32>
    %c0_10 = arith.constant 0 : index
    %c1 = arith.constant 1 : index
    %c1_11 = arith.constant 1 : index
    %6 = vector.load %arg10[%c0_10, %c1, %c1_11] : memref<4x18x18xf32, #tpu.memory_space<vmem>>, vector<1x16x16xf32>
    %7 = vector.shape_cast %6 : vector<1x16x16xf32> to vector<16x16xf32>
    %8 = vector.shape_cast %5 : vector<16x16xf32> to vector<1x16x16xf32>
    tpu.vector_store %arg10[%c0_10, %c1, %c1_11], %8 {strides = array<i32>} : memref<4x18x18xf32, #tpu.memory_space<vmem>>, vector<1x16x16xf32>,
    %c0_12 = arith.constant 0 : index
    %c1_13 = arith.constant 1 : index
    %c0_14 = arith.constant 0 : index
    %c0_15 = arith.constant 0 : index
    %9 = vector.load %arg4[%c0_12, %c1_13, %c0_14, %c0_15] : memref<1x2x16x16xf32, #tpu.memory_space<vmem>>, vector<1x1x16x16xf32>
    %10 = vector.shape_cast %9 : vector<1x1x16x16xf32> to vector<16x16xf32>
    %c1_16 = arith.constant 1 : index
    %c1_17 = arith.constant 1 : index
    %c1_18 = arith.constant 1 : index
    %11 = vector.load %arg10[%c1_16, %c1_17, %c1_18] : memref<4x18x18xf32, #tpu.memory_space<vmem>>, vector<1x16x16xf32>
    %12 = vector.shape_cast %11 : vector<1x16x16xf32> to vector<16x16xf32>
    %13 = vector.shape_cast %10 : vector<16x16xf32> to vector<1x16x16xf32>
    tpu.vector_store %arg10[%c1_16, %c1_17, %c1_18], %13 {strides = array<i32>} : memref<4x18x18xf32, #tpu.memory_space<vmem>>, vector<1x16x16xf32>,
    %c0_19 = arith.constant 0 : index
    %c0_20 = arith.constant 0 : index
    %14 = vector.load %arg1[%c0_19, %c0_20] : memref<16x8xf32, #tpu.memory_space<vmem>>, vector<16x8xf32>
    %c0_21 = arith.constant 0 : index
    %c0_22 = arith.constant 0 : index
    %15 = vector.load %arg2[%c0_21, %c0_22] : memref<8x16xf32, #tpu.memory_space<vmem>>, vector<8x16xf32>
    %c0_23 = arith.constant 0 : index
    %c0_24 = arith.constant 0 : index
    %c0_25 = arith.constant 0 : index
    %c0_26 = arith.constant 0 : index
    %16 = vector.load %arg3[%c0_23, %c0_24, %c0_25, %c0_26] : memref<1x2x8x8xf32, #tpu.memory_space<vmem>>, vector<1x1x8x8xf32>
    %17 = vector.shape_cast %16 : vector<1x1x8x8xf32> to vector<8x8xf32>
    %cst_27 = arith.constant 0.000000e+00 : f32
    %18 = vector.broadcast %cst_27 : f32 to vector<16x8xf32>
    %19 = vector.extract_strided_slice %14 {offsets = [0, 0], sizes = [16, 1], strides = [1, 1]} : vector<16x8xf32> to vector<16x1xf32>
    %20 = vector.extract_strided_slice %17 {offsets = [0, 0], sizes = [1, 8], strides = [1, 1]} : vector<8x8xf32> to vector<1x8xf32>
    %21 = vector.broadcast %19 : vector<16x1xf32> to vector<16x8xf32>
    %22 = vector.broadcast %20 : vector<1x8xf32> to vector<16x8xf32>
    %23 = arith.mulf %21, %22 : vector<16x8xf32>
    %24 = arith.addf %18, %23 : vector<16x8xf32>
    %25 = vector.extract_strided_slice %14 {offsets = [0, 1], sizes = [16, 1], strides = [1, 1]} : vector<16x8xf32> to vector<16x1xf32>
    %26 = vector.extract_strided_slice %17 {offsets = [1, 0], sizes = [1, 8], strides = [1, 1]} : vector<8x8xf32> to vector<1x8xf32>
    %27 = vector.broadcast %25 : vector<16x1xf32> to vector<16x8xf32>
    %28 = vector.broadcast %26 : vector<1x8xf32> to vector<16x8xf32>
    %29 = arith.mulf %27, %28 : vector<16x8xf32>
    %30 = arith.addf %24, %29 : vector<16x8xf32>
    %31 = vector.extract_strided_slice %14 {offsets = [0, 2], sizes = [16, 1], strides = [1, 1]} : vector<16x8xf32> to vector<16x1xf32>
    %32 = vector.extract_strided_slice %17 {offsets = [2, 0], sizes = [1, 8], strides = [1, 1]} : vector<8x8xf32> to vector<1x8xf32>
    %33 = vector.broadcast %31 : vector<16x1xf32> to vector<16x8xf32>
    %34 = vector.broadcast %32 : vector<1x8xf32> to vector<16x8xf32>
    %35 = arith.mulf %33, %34 : vector<16x8xf32>
    %36 = arith.addf %30, %35 : vector<16x8xf32>
    %37 = vector.extract_strided_slice %14 {offsets = [0, 3], sizes = [16, 1], strides = [1, 1]} : vector<16x8xf32> to vector<16x1xf32>
    %38 = vector.extract_strided_slice %17 {offsets = [3, 0], sizes = [1, 8], strides = [1, 1]} : vector<8x8xf32> to vector<1x8xf32>
    %39 = vector.broadcast %37 : vector<16x1xf32> to vector<16x8xf32>
    %40 = vector.broadcast %38 : vector<1x8xf32> to vector<16x8xf32>
    %41 = arith.mulf %39, %40 : vector<16x8xf32>
    %42 = arith.addf %36, %41 : vector<16x8xf32>
    %43 = vector.extract_strided_slice %14 {offsets = [0, 4], sizes = [16, 1], strides = [1, 1]} : vector<16x8xf32> to vector<16x1xf32>
    %44 = vector.extract_strided_slice %17 {offsets = [4, 0], sizes = [1, 8], strides = [1, 1]} : vector<8x8xf32> to vector<1x8xf32>
    %45 = vector.broadcast %43 : vector<16x1xf32> to vector<16x8xf32>
    %46 = vector.broadcast %44 : vector<1x8xf32> to vector<16x8xf32>
    %47 = arith.mulf %45, %46 : vector<16x8xf32>
    %48 = arith.addf %42, %47 : vector<16x8xf32>
    %49 = vector.extract_strided_slice %14 {offsets = [0, 5], sizes = [16, 1], strides = [1, 1]} : vector<16x8xf32> to vector<16x1xf32>
    %50 = vector.extract_strided_slice %17 {offsets = [5, 0], sizes = [1, 8], strides = [1, 1]} : vector<8x8xf32> to vector<1x8xf32>
    %51 = vector.broadcast %49 : vector<16x1xf32> to vector<16x8xf32>
    %52 = vector.broadcast %50 : vector<1x8xf32> to vector<16x8xf32>
    %53 = arith.mulf %51, %52 : vector<16x8xf32>
    %54 = arith.addf %48, %53 : vector<16x8xf32>
    %55 = vector.extract_strided_slice %14 {offsets = [0, 6], sizes = [16, 1], strides = [1, 1]} : vector<16x8xf32> to vector<16x1xf32>
    %56 = vector.extract_strided_slice %17 {offsets = [6, 0], sizes = [1, 8], strides = [1, 1]} : vector<8x8xf32> to vector<1x8xf32>
    %57 = vector.broadcast %55 : vector<16x1xf32> to vector<16x8xf32>
    %58 = vector.broadcast %56 : vector<1x8xf32> to vector<16x8xf32>
    %59 = arith.mulf %57, %58 : vector<16x8xf32>
    %60 = arith.addf %54, %59 : vector<16x8xf32>
    %61 = vector.extract_strided_slice %14 {offsets = [0, 7], sizes = [16, 1], strides = [1, 1]} : vector<16x8xf32> to vector<16x1xf32>
    %62 = vector.extract_strided_slice %17 {offsets = [7, 0], sizes = [1, 8], strides = [1, 1]} : vector<8x8xf32> to vector<1x8xf32>
    %63 = vector.broadcast %61 : vector<16x1xf32> to vector<16x8xf32>
    %64 = vector.broadcast %62 : vector<1x8xf32> to vector<16x8xf32>
    %65 = arith.mulf %63, %64 : vector<16x8xf32>
    %66 = arith.addf %60, %65 : vector<16x8xf32>
    %cst_28 = arith.constant 0.000000e+00 : f32
    %67 = vector.broadcast %cst_28 : f32 to vector<16x16xf32>
    %68 = vector.extract_strided_slice %66 {offsets = [0, 0], sizes = [16, 1], strides = [1, 1]} : vector<16x8xf32> to vector<16x1xf32>
    %69 = vector.extract_strided_slice %15 {offsets = [0, 0], sizes = [1, 16], strides = [1, 1]} : vector<8x16xf32> to vector<1x16xf32>
    %70 = vector.broadcast %68 : vector<16x1xf32> to vector<16x16xf32>
    %71 = vector.broadcast %69 : vector<1x16xf32> to vector<16x16xf32>
    %72 = arith.mulf %70, %71 : vector<16x16xf32>
    %73 = arith.addf %67, %72 : vector<16x16xf32>
    %74 = vector.extract_strided_slice %66 {offsets = [0, 1], sizes = [16, 1], strides = [1, 1]} : vector<16x8xf32> to vector<16x1xf32>
    %75 = vector.extract_strided_slice %15 {offsets = [1, 0], sizes = [1, 16], strides = [1, 1]} : vector<8x16xf32> to vector<1x16xf32>
    %76 = vector.broadcast %74 : vector<16x1xf32> to vector<16x16xf32>
    %77 = vector.broadcast %75 : vector<1x16xf32> to vector<16x16xf32>
    %78 = arith.mulf %76, %77 : vector<16x16xf32>
    %79 = arith.addf %73, %78 : vector<16x16xf32>
    %80 = vector.extract_strided_slice %66 {offsets = [0, 2], sizes = [16, 1], strides = [1, 1]} : vector<16x8xf32> to vector<16x1xf32>
    %81 = vector.extract_strided_slice %15 {offsets = [2, 0], sizes = [1, 16], strides = [1, 1]} : vector<8x16xf32> to vector<1x16xf32>
    %82 = vector.broadcast %80 : vector<16x1xf32> to vector<16x16xf32>
    %83 = vector.broadcast %81 : vector<1x16xf32> to vector<16x16xf32>
    %84 = arith.mulf %82, %83 : vector<16x16xf32>
    %85 = arith.addf %79, %84 : vector<16x16xf32>
    %86 = vector.extract_strided_slice %66 {offsets = [0, 3], sizes = [16, 1], strides = [1, 1]} : vector<16x8xf32> to vector<16x1xf32>
    %87 = vector.extract_strided_slice %15 {offsets = [3, 0], sizes = [1, 16], strides = [1, 1]} : vector<8x16xf32> to vector<1x16xf32>
    %88 = vector.broadcast %86 : vector<16x1xf32> to vector<16x16xf32>
    %89 = vector.broadcast %87 : vector<1x16xf32> to vector<16x16xf32>
    %90 = arith.mulf %88, %89 : vector<16x16xf32>
    %91 = arith.addf %85, %90 : vector<16x16xf32>
    %92 = vector.extract_strided_slice %66 {offsets = [0, 4], sizes = [16, 1], strides = [1, 1]} : vector<16x8xf32> to vector<16x1xf32>
    %93 = vector.extract_strided_slice %15 {offsets = [4, 0], sizes = [1, 16], strides = [1, 1]} : vector<8x16xf32> to vector<1x16xf32>
    %94 = vector.broadcast %92 : vector<16x1xf32> to vector<16x16xf32>
    %95 = vector.broadcast %93 : vector<1x16xf32> to vector<16x16xf32>
    %96 = arith.mulf %94, %95 : vector<16x16xf32>
    %97 = arith.addf %91, %96 : vector<16x16xf32>
    %98 = vector.extract_strided_slice %66 {offsets = [0, 5], sizes = [16, 1], strides = [1, 1]} : vector<16x8xf32> to vector<16x1xf32>
    %99 = vector.extract_strided_slice %15 {offsets = [5, 0], sizes = [1, 16], strides = [1, 1]} : vector<8x16xf32> to vector<1x16xf32>
    %100 = vector.broadcast %98 : vector<16x1xf32> to vector<16x16xf32>
    %101 = vector.broadcast %99 : vector<1x16xf32> to vector<16x16xf32>
    %102 = arith.mulf %100, %101 : vector<16x16xf32>
    %103 = arith.addf %97, %102 : vector<16x16xf32>
    %104 = vector.extract_strided_slice %66 {offsets = [0, 6], sizes = [16, 1], strides = [1, 1]} : vector<16x8xf32> to vector<16x1xf32>
    %105 = vector.extract_strided_slice %15 {offsets = [6, 0], sizes = [1, 16], strides = [1, 1]} : vector<8x16xf32> to vector<1x16xf32>
    %106 = vector.broadcast %104 : vector<16x1xf32> to vector<16x16xf32>
    %107 = vector.broadcast %105 : vector<1x16xf32> to vector<16x16xf32>
    %108 = arith.mulf %106, %107 : vector<16x16xf32>
    %109 = arith.addf %103, %108 : vector<16x16xf32>
    %110 = vector.extract_strided_slice %66 {offsets = [0, 7], sizes = [16, 1], strides = [1, 1]} : vector<16x8xf32> to vector<16x1xf32>
    %111 = vector.extract_strided_slice %15 {offsets = [7, 0], sizes = [1, 16], strides = [1, 1]} : vector<8x16xf32> to vector<1x16xf32>
    %112 = vector.broadcast %110 : vector<16x1xf32> to vector<16x16xf32>
    %113 = vector.broadcast %111 : vector<1x16xf32> to vector<16x16xf32>
    %114 = arith.mulf %112, %113 : vector<16x16xf32>
    %115 = arith.addf %109, %114 : vector<16x16xf32>
    %c2 = arith.constant 2 : index
    %c1_29 = arith.constant 1 : index
    %c1_30 = arith.constant 1 : index
    %116 = vector.load %arg10[%c2, %c1_29, %c1_30] : memref<4x18x18xf32, #tpu.memory_space<vmem>>, vector<1x16x16xf32>
    %117 = vector.shape_cast %116 : vector<1x16x16xf32> to vector<16x16xf32>
    %118 = vector.shape_cast %115 : vector<16x16xf32> to vector<1x16x16xf32>
    tpu.vector_store %arg10[%c2, %c1_29, %c1_30], %118 {strides = array<i32>} : memref<4x18x18xf32, #tpu.memory_space<vmem>>, vector<1x16x16xf32>,
    %c0_31 = arith.constant 0 : index
    %c1_32 = arith.constant 1 : index
    %c0_33 = arith.constant 0 : index
    %c0_34 = arith.constant 0 : index
    %119 = vector.load %arg3[%c0_31, %c1_32, %c0_33, %c0_34] : memref<1x2x8x8xf32, #tpu.memory_space<vmem>>, vector<1x1x8x8xf32>
    %120 = vector.shape_cast %119 : vector<1x1x8x8xf32> to vector<8x8xf32>
    %cst_35 = arith.constant 0.000000e+00 : f32
    %121 = vector.broadcast %cst_35 : f32 to vector<16x8xf32>
    %122 = vector.extract_strided_slice %14 {offsets = [0, 0], sizes = [16, 1], strides = [1, 1]} : vector<16x8xf32> to vector<16x1xf32>
    %123 = vector.extract_strided_slice %120 {offsets = [0, 0], sizes = [1, 8], strides = [1, 1]} : vector<8x8xf32> to vector<1x8xf32>
    %124 = vector.broadcast %122 : vector<16x1xf32> to vector<16x8xf32>
    %125 = vector.broadcast %123 : vector<1x8xf32> to vector<16x8xf32>
    %126 = arith.mulf %124, %125 : vector<16x8xf32>
    %127 = arith.addf %121, %126 : vector<16x8xf32>
    %128 = vector.extract_strided_slice %14 {offsets = [0, 1], sizes = [16, 1], strides = [1, 1]} : vector<16x8xf32> to vector<16x1xf32>
    %129 = vector.extract_strided_slice %120 {offsets = [1, 0], sizes = [1, 8], strides = [1, 1]} : vector<8x8xf32> to vector<1x8xf32>
    %130 = vector.broadcast %128 : vector<16x1xf32> to vector<16x8xf32>
    %131 = vector.broadcast %129 : vector<1x8xf32> to vector<16x8xf32>
    %132 = arith.mulf %130, %131 : vector<16x8xf32>
    %133 = arith.addf %127, %132 : vector<16x8xf32>
    %134 = vector.extract_strided_slice %14 {offsets = [0, 2], sizes = [16, 1], strides = [1, 1]} : vector<16x8xf32> to vector<16x1xf32>
    %135 = vector.extract_strided_slice %120 {offsets = [2, 0], sizes = [1, 8], strides = [1, 1]} : vector<8x8xf32> to vector<1x8xf32>
    %136 = vector.broadcast %134 : vector<16x1xf32> to vector<16x8xf32>
    %137 = vector.broadcast %135 : vector<1x8xf32> to vector<16x8xf32>
    %138 = arith.mulf %136, %137 : vector<16x8xf32>
    %139 = arith.addf %133, %138 : vector<16x8xf32>
    %140 = vector.extract_strided_slice %14 {offsets = [0, 3], sizes = [16, 1], strides = [1, 1]} : vector<16x8xf32> to vector<16x1xf32>
    %141 = vector.extract_strided_slice %120 {offsets = [3, 0], sizes = [1, 8], strides = [1, 1]} : vector<8x8xf32> to vector<1x8xf32>
    %142 = vector.broadcast %140 : vector<16x1xf32> to vector<16x8xf32>
    %143 = vector.broadcast %141 : vector<1x8xf32> to vector<16x8xf32>
    %144 = arith.mulf %142, %143 : vector<16x8xf32>
    %145 = arith.addf %139, %144 : vector<16x8xf32>
    %146 = vector.extract_strided_slice %14 {offsets = [0, 4], sizes = [16, 1], strides = [1, 1]} : vector<16x8xf32> to vector<16x1xf32>
    %147 = vector.extract_strided_slice %120 {offsets = [4, 0], sizes = [1, 8], strides = [1, 1]} : vector<8x8xf32> to vector<1x8xf32>
    %148 = vector.broadcast %146 : vector<16x1xf32> to vector<16x8xf32>
    %149 = vector.broadcast %147 : vector<1x8xf32> to vector<16x8xf32>
    %150 = arith.mulf %148, %149 : vector<16x8xf32>
    %151 = arith.addf %145, %150 : vector<16x8xf32>
    %152 = vector.extract_strided_slice %14 {offsets = [0, 5], sizes = [16, 1], strides = [1, 1]} : vector<16x8xf32> to vector<16x1xf32>
    %153 = vector.extract_strided_slice %120 {offsets = [5, 0], sizes = [1, 8], strides = [1, 1]} : vector<8x8xf32> to vector<1x8xf32>
    %154 = vector.broadcast %152 : vector<16x1xf32> to vector<16x8xf32>
    %155 = vector.broadcast %153 : vector<1x8xf32> to vector<16x8xf32>
    %156 = arith.mulf %154, %155 : vector<16x8xf32>
    %157 = arith.addf %151, %156 : vector<16x8xf32>
    %158 = vector.extract_strided_slice %14 {offsets = [0, 6], sizes = [16, 1], strides = [1, 1]} : vector<16x8xf32> to vector<16x1xf32>
    %159 = vector.extract_strided_slice %120 {offsets = [6, 0], sizes = [1, 8], strides = [1, 1]} : vector<8x8xf32> to vector<1x8xf32>
    %160 = vector.broadcast %158 : vector<16x1xf32> to vector<16x8xf32>
    %161 = vector.broadcast %159 : vector<1x8xf32> to vector<16x8xf32>
    %162 = arith.mulf %160, %161 : vector<16x8xf32>
    %163 = arith.addf %157, %162 : vector<16x8xf32>
    %164 = vector.extract_strided_slice %14 {offsets = [0, 7], sizes = [16, 1], strides = [1, 1]} : vector<16x8xf32> to vector<16x1xf32>
    %165 = vector.extract_strided_slice %120 {offsets = [7, 0], sizes = [1, 8], strides = [1, 1]} : vector<8x8xf32> to vector<1x8xf32>
    %166 = vector.broadcast %164 : vector<16x1xf32> to vector<16x8xf32>
    %167 = vector.broadcast %165 : vector<1x8xf32> to vector<16x8xf32>
    %168 = arith.mulf %166, %167 : vector<16x8xf32>
    %169 = arith.addf %163, %168 : vector<16x8xf32>
    %cst_36 = arith.constant 0.000000e+00 : f32
    %170 = vector.broadcast %cst_36 : f32 to vector<16x16xf32>
    %171 = vector.extract_strided_slice %169 {offsets = [0, 0], sizes = [16, 1], strides = [1, 1]} : vector<16x8xf32> to vector<16x1xf32>
    %172 = vector.extract_strided_slice %15 {offsets = [0, 0], sizes = [1, 16], strides = [1, 1]} : vector<8x16xf32> to vector<1x16xf32>
    %173 = vector.broadcast %171 : vector<16x1xf32> to vector<16x16xf32>
    %174 = vector.broadcast %172 : vector<1x16xf32> to vector<16x16xf32>
    %175 = arith.mulf %173, %174 : vector<16x16xf32>
    %176 = arith.addf %170, %175 : vector<16x16xf32>
    %177 = vector.extract_strided_slice %169 {offsets = [0, 1], sizes = [16, 1], strides = [1, 1]} : vector<16x8xf32> to vector<16x1xf32>
    %178 = vector.extract_strided_slice %15 {offsets = [1, 0], sizes = [1, 16], strides = [1, 1]} : vector<8x16xf32> to vector<1x16xf32>
    %179 = vector.broadcast %177 : vector<16x1xf32> to vector<16x16xf32>
    %180 = vector.broadcast %178 : vector<1x16xf32> to vector<16x16xf32>
    %181 = arith.mulf %179, %180 : vector<16x16xf32>
    %182 = arith.addf %176, %181 : vector<16x16xf32>
    %183 = vector.extract_strided_slice %169 {offsets = [0, 2], sizes = [16, 1], strides = [1, 1]} : vector<16x8xf32> to vector<16x1xf32>
    %184 = vector.extract_strided_slice %15 {offsets = [2, 0], sizes = [1, 16], strides = [1, 1]} : vector<8x16xf32> to vector<1x16xf32>
    %185 = vector.broadcast %183 : vector<16x1xf32> to vector<16x16xf32>
    %186 = vector.broadcast %184 : vector<1x16xf32> to vector<16x16xf32>
    %187 = arith.mulf %185, %186 : vector<16x16xf32>
    %188 = arith.addf %182, %187 : vector<16x16xf32>
    %189 = vector.extract_strided_slice %169 {offsets = [0, 3], sizes = [16, 1], strides = [1, 1]} : vector<16x8xf32> to vector<16x1xf32>
    %190 = vector.extract_strided_slice %15 {offsets = [3, 0], sizes = [1, 16], strides = [1, 1]} : vector<8x16xf32> to vector<1x16xf32>
    %191 = vector.broadcast %189 : vector<16x1xf32> to vector<16x16xf32>
    %192 = vector.broadcast %190 : vector<1x16xf32> to vector<16x16xf32>
    %193 = arith.mulf %191, %192 : vector<16x16xf32>
    %194 = arith.addf %188, %193 : vector<16x16xf32>
    %195 = vector.extract_strided_slice %169 {offsets = [0, 4], sizes = [16, 1], strides = [1, 1]} : vector<16x8xf32> to vector<16x1xf32>
    %196 = vector.extract_strided_slice %15 {offsets = [4, 0], sizes = [1, 16], strides = [1, 1]} : vector<8x16xf32> to vector<1x16xf32>
    %197 = vector.broadcast %195 : vector<16x1xf32> to vector<16x16xf32>
    %198 = vector.broadcast %196 : vector<1x16xf32> to vector<16x16xf32>
    %199 = arith.mulf %197, %198 : vector<16x16xf32>
    %200 = arith.addf %194, %199 : vector<16x16xf32>
    %201 = vector.extract_strided_slice %169 {offsets = [0, 5], sizes = [16, 1], strides = [1, 1]} : vector<16x8xf32> to vector<16x1xf32>
    %202 = vector.extract_strided_slice %15 {offsets = [5, 0], sizes = [1, 16], strides = [1, 1]} : vector<8x16xf32> to vector<1x16xf32>
    %203 = vector.broadcast %201 : vector<16x1xf32> to vector<16x16xf32>
    %204 = vector.broadcast %202 : vector<1x16xf32> to vector<16x16xf32>
    %205 = arith.mulf %203, %204 : vector<16x16xf32>
    %206 = arith.addf %200, %205 : vector<16x16xf32>
    %207 = vector.extract_strided_slice %169 {offsets = [0, 6], sizes = [16, 1], strides = [1, 1]} : vector<16x8xf32> to vector<16x1xf32>
    %208 = vector.extract_strided_slice %15 {offsets = [6, 0], sizes = [1, 16], strides = [1, 1]} : vector<8x16xf32> to vector<1x16xf32>
    %209 = vector.broadcast %207 : vector<16x1xf32> to vector<16x16xf32>
    %210 = vector.broadcast %208 : vector<1x16xf32> to vector<16x16xf32>
    %211 = arith.mulf %209, %210 : vector<16x16xf32>
    %212 = arith.addf %206, %211 : vector<16x16xf32>
    %213 = vector.extract_strided_slice %169 {offsets = [0, 7], sizes = [16, 1], strides = [1, 1]} : vector<16x8xf32> to vector<16x1xf32>
    %214 = vector.extract_strided_slice %15 {offsets = [7, 0], sizes = [1, 16], strides = [1, 1]} : vector<8x16xf32> to vector<1x16xf32>
    %215 = vector.broadcast %213 : vector<16x1xf32> to vector<16x16xf32>
    %216 = vector.broadcast %214 : vector<1x16xf32> to vector<16x16xf32>
    %217 = arith.mulf %215, %216 : vector<16x16xf32>
    %218 = arith.addf %212, %217 : vector<16x16xf32>
    %c3 = arith.constant 3 : index
    %c1_37 = arith.constant 1 : index
    %c1_38 = arith.constant 1 : index
    %219 = vector.load %arg10[%c3, %c1_37, %c1_38] : memref<4x18x18xf32, #tpu.memory_space<vmem>>, vector<1x16x16xf32>
    %220 = vector.shape_cast %219 : vector<1x16x16xf32> to vector<16x16xf32>
    %221 = vector.shape_cast %218 : vector<16x16xf32> to vector<1x16x16xf32>
    tpu.vector_store %arg10[%c3, %c1_37, %c1_38], %221 {strides = array<i32>} : memref<4x18x18xf32, #tpu.memory_space<vmem>>, vector<1x16x16xf32>,
    %c0_39 = arith.constant 0 : index
    %c0_40 = arith.constant 0 : index
    %c0_41 = arith.constant 0 : index
    %222 = vector.load %arg10[%c0_39, %c0_40, %c0_41] : memref<4x18x18xf32, #tpu.memory_space<vmem>>, vector<1x16x16xf32>
    %223 = vector.shape_cast %222 : vector<1x16x16xf32> to vector<16x16xf32>
    %c0_42 = arith.constant 0 : index
    %c0_43 = arith.constant 0 : index
    %c1_44 = arith.constant 1 : index
    %224 = vector.load %arg10[%c0_42, %c0_43, %c1_44] : memref<4x18x18xf32, #tpu.memory_space<vmem>>, vector<1x16x16xf32>
    %225 = vector.shape_cast %224 : vector<1x16x16xf32> to vector<16x16xf32>
    %c0_45 = arith.constant 0 : index
    %c0_46 = arith.constant 0 : index
    %c2_47 = arith.constant 2 : index
    %226 = vector.load %arg10[%c0_45, %c0_46, %c2_47] : memref<4x18x18xf32, #tpu.memory_space<vmem>>, vector<1x16x16xf32>
    %227 = vector.shape_cast %226 : vector<1x16x16xf32> to vector<16x16xf32>
    %c0_48 = arith.constant 0 : index
    %c1_49 = arith.constant 1 : index
    %c0_50 = arith.constant 0 : index
    %228 = vector.load %arg10[%c0_48, %c1_49, %c0_50] : memref<4x18x18xf32, #tpu.memory_space<vmem>>, vector<1x16x16xf32>
    %229 = vector.shape_cast %228 : vector<1x16x16xf32> to vector<16x16xf32>
    %c0_51 = arith.constant 0 : index
    %c1_52 = arith.constant 1 : index
    %c1_53 = arith.constant 1 : index
    %230 = vector.load %arg10[%c0_51, %c1_52, %c1_53] : memref<4x18x18xf32, #tpu.memory_space<vmem>>, vector<1x16x16xf32>
    %231 = vector.shape_cast %230 : vector<1x16x16xf32> to vector<16x16xf32>
    %c0_54 = arith.constant 0 : index
    %c1_55 = arith.constant 1 : index
    %c2_56 = arith.constant 2 : index
    %232 = vector.load %arg10[%c0_54, %c1_55, %c2_56] : memref<4x18x18xf32, #tpu.memory_space<vmem>>, vector<1x16x16xf32>
    %233 = vector.shape_cast %232 : vector<1x16x16xf32> to vector<16x16xf32>
    %c0_57 = arith.constant 0 : index
    %c2_58 = arith.constant 2 : index
    %c0_59 = arith.constant 0 : index
    %234 = vector.load %arg10[%c0_57, %c2_58, %c0_59] : memref<4x18x18xf32, #tpu.memory_space<vmem>>, vector<1x16x16xf32>
    %235 = vector.shape_cast %234 : vector<1x16x16xf32> to vector<16x16xf32>
    %c0_60 = arith.constant 0 : index
    %c2_61 = arith.constant 2 : index
    %c1_62 = arith.constant 1 : index
    %236 = vector.load %arg10[%c0_60, %c2_61, %c1_62] : memref<4x18x18xf32, #tpu.memory_space<vmem>>, vector<1x16x16xf32>
    %237 = vector.shape_cast %236 : vector<1x16x16xf32> to vector<16x16xf32>
    %c0_63 = arith.constant 0 : index
    %c2_64 = arith.constant 2 : index
    %c2_65 = arith.constant 2 : index
    %238 = vector.load %arg10[%c0_63, %c2_64, %c2_65] : memref<4x18x18xf32, #tpu.memory_space<vmem>>, vector<1x16x16xf32>
    %239 = vector.shape_cast %238 : vector<1x16x16xf32> to vector<16x16xf32>
    %c1_66 = arith.constant 1 : index
    %c0_67 = arith.constant 0 : index
    %c0_68 = arith.constant 0 : index
    %240 = vector.load %arg10[%c1_66, %c0_67, %c0_68] : memref<4x18x18xf32, #tpu.memory_space<vmem>>, vector<1x16x16xf32>
    %241 = vector.shape_cast %240 : vector<1x16x16xf32> to vector<16x16xf32>
    %c1_69 = arith.constant 1 : index
    %c0_70 = arith.constant 0 : index
    %c1_71 = arith.constant 1 : index
    %242 = vector.load %arg10[%c1_69, %c0_70, %c1_71] : memref<4x18x18xf32, #tpu.memory_space<vmem>>, vector<1x16x16xf32>
    %243 = vector.shape_cast %242 : vector<1x16x16xf32> to vector<16x16xf32>
    %c1_72 = arith.constant 1 : index
    %c0_73 = arith.constant 0 : index
    %c2_74 = arith.constant 2 : index
    %244 = vector.load %arg10[%c1_72, %c0_73, %c2_74] : memref<4x18x18xf32, #tpu.memory_space<vmem>>, vector<1x16x16xf32>
    %245 = vector.shape_cast %244 : vector<1x16x16xf32> to vector<16x16xf32>
    %c1_75 = arith.constant 1 : index
    %c1_76 = arith.constant 1 : index
    %c0_77 = arith.constant 0 : index
    %246 = vector.load %arg10[%c1_75, %c1_76, %c0_77] : memref<4x18x18xf32, #tpu.memory_space<vmem>>, vector<1x16x16xf32>
    %247 = vector.shape_cast %246 : vector<1x16x16xf32> to vector<16x16xf32>
    %c1_78 = arith.constant 1 : index
    %c1_79 = arith.constant 1 : index
    %c1_80 = arith.constant 1 : index
    %248 = vector.load %arg10[%c1_78, %c1_79, %c1_80] : memref<4x18x18xf32, #tpu.memory_space<vmem>>, vector<1x16x16xf32>
    %249 = vector.shape_cast %248 : vector<1x16x16xf32> to vector<16x16xf32>
    %c1_81 = arith.constant 1 : index
    %c1_82 = arith.constant 1 : index
    %c2_83 = arith.constant 2 : index
    %250 = vector.load %arg10[%c1_81, %c1_82, %c2_83] : memref<4x18x18xf32, #tpu.memory_space<vmem>>, vector<1x16x16xf32>
    %251 = vector.shape_cast %250 : vector<1x16x16xf32> to vector<16x16xf32>
    %c1_84 = arith.constant 1 : index
    %c2_85 = arith.constant 2 : index
    %c0_86 = arith.constant 0 : index
    %252 = vector.load %arg10[%c1_84, %c2_85, %c0_86] : memref<4x18x18xf32, #tpu.memory_space<vmem>>, vector<1x16x16xf32>
    %253 = vector.shape_cast %252 : vector<1x16x16xf32> to vector<16x16xf32>
    %c1_87 = arith.constant 1 : index
    %c2_88 = arith.constant 2 : index
    %c1_89 = arith.constant 1 : index
    %254 = vector.load %arg10[%c1_87, %c2_88, %c1_89] : memref<4x18x18xf32, #tpu.memory_space<vmem>>, vector<1x16x16xf32>
    %255 = vector.shape_cast %254 : vector<1x16x16xf32> to vector<16x16xf32>
    %c1_90 = arith.constant 1 : index
    %c2_91 = arith.constant 2 : index
    %c2_92 = arith.constant 2 : index
    %256 = vector.load %arg10[%c1_90, %c2_91, %c2_92] : memref<4x18x18xf32, #tpu.memory_space<vmem>>, vector<1x16x16xf32>
    %257 = vector.shape_cast %256 : vector<1x16x16xf32> to vector<16x16xf32>
    %c2_93 = arith.constant 2 : index
    %c0_94 = arith.constant 0 : index
    %c0_95 = arith.constant 0 : index
    %258 = vector.load %arg10[%c2_93, %c0_94, %c0_95] : memref<4x18x18xf32, #tpu.memory_space<vmem>>, vector<1x16x16xf32>
    %259 = vector.shape_cast %258 : vector<1x16x16xf32> to vector<16x16xf32>
    %c2_96 = arith.constant 2 : index
    %c0_97 = arith.constant 0 : index
    %c1_98 = arith.constant 1 : index
    %260 = vector.load %arg10[%c2_96, %c0_97, %c1_98] : memref<4x18x18xf32, #tpu.memory_space<vmem>>, vector<1x16x16xf32>
    %261 = vector.shape_cast %260 : vector<1x16x16xf32> to vector<16x16xf32>
    %c2_99 = arith.constant 2 : index
    %c0_100 = arith.constant 0 : index
    %c2_101 = arith.constant 2 : index
    %262 = vector.load %arg10[%c2_99, %c0_100, %c2_101] : memref<4x18x18xf32, #tpu.memory_space<vmem>>, vector<1x16x16xf32>
    %263 = vector.shape_cast %262 : vector<1x16x16xf32> to vector<16x16xf32>
    %c2_102 = arith.constant 2 : index
    %c1_103 = arith.constant 1 : index
    %c0_104 = arith.constant 0 : index
    %264 = vector.load %arg10[%c2_102, %c1_103, %c0_104] : memref<4x18x18xf32, #tpu.memory_space<vmem>>, vector<1x16x16xf32>
    %265 = vector.shape_cast %264 : vector<1x16x16xf32> to vector<16x16xf32>
    %c2_105 = arith.constant 2 : index
    %c1_106 = arith.constant 1 : index
    %c1_107 = arith.constant 1 : index
    %266 = vector.load %arg10[%c2_105, %c1_106, %c1_107] : memref<4x18x18xf32, #tpu.memory_space<vmem>>, vector<1x16x16xf32>
    %267 = vector.shape_cast %266 : vector<1x16x16xf32> to vector<16x16xf32>
    %c2_108 = arith.constant 2 : index
    %c1_109 = arith.constant 1 : index
    %c2_110 = arith.constant 2 : index
    %268 = vector.load %arg10[%c2_108, %c1_109, %c2_110] : memref<4x18x18xf32, #tpu.memory_space<vmem>>, vector<1x16x16xf32>
    %269 = vector.shape_cast %268 : vector<1x16x16xf32> to vector<16x16xf32>
    %c2_111 = arith.constant 2 : index
    %c2_112 = arith.constant 2 : index
    %c0_113 = arith.constant 0 : index
    %270 = vector.load %arg10[%c2_111, %c2_112, %c0_113] : memref<4x18x18xf32, #tpu.memory_space<vmem>>, vector<1x16x16xf32>
    %271 = vector.shape_cast %270 : vector<1x16x16xf32> to vector<16x16xf32>
    %c2_114 = arith.constant 2 : index
    %c2_115 = arith.constant 2 : index
    %c1_116 = arith.constant 1 : index
    %272 = vector.load %arg10[%c2_114, %c2_115, %c1_116] : memref<4x18x18xf32, #tpu.memory_space<vmem>>, vector<1x16x16xf32>
    %273 = vector.shape_cast %272 : vector<1x16x16xf32> to vector<16x16xf32>
    %c2_117 = arith.constant 2 : index
    %c2_118 = arith.constant 2 : index
    %c2_119 = arith.constant 2 : index
    %274 = vector.load %arg10[%c2_117, %c2_118, %c2_119] : memref<4x18x18xf32, #tpu.memory_space<vmem>>, vector<1x16x16xf32>
    %275 = vector.shape_cast %274 : vector<1x16x16xf32> to vector<16x16xf32>
    %c3_120 = arith.constant 3 : index
    %c0_121 = arith.constant 0 : index
    %c0_122 = arith.constant 0 : index
    %276 = vector.load %arg10[%c3_120, %c0_121, %c0_122] : memref<4x18x18xf32, #tpu.memory_space<vmem>>, vector<1x16x16xf32>
    %277 = vector.shape_cast %276 : vector<1x16x16xf32> to vector<16x16xf32>
    %c3_123 = arith.constant 3 : index
    %c0_124 = arith.constant 0 : index
    %c1_125 = arith.constant 1 : index
    %278 = vector.load %arg10[%c3_123, %c0_124, %c1_125] : memref<4x18x18xf32, #tpu.memory_space<vmem>>, vector<1x16x16xf32>
    %279 = vector.shape_cast %278 : vector<1x16x16xf32> to vector<16x16xf32>
    %c3_126 = arith.constant 3 : index
    %c0_127 = arith.constant 0 : index
    %c2_128 = arith.constant 2 : index
    %280 = vector.load %arg10[%c3_126, %c0_127, %c2_128] : memref<4x18x18xf32, #tpu.memory_space<vmem>>, vector<1x16x16xf32>
    %281 = vector.shape_cast %280 : vector<1x16x16xf32> to vector<16x16xf32>
    %c3_129 = arith.constant 3 : index
    %c1_130 = arith.constant 1 : index
    %c0_131 = arith.constant 0 : index
    %282 = vector.load %arg10[%c3_129, %c1_130, %c0_131] : memref<4x18x18xf32, #tpu.memory_space<vmem>>, vector<1x16x16xf32>
    %283 = vector.shape_cast %282 : vector<1x16x16xf32> to vector<16x16xf32>
    %c3_132 = arith.constant 3 : index
    %c1_133 = arith.constant 1 : index
    %c1_134 = arith.constant 1 : index
    %284 = vector.load %arg10[%c3_132, %c1_133, %c1_134] : memref<4x18x18xf32, #tpu.memory_space<vmem>>, vector<1x16x16xf32>
    %285 = vector.shape_cast %284 : vector<1x16x16xf32> to vector<16x16xf32>
    %c3_135 = arith.constant 3 : index
    %c1_136 = arith.constant 1 : index
    %c2_137 = arith.constant 2 : index
    %286 = vector.load %arg10[%c3_135, %c1_136, %c2_137] : memref<4x18x18xf32, #tpu.memory_space<vmem>>, vector<1x16x16xf32>
    %287 = vector.shape_cast %286 : vector<1x16x16xf32> to vector<16x16xf32>
    %c3_138 = arith.constant 3 : index
    %c2_139 = arith.constant 2 : index
    %c0_140 = arith.constant 0 : index
    %288 = vector.load %arg10[%c3_138, %c2_139, %c0_140] : memref<4x18x18xf32, #tpu.memory_space<vmem>>, vector<1x16x16xf32>
    %289 = vector.shape_cast %288 : vector<1x16x16xf32> to vector<16x16xf32>
    %c3_141 = arith.constant 3 : index
    %c2_142 = arith.constant 2 : index
    %c1_143 = arith.constant 1 : index
    %290 = vector.load %arg10[%c3_141, %c2_142, %c1_143] : memref<4x18x18xf32, #tpu.memory_space<vmem>>, vector<1x16x16xf32>
    %291 = vector.shape_cast %290 : vector<1x16x16xf32> to vector<16x16xf32>
    %c3_144 = arith.constant 3 : index
    %c2_145 = arith.constant 2 : index
    %c2_146 = arith.constant 2 : index
    %292 = vector.load %arg10[%c3_144, %c2_145, %c2_146] : memref<4x18x18xf32, #tpu.memory_space<vmem>>, vector<1x16x16xf32>
    %293 = vector.shape_cast %292 : vector<1x16x16xf32> to vector<16x16xf32>
    %c0_147 = arith.constant 0 : index
    %294 = memref.load %arg6[%c0_147] : memref<4xf32, #tpu.memory_space<smem>>
    %295 = vector.broadcast %294 : f32 to vector<16x16xf32>
    %c0_148 = arith.constant 0 : index
    %296 = memref.load %arg5[%c0_148] : memref<144xf32, #tpu.memory_space<smem>>
    %297 = vector.broadcast %296 : f32 to vector<16x16xf32>
    %298 = arith.mulf %297, %223 : vector<16x16xf32>
    %299 = arith.addf %295, %298 : vector<16x16xf32>
    %c1_149 = arith.constant 1 : index
    %300 = memref.load %arg5[%c1_149] : memref<144xf32, #tpu.memory_space<smem>>
    %301 = vector.broadcast %300 : f32 to vector<16x16xf32>
    %302 = arith.mulf %301, %225 : vector<16x16xf32>
    %303 = arith.addf %299, %302 : vector<16x16xf32>
    %c2_150 = arith.constant 2 : index
    %304 = memref.load %arg5[%c2_150] : memref<144xf32, #tpu.memory_space<smem>>
    %305 = vector.broadcast %304 : f32 to vector<16x16xf32>
    %306 = arith.mulf %305, %227 : vector<16x16xf32>
    %307 = arith.addf %303, %306 : vector<16x16xf32>
    %c3_151 = arith.constant 3 : index
    %308 = memref.load %arg5[%c3_151] : memref<144xf32, #tpu.memory_space<smem>>
    %309 = vector.broadcast %308 : f32 to vector<16x16xf32>
    %310 = arith.mulf %309, %229 : vector<16x16xf32>
    %311 = arith.addf %307, %310 : vector<16x16xf32>
    %c4 = arith.constant 4 : index
    %312 = memref.load %arg5[%c4] : memref<144xf32, #tpu.memory_space<smem>>
    %313 = vector.broadcast %312 : f32 to vector<16x16xf32>
    %314 = arith.mulf %313, %231 : vector<16x16xf32>
    %315 = arith.addf %311, %314 : vector<16x16xf32>
    %c5 = arith.constant 5 : index
    %316 = memref.load %arg5[%c5] : memref<144xf32, #tpu.memory_space<smem>>
    %317 = vector.broadcast %316 : f32 to vector<16x16xf32>
    %318 = arith.mulf %317, %233 : vector<16x16xf32>
    %319 = arith.addf %315, %318 : vector<16x16xf32>
    %c6 = arith.constant 6 : index
    %320 = memref.load %arg5[%c6] : memref<144xf32, #tpu.memory_space<smem>>
    %321 = vector.broadcast %320 : f32 to vector<16x16xf32>
    %322 = arith.mulf %321, %235 : vector<16x16xf32>
    %323 = arith.addf %319, %322 : vector<16x16xf32>
    %c7 = arith.constant 7 : index
    %324 = memref.load %arg5[%c7] : memref<144xf32, #tpu.memory_space<smem>>
    %325 = vector.broadcast %324 : f32 to vector<16x16xf32>
    %326 = arith.mulf %325, %237 : vector<16x16xf32>
    %327 = arith.addf %323, %326 : vector<16x16xf32>
    %c8 = arith.constant 8 : index
    %328 = memref.load %arg5[%c8] : memref<144xf32, #tpu.memory_space<smem>>
    %329 = vector.broadcast %328 : f32 to vector<16x16xf32>
    %330 = arith.mulf %329, %239 : vector<16x16xf32>
    %331 = arith.addf %327, %330 : vector<16x16xf32>
    %c9 = arith.constant 9 : index
    %332 = memref.load %arg5[%c9] : memref<144xf32, #tpu.memory_space<smem>>
    %333 = vector.broadcast %332 : f32 to vector<16x16xf32>
    %334 = arith.mulf %333, %241 : vector<16x16xf32>
    %335 = arith.addf %331, %334 : vector<16x16xf32>
    %c10 = arith.constant 10 : index
    %336 = memref.load %arg5[%c10] : memref<144xf32, #tpu.memory_space<smem>>
    %337 = vector.broadcast %336 : f32 to vector<16x16xf32>
    %338 = arith.mulf %337, %243 : vector<16x16xf32>
    %339 = arith.addf %335, %338 : vector<16x16xf32>
    %c11 = arith.constant 11 : index
    %340 = memref.load %arg5[%c11] : memref<144xf32, #tpu.memory_space<smem>>
    %341 = vector.broadcast %340 : f32 to vector<16x16xf32>
    %342 = arith.mulf %341, %245 : vector<16x16xf32>
    %343 = arith.addf %339, %342 : vector<16x16xf32>
    %c12 = arith.constant 12 : index
    %344 = memref.load %arg5[%c12] : memref<144xf32, #tpu.memory_space<smem>>
    %345 = vector.broadcast %344 : f32 to vector<16x16xf32>
    %346 = arith.mulf %345, %247 : vector<16x16xf32>
    %347 = arith.addf %343, %346 : vector<16x16xf32>
    %c13 = arith.constant 13 : index
    %348 = memref.load %arg5[%c13] : memref<144xf32, #tpu.memory_space<smem>>
    %349 = vector.broadcast %348 : f32 to vector<16x16xf32>
    %350 = arith.mulf %349, %249 : vector<16x16xf32>
    %351 = arith.addf %347, %350 : vector<16x16xf32>
    %c14 = arith.constant 14 : index
    %352 = memref.load %arg5[%c14] : memref<144xf32, #tpu.memory_space<smem>>
    %353 = vector.broadcast %352 : f32 to vector<16x16xf32>
    %354 = arith.mulf %353, %251 : vector<16x16xf32>
    %355 = arith.addf %351, %354 : vector<16x16xf32>
    %c15 = arith.constant 15 : index
    %356 = memref.load %arg5[%c15] : memref<144xf32, #tpu.memory_space<smem>>
    %357 = vector.broadcast %356 : f32 to vector<16x16xf32>
    %358 = arith.mulf %357, %253 : vector<16x16xf32>
    %359 = arith.addf %355, %358 : vector<16x16xf32>
    %c16 = arith.constant 16 : index
    %360 = memref.load %arg5[%c16] : memref<144xf32, #tpu.memory_space<smem>>
    %361 = vector.broadcast %360 : f32 to vector<16x16xf32>
    %362 = arith.mulf %361, %255 : vector<16x16xf32>
    %363 = arith.addf %359, %362 : vector<16x16xf32>
    %c17 = arith.constant 17 : index
    %364 = memref.load %arg5[%c17] : memref<144xf32, #tpu.memory_space<smem>>
    %365 = vector.broadcast %364 : f32 to vector<16x16xf32>
    %366 = arith.mulf %365, %257 : vector<16x16xf32>
    %367 = arith.addf %363, %366 : vector<16x16xf32>
    %c18 = arith.constant 18 : index
    %368 = memref.load %arg5[%c18] : memref<144xf32, #tpu.memory_space<smem>>
    %369 = vector.broadcast %368 : f32 to vector<16x16xf32>
    %370 = arith.mulf %369, %259 : vector<16x16xf32>
    %371 = arith.addf %367, %370 : vector<16x16xf32>
    %c19 = arith.constant 19 : index
    %372 = memref.load %arg5[%c19] : memref<144xf32, #tpu.memory_space<smem>>
    %373 = vector.broadcast %372 : f32 to vector<16x16xf32>
    %374 = arith.mulf %373, %261 : vector<16x16xf32>
    %375 = arith.addf %371, %374 : vector<16x16xf32>
    %c20 = arith.constant 20 : index
    %376 = memref.load %arg5[%c20] : memref<144xf32, #tpu.memory_space<smem>>
    %377 = vector.broadcast %376 : f32 to vector<16x16xf32>
    %378 = arith.mulf %377, %263 : vector<16x16xf32>
    %379 = arith.addf %375, %378 : vector<16x16xf32>
    %c21 = arith.constant 21 : index
    %380 = memref.load %arg5[%c21] : memref<144xf32, #tpu.memory_space<smem>>
    %381 = vector.broadcast %380 : f32 to vector<16x16xf32>
    %382 = arith.mulf %381, %265 : vector<16x16xf32>
    %383 = arith.addf %379, %382 : vector<16x16xf32>
    %c22 = arith.constant 22 : index
    %384 = memref.load %arg5[%c22] : memref<144xf32, #tpu.memory_space<smem>>
    %385 = vector.broadcast %384 : f32 to vector<16x16xf32>
    %386 = arith.mulf %385, %267 : vector<16x16xf32>
    %387 = arith.addf %383, %386 : vector<16x16xf32>
    %c23 = arith.constant 23 : index
    %388 = memref.load %arg5[%c23] : memref<144xf32, #tpu.memory_space<smem>>
    %389 = vector.broadcast %388 : f32 to vector<16x16xf32>
    %390 = arith.mulf %389, %269 : vector<16x16xf32>
    %391 = arith.addf %387, %390 : vector<16x16xf32>
    %c24 = arith.constant 24 : index
    %392 = memref.load %arg5[%c24] : memref<144xf32, #tpu.memory_space<smem>>
    %393 = vector.broadcast %392 : f32 to vector<16x16xf32>
    %394 = arith.mulf %393, %271 : vector<16x16xf32>
    %395 = arith.addf %391, %394 : vector<16x16xf32>
    %c25 = arith.constant 25 : index
    %396 = memref.load %arg5[%c25] : memref<144xf32, #tpu.memory_space<smem>>
    %397 = vector.broadcast %396 : f32 to vector<16x16xf32>
    %398 = arith.mulf %397, %273 : vector<16x16xf32>
    %399 = arith.addf %395, %398 : vector<16x16xf32>
    %c26 = arith.constant 26 : index
    %400 = memref.load %arg5[%c26] : memref<144xf32, #tpu.memory_space<smem>>
    %401 = vector.broadcast %400 : f32 to vector<16x16xf32>
    %402 = arith.mulf %401, %275 : vector<16x16xf32>
    %403 = arith.addf %399, %402 : vector<16x16xf32>
    %c27 = arith.constant 27 : index
    %404 = memref.load %arg5[%c27] : memref<144xf32, #tpu.memory_space<smem>>
    %405 = vector.broadcast %404 : f32 to vector<16x16xf32>
    %406 = arith.mulf %405, %277 : vector<16x16xf32>
    %407 = arith.addf %403, %406 : vector<16x16xf32>
    %c28 = arith.constant 28 : index
    %408 = memref.load %arg5[%c28] : memref<144xf32, #tpu.memory_space<smem>>
    %409 = vector.broadcast %408 : f32 to vector<16x16xf32>
    %410 = arith.mulf %409, %279 : vector<16x16xf32>
    %411 = arith.addf %407, %410 : vector<16x16xf32>
    %c29 = arith.constant 29 : index
    %412 = memref.load %arg5[%c29] : memref<144xf32, #tpu.memory_space<smem>>
    %413 = vector.broadcast %412 : f32 to vector<16x16xf32>
    %414 = arith.mulf %413, %281 : vector<16x16xf32>
    %415 = arith.addf %411, %414 : vector<16x16xf32>
    %c30 = arith.constant 30 : index
    %416 = memref.load %arg5[%c30] : memref<144xf32, #tpu.memory_space<smem>>
    %417 = vector.broadcast %416 : f32 to vector<16x16xf32>
    %418 = arith.mulf %417, %283 : vector<16x16xf32>
    %419 = arith.addf %415, %418 : vector<16x16xf32>
    %c31 = arith.constant 31 : index
    %420 = memref.load %arg5[%c31] : memref<144xf32, #tpu.memory_space<smem>>
    %421 = vector.broadcast %420 : f32 to vector<16x16xf32>
    %422 = arith.mulf %421, %285 : vector<16x16xf32>
    %423 = arith.addf %419, %422 : vector<16x16xf32>
    %c32 = arith.constant 32 : index
    %424 = memref.load %arg5[%c32] : memref<144xf32, #tpu.memory_space<smem>>
    %425 = vector.broadcast %424 : f32 to vector<16x16xf32>
    %426 = arith.mulf %425, %287 : vector<16x16xf32>
    %427 = arith.addf %423, %426 : vector<16x16xf32>
    %c33 = arith.constant 33 : index
    %428 = memref.load %arg5[%c33] : memref<144xf32, #tpu.memory_space<smem>>
    %429 = vector.broadcast %428 : f32 to vector<16x16xf32>
    %430 = arith.mulf %429, %289 : vector<16x16xf32>
    %431 = arith.addf %427, %430 : vector<16x16xf32>
    %c34 = arith.constant 34 : index
    %432 = memref.load %arg5[%c34] : memref<144xf32, #tpu.memory_space<smem>>
    %433 = vector.broadcast %432 : f32 to vector<16x16xf32>
    %434 = arith.mulf %433, %291 : vector<16x16xf32>
    %435 = arith.addf %431, %434 : vector<16x16xf32>
    %c35 = arith.constant 35 : index
    %436 = memref.load %arg5[%c35] : memref<144xf32, #tpu.memory_space<smem>>
    %437 = vector.broadcast %436 : f32 to vector<16x16xf32>
    %438 = arith.mulf %437, %293 : vector<16x16xf32>
    %439 = arith.addf %435, %438 : vector<16x16xf32>
    %cst_152 = arith.constant 0.000000e+00 : f32
    %440 = vector.broadcast %cst_152 : f32 to vector<16x16xf32>
    %441 = arith.maximumf %439, %440 : vector<16x16xf32>
    %c0_153 = arith.constant 0 : index
    %c1_154 = arith.constant 1 : index
    %c1_155 = arith.constant 1 : index
    %442 = vector.load %arg11[%c0_153, %c1_154, %c1_155] : memref<4x18x18xf32, #tpu.memory_space<vmem>>, vector<1x16x16xf32>
    %443 = vector.shape_cast %442 : vector<1x16x16xf32> to vector<16x16xf32>
    %444 = vector.shape_cast %441 : vector<16x16xf32> to vector<1x16x16xf32>
    tpu.vector_store %arg11[%c0_153, %c1_154, %c1_155], %444 {strides = array<i32>} : memref<4x18x18xf32, #tpu.memory_space<vmem>>, vector<1x16x16xf32>,
    %c1_156 = arith.constant 1 : index
    %445 = memref.load %arg6[%c1_156] : memref<4xf32, #tpu.memory_space<smem>>
    %446 = vector.broadcast %445 : f32 to vector<16x16xf32>
    %c36 = arith.constant 36 : index
    %447 = memref.load %arg5[%c36] : memref<144xf32, #tpu.memory_space<smem>>
    %448 = vector.broadcast %447 : f32 to vector<16x16xf32>
    %449 = arith.mulf %448, %223 : vector<16x16xf32>
    %450 = arith.addf %446, %449 : vector<16x16xf32>
    %c37 = arith.constant 37 : index
    %451 = memref.load %arg5[%c37] : memref<144xf32, #tpu.memory_space<smem>>
    %452 = vector.broadcast %451 : f32 to vector<16x16xf32>
    %453 = arith.mulf %452, %225 : vector<16x16xf32>
    %454 = arith.addf %450, %453 : vector<16x16xf32>
    %c38 = arith.constant 38 : index
    %455 = memref.load %arg5[%c38] : memref<144xf32, #tpu.memory_space<smem>>
    %456 = vector.broadcast %455 : f32 to vector<16x16xf32>
    %457 = arith.mulf %456, %227 : vector<16x16xf32>
    %458 = arith.addf %454, %457 : vector<16x16xf32>
    %c39 = arith.constant 39 : index
    %459 = memref.load %arg5[%c39] : memref<144xf32, #tpu.memory_space<smem>>
    %460 = vector.broadcast %459 : f32 to vector<16x16xf32>
    %461 = arith.mulf %460, %229 : vector<16x16xf32>
    %462 = arith.addf %458, %461 : vector<16x16xf32>
    %c40 = arith.constant 40 : index
    %463 = memref.load %arg5[%c40] : memref<144xf32, #tpu.memory_space<smem>>
    %464 = vector.broadcast %463 : f32 to vector<16x16xf32>
    %465 = arith.mulf %464, %231 : vector<16x16xf32>
    %466 = arith.addf %462, %465 : vector<16x16xf32>
    %c41 = arith.constant 41 : index
    %467 = memref.load %arg5[%c41] : memref<144xf32, #tpu.memory_space<smem>>
    %468 = vector.broadcast %467 : f32 to vector<16x16xf32>
    %469 = arith.mulf %468, %233 : vector<16x16xf32>
    %470 = arith.addf %466, %469 : vector<16x16xf32>
    %c42 = arith.constant 42 : index
    %471 = memref.load %arg5[%c42] : memref<144xf32, #tpu.memory_space<smem>>
    %472 = vector.broadcast %471 : f32 to vector<16x16xf32>
    %473 = arith.mulf %472, %235 : vector<16x16xf32>
    %474 = arith.addf %470, %473 : vector<16x16xf32>
    %c43 = arith.constant 43 : index
    %475 = memref.load %arg5[%c43] : memref<144xf32, #tpu.memory_space<smem>>
    %476 = vector.broadcast %475 : f32 to vector<16x16xf32>
    %477 = arith.mulf %476, %237 : vector<16x16xf32>
    %478 = arith.addf %474, %477 : vector<16x16xf32>
    %c44 = arith.constant 44 : index
    %479 = memref.load %arg5[%c44] : memref<144xf32, #tpu.memory_space<smem>>
    %480 = vector.broadcast %479 : f32 to vector<16x16xf32>
    %481 = arith.mulf %480, %239 : vector<16x16xf32>
    %482 = arith.addf %478, %481 : vector<16x16xf32>
    %c45 = arith.constant 45 : index
    %483 = memref.load %arg5[%c45] : memref<144xf32, #tpu.memory_space<smem>>
    %484 = vector.broadcast %483 : f32 to vector<16x16xf32>
    %485 = arith.mulf %484, %241 : vector<16x16xf32>
    %486 = arith.addf %482, %485 : vector<16x16xf32>
    %c46 = arith.constant 46 : index
    %487 = memref.load %arg5[%c46] : memref<144xf32, #tpu.memory_space<smem>>
    %488 = vector.broadcast %487 : f32 to vector<16x16xf32>
    %489 = arith.mulf %488, %243 : vector<16x16xf32>
    %490 = arith.addf %486, %489 : vector<16x16xf32>
    %c47 = arith.constant 47 : index
    %491 = memref.load %arg5[%c47] : memref<144xf32, #tpu.memory_space<smem>>
    %492 = vector.broadcast %491 : f32 to vector<16x16xf32>
    %493 = arith.mulf %492, %245 : vector<16x16xf32>
    %494 = arith.addf %490, %493 : vector<16x16xf32>
    %c48 = arith.constant 48 : index
    %495 = memref.load %arg5[%c48] : memref<144xf32, #tpu.memory_space<smem>>
    %496 = vector.broadcast %495 : f32 to vector<16x16xf32>
    %497 = arith.mulf %496, %247 : vector<16x16xf32>
    %498 = arith.addf %494, %497 : vector<16x16xf32>
    %c49 = arith.constant 49 : index
    %499 = memref.load %arg5[%c49] : memref<144xf32, #tpu.memory_space<smem>>
    %500 = vector.broadcast %499 : f32 to vector<16x16xf32>
    %501 = arith.mulf %500, %249 : vector<16x16xf32>
    %502 = arith.addf %498, %501 : vector<16x16xf32>
    %c50 = arith.constant 50 : index
    %503 = memref.load %arg5[%c50] : memref<144xf32, #tpu.memory_space<smem>>
    %504 = vector.broadcast %503 : f32 to vector<16x16xf32>
    %505 = arith.mulf %504, %251 : vector<16x16xf32>
    %506 = arith.addf %502, %505 : vector<16x16xf32>
    %c51 = arith.constant 51 : index
    %507 = memref.load %arg5[%c51] : memref<144xf32, #tpu.memory_space<smem>>
    %508 = vector.broadcast %507 : f32 to vector<16x16xf32>
    %509 = arith.mulf %508, %253 : vector<16x16xf32>
    %510 = arith.addf %506, %509 : vector<16x16xf32>
    %c52 = arith.constant 52 : index
    %511 = memref.load %arg5[%c52] : memref<144xf32, #tpu.memory_space<smem>>
    %512 = vector.broadcast %511 : f32 to vector<16x16xf32>
    %513 = arith.mulf %512, %255 : vector<16x16xf32>
    %514 = arith.addf %510, %513 : vector<16x16xf32>
    %c53 = arith.constant 53 : index
    %515 = memref.load %arg5[%c53] : memref<144xf32, #tpu.memory_space<smem>>
    %516 = vector.broadcast %515 : f32 to vector<16x16xf32>
    %517 = arith.mulf %516, %257 : vector<16x16xf32>
    %518 = arith.addf %514, %517 : vector<16x16xf32>
    %c54 = arith.constant 54 : index
    %519 = memref.load %arg5[%c54] : memref<144xf32, #tpu.memory_space<smem>>
    %520 = vector.broadcast %519 : f32 to vector<16x16xf32>
    %521 = arith.mulf %520, %259 : vector<16x16xf32>
    %522 = arith.addf %518, %521 : vector<16x16xf32>
    %c55 = arith.constant 55 : index
    %523 = memref.load %arg5[%c55] : memref<144xf32, #tpu.memory_space<smem>>
    %524 = vector.broadcast %523 : f32 to vector<16x16xf32>
    %525 = arith.mulf %524, %261 : vector<16x16xf32>
    %526 = arith.addf %522, %525 : vector<16x16xf32>
    %c56 = arith.constant 56 : index
    %527 = memref.load %arg5[%c56] : memref<144xf32, #tpu.memory_space<smem>>
    %528 = vector.broadcast %527 : f32 to vector<16x16xf32>
    %529 = arith.mulf %528, %263 : vector<16x16xf32>
    %530 = arith.addf %526, %529 : vector<16x16xf32>
    %c57 = arith.constant 57 : index
    %531 = memref.load %arg5[%c57] : memref<144xf32, #tpu.memory_space<smem>>
    %532 = vector.broadcast %531 : f32 to vector<16x16xf32>
    %533 = arith.mulf %532, %265 : vector<16x16xf32>
    %534 = arith.addf %530, %533 : vector<16x16xf32>
    %c58 = arith.constant 58 : index
    %535 = memref.load %arg5[%c58] : memref<144xf32, #tpu.memory_space<smem>>
    %536 = vector.broadcast %535 : f32 to vector<16x16xf32>
    %537 = arith.mulf %536, %267 : vector<16x16xf32>
    %538 = arith.addf %534, %537 : vector<16x16xf32>
    %c59 = arith.constant 59 : index
    %539 = memref.load %arg5[%c59] : memref<144xf32, #tpu.memory_space<smem>>
    %540 = vector.broadcast %539 : f32 to vector<16x16xf32>
    %541 = arith.mulf %540, %269 : vector<16x16xf32>
    %542 = arith.addf %538, %541 : vector<16x16xf32>
    %c60 = arith.constant 60 : index
    %543 = memref.load %arg5[%c60] : memref<144xf32, #tpu.memory_space<smem>>
    %544 = vector.broadcast %543 : f32 to vector<16x16xf32>
    %545 = arith.mulf %544, %271 : vector<16x16xf32>
    %546 = arith.addf %542, %545 : vector<16x16xf32>
    %c61 = arith.constant 61 : index
    %547 = memref.load %arg5[%c61] : memref<144xf32, #tpu.memory_space<smem>>
    %548 = vector.broadcast %547 : f32 to vector<16x16xf32>
    %549 = arith.mulf %548, %273 : vector<16x16xf32>
    %550 = arith.addf %546, %549 : vector<16x16xf32>
    %c62 = arith.constant 62 : index
    %551 = memref.load %arg5[%c62] : memref<144xf32, #tpu.memory_space<smem>>
    %552 = vector.broadcast %551 : f32 to vector<16x16xf32>
    %553 = arith.mulf %552, %275 : vector<16x16xf32>
    %554 = arith.addf %550, %553 : vector<16x16xf32>
    %c63 = arith.constant 63 : index
    %555 = memref.load %arg5[%c63] : memref<144xf32, #tpu.memory_space<smem>>
    %556 = vector.broadcast %555 : f32 to vector<16x16xf32>
    %557 = arith.mulf %556, %277 : vector<16x16xf32>
    %558 = arith.addf %554, %557 : vector<16x16xf32>
    %c64 = arith.constant 64 : index
    %559 = memref.load %arg5[%c64] : memref<144xf32, #tpu.memory_space<smem>>
    %560 = vector.broadcast %559 : f32 to vector<16x16xf32>
    %561 = arith.mulf %560, %279 : vector<16x16xf32>
    %562 = arith.addf %558, %561 : vector<16x16xf32>
    %c65 = arith.constant 65 : index
    %563 = memref.load %arg5[%c65] : memref<144xf32, #tpu.memory_space<smem>>
    %564 = vector.broadcast %563 : f32 to vector<16x16xf32>
    %565 = arith.mulf %564, %281 : vector<16x16xf32>
    %566 = arith.addf %562, %565 : vector<16x16xf32>
    %c66 = arith.constant 66 : index
    %567 = memref.load %arg5[%c66] : memref<144xf32, #tpu.memory_space<smem>>
    %568 = vector.broadcast %567 : f32 to vector<16x16xf32>
    %569 = arith.mulf %568, %283 : vector<16x16xf32>
    %570 = arith.addf %566, %569 : vector<16x16xf32>
    %c67 = arith.constant 67 : index
    %571 = memref.load %arg5[%c67] : memref<144xf32, #tpu.memory_space<smem>>
    %572 = vector.broadcast %571 : f32 to vector<16x16xf32>
    %573 = arith.mulf %572, %285 : vector<16x16xf32>
    %574 = arith.addf %570, %573 : vector<16x16xf32>
    %c68 = arith.constant 68 : index
    %575 = memref.load %arg5[%c68] : memref<144xf32, #tpu.memory_space<smem>>
    %576 = vector.broadcast %575 : f32 to vector<16x16xf32>
    %577 = arith.mulf %576, %287 : vector<16x16xf32>
    %578 = arith.addf %574, %577 : vector<16x16xf32>
    %c69 = arith.constant 69 : index
    %579 = memref.load %arg5[%c69] : memref<144xf32, #tpu.memory_space<smem>>
    %580 = vector.broadcast %579 : f32 to vector<16x16xf32>
    %581 = arith.mulf %580, %289 : vector<16x16xf32>
    %582 = arith.addf %578, %581 : vector<16x16xf32>
    %c70 = arith.constant 70 : index
    %583 = memref.load %arg5[%c70] : memref<144xf32, #tpu.memory_space<smem>>
    %584 = vector.broadcast %583 : f32 to vector<16x16xf32>
    %585 = arith.mulf %584, %291 : vector<16x16xf32>
    %586 = arith.addf %582, %585 : vector<16x16xf32>
    %c71 = arith.constant 71 : index
    %587 = memref.load %arg5[%c71] : memref<144xf32, #tpu.memory_space<smem>>
    %588 = vector.broadcast %587 : f32 to vector<16x16xf32>
    %589 = arith.mulf %588, %293 : vector<16x16xf32>
    %590 = arith.addf %586, %589 : vector<16x16xf32>
    %cst_157 = arith.constant 0.000000e+00 : f32
    %591 = vector.broadcast %cst_157 : f32 to vector<16x16xf32>
    %592 = arith.maximumf %590, %591 : vector<16x16xf32>
    %c1_158 = arith.constant 1 : index
    %c1_159 = arith.constant 1 : index
    %c1_160 = arith.constant 1 : index
    %593 = vector.load %arg11[%c1_158, %c1_159, %c1_160] : memref<4x18x18xf32, #tpu.memory_space<vmem>>, vector<1x16x16xf32>
    %594 = vector.shape_cast %593 : vector<1x16x16xf32> to vector<16x16xf32>
    %595 = vector.shape_cast %592 : vector<16x16xf32> to vector<1x16x16xf32>
    tpu.vector_store %arg11[%c1_158, %c1_159, %c1_160], %595 {strides = array<i32>} : memref<4x18x18xf32, #tpu.memory_space<vmem>>, vector<1x16x16xf32>,
    %c2_161 = arith.constant 2 : index
    %596 = memref.load %arg6[%c2_161] : memref<4xf32, #tpu.memory_space<smem>>
    %597 = vector.broadcast %596 : f32 to vector<16x16xf32>
    %c72 = arith.constant 72 : index
    %598 = memref.load %arg5[%c72] : memref<144xf32, #tpu.memory_space<smem>>
    %599 = vector.broadcast %598 : f32 to vector<16x16xf32>
    %600 = arith.mulf %599, %223 : vector<16x16xf32>
    %601 = arith.addf %597, %600 : vector<16x16xf32>
    %c73 = arith.constant 73 : index
    %602 = memref.load %arg5[%c73] : memref<144xf32, #tpu.memory_space<smem>>
    %603 = vector.broadcast %602 : f32 to vector<16x16xf32>
    %604 = arith.mulf %603, %225 : vector<16x16xf32>
    %605 = arith.addf %601, %604 : vector<16x16xf32>
    %c74 = arith.constant 74 : index
    %606 = memref.load %arg5[%c74] : memref<144xf32, #tpu.memory_space<smem>>
    %607 = vector.broadcast %606 : f32 to vector<16x16xf32>
    %608 = arith.mulf %607, %227 : vector<16x16xf32>
    %609 = arith.addf %605, %608 : vector<16x16xf32>
    %c75 = arith.constant 75 : index
    %610 = memref.load %arg5[%c75] : memref<144xf32, #tpu.memory_space<smem>>
    %611 = vector.broadcast %610 : f32 to vector<16x16xf32>
    %612 = arith.mulf %611, %229 : vector<16x16xf32>
    %613 = arith.addf %609, %612 : vector<16x16xf32>
    %c76 = arith.constant 76 : index
    %614 = memref.load %arg5[%c76] : memref<144xf32, #tpu.memory_space<smem>>
    %615 = vector.broadcast %614 : f32 to vector<16x16xf32>
    %616 = arith.mulf %615, %231 : vector<16x16xf32>
    %617 = arith.addf %613, %616 : vector<16x16xf32>
    %c77 = arith.constant 77 : index
    %618 = memref.load %arg5[%c77] : memref<144xf32, #tpu.memory_space<smem>>
    %619 = vector.broadcast %618 : f32 to vector<16x16xf32>
    %620 = arith.mulf %619, %233 : vector<16x16xf32>
    %621 = arith.addf %617, %620 : vector<16x16xf32>
    %c78 = arith.constant 78 : index
    %622 = memref.load %arg5[%c78] : memref<144xf32, #tpu.memory_space<smem>>
    %623 = vector.broadcast %622 : f32 to vector<16x16xf32>
    %624 = arith.mulf %623, %235 : vector<16x16xf32>
    %625 = arith.addf %621, %624 : vector<16x16xf32>
    %c79 = arith.constant 79 : index
    %626 = memref.load %arg5[%c79] : memref<144xf32, #tpu.memory_space<smem>>
    %627 = vector.broadcast %626 : f32 to vector<16x16xf32>
    %628 = arith.mulf %627, %237 : vector<16x16xf32>
    %629 = arith.addf %625, %628 : vector<16x16xf32>
    %c80 = arith.constant 80 : index
    %630 = memref.load %arg5[%c80] : memref<144xf32, #tpu.memory_space<smem>>
    %631 = vector.broadcast %630 : f32 to vector<16x16xf32>
    %632 = arith.mulf %631, %239 : vector<16x16xf32>
    %633 = arith.addf %629, %632 : vector<16x16xf32>
    %c81 = arith.constant 81 : index
    %634 = memref.load %arg5[%c81] : memref<144xf32, #tpu.memory_space<smem>>
    %635 = vector.broadcast %634 : f32 to vector<16x16xf32>
    %636 = arith.mulf %635, %241 : vector<16x16xf32>
    %637 = arith.addf %633, %636 : vector<16x16xf32>
    %c82 = arith.constant 82 : index
    %638 = memref.load %arg5[%c82] : memref<144xf32, #tpu.memory_space<smem>>
    %639 = vector.broadcast %638 : f32 to vector<16x16xf32>
    %640 = arith.mulf %639, %243 : vector<16x16xf32>
    %641 = arith.addf %637, %640 : vector<16x16xf32>
    %c83 = arith.constant 83 : index
    %642 = memref.load %arg5[%c83] : memref<144xf32, #tpu.memory_space<smem>>
    %643 = vector.broadcast %642 : f32 to vector<16x16xf32>
    %644 = arith.mulf %643, %245 : vector<16x16xf32>
    %645 = arith.addf %641, %644 : vector<16x16xf32>
    %c84 = arith.constant 84 : index
    %646 = memref.load %arg5[%c84] : memref<144xf32, #tpu.memory_space<smem>>
    %647 = vector.broadcast %646 : f32 to vector<16x16xf32>
    %648 = arith.mulf %647, %247 : vector<16x16xf32>
    %649 = arith.addf %645, %648 : vector<16x16xf32>
    %c85 = arith.constant 85 : index
    %650 = memref.load %arg5[%c85] : memref<144xf32, #tpu.memory_space<smem>>
    %651 = vector.broadcast %650 : f32 to vector<16x16xf32>
    %652 = arith.mulf %651, %249 : vector<16x16xf32>
    %653 = arith.addf %649, %652 : vector<16x16xf32>
    %c86 = arith.constant 86 : index
    %654 = memref.load %arg5[%c86] : memref<144xf32, #tpu.memory_space<smem>>
    %655 = vector.broadcast %654 : f32 to vector<16x16xf32>
    %656 = arith.mulf %655, %251 : vector<16x16xf32>
    %657 = arith.addf %653, %656 : vector<16x16xf32>
    %c87 = arith.constant 87 : index
    %658 = memref.load %arg5[%c87] : memref<144xf32, #tpu.memory_space<smem>>
    %659 = vector.broadcast %658 : f32 to vector<16x16xf32>
    %660 = arith.mulf %659, %253 : vector<16x16xf32>
    %661 = arith.addf %657, %660 : vector<16x16xf32>
    %c88 = arith.constant 88 : index
    %662 = memref.load %arg5[%c88] : memref<144xf32, #tpu.memory_space<smem>>
    %663 = vector.broadcast %662 : f32 to vector<16x16xf32>
    %664 = arith.mulf %663, %255 : vector<16x16xf32>
    %665 = arith.addf %661, %664 : vector<16x16xf32>
    %c89 = arith.constant 89 : index
    %666 = memref.load %arg5[%c89] : memref<144xf32, #tpu.memory_space<smem>>
    %667 = vector.broadcast %666 : f32 to vector<16x16xf32>
    %668 = arith.mulf %667, %257 : vector<16x16xf32>
    %669 = arith.addf %665, %668 : vector<16x16xf32>
    %c90 = arith.constant 90 : index
    %670 = memref.load %arg5[%c90] : memref<144xf32, #tpu.memory_space<smem>>
    %671 = vector.broadcast %670 : f32 to vector<16x16xf32>
    %672 = arith.mulf %671, %259 : vector<16x16xf32>
    %673 = arith.addf %669, %672 : vector<16x16xf32>
    %c91 = arith.constant 91 : index
    %674 = memref.load %arg5[%c91] : memref<144xf32, #tpu.memory_space<smem>>
    %675 = vector.broadcast %674 : f32 to vector<16x16xf32>
    %676 = arith.mulf %675, %261 : vector<16x16xf32>
    %677 = arith.addf %673, %676 : vector<16x16xf32>
    %c92 = arith.constant 92 : index
    %678 = memref.load %arg5[%c92] : memref<144xf32, #tpu.memory_space<smem>>
    %679 = vector.broadcast %678 : f32 to vector<16x16xf32>
    %680 = arith.mulf %679, %263 : vector<16x16xf32>
    %681 = arith.addf %677, %680 : vector<16x16xf32>
    %c93 = arith.constant 93 : index
    %682 = memref.load %arg5[%c93] : memref<144xf32, #tpu.memory_space<smem>>
    %683 = vector.broadcast %682 : f32 to vector<16x16xf32>
    %684 = arith.mulf %683, %265 : vector<16x16xf32>
    %685 = arith.addf %681, %684 : vector<16x16xf32>
    %c94 = arith.constant 94 : index
    %686 = memref.load %arg5[%c94] : memref<144xf32, #tpu.memory_space<smem>>
    %687 = vector.broadcast %686 : f32 to vector<16x16xf32>
    %688 = arith.mulf %687, %267 : vector<16x16xf32>
    %689 = arith.addf %685, %688 : vector<16x16xf32>
    %c95 = arith.constant 95 : index
    %690 = memref.load %arg5[%c95] : memref<144xf32, #tpu.memory_space<smem>>
    %691 = vector.broadcast %690 : f32 to vector<16x16xf32>
    %692 = arith.mulf %691, %269 : vector<16x16xf32>
    %693 = arith.addf %689, %692 : vector<16x16xf32>
    %c96 = arith.constant 96 : index
    %694 = memref.load %arg5[%c96] : memref<144xf32, #tpu.memory_space<smem>>
    %695 = vector.broadcast %694 : f32 to vector<16x16xf32>
    %696 = arith.mulf %695, %271 : vector<16x16xf32>
    %697 = arith.addf %693, %696 : vector<16x16xf32>
    %c97 = arith.constant 97 : index
    %698 = memref.load %arg5[%c97] : memref<144xf32, #tpu.memory_space<smem>>
    %699 = vector.broadcast %698 : f32 to vector<16x16xf32>
    %700 = arith.mulf %699, %273 : vector<16x16xf32>
    %701 = arith.addf %697, %700 : vector<16x16xf32>
    %c98 = arith.constant 98 : index
    %702 = memref.load %arg5[%c98] : memref<144xf32, #tpu.memory_space<smem>>
    %703 = vector.broadcast %702 : f32 to vector<16x16xf32>
    %704 = arith.mulf %703, %275 : vector<16x16xf32>
    %705 = arith.addf %701, %704 : vector<16x16xf32>
    %c99 = arith.constant 99 : index
    %706 = memref.load %arg5[%c99] : memref<144xf32, #tpu.memory_space<smem>>
    %707 = vector.broadcast %706 : f32 to vector<16x16xf32>
    %708 = arith.mulf %707, %277 : vector<16x16xf32>
    %709 = arith.addf %705, %708 : vector<16x16xf32>
    %c100 = arith.constant 100 : index
    %710 = memref.load %arg5[%c100] : memref<144xf32, #tpu.memory_space<smem>>
    %711 = vector.broadcast %710 : f32 to vector<16x16xf32>
    %712 = arith.mulf %711, %279 : vector<16x16xf32>
    %713 = arith.addf %709, %712 : vector<16x16xf32>
    %c101 = arith.constant 101 : index
    %714 = memref.load %arg5[%c101] : memref<144xf32, #tpu.memory_space<smem>>
    %715 = vector.broadcast %714 : f32 to vector<16x16xf32>
    %716 = arith.mulf %715, %281 : vector<16x16xf32>
    %717 = arith.addf %713, %716 : vector<16x16xf32>
    %c102 = arith.constant 102 : index
    %718 = memref.load %arg5[%c102] : memref<144xf32, #tpu.memory_space<smem>>
    %719 = vector.broadcast %718 : f32 to vector<16x16xf32>
    %720 = arith.mulf %719, %283 : vector<16x16xf32>
    %721 = arith.addf %717, %720 : vector<16x16xf32>
    %c103 = arith.constant 103 : index
    %722 = memref.load %arg5[%c103] : memref<144xf32, #tpu.memory_space<smem>>
    %723 = vector.broadcast %722 : f32 to vector<16x16xf32>
    %724 = arith.mulf %723, %285 : vector<16x16xf32>
    %725 = arith.addf %721, %724 : vector<16x16xf32>
    %c104 = arith.constant 104 : index
    %726 = memref.load %arg5[%c104] : memref<144xf32, #tpu.memory_space<smem>>
    %727 = vector.broadcast %726 : f32 to vector<16x16xf32>
    %728 = arith.mulf %727, %287 : vector<16x16xf32>
    %729 = arith.addf %725, %728 : vector<16x16xf32>
    %c105 = arith.constant 105 : index
    %730 = memref.load %arg5[%c105] : memref<144xf32, #tpu.memory_space<smem>>
    %731 = vector.broadcast %730 : f32 to vector<16x16xf32>
    %732 = arith.mulf %731, %289 : vector<16x16xf32>
    %733 = arith.addf %729, %732 : vector<16x16xf32>
    %c106 = arith.constant 106 : index
    %734 = memref.load %arg5[%c106] : memref<144xf32, #tpu.memory_space<smem>>
    %735 = vector.broadcast %734 : f32 to vector<16x16xf32>
    %736 = arith.mulf %735, %291 : vector<16x16xf32>
    %737 = arith.addf %733, %736 : vector<16x16xf32>
    %c107 = arith.constant 107 : index
    %738 = memref.load %arg5[%c107] : memref<144xf32, #tpu.memory_space<smem>>
    %739 = vector.broadcast %738 : f32 to vector<16x16xf32>
    %740 = arith.mulf %739, %293 : vector<16x16xf32>
    %741 = arith.addf %737, %740 : vector<16x16xf32>
    %cst_162 = arith.constant 0.000000e+00 : f32
    %742 = vector.broadcast %cst_162 : f32 to vector<16x16xf32>
    %743 = arith.maximumf %741, %742 : vector<16x16xf32>
    %c2_163 = arith.constant 2 : index
    %c1_164 = arith.constant 1 : index
    %c1_165 = arith.constant 1 : index
    %744 = vector.load %arg11[%c2_163, %c1_164, %c1_165] : memref<4x18x18xf32, #tpu.memory_space<vmem>>, vector<1x16x16xf32>
    %745 = vector.shape_cast %744 : vector<1x16x16xf32> to vector<16x16xf32>
    %746 = vector.shape_cast %743 : vector<16x16xf32> to vector<1x16x16xf32>
    tpu.vector_store %arg11[%c2_163, %c1_164, %c1_165], %746 {strides = array<i32>} : memref<4x18x18xf32, #tpu.memory_space<vmem>>, vector<1x16x16xf32>,
    %c3_166 = arith.constant 3 : index
    %747 = memref.load %arg6[%c3_166] : memref<4xf32, #tpu.memory_space<smem>>
    %748 = vector.broadcast %747 : f32 to vector<16x16xf32>
    %c108 = arith.constant 108 : index
    %749 = memref.load %arg5[%c108] : memref<144xf32, #tpu.memory_space<smem>>
    %750 = vector.broadcast %749 : f32 to vector<16x16xf32>
    %751 = arith.mulf %750, %223 : vector<16x16xf32>
    %752 = arith.addf %748, %751 : vector<16x16xf32>
    %c109 = arith.constant 109 : index
    %753 = memref.load %arg5[%c109] : memref<144xf32, #tpu.memory_space<smem>>
    %754 = vector.broadcast %753 : f32 to vector<16x16xf32>
    %755 = arith.mulf %754, %225 : vector<16x16xf32>
    %756 = arith.addf %752, %755 : vector<16x16xf32>
    %c110 = arith.constant 110 : index
    %757 = memref.load %arg5[%c110] : memref<144xf32, #tpu.memory_space<smem>>
    %758 = vector.broadcast %757 : f32 to vector<16x16xf32>
    %759 = arith.mulf %758, %227 : vector<16x16xf32>
    %760 = arith.addf %756, %759 : vector<16x16xf32>
    %c111 = arith.constant 111 : index
    %761 = memref.load %arg5[%c111] : memref<144xf32, #tpu.memory_space<smem>>
    %762 = vector.broadcast %761 : f32 to vector<16x16xf32>
    %763 = arith.mulf %762, %229 : vector<16x16xf32>
    %764 = arith.addf %760, %763 : vector<16x16xf32>
    %c112 = arith.constant 112 : index
    %765 = memref.load %arg5[%c112] : memref<144xf32, #tpu.memory_space<smem>>
    %766 = vector.broadcast %765 : f32 to vector<16x16xf32>
    %767 = arith.mulf %766, %231 : vector<16x16xf32>
    %768 = arith.addf %764, %767 : vector<16x16xf32>
    %c113 = arith.constant 113 : index
    %769 = memref.load %arg5[%c113] : memref<144xf32, #tpu.memory_space<smem>>
    %770 = vector.broadcast %769 : f32 to vector<16x16xf32>
    %771 = arith.mulf %770, %233 : vector<16x16xf32>
    %772 = arith.addf %768, %771 : vector<16x16xf32>
    %c114 = arith.constant 114 : index
    %773 = memref.load %arg5[%c114] : memref<144xf32, #tpu.memory_space<smem>>
    %774 = vector.broadcast %773 : f32 to vector<16x16xf32>
    %775 = arith.mulf %774, %235 : vector<16x16xf32>
    %776 = arith.addf %772, %775 : vector<16x16xf32>
    %c115 = arith.constant 115 : index
    %777 = memref.load %arg5[%c115] : memref<144xf32, #tpu.memory_space<smem>>
    %778 = vector.broadcast %777 : f32 to vector<16x16xf32>
    %779 = arith.mulf %778, %237 : vector<16x16xf32>
    %780 = arith.addf %776, %779 : vector<16x16xf32>
    %c116 = arith.constant 116 : index
    %781 = memref.load %arg5[%c116] : memref<144xf32, #tpu.memory_space<smem>>
    %782 = vector.broadcast %781 : f32 to vector<16x16xf32>
    %783 = arith.mulf %782, %239 : vector<16x16xf32>
    %784 = arith.addf %780, %783 : vector<16x16xf32>
    %c117 = arith.constant 117 : index
    %785 = memref.load %arg5[%c117] : memref<144xf32, #tpu.memory_space<smem>>
    %786 = vector.broadcast %785 : f32 to vector<16x16xf32>
    %787 = arith.mulf %786, %241 : vector<16x16xf32>
    %788 = arith.addf %784, %787 : vector<16x16xf32>
    %c118 = arith.constant 118 : index
    %789 = memref.load %arg5[%c118] : memref<144xf32, #tpu.memory_space<smem>>
    %790 = vector.broadcast %789 : f32 to vector<16x16xf32>
    %791 = arith.mulf %790, %243 : vector<16x16xf32>
    %792 = arith.addf %788, %791 : vector<16x16xf32>
    %c119 = arith.constant 119 : index
    %793 = memref.load %arg5[%c119] : memref<144xf32, #tpu.memory_space<smem>>
    %794 = vector.broadcast %793 : f32 to vector<16x16xf32>
    %795 = arith.mulf %794, %245 : vector<16x16xf32>
    %796 = arith.addf %792, %795 : vector<16x16xf32>
    %c120 = arith.constant 120 : index
    %797 = memref.load %arg5[%c120] : memref<144xf32, #tpu.memory_space<smem>>
    %798 = vector.broadcast %797 : f32 to vector<16x16xf32>
    %799 = arith.mulf %798, %247 : vector<16x16xf32>
    %800 = arith.addf %796, %799 : vector<16x16xf32>
    %c121 = arith.constant 121 : index
    %801 = memref.load %arg5[%c121] : memref<144xf32, #tpu.memory_space<smem>>
    %802 = vector.broadcast %801 : f32 to vector<16x16xf32>
    %803 = arith.mulf %802, %249 : vector<16x16xf32>
    %804 = arith.addf %800, %803 : vector<16x16xf32>
    %c122 = arith.constant 122 : index
    %805 = memref.load %arg5[%c122] : memref<144xf32, #tpu.memory_space<smem>>
    %806 = vector.broadcast %805 : f32 to vector<16x16xf32>
    %807 = arith.mulf %806, %251 : vector<16x16xf32>
    %808 = arith.addf %804, %807 : vector<16x16xf32>
    %c123 = arith.constant 123 : index
    %809 = memref.load %arg5[%c123] : memref<144xf32, #tpu.memory_space<smem>>
    %810 = vector.broadcast %809 : f32 to vector<16x16xf32>
    %811 = arith.mulf %810, %253 : vector<16x16xf32>
    %812 = arith.addf %808, %811 : vector<16x16xf32>
    %c124 = arith.constant 124 : index
    %813 = memref.load %arg5[%c124] : memref<144xf32, #tpu.memory_space<smem>>
    %814 = vector.broadcast %813 : f32 to vector<16x16xf32>
    %815 = arith.mulf %814, %255 : vector<16x16xf32>
    %816 = arith.addf %812, %815 : vector<16x16xf32>
    %c125 = arith.constant 125 : index
    %817 = memref.load %arg5[%c125] : memref<144xf32, #tpu.memory_space<smem>>
    %818 = vector.broadcast %817 : f32 to vector<16x16xf32>
    %819 = arith.mulf %818, %257 : vector<16x16xf32>
    %820 = arith.addf %816, %819 : vector<16x16xf32>
    %c126 = arith.constant 126 : index
    %821 = memref.load %arg5[%c126] : memref<144xf32, #tpu.memory_space<smem>>
    %822 = vector.broadcast %821 : f32 to vector<16x16xf32>
    %823 = arith.mulf %822, %259 : vector<16x16xf32>
    %824 = arith.addf %820, %823 : vector<16x16xf32>
    %c127 = arith.constant 127 : index
    %825 = memref.load %arg5[%c127] : memref<144xf32, #tpu.memory_space<smem>>
    %826 = vector.broadcast %825 : f32 to vector<16x16xf32>
    %827 = arith.mulf %826, %261 : vector<16x16xf32>
    %828 = arith.addf %824, %827 : vector<16x16xf32>
    %c128 = arith.constant 128 : index
    %829 = memref.load %arg5[%c128] : memref<144xf32, #tpu.memory_space<smem>>
    %830 = vector.broadcast %829 : f32 to vector<16x16xf32>
    %831 = arith.mulf %830, %263 : vector<16x16xf32>
    %832 = arith.addf %828, %831 : vector<16x16xf32>
    %c129 = arith.constant 129 : index
    %833 = memref.load %arg5[%c129] : memref<144xf32, #tpu.memory_space<smem>>
    %834 = vector.broadcast %833 : f32 to vector<16x16xf32>
    %835 = arith.mulf %834, %265 : vector<16x16xf32>
    %836 = arith.addf %832, %835 : vector<16x16xf32>
    %c130 = arith.constant 130 : index
    %837 = memref.load %arg5[%c130] : memref<144xf32, #tpu.memory_space<smem>>
    %838 = vector.broadcast %837 : f32 to vector<16x16xf32>
    %839 = arith.mulf %838, %267 : vector<16x16xf32>
    %840 = arith.addf %836, %839 : vector<16x16xf32>
    %c131 = arith.constant 131 : index
    %841 = memref.load %arg5[%c131] : memref<144xf32, #tpu.memory_space<smem>>
    %842 = vector.broadcast %841 : f32 to vector<16x16xf32>
    %843 = arith.mulf %842, %269 : vector<16x16xf32>
    %844 = arith.addf %840, %843 : vector<16x16xf32>
    %c132 = arith.constant 132 : index
    %845 = memref.load %arg5[%c132] : memref<144xf32, #tpu.memory_space<smem>>
    %846 = vector.broadcast %845 : f32 to vector<16x16xf32>
    %847 = arith.mulf %846, %271 : vector<16x16xf32>
    %848 = arith.addf %844, %847 : vector<16x16xf32>
    %c133 = arith.constant 133 : index
    %849 = memref.load %arg5[%c133] : memref<144xf32, #tpu.memory_space<smem>>
    %850 = vector.broadcast %849 : f32 to vector<16x16xf32>
    %851 = arith.mulf %850, %273 : vector<16x16xf32>
    %852 = arith.addf %848, %851 : vector<16x16xf32>
    %c134 = arith.constant 134 : index
    %853 = memref.load %arg5[%c134] : memref<144xf32, #tpu.memory_space<smem>>
    %854 = vector.broadcast %853 : f32 to vector<16x16xf32>
    %855 = arith.mulf %854, %275 : vector<16x16xf32>
    %856 = arith.addf %852, %855 : vector<16x16xf32>
    %c135 = arith.constant 135 : index
    %857 = memref.load %arg5[%c135] : memref<144xf32, #tpu.memory_space<smem>>
    %858 = vector.broadcast %857 : f32 to vector<16x16xf32>
    %859 = arith.mulf %858, %277 : vector<16x16xf32>
    %860 = arith.addf %856, %859 : vector<16x16xf32>
    %c136 = arith.constant 136 : index
    %861 = memref.load %arg5[%c136] : memref<144xf32, #tpu.memory_space<smem>>
    %862 = vector.broadcast %861 : f32 to vector<16x16xf32>
    %863 = arith.mulf %862, %279 : vector<16x16xf32>
    %864 = arith.addf %860, %863 : vector<16x16xf32>
    %c137 = arith.constant 137 : index
    %865 = memref.load %arg5[%c137] : memref<144xf32, #tpu.memory_space<smem>>
    %866 = vector.broadcast %865 : f32 to vector<16x16xf32>
    %867 = arith.mulf %866, %281 : vector<16x16xf32>
    %868 = arith.addf %864, %867 : vector<16x16xf32>
    %c138 = arith.constant 138 : index
    %869 = memref.load %arg5[%c138] : memref<144xf32, #tpu.memory_space<smem>>
    %870 = vector.broadcast %869 : f32 to vector<16x16xf32>
    %871 = arith.mulf %870, %283 : vector<16x16xf32>
    %872 = arith.addf %868, %871 : vector<16x16xf32>
    %c139 = arith.constant 139 : index
    %873 = memref.load %arg5[%c139] : memref<144xf32, #tpu.memory_space<smem>>
    %874 = vector.broadcast %873 : f32 to vector<16x16xf32>
    %875 = arith.mulf %874, %285 : vector<16x16xf32>
    %876 = arith.addf %872, %875 : vector<16x16xf32>
    %c140 = arith.constant 140 : index
    %877 = memref.load %arg5[%c140] : memref<144xf32, #tpu.memory_space<smem>>
    %878 = vector.broadcast %877 : f32 to vector<16x16xf32>
    %879 = arith.mulf %878, %287 : vector<16x16xf32>
    %880 = arith.addf %876, %879 : vector<16x16xf32>
    %c141 = arith.constant 141 : index
    %881 = memref.load %arg5[%c141] : memref<144xf32, #tpu.memory_space<smem>>
    %882 = vector.broadcast %881 : f32 to vector<16x16xf32>
    %883 = arith.mulf %882, %289 : vector<16x16xf32>
    %884 = arith.addf %880, %883 : vector<16x16xf32>
    %c142 = arith.constant 142 : index
    %885 = memref.load %arg5[%c142] : memref<144xf32, #tpu.memory_space<smem>>
    %886 = vector.broadcast %885 : f32 to vector<16x16xf32>
    %887 = arith.mulf %886, %291 : vector<16x16xf32>
    %888 = arith.addf %884, %887 : vector<16x16xf32>
    %c143 = arith.constant 143 : index
    %889 = memref.load %arg5[%c143] : memref<144xf32, #tpu.memory_space<smem>>
    %890 = vector.broadcast %889 : f32 to vector<16x16xf32>
    %891 = arith.mulf %890, %293 : vector<16x16xf32>
    %892 = arith.addf %888, %891 : vector<16x16xf32>
    %cst_167 = arith.constant 0.000000e+00 : f32
    %893 = vector.broadcast %cst_167 : f32 to vector<16x16xf32>
    %894 = arith.maximumf %892, %893 : vector<16x16xf32>
    %c3_168 = arith.constant 3 : index
    %c1_169 = arith.constant 1 : index
    %c1_170 = arith.constant 1 : index
    %895 = vector.load %arg11[%c3_168, %c1_169, %c1_170] : memref<4x18x18xf32, #tpu.memory_space<vmem>>, vector<1x16x16xf32>
    %896 = vector.shape_cast %895 : vector<1x16x16xf32> to vector<16x16xf32>
    %897 = vector.shape_cast %894 : vector<16x16xf32> to vector<1x16x16xf32>
    tpu.vector_store %arg11[%c3_168, %c1_169, %c1_170], %897 {strides = array<i32>} : memref<4x18x18xf32, #tpu.memory_space<vmem>>, vector<1x16x16xf32>,
    %c0_171 = arith.constant 0 : index
    %c0_172 = arith.constant 0 : index
    %c0_173 = arith.constant 0 : index
    %898 = vector.load %arg11[%c0_171, %c0_172, %c0_173] : memref<4x18x18xf32, #tpu.memory_space<vmem>>, vector<1x16x16xf32>
    %899 = vector.shape_cast %898 : vector<1x16x16xf32> to vector<16x16xf32>
    %c0_174 = arith.constant 0 : index
    %c0_175 = arith.constant 0 : index
    %c1_176 = arith.constant 1 : index
    %900 = vector.load %arg11[%c0_174, %c0_175, %c1_176] : memref<4x18x18xf32, #tpu.memory_space<vmem>>, vector<1x16x16xf32>
    %901 = vector.shape_cast %900 : vector<1x16x16xf32> to vector<16x16xf32>
    %c0_177 = arith.constant 0 : index
    %c0_178 = arith.constant 0 : index
    %c2_179 = arith.constant 2 : index
    %902 = vector.load %arg11[%c0_177, %c0_178, %c2_179] : memref<4x18x18xf32, #tpu.memory_space<vmem>>, vector<1x16x16xf32>
    %903 = vector.shape_cast %902 : vector<1x16x16xf32> to vector<16x16xf32>
    %c0_180 = arith.constant 0 : index
    %c1_181 = arith.constant 1 : index
    %c0_182 = arith.constant 0 : index
    %904 = vector.load %arg11[%c0_180, %c1_181, %c0_182] : memref<4x18x18xf32, #tpu.memory_space<vmem>>, vector<1x16x16xf32>
    %905 = vector.shape_cast %904 : vector<1x16x16xf32> to vector<16x16xf32>
    %c0_183 = arith.constant 0 : index
    %c1_184 = arith.constant 1 : index
    %c1_185 = arith.constant 1 : index
    %906 = vector.load %arg11[%c0_183, %c1_184, %c1_185] : memref<4x18x18xf32, #tpu.memory_space<vmem>>, vector<1x16x16xf32>
    %907 = vector.shape_cast %906 : vector<1x16x16xf32> to vector<16x16xf32>
    %c0_186 = arith.constant 0 : index
    %c1_187 = arith.constant 1 : index
    %c2_188 = arith.constant 2 : index
    %908 = vector.load %arg11[%c0_186, %c1_187, %c2_188] : memref<4x18x18xf32, #tpu.memory_space<vmem>>, vector<1x16x16xf32>
    %909 = vector.shape_cast %908 : vector<1x16x16xf32> to vector<16x16xf32>
    %c0_189 = arith.constant 0 : index
    %c2_190 = arith.constant 2 : index
    %c0_191 = arith.constant 0 : index
    %910 = vector.load %arg11[%c0_189, %c2_190, %c0_191] : memref<4x18x18xf32, #tpu.memory_space<vmem>>, vector<1x16x16xf32>
    %911 = vector.shape_cast %910 : vector<1x16x16xf32> to vector<16x16xf32>
    %c0_192 = arith.constant 0 : index
    %c2_193 = arith.constant 2 : index
    %c1_194 = arith.constant 1 : index
    %912 = vector.load %arg11[%c0_192, %c2_193, %c1_194] : memref<4x18x18xf32, #tpu.memory_space<vmem>>, vector<1x16x16xf32>
    %913 = vector.shape_cast %912 : vector<1x16x16xf32> to vector<16x16xf32>
    %c0_195 = arith.constant 0 : index
    %c2_196 = arith.constant 2 : index
    %c2_197 = arith.constant 2 : index
    %914 = vector.load %arg11[%c0_195, %c2_196, %c2_197] : memref<4x18x18xf32, #tpu.memory_space<vmem>>, vector<1x16x16xf32>
    %915 = vector.shape_cast %914 : vector<1x16x16xf32> to vector<16x16xf32>
    %c1_198 = arith.constant 1 : index
    %c0_199 = arith.constant 0 : index
    %c0_200 = arith.constant 0 : index
    %916 = vector.load %arg11[%c1_198, %c0_199, %c0_200] : memref<4x18x18xf32, #tpu.memory_space<vmem>>, vector<1x16x16xf32>
    %917 = vector.shape_cast %916 : vector<1x16x16xf32> to vector<16x16xf32>
    %c1_201 = arith.constant 1 : index
    %c0_202 = arith.constant 0 : index
    %c1_203 = arith.constant 1 : index
    %918 = vector.load %arg11[%c1_201, %c0_202, %c1_203] : memref<4x18x18xf32, #tpu.memory_space<vmem>>, vector<1x16x16xf32>
    %919 = vector.shape_cast %918 : vector<1x16x16xf32> to vector<16x16xf32>
    %c1_204 = arith.constant 1 : index
    %c0_205 = arith.constant 0 : index
    %c2_206 = arith.constant 2 : index
    %920 = vector.load %arg11[%c1_204, %c0_205, %c2_206] : memref<4x18x18xf32, #tpu.memory_space<vmem>>, vector<1x16x16xf32>
    %921 = vector.shape_cast %920 : vector<1x16x16xf32> to vector<16x16xf32>
    %c1_207 = arith.constant 1 : index
    %c1_208 = arith.constant 1 : index
    %c0_209 = arith.constant 0 : index
    %922 = vector.load %arg11[%c1_207, %c1_208, %c0_209] : memref<4x18x18xf32, #tpu.memory_space<vmem>>, vector<1x16x16xf32>
    %923 = vector.shape_cast %922 : vector<1x16x16xf32> to vector<16x16xf32>
    %c1_210 = arith.constant 1 : index
    %c1_211 = arith.constant 1 : index
    %c1_212 = arith.constant 1 : index
    %924 = vector.load %arg11[%c1_210, %c1_211, %c1_212] : memref<4x18x18xf32, #tpu.memory_space<vmem>>, vector<1x16x16xf32>
    %925 = vector.shape_cast %924 : vector<1x16x16xf32> to vector<16x16xf32>
    %c1_213 = arith.constant 1 : index
    %c1_214 = arith.constant 1 : index
    %c2_215 = arith.constant 2 : index
    %926 = vector.load %arg11[%c1_213, %c1_214, %c2_215] : memref<4x18x18xf32, #tpu.memory_space<vmem>>, vector<1x16x16xf32>
    %927 = vector.shape_cast %926 : vector<1x16x16xf32> to vector<16x16xf32>
    %c1_216 = arith.constant 1 : index
    %c2_217 = arith.constant 2 : index
    %c0_218 = arith.constant 0 : index
    %928 = vector.load %arg11[%c1_216, %c2_217, %c0_218] : memref<4x18x18xf32, #tpu.memory_space<vmem>>, vector<1x16x16xf32>
    %929 = vector.shape_cast %928 : vector<1x16x16xf32> to vector<16x16xf32>
    %c1_219 = arith.constant 1 : index
    %c2_220 = arith.constant 2 : index
    %c1_221 = arith.constant 1 : index
    %930 = vector.load %arg11[%c1_219, %c2_220, %c1_221] : memref<4x18x18xf32, #tpu.memory_space<vmem>>, vector<1x16x16xf32>
    %931 = vector.shape_cast %930 : vector<1x16x16xf32> to vector<16x16xf32>
    %c1_222 = arith.constant 1 : index
    %c2_223 = arith.constant 2 : index
    %c2_224 = arith.constant 2 : index
    %932 = vector.load %arg11[%c1_222, %c2_223, %c2_224] : memref<4x18x18xf32, #tpu.memory_space<vmem>>, vector<1x16x16xf32>
    %933 = vector.shape_cast %932 : vector<1x16x16xf32> to vector<16x16xf32>
    %c2_225 = arith.constant 2 : index
    %c0_226 = arith.constant 0 : index
    %c0_227 = arith.constant 0 : index
    %934 = vector.load %arg11[%c2_225, %c0_226, %c0_227] : memref<4x18x18xf32, #tpu.memory_space<vmem>>, vector<1x16x16xf32>
    %935 = vector.shape_cast %934 : vector<1x16x16xf32> to vector<16x16xf32>
    %c2_228 = arith.constant 2 : index
    %c0_229 = arith.constant 0 : index
    %c1_230 = arith.constant 1 : index
    %936 = vector.load %arg11[%c2_228, %c0_229, %c1_230] : memref<4x18x18xf32, #tpu.memory_space<vmem>>, vector<1x16x16xf32>
    %937 = vector.shape_cast %936 : vector<1x16x16xf32> to vector<16x16xf32>
    %c2_231 = arith.constant 2 : index
    %c0_232 = arith.constant 0 : index
    %c2_233 = arith.constant 2 : index
    %938 = vector.load %arg11[%c2_231, %c0_232, %c2_233] : memref<4x18x18xf32, #tpu.memory_space<vmem>>, vector<1x16x16xf32>
    %939 = vector.shape_cast %938 : vector<1x16x16xf32> to vector<16x16xf32>
    %c2_234 = arith.constant 2 : index
    %c1_235 = arith.constant 1 : index
    %c0_236 = arith.constant 0 : index
    %940 = vector.load %arg11[%c2_234, %c1_235, %c0_236] : memref<4x18x18xf32, #tpu.memory_space<vmem>>, vector<1x16x16xf32>
    %941 = vector.shape_cast %940 : vector<1x16x16xf32> to vector<16x16xf32>
    %c2_237 = arith.constant 2 : index
    %c1_238 = arith.constant 1 : index
    %c1_239 = arith.constant 1 : index
    %942 = vector.load %arg11[%c2_237, %c1_238, %c1_239] : memref<4x18x18xf32, #tpu.memory_space<vmem>>, vector<1x16x16xf32>
    %943 = vector.shape_cast %942 : vector<1x16x16xf32> to vector<16x16xf32>
    %c2_240 = arith.constant 2 : index
    %c1_241 = arith.constant 1 : index
    %c2_242 = arith.constant 2 : index
    %944 = vector.load %arg11[%c2_240, %c1_241, %c2_242] : memref<4x18x18xf32, #tpu.memory_space<vmem>>, vector<1x16x16xf32>
    %945 = vector.shape_cast %944 : vector<1x16x16xf32> to vector<16x16xf32>
    %c2_243 = arith.constant 2 : index
    %c2_244 = arith.constant 2 : index
    %c0_245 = arith.constant 0 : index
    %946 = vector.load %arg11[%c2_243, %c2_244, %c0_245] : memref<4x18x18xf32, #tpu.memory_space<vmem>>, vector<1x16x16xf32>
    %947 = vector.shape_cast %946 : vector<1x16x16xf32> to vector<16x16xf32>
    %c2_246 = arith.constant 2 : index
    %c2_247 = arith.constant 2 : index
    %c1_248 = arith.constant 1 : index
    %948 = vector.load %arg11[%c2_246, %c2_247, %c1_248] : memref<4x18x18xf32, #tpu.memory_space<vmem>>, vector<1x16x16xf32>
    %949 = vector.shape_cast %948 : vector<1x16x16xf32> to vector<16x16xf32>
    %c2_249 = arith.constant 2 : index
    %c2_250 = arith.constant 2 : index
    %c2_251 = arith.constant 2 : index
    %950 = vector.load %arg11[%c2_249, %c2_250, %c2_251] : memref<4x18x18xf32, #tpu.memory_space<vmem>>, vector<1x16x16xf32>
    %951 = vector.shape_cast %950 : vector<1x16x16xf32> to vector<16x16xf32>
    %c3_252 = arith.constant 3 : index
    %c0_253 = arith.constant 0 : index
    %c0_254 = arith.constant 0 : index
    %952 = vector.load %arg11[%c3_252, %c0_253, %c0_254] : memref<4x18x18xf32, #tpu.memory_space<vmem>>, vector<1x16x16xf32>
    %953 = vector.shape_cast %952 : vector<1x16x16xf32> to vector<16x16xf32>
    %c3_255 = arith.constant 3 : index
    %c0_256 = arith.constant 0 : index
    %c1_257 = arith.constant 1 : index
    %954 = vector.load %arg11[%c3_255, %c0_256, %c1_257] : memref<4x18x18xf32, #tpu.memory_space<vmem>>, vector<1x16x16xf32>
    %955 = vector.shape_cast %954 : vector<1x16x16xf32> to vector<16x16xf32>
    %c3_258 = arith.constant 3 : index
    %c0_259 = arith.constant 0 : index
    %c2_260 = arith.constant 2 : index
    %956 = vector.load %arg11[%c3_258, %c0_259, %c2_260] : memref<4x18x18xf32, #tpu.memory_space<vmem>>, vector<1x16x16xf32>
    %957 = vector.shape_cast %956 : vector<1x16x16xf32> to vector<16x16xf32>
    %c3_261 = arith.constant 3 : index
    %c1_262 = arith.constant 1 : index
    %c0_263 = arith.constant 0 : index
    %958 = vector.load %arg11[%c3_261, %c1_262, %c0_263] : memref<4x18x18xf32, #tpu.memory_space<vmem>>, vector<1x16x16xf32>
    %959 = vector.shape_cast %958 : vector<1x16x16xf32> to vector<16x16xf32>
    %c3_264 = arith.constant 3 : index
    %c1_265 = arith.constant 1 : index
    %c1_266 = arith.constant 1 : index
    %960 = vector.load %arg11[%c3_264, %c1_265, %c1_266] : memref<4x18x18xf32, #tpu.memory_space<vmem>>, vector<1x16x16xf32>
    %961 = vector.shape_cast %960 : vector<1x16x16xf32> to vector<16x16xf32>
    %c3_267 = arith.constant 3 : index
    %c1_268 = arith.constant 1 : index
    %c2_269 = arith.constant 2 : index
    %962 = vector.load %arg11[%c3_267, %c1_268, %c2_269] : memref<4x18x18xf32, #tpu.memory_space<vmem>>, vector<1x16x16xf32>
    %963 = vector.shape_cast %962 : vector<1x16x16xf32> to vector<16x16xf32>
    %c3_270 = arith.constant 3 : index
    %c2_271 = arith.constant 2 : index
    %c0_272 = arith.constant 0 : index
    %964 = vector.load %arg11[%c3_270, %c2_271, %c0_272] : memref<4x18x18xf32, #tpu.memory_space<vmem>>, vector<1x16x16xf32>
    %965 = vector.shape_cast %964 : vector<1x16x16xf32> to vector<16x16xf32>
    %c3_273 = arith.constant 3 : index
    %c2_274 = arith.constant 2 : index
    %c1_275 = arith.constant 1 : index
    %966 = vector.load %arg11[%c3_273, %c2_274, %c1_275] : memref<4x18x18xf32, #tpu.memory_space<vmem>>, vector<1x16x16xf32>
    %967 = vector.shape_cast %966 : vector<1x16x16xf32> to vector<16x16xf32>
    %c3_276 = arith.constant 3 : index
    %c2_277 = arith.constant 2 : index
    %c2_278 = arith.constant 2 : index
    %968 = vector.load %arg11[%c3_276, %c2_277, %c2_278] : memref<4x18x18xf32, #tpu.memory_space<vmem>>, vector<1x16x16xf32>
    %969 = vector.shape_cast %968 : vector<1x16x16xf32> to vector<16x16xf32>
    %c0_279 = arith.constant 0 : index
    %970 = memref.load %arg8[%c0_279] : memref<4xf32, #tpu.memory_space<smem>>
    %971 = vector.broadcast %970 : f32 to vector<16x16xf32>
    %c0_280 = arith.constant 0 : index
    %972 = memref.load %arg7[%c0_280] : memref<144xf32, #tpu.memory_space<smem>>
    %973 = vector.broadcast %972 : f32 to vector<16x16xf32>
    %974 = arith.mulf %973, %899 : vector<16x16xf32>
    %975 = arith.addf %971, %974 : vector<16x16xf32>
    %c1_281 = arith.constant 1 : index
    %976 = memref.load %arg7[%c1_281] : memref<144xf32, #tpu.memory_space<smem>>
    %977 = vector.broadcast %976 : f32 to vector<16x16xf32>
    %978 = arith.mulf %977, %901 : vector<16x16xf32>
    %979 = arith.addf %975, %978 : vector<16x16xf32>
    %c2_282 = arith.constant 2 : index
    %980 = memref.load %arg7[%c2_282] : memref<144xf32, #tpu.memory_space<smem>>
    %981 = vector.broadcast %980 : f32 to vector<16x16xf32>
    %982 = arith.mulf %981, %903 : vector<16x16xf32>
    %983 = arith.addf %979, %982 : vector<16x16xf32>
    %c3_283 = arith.constant 3 : index
    %984 = memref.load %arg7[%c3_283] : memref<144xf32, #tpu.memory_space<smem>>
    %985 = vector.broadcast %984 : f32 to vector<16x16xf32>
    %986 = arith.mulf %985, %905 : vector<16x16xf32>
    %987 = arith.addf %983, %986 : vector<16x16xf32>
    %c4_284 = arith.constant 4 : index
    %988 = memref.load %arg7[%c4_284] : memref<144xf32, #tpu.memory_space<smem>>
    %989 = vector.broadcast %988 : f32 to vector<16x16xf32>
    %990 = arith.mulf %989, %907 : vector<16x16xf32>
    %991 = arith.addf %987, %990 : vector<16x16xf32>
    %c5_285 = arith.constant 5 : index
    %992 = memref.load %arg7[%c5_285] : memref<144xf32, #tpu.memory_space<smem>>
    %993 = vector.broadcast %992 : f32 to vector<16x16xf32>
    %994 = arith.mulf %993, %909 : vector<16x16xf32>
    %995 = arith.addf %991, %994 : vector<16x16xf32>
    %c6_286 = arith.constant 6 : index
    %996 = memref.load %arg7[%c6_286] : memref<144xf32, #tpu.memory_space<smem>>
    %997 = vector.broadcast %996 : f32 to vector<16x16xf32>
    %998 = arith.mulf %997, %911 : vector<16x16xf32>
    %999 = arith.addf %995, %998 : vector<16x16xf32>
    %c7_287 = arith.constant 7 : index
    %1000 = memref.load %arg7[%c7_287] : memref<144xf32, #tpu.memory_space<smem>>
    %1001 = vector.broadcast %1000 : f32 to vector<16x16xf32>
    %1002 = arith.mulf %1001, %913 : vector<16x16xf32>
    %1003 = arith.addf %999, %1002 : vector<16x16xf32>
    %c8_288 = arith.constant 8 : index
    %1004 = memref.load %arg7[%c8_288] : memref<144xf32, #tpu.memory_space<smem>>
    %1005 = vector.broadcast %1004 : f32 to vector<16x16xf32>
    %1006 = arith.mulf %1005, %915 : vector<16x16xf32>
    %1007 = arith.addf %1003, %1006 : vector<16x16xf32>
    %c9_289 = arith.constant 9 : index
    %1008 = memref.load %arg7[%c9_289] : memref<144xf32, #tpu.memory_space<smem>>
    %1009 = vector.broadcast %1008 : f32 to vector<16x16xf32>
    %1010 = arith.mulf %1009, %917 : vector<16x16xf32>
    %1011 = arith.addf %1007, %1010 : vector<16x16xf32>
    %c10_290 = arith.constant 10 : index
    %1012 = memref.load %arg7[%c10_290] : memref<144xf32, #tpu.memory_space<smem>>
    %1013 = vector.broadcast %1012 : f32 to vector<16x16xf32>
    %1014 = arith.mulf %1013, %919 : vector<16x16xf32>
    %1015 = arith.addf %1011, %1014 : vector<16x16xf32>
    %c11_291 = arith.constant 11 : index
    %1016 = memref.load %arg7[%c11_291] : memref<144xf32, #tpu.memory_space<smem>>
    %1017 = vector.broadcast %1016 : f32 to vector<16x16xf32>
    %1018 = arith.mulf %1017, %921 : vector<16x16xf32>
    %1019 = arith.addf %1015, %1018 : vector<16x16xf32>
    %c12_292 = arith.constant 12 : index
    %1020 = memref.load %arg7[%c12_292] : memref<144xf32, #tpu.memory_space<smem>>
    %1021 = vector.broadcast %1020 : f32 to vector<16x16xf32>
    %1022 = arith.mulf %1021, %923 : vector<16x16xf32>
    %1023 = arith.addf %1019, %1022 : vector<16x16xf32>
    %c13_293 = arith.constant 13 : index
    %1024 = memref.load %arg7[%c13_293] : memref<144xf32, #tpu.memory_space<smem>>
    %1025 = vector.broadcast %1024 : f32 to vector<16x16xf32>
    %1026 = arith.mulf %1025, %925 : vector<16x16xf32>
    %1027 = arith.addf %1023, %1026 : vector<16x16xf32>
    %c14_294 = arith.constant 14 : index
    %1028 = memref.load %arg7[%c14_294] : memref<144xf32, #tpu.memory_space<smem>>
    %1029 = vector.broadcast %1028 : f32 to vector<16x16xf32>
    %1030 = arith.mulf %1029, %927 : vector<16x16xf32>
    %1031 = arith.addf %1027, %1030 : vector<16x16xf32>
    %c15_295 = arith.constant 15 : index
    %1032 = memref.load %arg7[%c15_295] : memref<144xf32, #tpu.memory_space<smem>>
    %1033 = vector.broadcast %1032 : f32 to vector<16x16xf32>
    %1034 = arith.mulf %1033, %929 : vector<16x16xf32>
    %1035 = arith.addf %1031, %1034 : vector<16x16xf32>
    %c16_296 = arith.constant 16 : index
    %1036 = memref.load %arg7[%c16_296] : memref<144xf32, #tpu.memory_space<smem>>
    %1037 = vector.broadcast %1036 : f32 to vector<16x16xf32>
    %1038 = arith.mulf %1037, %931 : vector<16x16xf32>
    %1039 = arith.addf %1035, %1038 : vector<16x16xf32>
    %c17_297 = arith.constant 17 : index
    %1040 = memref.load %arg7[%c17_297] : memref<144xf32, #tpu.memory_space<smem>>
    %1041 = vector.broadcast %1040 : f32 to vector<16x16xf32>
    %1042 = arith.mulf %1041, %933 : vector<16x16xf32>
    %1043 = arith.addf %1039, %1042 : vector<16x16xf32>
    %c18_298 = arith.constant 18 : index
    %1044 = memref.load %arg7[%c18_298] : memref<144xf32, #tpu.memory_space<smem>>
    %1045 = vector.broadcast %1044 : f32 to vector<16x16xf32>
    %1046 = arith.mulf %1045, %935 : vector<16x16xf32>
    %1047 = arith.addf %1043, %1046 : vector<16x16xf32>
    %c19_299 = arith.constant 19 : index
    %1048 = memref.load %arg7[%c19_299] : memref<144xf32, #tpu.memory_space<smem>>
    %1049 = vector.broadcast %1048 : f32 to vector<16x16xf32>
    %1050 = arith.mulf %1049, %937 : vector<16x16xf32>
    %1051 = arith.addf %1047, %1050 : vector<16x16xf32>
    %c20_300 = arith.constant 20 : index
    %1052 = memref.load %arg7[%c20_300] : memref<144xf32, #tpu.memory_space<smem>>
    %1053 = vector.broadcast %1052 : f32 to vector<16x16xf32>
    %1054 = arith.mulf %1053, %939 : vector<16x16xf32>
    %1055 = arith.addf %1051, %1054 : vector<16x16xf32>
    %c21_301 = arith.constant 21 : index
    %1056 = memref.load %arg7[%c21_301] : memref<144xf32, #tpu.memory_space<smem>>
    %1057 = vector.broadcast %1056 : f32 to vector<16x16xf32>
    %1058 = arith.mulf %1057, %941 : vector<16x16xf32>
    %1059 = arith.addf %1055, %1058 : vector<16x16xf32>
    %c22_302 = arith.constant 22 : index
    %1060 = memref.load %arg7[%c22_302] : memref<144xf32, #tpu.memory_space<smem>>
    %1061 = vector.broadcast %1060 : f32 to vector<16x16xf32>
    %1062 = arith.mulf %1061, %943 : vector<16x16xf32>
    %1063 = arith.addf %1059, %1062 : vector<16x16xf32>
    %c23_303 = arith.constant 23 : index
    %1064 = memref.load %arg7[%c23_303] : memref<144xf32, #tpu.memory_space<smem>>
    %1065 = vector.broadcast %1064 : f32 to vector<16x16xf32>
    %1066 = arith.mulf %1065, %945 : vector<16x16xf32>
    %1067 = arith.addf %1063, %1066 : vector<16x16xf32>
    %c24_304 = arith.constant 24 : index
    %1068 = memref.load %arg7[%c24_304] : memref<144xf32, #tpu.memory_space<smem>>
    %1069 = vector.broadcast %1068 : f32 to vector<16x16xf32>
    %1070 = arith.mulf %1069, %947 : vector<16x16xf32>
    %1071 = arith.addf %1067, %1070 : vector<16x16xf32>
    %c25_305 = arith.constant 25 : index
    %1072 = memref.load %arg7[%c25_305] : memref<144xf32, #tpu.memory_space<smem>>
    %1073 = vector.broadcast %1072 : f32 to vector<16x16xf32>
    %1074 = arith.mulf %1073, %949 : vector<16x16xf32>
    %1075 = arith.addf %1071, %1074 : vector<16x16xf32>
    %c26_306 = arith.constant 26 : index
    %1076 = memref.load %arg7[%c26_306] : memref<144xf32, #tpu.memory_space<smem>>
    %1077 = vector.broadcast %1076 : f32 to vector<16x16xf32>
    %1078 = arith.mulf %1077, %951 : vector<16x16xf32>
    %1079 = arith.addf %1075, %1078 : vector<16x16xf32>
    %c27_307 = arith.constant 27 : index
    %1080 = memref.load %arg7[%c27_307] : memref<144xf32, #tpu.memory_space<smem>>
    %1081 = vector.broadcast %1080 : f32 to vector<16x16xf32>
    %1082 = arith.mulf %1081, %953 : vector<16x16xf32>
    %1083 = arith.addf %1079, %1082 : vector<16x16xf32>
    %c28_308 = arith.constant 28 : index
    %1084 = memref.load %arg7[%c28_308] : memref<144xf32, #tpu.memory_space<smem>>
    %1085 = vector.broadcast %1084 : f32 to vector<16x16xf32>
    %1086 = arith.mulf %1085, %955 : vector<16x16xf32>
    %1087 = arith.addf %1083, %1086 : vector<16x16xf32>
    %c29_309 = arith.constant 29 : index
    %1088 = memref.load %arg7[%c29_309] : memref<144xf32, #tpu.memory_space<smem>>
    %1089 = vector.broadcast %1088 : f32 to vector<16x16xf32>
    %1090 = arith.mulf %1089, %957 : vector<16x16xf32>
    %1091 = arith.addf %1087, %1090 : vector<16x16xf32>
    %c30_310 = arith.constant 30 : index
    %1092 = memref.load %arg7[%c30_310] : memref<144xf32, #tpu.memory_space<smem>>
    %1093 = vector.broadcast %1092 : f32 to vector<16x16xf32>
    %1094 = arith.mulf %1093, %959 : vector<16x16xf32>
    %1095 = arith.addf %1091, %1094 : vector<16x16xf32>
    %c31_311 = arith.constant 31 : index
    %1096 = memref.load %arg7[%c31_311] : memref<144xf32, #tpu.memory_space<smem>>
    %1097 = vector.broadcast %1096 : f32 to vector<16x16xf32>
    %1098 = arith.mulf %1097, %961 : vector<16x16xf32>
    %1099 = arith.addf %1095, %1098 : vector<16x16xf32>
    %c32_312 = arith.constant 32 : index
    %1100 = memref.load %arg7[%c32_312] : memref<144xf32, #tpu.memory_space<smem>>
    %1101 = vector.broadcast %1100 : f32 to vector<16x16xf32>
    %1102 = arith.mulf %1101, %963 : vector<16x16xf32>
    %1103 = arith.addf %1099, %1102 : vector<16x16xf32>
    %c33_313 = arith.constant 33 : index
    %1104 = memref.load %arg7[%c33_313] : memref<144xf32, #tpu.memory_space<smem>>
    %1105 = vector.broadcast %1104 : f32 to vector<16x16xf32>
    %1106 = arith.mulf %1105, %965 : vector<16x16xf32>
    %1107 = arith.addf %1103, %1106 : vector<16x16xf32>
    %c34_314 = arith.constant 34 : index
    %1108 = memref.load %arg7[%c34_314] : memref<144xf32, #tpu.memory_space<smem>>
    %1109 = vector.broadcast %1108 : f32 to vector<16x16xf32>
    %1110 = arith.mulf %1109, %967 : vector<16x16xf32>
    %1111 = arith.addf %1107, %1110 : vector<16x16xf32>
    %c35_315 = arith.constant 35 : index
    %1112 = memref.load %arg7[%c35_315] : memref<144xf32, #tpu.memory_space<smem>>
    %1113 = vector.broadcast %1112 : f32 to vector<16x16xf32>
    %1114 = arith.mulf %1113, %969 : vector<16x16xf32>
    %1115 = arith.addf %1111, %1114 : vector<16x16xf32>
    %cst_316 = arith.constant 0.000000e+00 : f32
    %1116 = vector.broadcast %cst_316 : f32 to vector<16x16xf32>
    %1117 = arith.maximumf %1115, %1116 : vector<16x16xf32>
    %c0_317 = arith.constant 0 : index
    %c0_318 = arith.constant 0 : index
    %c0_319 = arith.constant 0 : index
    %c0_320 = arith.constant 0 : index
    %1118 = vector.load %arg9[%c0_317, %c0_318, %c0_319, %c0_320] : memref<1x4x16x16xf32, #tpu.memory_space<vmem>>, vector<1x1x16x16xf32>
    %1119 = vector.shape_cast %1118 : vector<1x1x16x16xf32> to vector<16x16xf32>
    %1120 = vector.shape_cast %1117 : vector<16x16xf32> to vector<1x1x16x16xf32>
    tpu.vector_store %arg9[%c0_317, %c0_318, %c0_319, %c0_320], %1120 {strides = array<i32>} : memref<1x4x16x16xf32, #tpu.memory_space<vmem>>, vector<1x1x16x16xf32>,
    %c1_321 = arith.constant 1 : index
    %1121 = memref.load %arg8[%c1_321] : memref<4xf32, #tpu.memory_space<smem>>
    %1122 = vector.broadcast %1121 : f32 to vector<16x16xf32>
    %c36_322 = arith.constant 36 : index
    %1123 = memref.load %arg7[%c36_322] : memref<144xf32, #tpu.memory_space<smem>>
    %1124 = vector.broadcast %1123 : f32 to vector<16x16xf32>
    %1125 = arith.mulf %1124, %899 : vector<16x16xf32>
    %1126 = arith.addf %1122, %1125 : vector<16x16xf32>
    %c37_323 = arith.constant 37 : index
    %1127 = memref.load %arg7[%c37_323] : memref<144xf32, #tpu.memory_space<smem>>
    %1128 = vector.broadcast %1127 : f32 to vector<16x16xf32>
    %1129 = arith.mulf %1128, %901 : vector<16x16xf32>
    %1130 = arith.addf %1126, %1129 : vector<16x16xf32>
    %c38_324 = arith.constant 38 : index
    %1131 = memref.load %arg7[%c38_324] : memref<144xf32, #tpu.memory_space<smem>>
    %1132 = vector.broadcast %1131 : f32 to vector<16x16xf32>
    %1133 = arith.mulf %1132, %903 : vector<16x16xf32>
    %1134 = arith.addf %1130, %1133 : vector<16x16xf32>
    %c39_325 = arith.constant 39 : index
    %1135 = memref.load %arg7[%c39_325] : memref<144xf32, #tpu.memory_space<smem>>
    %1136 = vector.broadcast %1135 : f32 to vector<16x16xf32>
    %1137 = arith.mulf %1136, %905 : vector<16x16xf32>
    %1138 = arith.addf %1134, %1137 : vector<16x16xf32>
    %c40_326 = arith.constant 40 : index
    %1139 = memref.load %arg7[%c40_326] : memref<144xf32, #tpu.memory_space<smem>>
    %1140 = vector.broadcast %1139 : f32 to vector<16x16xf32>
    %1141 = arith.mulf %1140, %907 : vector<16x16xf32>
    %1142 = arith.addf %1138, %1141 : vector<16x16xf32>
    %c41_327 = arith.constant 41 : index
    %1143 = memref.load %arg7[%c41_327] : memref<144xf32, #tpu.memory_space<smem>>
    %1144 = vector.broadcast %1143 : f32 to vector<16x16xf32>
    %1145 = arith.mulf %1144, %909 : vector<16x16xf32>
    %1146 = arith.addf %1142, %1145 : vector<16x16xf32>
    %c42_328 = arith.constant 42 : index
    %1147 = memref.load %arg7[%c42_328] : memref<144xf32, #tpu.memory_space<smem>>
    %1148 = vector.broadcast %1147 : f32 to vector<16x16xf32>
    %1149 = arith.mulf %1148, %911 : vector<16x16xf32>
    %1150 = arith.addf %1146, %1149 : vector<16x16xf32>
    %c43_329 = arith.constant 43 : index
    %1151 = memref.load %arg7[%c43_329] : memref<144xf32, #tpu.memory_space<smem>>
    %1152 = vector.broadcast %1151 : f32 to vector<16x16xf32>
    %1153 = arith.mulf %1152, %913 : vector<16x16xf32>
    %1154 = arith.addf %1150, %1153 : vector<16x16xf32>
    %c44_330 = arith.constant 44 : index
    %1155 = memref.load %arg7[%c44_330] : memref<144xf32, #tpu.memory_space<smem>>
    %1156 = vector.broadcast %1155 : f32 to vector<16x16xf32>
    %1157 = arith.mulf %1156, %915 : vector<16x16xf32>
    %1158 = arith.addf %1154, %1157 : vector<16x16xf32>
    %c45_331 = arith.constant 45 : index
    %1159 = memref.load %arg7[%c45_331] : memref<144xf32, #tpu.memory_space<smem>>
    %1160 = vector.broadcast %1159 : f32 to vector<16x16xf32>
    %1161 = arith.mulf %1160, %917 : vector<16x16xf32>
    %1162 = arith.addf %1158, %1161 : vector<16x16xf32>
    %c46_332 = arith.constant 46 : index
    %1163 = memref.load %arg7[%c46_332] : memref<144xf32, #tpu.memory_space<smem>>
    %1164 = vector.broadcast %1163 : f32 to vector<16x16xf32>
    %1165 = arith.mulf %1164, %919 : vector<16x16xf32>
    %1166 = arith.addf %1162, %1165 : vector<16x16xf32>
    %c47_333 = arith.constant 47 : index
    %1167 = memref.load %arg7[%c47_333] : memref<144xf32, #tpu.memory_space<smem>>
    %1168 = vector.broadcast %1167 : f32 to vector<16x16xf32>
    %1169 = arith.mulf %1168, %921 : vector<16x16xf32>
    %1170 = arith.addf %1166, %1169 : vector<16x16xf32>
    %c48_334 = arith.constant 48 : index
    %1171 = memref.load %arg7[%c48_334] : memref<144xf32, #tpu.memory_space<smem>>
    %1172 = vector.broadcast %1171 : f32 to vector<16x16xf32>
    %1173 = arith.mulf %1172, %923 : vector<16x16xf32>
    %1174 = arith.addf %1170, %1173 : vector<16x16xf32>
    %c49_335 = arith.constant 49 : index
    %1175 = memref.load %arg7[%c49_335] : memref<144xf32, #tpu.memory_space<smem>>
    %1176 = vector.broadcast %1175 : f32 to vector<16x16xf32>
    %1177 = arith.mulf %1176, %925 : vector<16x16xf32>
    %1178 = arith.addf %1174, %1177 : vector<16x16xf32>
    %c50_336 = arith.constant 50 : index
    %1179 = memref.load %arg7[%c50_336] : memref<144xf32, #tpu.memory_space<smem>>
    %1180 = vector.broadcast %1179 : f32 to vector<16x16xf32>
    %1181 = arith.mulf %1180, %927 : vector<16x16xf32>
    %1182 = arith.addf %1178, %1181 : vector<16x16xf32>
    %c51_337 = arith.constant 51 : index
    %1183 = memref.load %arg7[%c51_337] : memref<144xf32, #tpu.memory_space<smem>>
    %1184 = vector.broadcast %1183 : f32 to vector<16x16xf32>
    %1185 = arith.mulf %1184, %929 : vector<16x16xf32>
    %1186 = arith.addf %1182, %1185 : vector<16x16xf32>
    %c52_338 = arith.constant 52 : index
    %1187 = memref.load %arg7[%c52_338] : memref<144xf32, #tpu.memory_space<smem>>
    %1188 = vector.broadcast %1187 : f32 to vector<16x16xf32>
    %1189 = arith.mulf %1188, %931 : vector<16x16xf32>
    %1190 = arith.addf %1186, %1189 : vector<16x16xf32>
    %c53_339 = arith.constant 53 : index
    %1191 = memref.load %arg7[%c53_339] : memref<144xf32, #tpu.memory_space<smem>>
    %1192 = vector.broadcast %1191 : f32 to vector<16x16xf32>
    %1193 = arith.mulf %1192, %933 : vector<16x16xf32>
    %1194 = arith.addf %1190, %1193 : vector<16x16xf32>
    %c54_340 = arith.constant 54 : index
    %1195 = memref.load %arg7[%c54_340] : memref<144xf32, #tpu.memory_space<smem>>
    %1196 = vector.broadcast %1195 : f32 to vector<16x16xf32>
    %1197 = arith.mulf %1196, %935 : vector<16x16xf32>
    %1198 = arith.addf %1194, %1197 : vector<16x16xf32>
    %c55_341 = arith.constant 55 : index
    %1199 = memref.load %arg7[%c55_341] : memref<144xf32, #tpu.memory_space<smem>>
    %1200 = vector.broadcast %1199 : f32 to vector<16x16xf32>
    %1201 = arith.mulf %1200, %937 : vector<16x16xf32>
    %1202 = arith.addf %1198, %1201 : vector<16x16xf32>
    %c56_342 = arith.constant 56 : index
    %1203 = memref.load %arg7[%c56_342] : memref<144xf32, #tpu.memory_space<smem>>
    %1204 = vector.broadcast %1203 : f32 to vector<16x16xf32>
    %1205 = arith.mulf %1204, %939 : vector<16x16xf32>
    %1206 = arith.addf %1202, %1205 : vector<16x16xf32>
    %c57_343 = arith.constant 57 : index
    %1207 = memref.load %arg7[%c57_343] : memref<144xf32, #tpu.memory_space<smem>>
    %1208 = vector.broadcast %1207 : f32 to vector<16x16xf32>
    %1209 = arith.mulf %1208, %941 : vector<16x16xf32>
    %1210 = arith.addf %1206, %1209 : vector<16x16xf32>
    %c58_344 = arith.constant 58 : index
    %1211 = memref.load %arg7[%c58_344] : memref<144xf32, #tpu.memory_space<smem>>
    %1212 = vector.broadcast %1211 : f32 to vector<16x16xf32>
    %1213 = arith.mulf %1212, %943 : vector<16x16xf32>
    %1214 = arith.addf %1210, %1213 : vector<16x16xf32>
    %c59_345 = arith.constant 59 : index
    %1215 = memref.load %arg7[%c59_345] : memref<144xf32, #tpu.memory_space<smem>>
    %1216 = vector.broadcast %1215 : f32 to vector<16x16xf32>
    %1217 = arith.mulf %1216, %945 : vector<16x16xf32>
    %1218 = arith.addf %1214, %1217 : vector<16x16xf32>
    %c60_346 = arith.constant 60 : index
    %1219 = memref.load %arg7[%c60_346] : memref<144xf32, #tpu.memory_space<smem>>
    %1220 = vector.broadcast %1219 : f32 to vector<16x16xf32>
    %1221 = arith.mulf %1220, %947 : vector<16x16xf32>
    %1222 = arith.addf %1218, %1221 : vector<16x16xf32>
    %c61_347 = arith.constant 61 : index
    %1223 = memref.load %arg7[%c61_347] : memref<144xf32, #tpu.memory_space<smem>>
    %1224 = vector.broadcast %1223 : f32 to vector<16x16xf32>
    %1225 = arith.mulf %1224, %949 : vector<16x16xf32>
    %1226 = arith.addf %1222, %1225 : vector<16x16xf32>
    %c62_348 = arith.constant 62 : index
    %1227 = memref.load %arg7[%c62_348] : memref<144xf32, #tpu.memory_space<smem>>
    %1228 = vector.broadcast %1227 : f32 to vector<16x16xf32>
    %1229 = arith.mulf %1228, %951 : vector<16x16xf32>
    %1230 = arith.addf %1226, %1229 : vector<16x16xf32>
    %c63_349 = arith.constant 63 : index
    %1231 = memref.load %arg7[%c63_349] : memref<144xf32, #tpu.memory_space<smem>>
    %1232 = vector.broadcast %1231 : f32 to vector<16x16xf32>
    %1233 = arith.mulf %1232, %953 : vector<16x16xf32>
    %1234 = arith.addf %1230, %1233 : vector<16x16xf32>
    %c64_350 = arith.constant 64 : index
    %1235 = memref.load %arg7[%c64_350] : memref<144xf32, #tpu.memory_space<smem>>
    %1236 = vector.broadcast %1235 : f32 to vector<16x16xf32>
    %1237 = arith.mulf %1236, %955 : vector<16x16xf32>
    %1238 = arith.addf %1234, %1237 : vector<16x16xf32>
    %c65_351 = arith.constant 65 : index
    %1239 = memref.load %arg7[%c65_351] : memref<144xf32, #tpu.memory_space<smem>>
    %1240 = vector.broadcast %1239 : f32 to vector<16x16xf32>
    %1241 = arith.mulf %1240, %957 : vector<16x16xf32>
    %1242 = arith.addf %1238, %1241 : vector<16x16xf32>
    %c66_352 = arith.constant 66 : index
    %1243 = memref.load %arg7[%c66_352] : memref<144xf32, #tpu.memory_space<smem>>
    %1244 = vector.broadcast %1243 : f32 to vector<16x16xf32>
    %1245 = arith.mulf %1244, %959 : vector<16x16xf32>
    %1246 = arith.addf %1242, %1245 : vector<16x16xf32>
    %c67_353 = arith.constant 67 : index
    %1247 = memref.load %arg7[%c67_353] : memref<144xf32, #tpu.memory_space<smem>>
    %1248 = vector.broadcast %1247 : f32 to vector<16x16xf32>
    %1249 = arith.mulf %1248, %961 : vector<16x16xf32>
    %1250 = arith.addf %1246, %1249 : vector<16x16xf32>
    %c68_354 = arith.constant 68 : index
    %1251 = memref.load %arg7[%c68_354] : memref<144xf32, #tpu.memory_space<smem>>
    %1252 = vector.broadcast %1251 : f32 to vector<16x16xf32>
    %1253 = arith.mulf %1252, %963 : vector<16x16xf32>
    %1254 = arith.addf %1250, %1253 : vector<16x16xf32>
    %c69_355 = arith.constant 69 : index
    %1255 = memref.load %arg7[%c69_355] : memref<144xf32, #tpu.memory_space<smem>>
    %1256 = vector.broadcast %1255 : f32 to vector<16x16xf32>
    %1257 = arith.mulf %1256, %965 : vector<16x16xf32>
    %1258 = arith.addf %1254, %1257 : vector<16x16xf32>
    %c70_356 = arith.constant 70 : index
    %1259 = memref.load %arg7[%c70_356] : memref<144xf32, #tpu.memory_space<smem>>
    %1260 = vector.broadcast %1259 : f32 to vector<16x16xf32>
    %1261 = arith.mulf %1260, %967 : vector<16x16xf32>
    %1262 = arith.addf %1258, %1261 : vector<16x16xf32>
    %c71_357 = arith.constant 71 : index
    %1263 = memref.load %arg7[%c71_357] : memref<144xf32, #tpu.memory_space<smem>>
    %1264 = vector.broadcast %1263 : f32 to vector<16x16xf32>
    %1265 = arith.mulf %1264, %969 : vector<16x16xf32>
    %1266 = arith.addf %1262, %1265 : vector<16x16xf32>
    %cst_358 = arith.constant 0.000000e+00 : f32
    %1267 = vector.broadcast %cst_358 : f32 to vector<16x16xf32>
    %1268 = arith.maximumf %1266, %1267 : vector<16x16xf32>
    %c0_359 = arith.constant 0 : index
    %c1_360 = arith.constant 1 : index
    %c0_361 = arith.constant 0 : index
    %c0_362 = arith.constant 0 : index
    %1269 = vector.load %arg9[%c0_359, %c1_360, %c0_361, %c0_362] : memref<1x4x16x16xf32, #tpu.memory_space<vmem>>, vector<1x1x16x16xf32>
    %1270 = vector.shape_cast %1269 : vector<1x1x16x16xf32> to vector<16x16xf32>
    %1271 = vector.shape_cast %1268 : vector<16x16xf32> to vector<1x1x16x16xf32>
    tpu.vector_store %arg9[%c0_359, %c1_360, %c0_361, %c0_362], %1271 {strides = array<i32>} : memref<1x4x16x16xf32, #tpu.memory_space<vmem>>, vector<1x1x16x16xf32>,
    %c2_363 = arith.constant 2 : index
    %1272 = memref.load %arg8[%c2_363] : memref<4xf32, #tpu.memory_space<smem>>
    %1273 = vector.broadcast %1272 : f32 to vector<16x16xf32>
    %c72_364 = arith.constant 72 : index
    %1274 = memref.load %arg7[%c72_364] : memref<144xf32, #tpu.memory_space<smem>>
    %1275 = vector.broadcast %1274 : f32 to vector<16x16xf32>
    %1276 = arith.mulf %1275, %899 : vector<16x16xf32>
    %1277 = arith.addf %1273, %1276 : vector<16x16xf32>
    %c73_365 = arith.constant 73 : index
    %1278 = memref.load %arg7[%c73_365] : memref<144xf32, #tpu.memory_space<smem>>
    %1279 = vector.broadcast %1278 : f32 to vector<16x16xf32>
    %1280 = arith.mulf %1279, %901 : vector<16x16xf32>
    %1281 = arith.addf %1277, %1280 : vector<16x16xf32>
    %c74_366 = arith.constant 74 : index
    %1282 = memref.load %arg7[%c74_366] : memref<144xf32, #tpu.memory_space<smem>>
    %1283 = vector.broadcast %1282 : f32 to vector<16x16xf32>
    %1284 = arith.mulf %1283, %903 : vector<16x16xf32>
    %1285 = arith.addf %1281, %1284 : vector<16x16xf32>
    %c75_367 = arith.constant 75 : index
    %1286 = memref.load %arg7[%c75_367] : memref<144xf32, #tpu.memory_space<smem>>
    %1287 = vector.broadcast %1286 : f32 to vector<16x16xf32>
    %1288 = arith.mulf %1287, %905 : vector<16x16xf32>
    %1289 = arith.addf %1285, %1288 : vector<16x16xf32>
    %c76_368 = arith.constant 76 : index
    %1290 = memref.load %arg7[%c76_368] : memref<144xf32, #tpu.memory_space<smem>>
    %1291 = vector.broadcast %1290 : f32 to vector<16x16xf32>
    %1292 = arith.mulf %1291, %907 : vector<16x16xf32>
    %1293 = arith.addf %1289, %1292 : vector<16x16xf32>
    %c77_369 = arith.constant 77 : index
    %1294 = memref.load %arg7[%c77_369] : memref<144xf32, #tpu.memory_space<smem>>
    %1295 = vector.broadcast %1294 : f32 to vector<16x16xf32>
    %1296 = arith.mulf %1295, %909 : vector<16x16xf32>
    %1297 = arith.addf %1293, %1296 : vector<16x16xf32>
    %c78_370 = arith.constant 78 : index
    %1298 = memref.load %arg7[%c78_370] : memref<144xf32, #tpu.memory_space<smem>>
    %1299 = vector.broadcast %1298 : f32 to vector<16x16xf32>
    %1300 = arith.mulf %1299, %911 : vector<16x16xf32>
    %1301 = arith.addf %1297, %1300 : vector<16x16xf32>
    %c79_371 = arith.constant 79 : index
    %1302 = memref.load %arg7[%c79_371] : memref<144xf32, #tpu.memory_space<smem>>
    %1303 = vector.broadcast %1302 : f32 to vector<16x16xf32>
    %1304 = arith.mulf %1303, %913 : vector<16x16xf32>
    %1305 = arith.addf %1301, %1304 : vector<16x16xf32>
    %c80_372 = arith.constant 80 : index
    %1306 = memref.load %arg7[%c80_372] : memref<144xf32, #tpu.memory_space<smem>>
    %1307 = vector.broadcast %1306 : f32 to vector<16x16xf32>
    %1308 = arith.mulf %1307, %915 : vector<16x16xf32>
    %1309 = arith.addf %1305, %1308 : vector<16x16xf32>
    %c81_373 = arith.constant 81 : index
    %1310 = memref.load %arg7[%c81_373] : memref<144xf32, #tpu.memory_space<smem>>
    %1311 = vector.broadcast %1310 : f32 to vector<16x16xf32>
    %1312 = arith.mulf %1311, %917 : vector<16x16xf32>
    %1313 = arith.addf %1309, %1312 : vector<16x16xf32>
    %c82_374 = arith.constant 82 : index
    %1314 = memref.load %arg7[%c82_374] : memref<144xf32, #tpu.memory_space<smem>>
    %1315 = vector.broadcast %1314 : f32 to vector<16x16xf32>
    %1316 = arith.mulf %1315, %919 : vector<16x16xf32>
    %1317 = arith.addf %1313, %1316 : vector<16x16xf32>
    %c83_375 = arith.constant 83 : index
    %1318 = memref.load %arg7[%c83_375] : memref<144xf32, #tpu.memory_space<smem>>
    %1319 = vector.broadcast %1318 : f32 to vector<16x16xf32>
    %1320 = arith.mulf %1319, %921 : vector<16x16xf32>
    %1321 = arith.addf %1317, %1320 : vector<16x16xf32>
    %c84_376 = arith.constant 84 : index
    %1322 = memref.load %arg7[%c84_376] : memref<144xf32, #tpu.memory_space<smem>>
    %1323 = vector.broadcast %1322 : f32 to vector<16x16xf32>
    %1324 = arith.mulf %1323, %923 : vector<16x16xf32>
    %1325 = arith.addf %1321, %1324 : vector<16x16xf32>
    %c85_377 = arith.constant 85 : index
    %1326 = memref.load %arg7[%c85_377] : memref<144xf32, #tpu.memory_space<smem>>
    %1327 = vector.broadcast %1326 : f32 to vector<16x16xf32>
    %1328 = arith.mulf %1327, %925 : vector<16x16xf32>
    %1329 = arith.addf %1325, %1328 : vector<16x16xf32>
    %c86_378 = arith.constant 86 : index
    %1330 = memref.load %arg7[%c86_378] : memref<144xf32, #tpu.memory_space<smem>>
    %1331 = vector.broadcast %1330 : f32 to vector<16x16xf32>
    %1332 = arith.mulf %1331, %927 : vector<16x16xf32>
    %1333 = arith.addf %1329, %1332 : vector<16x16xf32>
    %c87_379 = arith.constant 87 : index
    %1334 = memref.load %arg7[%c87_379] : memref<144xf32, #tpu.memory_space<smem>>
    %1335 = vector.broadcast %1334 : f32 to vector<16x16xf32>
    %1336 = arith.mulf %1335, %929 : vector<16x16xf32>
    %1337 = arith.addf %1333, %1336 : vector<16x16xf32>
    %c88_380 = arith.constant 88 : index
    %1338 = memref.load %arg7[%c88_380] : memref<144xf32, #tpu.memory_space<smem>>
    %1339 = vector.broadcast %1338 : f32 to vector<16x16xf32>
    %1340 = arith.mulf %1339, %931 : vector<16x16xf32>
    %1341 = arith.addf %1337, %1340 : vector<16x16xf32>
    %c89_381 = arith.constant 89 : index
    %1342 = memref.load %arg7[%c89_381] : memref<144xf32, #tpu.memory_space<smem>>
    %1343 = vector.broadcast %1342 : f32 to vector<16x16xf32>
    %1344 = arith.mulf %1343, %933 : vector<16x16xf32>
    %1345 = arith.addf %1341, %1344 : vector<16x16xf32>
    %c90_382 = arith.constant 90 : index
    %1346 = memref.load %arg7[%c90_382] : memref<144xf32, #tpu.memory_space<smem>>
    %1347 = vector.broadcast %1346 : f32 to vector<16x16xf32>
    %1348 = arith.mulf %1347, %935 : vector<16x16xf32>
    %1349 = arith.addf %1345, %1348 : vector<16x16xf32>
    %c91_383 = arith.constant 91 : index
    %1350 = memref.load %arg7[%c91_383] : memref<144xf32, #tpu.memory_space<smem>>
    %1351 = vector.broadcast %1350 : f32 to vector<16x16xf32>
    %1352 = arith.mulf %1351, %937 : vector<16x16xf32>
    %1353 = arith.addf %1349, %1352 : vector<16x16xf32>
    %c92_384 = arith.constant 92 : index
    %1354 = memref.load %arg7[%c92_384] : memref<144xf32, #tpu.memory_space<smem>>
    %1355 = vector.broadcast %1354 : f32 to vector<16x16xf32>
    %1356 = arith.mulf %1355, %939 : vector<16x16xf32>
    %1357 = arith.addf %1353, %1356 : vector<16x16xf32>
    %c93_385 = arith.constant 93 : index
    %1358 = memref.load %arg7[%c93_385] : memref<144xf32, #tpu.memory_space<smem>>
    %1359 = vector.broadcast %1358 : f32 to vector<16x16xf32>
    %1360 = arith.mulf %1359, %941 : vector<16x16xf32>
    %1361 = arith.addf %1357, %1360 : vector<16x16xf32>
    %c94_386 = arith.constant 94 : index
    %1362 = memref.load %arg7[%c94_386] : memref<144xf32, #tpu.memory_space<smem>>
    %1363 = vector.broadcast %1362 : f32 to vector<16x16xf32>
    %1364 = arith.mulf %1363, %943 : vector<16x16xf32>
    %1365 = arith.addf %1361, %1364 : vector<16x16xf32>
    %c95_387 = arith.constant 95 : index
    %1366 = memref.load %arg7[%c95_387] : memref<144xf32, #tpu.memory_space<smem>>
    %1367 = vector.broadcast %1366 : f32 to vector<16x16xf32>
    %1368 = arith.mulf %1367, %945 : vector<16x16xf32>
    %1369 = arith.addf %1365, %1368 : vector<16x16xf32>
    %c96_388 = arith.constant 96 : index
    %1370 = memref.load %arg7[%c96_388] : memref<144xf32, #tpu.memory_space<smem>>
    %1371 = vector.broadcast %1370 : f32 to vector<16x16xf32>
    %1372 = arith.mulf %1371, %947 : vector<16x16xf32>
    %1373 = arith.addf %1369, %1372 : vector<16x16xf32>
    %c97_389 = arith.constant 97 : index
    %1374 = memref.load %arg7[%c97_389] : memref<144xf32, #tpu.memory_space<smem>>
    %1375 = vector.broadcast %1374 : f32 to vector<16x16xf32>
    %1376 = arith.mulf %1375, %949 : vector<16x16xf32>
    %1377 = arith.addf %1373, %1376 : vector<16x16xf32>
    %c98_390 = arith.constant 98 : index
    %1378 = memref.load %arg7[%c98_390] : memref<144xf32, #tpu.memory_space<smem>>
    %1379 = vector.broadcast %1378 : f32 to vector<16x16xf32>
    %1380 = arith.mulf %1379, %951 : vector<16x16xf32>
    %1381 = arith.addf %1377, %1380 : vector<16x16xf32>
    %c99_391 = arith.constant 99 : index
    %1382 = memref.load %arg7[%c99_391] : memref<144xf32, #tpu.memory_space<smem>>
    %1383 = vector.broadcast %1382 : f32 to vector<16x16xf32>
    %1384 = arith.mulf %1383, %953 : vector<16x16xf32>
    %1385 = arith.addf %1381, %1384 : vector<16x16xf32>
    %c100_392 = arith.constant 100 : index
    %1386 = memref.load %arg7[%c100_392] : memref<144xf32, #tpu.memory_space<smem>>
    %1387 = vector.broadcast %1386 : f32 to vector<16x16xf32>
    %1388 = arith.mulf %1387, %955 : vector<16x16xf32>
    %1389 = arith.addf %1385, %1388 : vector<16x16xf32>
    %c101_393 = arith.constant 101 : index
    %1390 = memref.load %arg7[%c101_393] : memref<144xf32, #tpu.memory_space<smem>>
    %1391 = vector.broadcast %1390 : f32 to vector<16x16xf32>
    %1392 = arith.mulf %1391, %957 : vector<16x16xf32>
    %1393 = arith.addf %1389, %1392 : vector<16x16xf32>
    %c102_394 = arith.constant 102 : index
    %1394 = memref.load %arg7[%c102_394] : memref<144xf32, #tpu.memory_space<smem>>
    %1395 = vector.broadcast %1394 : f32 to vector<16x16xf32>
    %1396 = arith.mulf %1395, %959 : vector<16x16xf32>
    %1397 = arith.addf %1393, %1396 : vector<16x16xf32>
    %c103_395 = arith.constant 103 : index
    %1398 = memref.load %arg7[%c103_395] : memref<144xf32, #tpu.memory_space<smem>>
    %1399 = vector.broadcast %1398 : f32 to vector<16x16xf32>
    %1400 = arith.mulf %1399, %961 : vector<16x16xf32>
    %1401 = arith.addf %1397, %1400 : vector<16x16xf32>
    %c104_396 = arith.constant 104 : index
    %1402 = memref.load %arg7[%c104_396] : memref<144xf32, #tpu.memory_space<smem>>
    %1403 = vector.broadcast %1402 : f32 to vector<16x16xf32>
    %1404 = arith.mulf %1403, %963 : vector<16x16xf32>
    %1405 = arith.addf %1401, %1404 : vector<16x16xf32>
    %c105_397 = arith.constant 105 : index
    %1406 = memref.load %arg7[%c105_397] : memref<144xf32, #tpu.memory_space<smem>>
    %1407 = vector.broadcast %1406 : f32 to vector<16x16xf32>
    %1408 = arith.mulf %1407, %965 : vector<16x16xf32>
    %1409 = arith.addf %1405, %1408 : vector<16x16xf32>
    %c106_398 = arith.constant 106 : index
    %1410 = memref.load %arg7[%c106_398] : memref<144xf32, #tpu.memory_space<smem>>
    %1411 = vector.broadcast %1410 : f32 to vector<16x16xf32>
    %1412 = arith.mulf %1411, %967 : vector<16x16xf32>
    %1413 = arith.addf %1409, %1412 : vector<16x16xf32>
    %c107_399 = arith.constant 107 : index
    %1414 = memref.load %arg7[%c107_399] : memref<144xf32, #tpu.memory_space<smem>>
    %1415 = vector.broadcast %1414 : f32 to vector<16x16xf32>
    %1416 = arith.mulf %1415, %969 : vector<16x16xf32>
    %1417 = arith.addf %1413, %1416 : vector<16x16xf32>
    %cst_400 = arith.constant 0.000000e+00 : f32
    %1418 = vector.broadcast %cst_400 : f32 to vector<16x16xf32>
    %1419 = arith.maximumf %1417, %1418 : vector<16x16xf32>
    %c0_401 = arith.constant 0 : index
    %c2_402 = arith.constant 2 : index
    %c0_403 = arith.constant 0 : index
    %c0_404 = arith.constant 0 : index
    %1420 = vector.load %arg9[%c0_401, %c2_402, %c0_403, %c0_404] : memref<1x4x16x16xf32, #tpu.memory_space<vmem>>, vector<1x1x16x16xf32>
    %1421 = vector.shape_cast %1420 : vector<1x1x16x16xf32> to vector<16x16xf32>
    %1422 = vector.shape_cast %1419 : vector<16x16xf32> to vector<1x1x16x16xf32>
    tpu.vector_store %arg9[%c0_401, %c2_402, %c0_403, %c0_404], %1422 {strides = array<i32>} : memref<1x4x16x16xf32, #tpu.memory_space<vmem>>, vector<1x1x16x16xf32>,
    %c3_405 = arith.constant 3 : index
    %1423 = memref.load %arg8[%c3_405] : memref<4xf32, #tpu.memory_space<smem>>
    %1424 = vector.broadcast %1423 : f32 to vector<16x16xf32>
    %c108_406 = arith.constant 108 : index
    %1425 = memref.load %arg7[%c108_406] : memref<144xf32, #tpu.memory_space<smem>>
    %1426 = vector.broadcast %1425 : f32 to vector<16x16xf32>
    %1427 = arith.mulf %1426, %899 : vector<16x16xf32>
    %1428 = arith.addf %1424, %1427 : vector<16x16xf32>
    %c109_407 = arith.constant 109 : index
    %1429 = memref.load %arg7[%c109_407] : memref<144xf32, #tpu.memory_space<smem>>
    %1430 = vector.broadcast %1429 : f32 to vector<16x16xf32>
    %1431 = arith.mulf %1430, %901 : vector<16x16xf32>
    %1432 = arith.addf %1428, %1431 : vector<16x16xf32>
    %c110_408 = arith.constant 110 : index
    %1433 = memref.load %arg7[%c110_408] : memref<144xf32, #tpu.memory_space<smem>>
    %1434 = vector.broadcast %1433 : f32 to vector<16x16xf32>
    %1435 = arith.mulf %1434, %903 : vector<16x16xf32>
    %1436 = arith.addf %1432, %1435 : vector<16x16xf32>
    %c111_409 = arith.constant 111 : index
    %1437 = memref.load %arg7[%c111_409] : memref<144xf32, #tpu.memory_space<smem>>
    %1438 = vector.broadcast %1437 : f32 to vector<16x16xf32>
    %1439 = arith.mulf %1438, %905 : vector<16x16xf32>
    %1440 = arith.addf %1436, %1439 : vector<16x16xf32>
    %c112_410 = arith.constant 112 : index
    %1441 = memref.load %arg7[%c112_410] : memref<144xf32, #tpu.memory_space<smem>>
    %1442 = vector.broadcast %1441 : f32 to vector<16x16xf32>
    %1443 = arith.mulf %1442, %907 : vector<16x16xf32>
    %1444 = arith.addf %1440, %1443 : vector<16x16xf32>
    %c113_411 = arith.constant 113 : index
    %1445 = memref.load %arg7[%c113_411] : memref<144xf32, #tpu.memory_space<smem>>
    %1446 = vector.broadcast %1445 : f32 to vector<16x16xf32>
    %1447 = arith.mulf %1446, %909 : vector<16x16xf32>
    %1448 = arith.addf %1444, %1447 : vector<16x16xf32>
    %c114_412 = arith.constant 114 : index
    %1449 = memref.load %arg7[%c114_412] : memref<144xf32, #tpu.memory_space<smem>>
    %1450 = vector.broadcast %1449 : f32 to vector<16x16xf32>
    %1451 = arith.mulf %1450, %911 : vector<16x16xf32>
    %1452 = arith.addf %1448, %1451 : vector<16x16xf32>
    %c115_413 = arith.constant 115 : index
    %1453 = memref.load %arg7[%c115_413] : memref<144xf32, #tpu.memory_space<smem>>
    %1454 = vector.broadcast %1453 : f32 to vector<16x16xf32>
    %1455 = arith.mulf %1454, %913 : vector<16x16xf32>
    %1456 = arith.addf %1452, %1455 : vector<16x16xf32>
    %c116_414 = arith.constant 116 : index
    %1457 = memref.load %arg7[%c116_414] : memref<144xf32, #tpu.memory_space<smem>>
    %1458 = vector.broadcast %1457 : f32 to vector<16x16xf32>
    %1459 = arith.mulf %1458, %915 : vector<16x16xf32>
    %1460 = arith.addf %1456, %1459 : vector<16x16xf32>
    %c117_415 = arith.constant 117 : index
    %1461 = memref.load %arg7[%c117_415] : memref<144xf32, #tpu.memory_space<smem>>
    %1462 = vector.broadcast %1461 : f32 to vector<16x16xf32>
    %1463 = arith.mulf %1462, %917 : vector<16x16xf32>
    %1464 = arith.addf %1460, %1463 : vector<16x16xf32>
    %c118_416 = arith.constant 118 : index
    %1465 = memref.load %arg7[%c118_416] : memref<144xf32, #tpu.memory_space<smem>>
    %1466 = vector.broadcast %1465 : f32 to vector<16x16xf32>
    %1467 = arith.mulf %1466, %919 : vector<16x16xf32>
    %1468 = arith.addf %1464, %1467 : vector<16x16xf32>
    %c119_417 = arith.constant 119 : index
    %1469 = memref.load %arg7[%c119_417] : memref<144xf32, #tpu.memory_space<smem>>
    %1470 = vector.broadcast %1469 : f32 to vector<16x16xf32>
    %1471 = arith.mulf %1470, %921 : vector<16x16xf32>
    %1472 = arith.addf %1468, %1471 : vector<16x16xf32>
    %c120_418 = arith.constant 120 : index
    %1473 = memref.load %arg7[%c120_418] : memref<144xf32, #tpu.memory_space<smem>>
    %1474 = vector.broadcast %1473 : f32 to vector<16x16xf32>
    %1475 = arith.mulf %1474, %923 : vector<16x16xf32>
    %1476 = arith.addf %1472, %1475 : vector<16x16xf32>
    %c121_419 = arith.constant 121 : index
    %1477 = memref.load %arg7[%c121_419] : memref<144xf32, #tpu.memory_space<smem>>
    %1478 = vector.broadcast %1477 : f32 to vector<16x16xf32>
    %1479 = arith.mulf %1478, %925 : vector<16x16xf32>
    %1480 = arith.addf %1476, %1479 : vector<16x16xf32>
    %c122_420 = arith.constant 122 : index
    %1481 = memref.load %arg7[%c122_420] : memref<144xf32, #tpu.memory_space<smem>>
    %1482 = vector.broadcast %1481 : f32 to vector<16x16xf32>
    %1483 = arith.mulf %1482, %927 : vector<16x16xf32>
    %1484 = arith.addf %1480, %1483 : vector<16x16xf32>
    %c123_421 = arith.constant 123 : index
    %1485 = memref.load %arg7[%c123_421] : memref<144xf32, #tpu.memory_space<smem>>
    %1486 = vector.broadcast %1485 : f32 to vector<16x16xf32>
    %1487 = arith.mulf %1486, %929 : vector<16x16xf32>
    %1488 = arith.addf %1484, %1487 : vector<16x16xf32>
    %c124_422 = arith.constant 124 : index
    %1489 = memref.load %arg7[%c124_422] : memref<144xf32, #tpu.memory_space<smem>>
    %1490 = vector.broadcast %1489 : f32 to vector<16x16xf32>
    %1491 = arith.mulf %1490, %931 : vector<16x16xf32>
    %1492 = arith.addf %1488, %1491 : vector<16x16xf32>
    %c125_423 = arith.constant 125 : index
    %1493 = memref.load %arg7[%c125_423] : memref<144xf32, #tpu.memory_space<smem>>
    %1494 = vector.broadcast %1493 : f32 to vector<16x16xf32>
    %1495 = arith.mulf %1494, %933 : vector<16x16xf32>
    %1496 = arith.addf %1492, %1495 : vector<16x16xf32>
    %c126_424 = arith.constant 126 : index
    %1497 = memref.load %arg7[%c126_424] : memref<144xf32, #tpu.memory_space<smem>>
    %1498 = vector.broadcast %1497 : f32 to vector<16x16xf32>
    %1499 = arith.mulf %1498, %935 : vector<16x16xf32>
    %1500 = arith.addf %1496, %1499 : vector<16x16xf32>
    %c127_425 = arith.constant 127 : index
    %1501 = memref.load %arg7[%c127_425] : memref<144xf32, #tpu.memory_space<smem>>
    %1502 = vector.broadcast %1501 : f32 to vector<16x16xf32>
    %1503 = arith.mulf %1502, %937 : vector<16x16xf32>
    %1504 = arith.addf %1500, %1503 : vector<16x16xf32>
    %c128_426 = arith.constant 128 : index
    %1505 = memref.load %arg7[%c128_426] : memref<144xf32, #tpu.memory_space<smem>>
    %1506 = vector.broadcast %1505 : f32 to vector<16x16xf32>
    %1507 = arith.mulf %1506, %939 : vector<16x16xf32>
    %1508 = arith.addf %1504, %1507 : vector<16x16xf32>
    %c129_427 = arith.constant 129 : index
    %1509 = memref.load %arg7[%c129_427] : memref<144xf32, #tpu.memory_space<smem>>
    %1510 = vector.broadcast %1509 : f32 to vector<16x16xf32>
    %1511 = arith.mulf %1510, %941 : vector<16x16xf32>
    %1512 = arith.addf %1508, %1511 : vector<16x16xf32>
    %c130_428 = arith.constant 130 : index
    %1513 = memref.load %arg7[%c130_428] : memref<144xf32, #tpu.memory_space<smem>>
    %1514 = vector.broadcast %1513 : f32 to vector<16x16xf32>
    %1515 = arith.mulf %1514, %943 : vector<16x16xf32>
    %1516 = arith.addf %1512, %1515 : vector<16x16xf32>
    %c131_429 = arith.constant 131 : index
    %1517 = memref.load %arg7[%c131_429] : memref<144xf32, #tpu.memory_space<smem>>
    %1518 = vector.broadcast %1517 : f32 to vector<16x16xf32>
    %1519 = arith.mulf %1518, %945 : vector<16x16xf32>
    %1520 = arith.addf %1516, %1519 : vector<16x16xf32>
    %c132_430 = arith.constant 132 : index
    %1521 = memref.load %arg7[%c132_430] : memref<144xf32, #tpu.memory_space<smem>>
    %1522 = vector.broadcast %1521 : f32 to vector<16x16xf32>
    %1523 = arith.mulf %1522, %947 : vector<16x16xf32>
    %1524 = arith.addf %1520, %1523 : vector<16x16xf32>
    %c133_431 = arith.constant 133 : index
    %1525 = memref.load %arg7[%c133_431] : memref<144xf32, #tpu.memory_space<smem>>
    %1526 = vector.broadcast %1525 : f32 to vector<16x16xf32>
    %1527 = arith.mulf %1526, %949 : vector<16x16xf32>
    %1528 = arith.addf %1524, %1527 : vector<16x16xf32>
    %c134_432 = arith.constant 134 : index
    %1529 = memref.load %arg7[%c134_432] : memref<144xf32, #tpu.memory_space<smem>>
    %1530 = vector.broadcast %1529 : f32 to vector<16x16xf32>
    %1531 = arith.mulf %1530, %951 : vector<16x16xf32>
    %1532 = arith.addf %1528, %1531 : vector<16x16xf32>
    %c135_433 = arith.constant 135 : index
    %1533 = memref.load %arg7[%c135_433] : memref<144xf32, #tpu.memory_space<smem>>
    %1534 = vector.broadcast %1533 : f32 to vector<16x16xf32>
    %1535 = arith.mulf %1534, %953 : vector<16x16xf32>
    %1536 = arith.addf %1532, %1535 : vector<16x16xf32>
    %c136_434 = arith.constant 136 : index
    %1537 = memref.load %arg7[%c136_434] : memref<144xf32, #tpu.memory_space<smem>>
    %1538 = vector.broadcast %1537 : f32 to vector<16x16xf32>
    %1539 = arith.mulf %1538, %955 : vector<16x16xf32>
    %1540 = arith.addf %1536, %1539 : vector<16x16xf32>
    %c137_435 = arith.constant 137 : index
    %1541 = memref.load %arg7[%c137_435] : memref<144xf32, #tpu.memory_space<smem>>
    %1542 = vector.broadcast %1541 : f32 to vector<16x16xf32>
    %1543 = arith.mulf %1542, %957 : vector<16x16xf32>
    %1544 = arith.addf %1540, %1543 : vector<16x16xf32>
    %c138_436 = arith.constant 138 : index
    %1545 = memref.load %arg7[%c138_436] : memref<144xf32, #tpu.memory_space<smem>>
    %1546 = vector.broadcast %1545 : f32 to vector<16x16xf32>
    %1547 = arith.mulf %1546, %959 : vector<16x16xf32>
    %1548 = arith.addf %1544, %1547 : vector<16x16xf32>
    %c139_437 = arith.constant 139 : index
    %1549 = memref.load %arg7[%c139_437] : memref<144xf32, #tpu.memory_space<smem>>
    %1550 = vector.broadcast %1549 : f32 to vector<16x16xf32>
    %1551 = arith.mulf %1550, %961 : vector<16x16xf32>
    %1552 = arith.addf %1548, %1551 : vector<16x16xf32>
    %c140_438 = arith.constant 140 : index
    %1553 = memref.load %arg7[%c140_438] : memref<144xf32, #tpu.memory_space<smem>>
    %1554 = vector.broadcast %1553 : f32 to vector<16x16xf32>
    %1555 = arith.mulf %1554, %963 : vector<16x16xf32>
    %1556 = arith.addf %1552, %1555 : vector<16x16xf32>
    %c141_439 = arith.constant 141 : index
    %1557 = memref.load %arg7[%c141_439] : memref<144xf32, #tpu.memory_space<smem>>
    %1558 = vector.broadcast %1557 : f32 to vector<16x16xf32>
    %1559 = arith.mulf %1558, %965 : vector<16x16xf32>
    %1560 = arith.addf %1556, %1559 : vector<16x16xf32>
    %c142_440 = arith.constant 142 : index
    %1561 = memref.load %arg7[%c142_440] : memref<144xf32, #tpu.memory_space<smem>>
    %1562 = vector.broadcast %1561 : f32 to vector<16x16xf32>
    %1563 = arith.mulf %1562, %967 : vector<16x16xf32>
    %1564 = arith.addf %1560, %1563 : vector<16x16xf32>
    %c143_441 = arith.constant 143 : index
    %1565 = memref.load %arg7[%c143_441] : memref<144xf32, #tpu.memory_space<smem>>
    %1566 = vector.broadcast %1565 : f32 to vector<16x16xf32>
    %1567 = arith.mulf %1566, %969 : vector<16x16xf32>
    %1568 = arith.addf %1564, %1567 : vector<16x16xf32>
    %cst_442 = arith.constant 0.000000e+00 : f32
    %1569 = vector.broadcast %cst_442 : f32 to vector<16x16xf32>
    %1570 = arith.maximumf %1568, %1569 : vector<16x16xf32>
    %c0_443 = arith.constant 0 : index
    %c3_444 = arith.constant 3 : index
    %c0_445 = arith.constant 0 : index
    %c0_446 = arith.constant 0 : index
    %1571 = vector.load %arg9[%c0_443, %c3_444, %c0_445, %c0_446] : memref<1x4x16x16xf32, #tpu.memory_space<vmem>>, vector<1x1x16x16xf32>
    %1572 = vector.shape_cast %1571 : vector<1x1x16x16xf32> to vector<16x16xf32>
    %1573 = vector.shape_cast %1570 : vector<16x16xf32> to vector<1x1x16x16xf32>
    tpu.vector_store %arg9[%c0_443, %c3_444, %c0_445, %c0_446], %1573 {strides = array<i32>} : memref<1x4x16x16xf32, #tpu.memory_space<vmem>>, vector<1x1x16x16xf32>,
    return
  }
  func.func @transform_0(%arg0: i32) -> (i32, i32) {
    %c0_i32 = arith.constant 0 : i32
    %c0_i32_0 = arith.constant 0 : i32
    %c0_i32_1 = arith.constant 0 : i32
    return %c0_i32, %c0_i32_0 : i32, i32
  }
  func.func @transform_1(%arg0: i32) -> (i32, i32) {
    %c0_i32 = arith.constant 0 : i32
    %c0_i32_0 = arith.constant 0 : i32
    %c0_i32_1 = arith.constant 0 : i32
    return %c0_i32, %c0_i32_0 : i32, i32
  }
  func.func @transform_2(%arg0: i32) -> (i32, i32, i32, i32) {
    %c0_i32 = arith.constant 0 : i32
    %c0_i32_0 = arith.constant 0 : i32
    %c0_i32_1 = arith.constant 0 : i32
    %c0_i32_2 = arith.constant 0 : i32
    return %arg0, %c0_i32, %c0_i32_0, %c0_i32_1 : i32, i32, i32, i32
  }
  func.func @transform_3(%arg0: i32) -> (i32, i32, i32, i32) {
    %c0_i32 = arith.constant 0 : i32
    %c0_i32_0 = arith.constant 0 : i32
    %c0_i32_1 = arith.constant 0 : i32
    %c0_i32_2 = arith.constant 0 : i32
    return %arg0, %c0_i32, %c0_i32_0, %c0_i32_1 : i32, i32, i32, i32
  }
  func.func @transform_4(%arg0: i32) -> i32 {
    %c0_i32 = arith.constant 0 : i32
    %c0_i32_0 = arith.constant 0 : i32
    return %c0_i32 : i32
  }
  func.func @transform_5(%arg0: i32) -> i32 {
    %c0_i32 = arith.constant 0 : i32
    %c0_i32_0 = arith.constant 0 : i32
    return %c0_i32 : i32
  }
  func.func @transform_6(%arg0: i32) -> i32 {
    %c0_i32 = arith.constant 0 : i32
    %c0_i32_0 = arith.constant 0 : i32
    return %c0_i32 : i32
  }
  func.func @transform_7(%arg0: i32) -> i32 {
    %c0_i32 = arith.constant 0 : i32
    %c0_i32_0 = arith.constant 0 : i32
    return %c0_i32 : i32
  }
  func.func @transform_8(%arg0: i32) -> (i32, i32, i32, i32) {
    %c0_i32 = arith.constant 0 : i32
    %c0_i32_0 = arith.constant 0 : i32
    %c0_i32_1 = arith.constant 0 : i32
    %c0_i32_2 = arith.constant 0 : i32
    return %arg0, %c0_i32, %c0_i32_0, %c0_i32_1 : i32, i32, i32, i32
  }
}

</mosaic_0001>

<bundles_post_ra>
// kernel: up_forward.1
= control target key start
LH: loop header
LB: loop body
LE: loop exit
PB: predicated region body
PF: predicated region fallthrough
CT: control target
= control target key end

     0   :  { %s7728_s0 = inlined_call_operand.vmem [shape: f32[16,8], index: 0, kind: input, shape index: {}]   ;;  %s7729_s1 = inlined_call_operand.vmem [shape: f32[8,16], index: 1, kind: input, shape index: {}]   ;;  %s7730_s2 = inlined_call_operand.vmem [shape: f32[2,2,8,8], index: 2, kind: input, shape index: {}]   ;;  %s7731_s3 = inlined_call_operand.vmem [shape: f32[2,2,16,16], index: 3, kind: input, shape index: {}]   ;;  %s7732_s4 = inlined_call_operand.vmem [shape: f32[144], index: 4, kind: input, shape index: {}]   ;;  %s7733_s5 = inlined_call_operand.vmem [shape: f32[4], index: 5, kind: input, shape index: {}]   ;;  %s7734_s6 = inlined_call_operand.vmem [shape: f32[144], index: 6, kind: input, shape index: {}]   ;;  %s7735_s7 = inlined_call_operand.vmem [shape: f32[4], index: 7, kind: input, shape index: {}]   ;;  %s7736_s8 = inlined_call_operand.hbm [shape: f32[2,4,16,16], index: 8, kind: output, shape index: {}]  }
   0x1   :  { %7747 = sst [smem:[#allocation18_spill]] %s7728_s0 }
   0x2   :  { %7748 = sst [smem:[#allocation19_spill]] %s7730_s2 }
   0x3   :  { %7749 = sst [smem:[#allocation20_spill]] %s7731_s3 }
   0x4   :  { %7750 = sst [smem:[#allocation21_spill]] %s7732_s4 }
   0x5   :  { %7751 = sst [smem:[#allocation22_spill]] %s7733_s5 }
   0x6   :  { %7752 = sst [smem:[#allocation23_spill]] %s7734_s6 }
   0x7   :  { %7753 = sst [smem:[#allocation24_spill]] %s7735_s7 }
   0x8   :  { %13 = vsyncpa [#allocation6], 0 }
   0x9   :  { %14 = vsyncpa [#allocation8], 0 }
   0xa   :  { %15 = vsyncpa [#allocation11], 0 }
   0xb   :  { %16 = vsyncpa [#allocation5], 0 }
   0xc   :  { %18 = vsyncpa [#allocation5 + $0x1], 0  ;;  %s5131_s27 = smov 0   ;;  %s5133_s28 = smov 0  }
   0xd   :  { %s5135_s29 = smov 0   ;;  %s5137_s30 = smov 0  }
   0xe LB: > { %s5152_s9 = sadd.s32 4294967295, %s5065_s30   ;;  %s4407_s10 = sadd.s32 4294967294, %s5065_s30   ;;  %s5065_s30 = sphi %s5137_s30, %s7783_s30   ;;  %s5061_s29 = sphi %s5135_s29, %s7782_s29   ;;  %s5057_s28 = sphi %s5133_s28, %s7781_s28   ;;  %s5053_s27 = sphi %s5131_s27, %s7780_s27  }
   0xf   : > { %s5156_s11 = sadd.s32 1, %s5065_s30   ;;  %s209_s12 = sadd.s32 1, %s5061_s29 }
  0x10   : > { %s206_s13 = ssub.s32 %s5065_s30, %s5156_s11  ;;  %p219_p0 = scmp.ne.s32.totalorder %s5061_s29, %s5057_s28 }
  0x11   : > { %p207_p1 = scmp.eq.s32.totalorder %s206_s13, 0  ;;  %p220_p2 = scmp.eq.s32.totalorder %s5152_s9, 1 }
  0x12   : > { %p225_p3 = scmp.ne.s32.totalorder %s5057_s28, %s5053_s27  ;;  %p226_p4 = scmp.eq.s32.totalorder %s4407_s10, 1 }
  0x13   : > { %s5167_s14 = scalar_select %p207_p1, %s5061_s29, %s209_s12  }
  0x14   : > { %p5169_p5 = por %p220_p2, %p219_p0  ;;  %p5173_p6 = por %p226_p4, %p225_p3 }
  0x15   : > { %7754 = sst [smem:[#allocation17_spill]] %s5167_s14  ;;  %p4408_p7 = scmp.ge.s32.totalorder %s5065_s30, 1 }
  0x16   : > { %s7755_s15 = scalar_select %p5169_p5, 1, 0 }
  0x17   : > { %s7756_s16 = scalar_select %p5173_p6, 1, 0 }
  0x18   : > { %p233_p8 = scmp.lt.s32.totalorder %s5065_s30, 3  ;;  %p7737_p9 = scmp.eq.s32.totalorder %s5152_s9, 0 }
  0x19   : > { %s7758_s5 = sld [smem:[#allocation22_spill]] }
  0x1a   : > { %p5180_p10 = pnand %p4408_p7, %p233_p8  ;;  %s7759_s4 = sld [smem:[#allocation21_spill]] }
  0x1b   : > { %s7761_s6 = sld [smem:[#allocation23_spill]] }
  0x1c   : > { %s7757_s17 = scalar_select %p5180_p10, 1, 0 }
  0x1d   : > { %p4751_p11 = pneg %p5180_p10  ;;  %s7762_s7 = sld [smem:[#allocation24_spill]] }
  0x1f   : > { %s263_s20 = sshll.u32 %s7758_s5, 4  ;;  %p5194_p12 = pnand %p7737_p9, %p4751_p11  ;;  %s264_s20 = int_to_ptr.vmem [resolvable:$true] %s263_s20 }
  0x20   : > { %s252_s23 = sshll.u32 %s7759_s4, 4  ;;  %s4933_s19 = scalar_lea.vmem %s264_s20, 16  ;;  %s253_s23 = int_to_ptr.vmem [resolvable:$true] %s252_s23 }
  0x21   : > { %s274_s10 = sshll.u32 %s7761_s6, 4  ;;  %p4934_p13 = scmp.ne.s32.totalorder %s264_s20, %s4933_s19  ;;  %s5201_s10 = int_to_ptr.vmem [resolvable:$true] %s274_s10 }
  0x22   : > { %p4935_p0 = pneg %p5194_p12  ;;  %p4941_p3 = scmp.lt.s32.totalorder %s264_s20, %s264_s20 }
  0x23   : > { %s285_s18 = sshll.u32 %s7762_s7, 4  ;;  %p4942_p4 = scmp.lt.s32.totalorder %s4933_s19, %s4933_s19  ;;  %s286_s18 = int_to_ptr.vmem [resolvable:$true] %s285_s18 }
  0x24   : > { %p4936_p1 = pnand %p4935_p0, %p4934_p13 }
  0x25   : > { %p4943_p7 = por %p4942_p4, %p4941_p3 }
  0x26   : > { %p4937_p2 = pneg %p4936_p1 }
  0x28   : > { %p4944_p8 = pnand %p4943_p7, %p4937_p2 }
  0x2a   : > { %4947 = shalt.err (!%p4944_p8)
}
  0x2b   : > { %s5067_s21 = smov [#allocation7]   ;;  %s4948_s22 = scalar_lea.vmem %s253_s23, 32 }
  0x2c   : > { %4757 = dma.vmem_to_smem (!%p5194_p12), %s264_s20, 16, %s5067_s21, [#allocation8]  }
  0x2d   : > { %p4949_p11 = scmp.ne.s32.totalorder %s253_s23, %s4948_s22  ;;  %p4956_p5 = scmp.lt.s32.totalorder %s253_s23, %s253_s23 }
  0x2e   : > { %p4957_p10 = scmp.lt.s32.totalorder %s4948_s22, %s4948_s22 }
  0x2f   : > { %p4951_p9 = pnand %p4949_p11, %p4935_p0 }
  0x30   : > { %p4958_p13 = por %p4957_p10, %p4956_p5 }
  0x31   : > { %p4952_p6 = pneg %p4951_p9 }
  0x33   : > { %p4959_p1 = pnand %p4958_p13, %p4952_p6 }
  0x35   : > { %4962 = shalt.err (!%p4959_p1)
}
  0x36   : > { %s5068_s25 = smov [#allocation4]   ;;  %s4963_s20 = scalar_lea.vmem %s5201_s10, 32 }
  0x37   : > { %4754 = dma.vmem_to_smem (!%p5194_p12), %s253_s23, 32, %s5068_s25, [#allocation6]  }
  0x38   : > { %p4964_p2 = scmp.ne.s32.totalorder %s5201_s10, %s4963_s20  ;;  %p4971_p9 = scmp.lt.s32.totalorder %s5201_s10, %s5201_s10 }
  0x39   : > { %p4972_p7 = scmp.lt.s32.totalorder %s4963_s20, %s4963_s20 }
  0x3a   : > { %p4966_p3 = pnand %p4964_p2, %p4935_p0 }
  0x3b   : > { %p4973_p5 = por %p4972_p7, %p4971_p9 }
  0x3c   : > { %p4967_p4 = pneg %p4966_p3 }
  0x3e   : > { %p4974_p6 = pnand %p4973_p5, %p4967_p4 }
  0x40   : > { %4977 = shalt.err (!%p4974_p6)
}
  0x41   : > { %s5069_s26 = smov [#allocation9]   ;;  %s4978_s13 = scalar_lea.vmem %s286_s18, 16 }
  0x42   : > { %4760 = dma.vmem_to_smem (!%p5194_p12), %s5201_s10, 32, %s5069_s26, [#allocation8]  }
  0x43   : > { %p4979_p10 = scmp.ne.s32.totalorder %s286_s18, %s4978_s13  ;;  %p4986_p13 = scmp.lt.s32.totalorder %s286_s18, %s286_s18 }
  0x44   : > { %p4987_p1 = scmp.lt.s32.totalorder %s4978_s13, %s4978_s13 }
  0x45   : > { %p4981_p8 = pnand %p4979_p10, %p4935_p0 }
  0x46   : > { %p4988_p2 = por %p4987_p1, %p4986_p13 }
  0x47   : > { %p4982_p11 = pneg %p4981_p8 }
  0x49   : > { %p4989_p3 = pnand %p4988_p2, %p4982_p11 }
  0x4b   : > { %4992 = shalt.err (!%p4989_p3)
}
  0x4c   : > { %s5070_s19 = smov [#allocation10]   ;;  %p7763_p4 = scmp.ne.s32.totalorder %s7757_s17, 0 }
  0x4d   : > { %4763 = dma.vmem_to_smem (!%p5194_p12), %s286_s18, 16, %s5070_s19, [#allocation11]  }
  0x4e   : > { %314 = sbr.rel (%p7763_p4) target bundleno = 1571 (0x623), region = 52  ;;  %p7764_p9 = scmp.eq.s32.totalorder (!%p7763_p4), %s5152_s9, 0 }
  0x53   : > { %5036 = dma.done.wait (%p7764_p9), [#allocation6], 32   ;;  %p7765_p7 = pmov %p7764_p9 }
  0x55   : > { %5038 = vsyncadd (%p7765_p7), [#allocation6], 4294967264  ;;  %p7766_p0 = pmov %p7765_p7 }
  0x57   : > { %5040 = dma.done.wait (%p7766_p0), [#allocation8], 48   ;;  %p7767_p5 = pmov %p7766_p0 }
  0x58   : > { %p7768_p6 = pmov %p7766_p0 }
  0x59   : > { %5042 = vsyncadd (%p7767_p5), [#allocation8], 4294967248 }
  0x5a   : > { %5044 = dma.done.wait (%p7768_p6), [#allocation11], 16   ;;  %p7769_p12 = pmov %p7766_p0 }
  0x5c   : > { %5046 = vsyncadd (%p7769_p12), [#allocation11], 4294967280 }
  0x5d   : > { %332 = sfence }
  0x5e   : > { %p366_p10 = scmp.lt.s32.totalorder %s5152_s9, 1  ;;  %v5071_v0 = vmov 0   ;;  %vm376_vm0 = vcmask 146432   ;;  %v5072_v1 = vmov 0.0   ;;  %vm379_vm1 = vcmask 140288   ;;  %s7770_s3 = sld [smem:[#allocation20_spill]] }
  0x5f   : > { %4828 = vset.pattern.permute.xlu1 %v5071_v0  ;;  %4827 = vset.pattern.permute.xlu0 %v5071_v0  ;;  %381 = vst.msk [vmem:[#allocation2 + $0x18] sm:$0xff] %vm376_vm0, %v5072_v1  ;;  %382 = vst.msk [vmem:[#allocation2 + $0x20] sm:$0xff] %vm376_vm0, %v5072_v1  ;;  %s7740_s22 = smov 1   ;;  %s7771_s0 = sld [smem:[#allocation18_spill]]  ;;  %v5074_v8 = vmov 1   ;;  %v5075_v9 = vmov 3   ;;  %v443_v32 = vlaneseq }
  0x60   : > { %s5255_s17 = scalar_select %p366_p10, %s5152_s9, 1  ;;  %377 = vst.msk [vmem:[#allocation2] sm:$0xff] %vm376_vm0, %v5072_v1  ;;  %378 = vst.msk [vmem:[#allocation2 + $0x8] sm:$0xff] %vm376_vm0, %v5072_v1  ;;  %v5076_v10 = vmov 2   ;;  %v5077_v11 = vmov 4   ;;  %v5078_v12 = vmov 6  }
  0x61   : > { %384 = vst.msk [vmem:[#allocation2 + $0x30] sm:$0xff] %vm376_vm0, %v5072_v1  ;;  %385 = vst.msk [vmem:[#allocation2 + $0x38] sm:$0xff] %vm376_vm0, %v5072_v1  ;;  %v5079_v13 = vmov 7   ;;  %v5080_v14 = vmov 5   ;;  %vm412_vm2 = vcmask 138248   ;;  %s4427_s23 = sld [smem:[#allocation4 + $0x1]] }
  0x62   : > { %387 = vst.msk [vmem:[#allocation2 + $0x48] sm:$0xff] %vm376_vm0, %v5072_v1  ;;  %388 = vst.msk [vmem:[#allocation2 + $0x50] sm:$0xff] %vm376_vm0, %v5072_v1  ;;  %s4731_s24 = sshll.u32 %s5255_s17, 5  ;;  %s4428_s13 = sld [smem:[#allocation4 + $0x2]]  ;;  %v444_v35 = vshrl.u32 %v443_v32, 7  ;;  %vm3030_vm3 = vcmask 130048  }
  0x63   : > { %390 = vst.msk [vmem:[#allocation3] sm:$0xff] %vm376_vm0, %v5072_v1  ;;  %391 = vst.msk [vmem:[#allocation3 + $0x8] sm:$0xff] %vm376_vm0, %v5072_v1  ;;  %s7742_s19 = smov 127   ;;  %s4730_s10 = sshll.u32 %s5255_s17, 4 }
  0x64   : > { %393 = vst.msk [vmem:[#allocation3 + $0x18] sm:$0xff] %vm376_vm0, %v5072_v1  ;;  %394 = vst.msk [vmem:[#allocation3 + $0x20] sm:$0xff] %vm376_vm0, %v5072_v1  ;;  %s375_s21 = scalar_lea.vmem %s7770_s3, %s4731_s24  ;;  %s7744_s24 = smov 126   ;;  %v5338_v37 = vsub.s32 1, %v444_v35  ;;  %v5340_v38 = vsub.s32 0, %v444_v35  ;;  %v5345_v41 = vsub.s32 2, %v444_v35 }
  0x65   : > { %396 = vst.msk [vmem:[#allocation3 + $0x30] sm:$0xff] %vm376_vm0, %v5072_v1  ;;  %397 = vst.msk [vmem:[#allocation3 + $0x38] sm:$0xff] %vm376_vm0, %v5072_v1  ;;  %v4424_v2 = vld [vmem:[%s375_s21 + $0x10] sm:$0xff]  ;;  %v402_v3 = vld [vmem:[%s375_s21] sm:$0xff]  ;;  %s7772_s2 = sld [smem:[#allocation19_spill]]  ;;  %v5351_v45 = vsub.s32 3, %v444_v35 }
  0x66   : > { %399 = vst.msk [vmem:[#allocation3 + $0x48] sm:$0xff] %vm376_vm0, %v5072_v1  ;;  %400 = vst.msk [vmem:[#allocation3 + $0x50] sm:$0xff] %vm376_vm0, %v5072_v1  ;;  %420 = vrot.lane.b32.xlu1 %v4424_v2, %s7740_s22  ;;  %406 = vrot.lane.b32.xlu0 %v402_v3, %s7740_s22  ;;  %v4425_v4 = vld [vmem:[%s375_s21 + $0x18] sm:$0xff]  ;;  %v403_v5 = vld [vmem:[%s375_s21 + $0x8] sm:$0xff]  ;;  %v5359_v52 = vsub.s32 4, %v444_v35  ;;  %v5363_v56 = vsub.s32 5, %v444_v35 }
  0x67   : > { %383 = vst.msk [vmem:[#allocation2 + $0x28] sm:$0x3] %vm379_vm1, %v5072_v1  ;;  %380 = vst.msk [vmem:[#allocation2 + $0x10] sm:$0x3] %vm379_vm1, %v5072_v1  ;;  %v430_v6 = vld [vmem:[%s7771_s0 + $0x8] sm:$0xff]  ;;  %v429_v7 = vld [vmem:[%s7771_s0] sm:$0xff]  ;;  %v912_v19 = vstv %s4427_s23 }
  0x68   : > { %386 = vst.msk [vmem:[#allocation2 + $0x40] sm:$0x3] %vm379_vm1, %v5072_v1  ;;  %389 = vst.msk [vmem:[#allocation2 + $0x58] sm:$0x3] %vm379_vm1, %v5072_v1  ;;  %v926_v21 = vstv %s4428_s13  ;;  %s5440_s17 = sld [smem:[#allocation4 + $0x4]]  ;;  %s7773_s0 = smov 127  }
  0x69   : > { %392 = vst.msk [vmem:[#allocation3 + $0x10] sm:$0x3] %vm379_vm1, %v5072_v1  ;;  %395 = vst.msk [vmem:[#allocation3 + $0x28] sm:$0x3] %vm379_vm1, %v5072_v1  ;;  %s5446_s20 = sld [smem:[#allocation4 + $0x5]]  ;;  %s7774_s4 = smov 126  }
  0x6a   : > { %398 = vst.msk [vmem:[#allocation3 + $0x40] sm:$0x3] %vm379_vm1, %v5072_v1  ;;  %401 = vst.msk [vmem:[#allocation3 + $0x58] sm:$0x3] %vm379_vm1, %v5072_v1  ;;  %422 = vrot.lane.b32.xlu1 %v4425_v4, %s7740_s22  ;;  %408 = vrot.lane.b32.xlu0 %v403_v5, %s7740_s22  ;;  %v5371_v4 = vsub.s32 6, %v444_v35  ;;  %s5453_s26 = sld [smem:[#allocation4 + $0x7]] }
  0x6b   : > { %s5336_s25 = scalar_lea.vmem %s7772_s2, %s4730_s10  ;;  %s5461_s12 = sld [smem:[#allocation4]] }
  0x6c   : > { %v432_v40 = vld [vmem:[%s5336_s25] sm:$0xff]  ;;  %s5464_s23 = sld [smem:[#allocation4 + $0x8]]  ;;  %p7777_p11 = scmp.ne.s32.totalorder %s7755_s15, 0 }
  0x6d   : > { %v462_v43 = vrot.slane %v432_v40, %v5338_v37  ;;  %v446_v44 = vrot.slane %v432_v40, %v5340_v38  ;;  %v478_v46 = vrot.slane %v432_v40, %v5345_v41  ;;  %v494_v54 = vrot.slane %v432_v40, %v5351_v45  ;;  %s5472_s13 = sld [smem:[#allocation7]] }
  0x6e   : > { %440 = vperm.xlu1 %4828, %v430_v6   ;;  %435 = vperm.xlu0 %4827, %v429_v7   ;;  %v510_v61 = vrot.slane %v432_v40, %v5359_v52  ;;  %v526_v2 = vrot.slane %v432_v40, %v5363_v56  ;;  %s5478_s10 = sld [smem:[#allocation4 + $0xa]] }
  0x6f   : > { %s5485_s18 = sld [smem:[#allocation4 + $0x3]] }
  0x70   : > { %s5489_s21 = sld [smem:[#allocation4 + $0xb]] }
  0x71   : > { %s5550_s22 = sld [smem:[#allocation4 + $0x25]] }
  0x72   : > { %4829 = vset.pattern.permute.xlu1 %v5074_v8  ;;  %4831 = vset.pattern.permute.xlu0 %v5075_v9  ;;  %s5566_s2 = sld [smem:[#allocation4 + $0x28]] }
  0x73   : > { %452 = vperm.xlu1 %4829, %v429_v7   ;;  %484 = vperm.xlu0 %4831, %v429_v7   ;;  %s5574_s3 = sld [smem:[#allocation4 + $0x29]] }
  0x74   : > { %s5592_s5 = sld [smem:[#allocation4 + $0x2c]] }
  0x75   : > { %s5600_s6 = sld [smem:[#allocation4 + $0x2e]] }
  0x76   : > { %s5611_s7 = sld [smem:[#allocation4 + $0x2f]] }
  0x77   : > { %4830 = vset.pattern.permute.xlu1 %v5076_v10  ;;  %4834 = vset.pattern.permute.xlu0 %v5077_v11  ;;  %s5809_s14 = sld [smem:[#allocation4 + $0x56]] }
  0x78   : > { %468 = vperm.xlu1 %4830, %v429_v7   ;;  %504 = vperm.xlu0 %4834, %v430_v6  }
  0x7c   : > { %472 = vperm.xlu1 %4830, %v430_v6   ;;  %4836 = vset.pattern.permute.xlu0 %v5078_v12 }
  0x7d   : > { %532 = vperm.xlu0 %4836, %v429_v7  }
  0x80   : > { %4832 = vset.pattern.permute.xlu1 %v5075_v9 }
  0x81   : > { %488 = vperm.xlu1 %4832, %v430_v6   ;;  %4839 = vset.pattern.permute.xlu0 %v5079_v13 }
  0x82   : > { %552 = vperm.xlu0 %4839, %v430_v6  }
  0x85   : > { %4833 = vset.pattern.permute.xlu1 %v5077_v11 }
  0x86   : > { %500 = vperm.xlu1 %4833, %v429_v7   ;;  %4840 = vset.pattern.permute.xlu0 %v5074_v8 }
  0x87   : > { %456 = vperm.xlu0 %4840, %v430_v6  }
  0x8a   : > { %4835 = vset.pattern.permute.xlu1 %v5080_v14 }
  0x8b   : > { %516 = vperm.xlu1 %4835, %v429_v7  }
  0x8f   : > { %520 = vperm.xlu1 %4835, %v430_v6  }
  0x93   : > { %4837 = vset.pattern.permute.xlu1 %v5078_v12 }
  0x94   : > { %536 = vperm.xlu1 %4837, %v430_v6  }
  0x98   : > { %4838 = vset.pattern.permute.xlu1 %v5079_v13 }
  0x99   : > { %548 = vperm.xlu1 %4838, %v429_v7  }
  0x9d   : > { %4841 = vset.pattern.permute.xlu1 %v5071_v0 }
  0xd8   : > { %v421_v15 = vpop.permute.xlu1 %420  ;;  %v407_v16 = vpop.permute.xlu0 %406 }
  0xd9   : > { %427 = vst.msk [vmem:[#allocation2 + $0x19] sm:$0xff] %vm412_vm2, %v421_v15  ;;  %413 = vst.msk [vmem:[#allocation2 + $0x1] sm:$0xff] %vm412_vm2, %v407_v16 }
  0xdc   : > { %v423_v17 = vpop.permute.xlu1 %422  ;;  %v409_v18 = vpop.permute.xlu0 %408 }
  0xdd   : > { %428 = vst.msk [vmem:[#allocation2 + $0x21] sm:$0xff] %vm412_vm2, %v423_v17  ;;  %414 = vst.msk [vmem:[#allocation2 + $0x9] sm:$0xff] %vm412_vm2, %v409_v18  ;;  %v542_v18 = vrot.slane %v432_v40, %v5371_v4 }
  0xe0   : > { %v5304_v20 = vld [vmem:[#allocation2] sm:$0xff] }
  0xe1   : > { %v913_v22 = vmul.f32 %v912_v19, %v5304_v20  ;;  %v927_v23 = vmul.f32 %v926_v21, %v5304_v20 }
  0xe3   : > { %917 = vrot.lane.b32.xlu0 %v913_v22, %s7742_s19 }
  0xe4   : > { %v5309_v24 = vld [vmem:[#allocation2 + $0x8] sm:$0xff] }
  0xe5   : > { %v914_v25 = vmul.f32 %v912_v19, %v5309_v24  ;;  %v928_v26 = vmul.f32 %v926_v21, %v5309_v24  ;;  %v5378_v19 = vsub.s32 7, %v444_v35 }
  0xe7   : > { %931 = vrot.lane.b32.xlu0 %v927_v23, %s7744_s24  ;;  %919 = vrot.lane.b32.xlu1 %v914_v25, %s7742_s19  ;;  %v4426_v23 = vld [vmem:[%s5336_s25 + $0x8] sm:$0xff]  ;;  %s5501_s25 = sld [smem:[#allocation4 + $0xd]] }
  0xe9   : > { %v5315_v27 = vpop.permute.xlu1 %440  ;;  %v5317_v28 = vpop.permute.xlu0 %435 }
  0xea   : > { %v447_v49 = vmul.f32 %v446_v44, %v5317_v28  ;;  %v448_v51 = vmul.f32 %v446_v44, %v5315_v27  ;;  %v558_v44 = vrot.slane %v432_v40, %v5378_v19  ;;  %v725_v40 = vrot.slane %v4426_v23, %v5345_v41 }
  0xeb   : > { %933 = vrot.lane.b32.xlu1 %v928_v26, %s7744_s24 }
  0xee   : > { %v5320_v29 = vpop.permute.xlu1 %452  ;;  %v5322_v30 = vpop.permute.xlu0 %484 }
  0xef   : > { %v463_v48 = vmul.f32 %v462_v43, %v5320_v29  ;;  %v495_v62 = vmul.f32 %v494_v54, %v5322_v30 }
  0xf1   : > { %v465_v59 = vadd.f32 %v463_v48, %v447_v49  ;;  %v709_v48 = vrot.slane %v4426_v23, %v5340_v38  ;;  %v717_v49 = vrot.slane %v4426_v23, %v5338_v37 }
  0xf3   : > { %v5324_v31 = vpop.permute.xlu1 %468  ;;  %v5326_v33 = vpop.permute.xlu0 %504 }
  0xf4   : > { %v479_v55 = vmul.f32 %v478_v46, %v5324_v31  ;;  %v512_v17 = vmul.f32 %v510_v61, %v5326_v33 }
  0xf6   : > { %v481_v63 = vadd.f32 %v479_v55, %v465_v59 }
  0xf7   : > { %v5329_v34 = vpop.permute.xlu1 %472 }
  0xf8   : > { %v5331_v36 = vpop.permute.xlu0 %532  ;;  %v480_v60 = vmul.f32 %v478_v46, %v5329_v34  ;;  %v497_v7 = vadd.f32 %v495_v62, %v481_v63 }
  0xfc   : > { %v5342_v39 = vpop.permute.xlu1 %488 }
  0xfd   : > { %v5347_v42 = vpop.permute.xlu0 %552  ;;  %v496_v5 = vmul.f32 %v494_v54, %v5342_v39 }
 0x101   : > { %v5354_v47 = vpop.permute.xlu1 %500 }
 0x102   : > { %v457_v50 = vpop.permute.xlu0 %456  ;;  %v511_v6 = vmul.f32 %v510_v61, %v5354_v47  ;;  %v560_v61 = vmul.f32 %v558_v44, %v5347_v42 }
 0x103   : > { %v464_v53 = vmul.f32 %v462_v43, %v457_v50  ;;  %v543_v43 = vmul.f32 %v542_v18, %v5331_v36  ;;  %v719_v55 = vmul.f32 %v717_v49, %v457_v50  ;;  %v733_v50 = vrot.slane %v4426_v23, %v5351_v45 }
 0x104   : > { %v513_v21 = vadd.f32 %v511_v6, %v497_v7  ;;  %v718_v6 = vmul.f32 %v717_v49, %v5320_v29  ;;  %v710_v7 = vmul.f32 %v709_v48, %v5317_v28  ;;  %v757_v29 = vrot.slane %v4426_v23, %v5371_v4 }
 0x105   : > { %v466_v57 = vadd.f32 %v464_v53, %v448_v51 }
 0x106   : > { %v5365_v58 = vpop.permute.xlu1 %516 }
 0x107   : > { %v482_v1 = vadd.f32 %v480_v60, %v466_v57  ;;  %v527_v15 = vmul.f32 %v526_v2, %v5365_v58  ;;  %v711_v60 = vmul.f32 %v709_v48, %v5315_v27 }
 0x109   : > { %v498_v16 = vadd.f32 %v496_v5, %v482_v1  ;;  %v529_v25 = vadd.f32 %v527_v15, %v513_v21  ;;  %v721_v62 = vadd.f32 %v719_v55, %v711_v60  ;;  %v727_v1 = vmul.f32 %v725_v40, %v5329_v34 }
 0x10a   : > { %v521_v3 = vpop.permute.xlu1 %520  ;;  %v735_v5 = vmul.f32 %v733_v50, %v5342_v39  ;;  %v726_v15 = vmul.f32 %v725_v40, %v5324_v31  ;;  %v720_v39 = vadd.f32 %v718_v6, %v710_v7  ;;  %v734_v21 = vmul.f32 %v733_v50, %v5322_v30 }
 0x10b   : > { %v514_v26 = vadd.f32 %v512_v17, %v498_v16  ;;  %v528_v32 = vmul.f32 %v526_v2, %v521_v3  ;;  %v545_v54 = vadd.f32 %v543_v43, %v529_v25  ;;  %v729_v27 = vadd.f32 %v727_v1, %v721_v62  ;;  %v5498_v62 = vld [vmem:[#allocation2 + $0x18] sm:$0xff] }
 0x10c   : > { %v741_v2 = vrot.slane %v4426_v23, %v5359_v52  ;;  %v749_v17 = vrot.slane %v4426_v23, %v5363_v56  ;;  %v728_v25 = vadd.f32 %v726_v15, %v720_v39  ;;  %v980_v55 = vstv %s5453_s26  ;;  %v5517_v39 = vld [vmem:[#allocation2 + $0x9] sm:$0xff]  ;;  %s5648_s26 = sld [smem:[#allocation4 + $0x34]] }
 0x10d   : > { %v530_v53 = vadd.f32 %v528_v32, %v514_v26  ;;  %v737_v34 = vadd.f32 %v735_v5, %v729_v27  ;;  %v765_v26 = vrot.slane %v4426_v23, %v5378_v19  ;;  %v758_v23 = vmul.f32 %v757_v29, %v5331_v36  ;;  %v5449_v36 = vld [vmem:[#allocation2 + $0x1] sm:$0xff] }
 0x10e   : > { %v743_v16 = vmul.f32 %v741_v2, %v5326_v33  ;;  %v751_v28 = vmul.f32 %v749_v17, %v521_v3  ;;  %v742_v33 = vmul.f32 %v741_v2, %v5354_v47  ;;  %v736_v43 = vadd.f32 %v734_v21, %v728_v25 }
 0x10f   : > { %v537_v22 = vpop.permute.xlu1 %536  ;;  %v750_v3 = vmul.f32 %v749_v17, %v5365_v58  ;;  %v940_v2 = vstv %s5485_s18  ;;  %v1028_v6 = vstv %s5489_s21  ;;  %v1048_v21 = vstv %s5501_s25  ;;  %s5537_s18 = sld [smem:[#allocation4 + $0x11]] }
 0x110   : > { %v544_v46 = vmul.f32 %v542_v18, %v537_v22  ;;  %v745_v18 = vadd.f32 %v743_v16, %v737_v34  ;;  %v759_v31 = vmul.f32 %v757_v29, %v537_v22  ;;  %v744_v30 = vadd.f32 %v742_v33, %v736_v43  ;;  %s5691_s21 = sld [smem:[#allocation4 + $0x4a]] }
 0x111   : > { %v767_v22 = vmul.f32 %v765_v26, %v5347_v42  ;;  %v946_v42 = vstv %s5440_s17  ;;  %v941_v17 = vmul.f32 %v940_v2, %v5449_v36  ;;  %v1029_v29 = vmul.f32 %v1028_v6, %v5498_v62  ;;  %s5624_s17 = sld [smem:[#allocation4 + $0x31]] }
 0x112   : > { %v546_v57 = vadd.f32 %v544_v46, %v530_v53  ;;  %v753_v32 = vadd.f32 %v751_v28, %v745_v18  ;;  %v752_v46 = vadd.f32 %v750_v3, %v744_v30  ;;  %v960_v53 = vstv %s5446_s20  ;;  %v5522_v18 = vld [vmem:[#allocation2 + $0x19] sm:$0xff]  ;;  %s5635_s20 = sld [smem:[#allocation4 + $0x32]] }
 0x113   : > { %v942_v33 = vmul.f32 %v940_v2, %v5517_v39  ;;  %v5546_v3 = vld [vmem:[#allocation2 + $0x1a] sm:$0xff]  ;;  %s5704_s25 = sld [smem:[#allocation4 + $0x4c]] }
 0x114   : > { %v549_v51 = vpop.permute.xlu1 %548  ;;  %v5392_v63 = vadd.f32 %v560_v61, %v546_v57  ;;  %v760_v48 = vadd.f32 %v758_v23, %v752_v46  ;;  %v906_v57 = vstv %s5461_s12  ;;  %v904_v61 = vstv %s5472_s13  ;;  %s5511_s12 = sld [smem:[#allocation4 + $0xe]] }
 0x115   : > { %v559_v35 = vmul.f32 %v558_v44, %v549_v51  ;;  %v761_v44 = vadd.f32 %v759_v31, %v753_v32  ;;  %v766_v58 = vmul.f32 %v765_v26, %v549_v51  ;;  %v947_v51 = vmul.f32 %v946_v42, %v5449_v36  ;;  %s5525_s13 = sld [smem:[#allocation4 + $0x10]] }
 0x116   : > { %v907_v60 = vmul.f32 %v906_v57, %v5304_v20  ;;  %v908_v50 = vmul.f32 %v906_v57, %v5309_v24  ;;  %v1049_v26 = vmul.f32 %v1048_v21, %v5522_v18  ;;  %v1334_v46 = vstv %s5550_s22  ;;  %s5760_s22 = sld [smem:[#allocation4 + $0x52]] }
 0x117   : > { %v5385_v59 = vadd.f32 %v559_v35, %v545_v54  ;;  %v5424_v47 = vadd.f32 %v767_v22, %v761_v44  ;;  %v5431_v49 = vadd.f32 %v766_v58, %v760_v48  ;;  %v961_v54 = vmul.f32 %v960_v53, %v5449_v36  ;;  %v5474_v35 = vld [vmem:[#allocation2 + $0x2] sm:$0xff] }
 0x118   : > { %v909_v1 = vadd.f32 %v907_v60, %v904_v61  ;;  %v910_v15 = vadd.f32 %v908_v50, %v904_v61  ;;  %v1335_v23 = vmul.f32 %v1334_v46, %v5304_v20  ;;  %v1368_v48 = vstv %s5566_s2  ;;  %v5617_v60 = vld [vmem:[#allocation2 + $0xa] sm:$0xff]  ;;  %v5641_v50 = vld [vmem:[#allocation2 + $0x20] sm:$0xff]  ;;  %s6094_s2 = sld [smem:[#allocation4 + $0x4b]] }
 0x119   : > { %582 = vperm.xlu0 %4840, %v5385_v59   ;;  %565 = vperm.xlu1 %4841, %v5385_v59   ;;  %v962_v57 = vmul.f32 %v960_v53, %v5517_v39  ;;  %v1436_v61 = vstv %s5600_s6  ;;  %s5880_s6 = sld [smem:[#allocation4 + $0x9]] }
 0x11a   : > { %v1062_v32 = vstv %s5511_s12  ;;  %v1437_v53 = vmul.f32 %v1436_v61, %v5498_v62  ;;  %s5717_s12 = sld [smem:[#allocation4 + $0x4d]] }
 0x11b   : > { %v1082_v44 = vstv %s5525_s13  ;;  %s5732_s13 = sld [smem:[#allocation4 + $0x4f]] }
 0x11c   : > { %v1083_v30 = vmul.f32 %v1082_v44, %v5546_v3 }
 0x11d   : > { %4844 = vset.pattern.permute.xlu0 %v5076_v10  ;;  %570 = vperm.xlu1 %4841, %v5392_v63  }
 0x11e   : > { %602 = vperm.xlu0 %4844, %v5392_v63  }
 0x121   : > { %4842 = vset.pattern.permute.xlu1 %v5074_v8 }
 0x122   : > { %4846 = vset.pattern.permute.xlu0 %v5077_v11  ;;  %586 = vperm.xlu1 %4842, %v5392_v63  }
 0x123   : > { %630 = vperm.xlu0 %4846, %v5385_v59  }
 0x126   : > { %4843 = vset.pattern.permute.xlu1 %v5076_v10 }
 0x127   : > { %4849 = vset.pattern.permute.xlu0 %v5080_v14  ;;  %598 = vperm.xlu1 %4843, %v5385_v59  }
 0x128   : > { %650 = vperm.xlu0 %4849, %v5392_v63  }
 0x12b   : > { %4845 = vset.pattern.permute.xlu1 %v5075_v9 }
 0x12c   : > { %4851 = vset.pattern.permute.xlu0 %v5079_v13  ;;  %614 = vperm.xlu1 %4845, %v5385_v59  }
 0x12d   : > { %678 = vperm.xlu0 %4851, %v5385_v59  }
 0x130   : > { %618 = vperm.xlu1 %4845, %v5392_v63  }
 0x131   : > { %4854 = vset.pattern.permute.xlu0 %v5071_v0 }
 0x132   : > { %777 = vperm.xlu0 %4854, %v5424_v47  }
 0x134   : > { %4847 = vset.pattern.permute.xlu1 %v5077_v11 }
 0x135   : > { %634 = vperm.xlu1 %4847, %v5392_v63  }
 0x136   : > { %4856 = vset.pattern.permute.xlu0 %v5076_v10 }
 0x137   : > { %797 = vperm.xlu0 %4856, %v5431_v49  }
 0x139   : > { %4848 = vset.pattern.permute.xlu1 %v5080_v14 }
 0x13a   : > { %646 = vperm.xlu1 %4848, %v5385_v59  }
 0x13b   : > { %4859 = vset.pattern.permute.xlu0 %v5075_v9 }
 0x13c   : > { %813 = vperm.xlu0 %4859, %v5424_v47  }
 0x13e   : > { %4850 = vset.pattern.permute.xlu1 %v5078_v12 }
 0x13f   : > { %662 = vperm.xlu1 %4850, %v5385_v59   ;;  %v994_v59 = vstv %s5464_s23  ;;  %s5659_s23 = sld [smem:[#allocation4 + $0x35]] }
 0x140   : > { %4861 = vset.pattern.permute.xlu0 %v5080_v14  ;;  %v995_v40 = vmul.f32 %v994_v59, %v5474_v35 }
 0x141   : > { %833 = vperm.xlu0 %4861, %v5431_v49  }
 0x143   : > { %666 = vperm.xlu1 %4850, %v5392_v63  }
 0x145   : > { %4864 = vset.pattern.permute.xlu0 %v5078_v12 }
 0x146   : > { %849 = vperm.xlu0 %4864, %v5424_v47  }
 0x147   : > { %4852 = vset.pattern.permute.xlu1 %v5079_v13 }
 0x148   : > { %682 = vperm.xlu1 %4852, %v5392_v63   ;;  %v1014_v63 = vstv %s5478_s10  ;;  %s5676_s10 = sld [smem:[#allocation4 + $0x49]] }
 0x149   : > { %v1015_v27 = vmul.f32 %v1014_v63, %v5498_v62  ;;  %v1016_v2 = vmul.f32 %v1014_v63, %v5641_v50 }
 0x14a   : > { %951 = vrot.lane.b32.xlu0 %v947_v51, %s7742_s19  ;;  %v1382_v51 = vstv %s5574_s3  ;;  %s5789_s3 = sld [smem:[#allocation4 + $0x55]] }
 0x14b   : > { %4866 = vset.pattern.permute.xlu0 %v5079_v13 }
 0x14c   : > { %4853 = vset.pattern.permute.xlu1 %v5071_v0  ;;  %v981_v0 = vmul.f32 %v980_v55, %v5474_v35 }
 0x14d   : > { %772 = vperm.xlu1 %4853, %v5431_v49  }
 0x14e   : > { %965 = vrot.lane.b32.xlu0 %v961_v54, %s7744_s24  ;;  %v1383_v54 = vmul.f32 %v1382_v51, %v5449_v36 }
 0x151   : > { %4855 = vset.pattern.permute.xlu1 %v5074_v8 }
 0x152   : > { %985 = vrot.lane.b32.xlu0 %v981_v0, %s7742_s19  ;;  %785 = vperm.xlu1 %4855, %v5431_v49  }
 0x155   : > { %v918_v8 = vpop.permute.xlu0 %917 }
 0x156   : > { %999 = vrot.lane.b32.xlu0 %v995_v40, %s7744_s24  ;;  %789 = vperm.xlu1 %4855, %v5424_v47   ;;  %v923_v5 = vadd.f32 %v918_v8, %v909_v1  ;;  %v982_v40 = vmul.f32 %v980_v55, %v5617_v60  ;;  %v1450_v8 = vstv %s5611_s7  ;;  %v996_v1 = vmul.f32 %v994_v59, %v5617_v60  ;;  %s7775_s7 = smov 1  }
 0x157   : > { %v1451_v55 = vmul.f32 %v1450_v8, %v5498_v62 }
 0x159   : > { %v920_v7 = vpop.permute.xlu1 %919  ;;  %v932_v34 = vpop.permute.xlu0 %931 }
 0x15a   : > { %1019 = vrot.lane.b32.xlu0 %v1015_v27, %s7742_s19  ;;  %4857 = vset.pattern.permute.xlu1 %v5076_v10  ;;  %v937_v16 = vadd.f32 %v932_v34, %v923_v5  ;;  %v924_v28 = vadd.f32 %v920_v7, %v910_v15  ;;  %v1470_v27 = vstv %s5624_s17  ;;  %v1484_v5 = vstv %s5635_s20  ;;  %v5665_v34 = vld [vmem:[#allocation2 + $0x21] sm:$0xff]  ;;  %s5901_s17 = sld [smem:[#allocation4 + $0xc]] }
 0x15b   : > { %801 = vperm.xlu1 %4857, %v5424_v47   ;;  %v1471_v59 = vmul.f32 %v1470_v27, %v5522_v18  ;;  %v1030_v7 = vmul.f32 %v1028_v6, %v5641_v50  ;;  %v1050_v6 = vmul.f32 %v1048_v21, %v5665_v34  ;;  %v1064_v21 = vmul.f32 %v1062_v32, %v5665_v34  ;;  %s5919_s20 = sld [smem:[#allocation4 + $0xf]] }
 0x15c   : > { %v5527_v10 = vadd.f32 %v941_v17, %v937_v16  ;;  %v1485_v16 = vmul.f32 %v1484_v5, %v5522_v18  ;;  %v1504_v17 = vstv %s5648_s26  ;;  %s5933_s26 = sld [smem:[#allocation4 + $0x24]] }
 0x15d   : > { %v934_v25 = vpop.permute.xlu1 %933 }
 0x15e   : > { %1033 = vrot.lane.b32.xlu0 %v1029_v29, %s7744_s24  ;;  %v938_v31 = vadd.f32 %v934_v25, %v924_v28  ;;  %v1505_v28 = vmul.f32 %v1504_v17, %v5546_v3 }
 0x15f   : > { %4858 = vset.pattern.permute.xlu1 %v5075_v9  ;;  %v1063_v9 = vmul.f32 %v1062_v32, %v5522_v18 }
 0x160   : > { %809 = vperm.xlu1 %4858, %v5431_v49   ;;  %v5539_v43 = vadd.f32 %v942_v33, %v938_v31  ;;  %v1518_v31 = vstv %s5659_s23  ;;  %v5697_v33 = vld [vmem:[#allocation2 + $0x22] sm:$0xff]  ;;  %s5943_s23 = sld [smem:[#allocation7 + $0x1]] }
 0x161   : > { %v1084_v32 = vmul.f32 %v1082_v44, %v5697_v33 }
 0x162   : > { %1053 = vrot.lane.b32.xlu0 %v1049_v26, %s7742_s19  ;;  %s5558_s19 = sld [smem:[#allocation4 + $0x26]]  ;;  %v1519_v26 = vmul.f32 %v1518_v31, %v5546_v3 }
 0x164   : > { %4860 = vset.pattern.permute.xlu1 %v5077_v11  ;;  %v1096_v11 = vstv %s5537_s18  ;;  %s5747_s18 = sld [smem:[#allocation4 + $0x50]] }
 0x165   : > { %821 = vperm.xlu1 %4860, %v5431_v49   ;;  %v1097_v22 = vmul.f32 %v1096_v11, %v5546_v3 }
 0x166   : > { %1067 = vrot.lane.b32.xlu0 %v1063_v9, %s7744_s24 }
 0x168   : > { %v1348_v58 = vstv %s5558_s19  ;;  %s5771_s19 = sld [smem:[#allocation4 + $0x53]] }
 0x169   : > { %825 = vperm.xlu1 %4860, %v5424_v47  }
 0x16a   : > { %1087 = vrot.lane.b32.xlu0 %v1083_v30, %s7773_s0  ;;  %v1757_v30 = vstv %s5676_s10  ;;  %s5957_s10 = sld [smem:[#allocation4 + $0x27]] }
 0x16d   : > { %4862 = vset.pattern.permute.xlu1 %v5080_v14  ;;  %v1349_v14 = vmul.f32 %v1348_v58, %v5304_v20 }
 0x16e   : > { %1101 = vrot.lane.b32.xlu0 %v1097_v22, %s7744_s24  ;;  %837 = vperm.xlu1 %4862, %v5424_v47   ;;  %s5583_s24 = sld [smem:[#allocation4 + $0x2b]] }
 0x172   : > { %1339 = vrot.lane.b32.xlu0 %v1335_v23, %s7773_s0  ;;  %4863 = vset.pattern.permute.xlu1 %v5078_v12  ;;  %v1369_v12 = vmul.f32 %v1368_v48, %v5449_v36  ;;  %v1758_v23 = vmul.f32 %v1757_v30, %v5304_v20 }
 0x173   : > { %845 = vperm.xlu1 %4863, %v5431_v49  }
 0x174   : > { %v1402_v0 = vstv %s5583_s24  ;;  %s5844_s24 = sld [smem:[#allocation4 + $0x6]] }
 0x176   : > { %1353 = vrot.lane.b32.xlu0 %v1349_v14, %s7774_s4  ;;  %v1771_v14 = vstv %s5691_s21  ;;  %s5985_s21 = sld [smem:[#allocation4 + $0x59]] }
 0x177   : > { %4865 = vset.pattern.permute.xlu1 %v5079_v13  ;;  %v948_v13 = vmul.f32 %v946_v42, %v5517_v39  ;;  %v1772_v44 = vmul.f32 %v1771_v14, %v5304_v20 }
 0x178   : > { %857 = vperm.xlu1 %4865, %v5431_v49   ;;  %v1403_v49 = vmul.f32 %v1402_v0, %v5474_v35 }
 0x17a   : > { %1373 = vrot.lane.b32.xlu0 %v1369_v12, %s7773_s0 }
 0x17c   : > { %861 = vperm.xlu1 %4865, %v5424_v47   ;;  %v1416_v47 = vstv %s5592_s5  ;;  %s5832_s5 = sld [smem:[#allocation4 + $0x58]] }
 0x17d   : > { %v1417_v42 = vmul.f32 %v1416_v47, %v5474_v35 }
 0x17e   : > { %1387 = vrot.lane.b32.xlu0 %v1383_v54, %s7774_s4  ;;  %v1098_v54 = vmul.f32 %v1096_v11, %v5697_v33 }
 0x180   : > { %953 = vrot.lane.b32.xlu1 %v948_v13, %s7773_s0 }
 0x182   : > { %1407 = vrot.lane.b32.xlu0 %v1403_v49, %s7773_s0  ;;  %v1791_v49 = vstv %s5704_s25  ;;  %s5990_s25 = sld [smem:[#allocation4 + $0x2a]] }
 0x184   : > { %967 = vrot.lane.b32.xlu1 %v962_v57, %s7774_s4  ;;  %v1336_v57 = vmul.f32 %v1334_v46, %v5309_v24  ;;  %v1350_v46 = vmul.f32 %v1348_v58, %v5309_v24 }
 0x186   : > { %1421 = vrot.lane.b32.xlu0 %v1417_v42, %s7774_s4 }
 0x188   : > { %987 = vrot.lane.b32.xlu1 %v982_v40, %s7773_s0  ;;  %v1792_v40 = vmul.f32 %v1791_v49, %v5449_v36 }
 0x18a   : > { %1441 = vrot.lane.b32.xlu0 %v1437_v53, %s7773_s0  ;;  %v1805_v53 = vstv %s5717_s12  ;;  %s6016_s12 = sld [smem:[#allocation4 + $0x2d]] }
 0x18c   : > { %1001 = vrot.lane.b32.xlu1 %v996_v1, %s7774_s4 }
 0x18e   : > { %1455 = vrot.lane.b32.xlu0 %v1451_v55, %s7774_s4  ;;  %v1806_v55 = vmul.f32 %v1805_v53, %v5449_v36 }
 0x190   : > { %1021 = vrot.lane.b32.xlu1 %v1016_v2, %s7773_s0 }
 0x192   : > { %1475 = vrot.lane.b32.xlu0 %v1471_v59, %s7773_s0  ;;  %v1825_v59 = vstv %s5732_s13  ;;  %s6051_s13 = sld [smem:[#allocation4 + $0x30]] }
 0x194   : > { %v5667_v15 = vpop.permute.xlu0 %582  ;;  %1035 = vrot.lane.b32.xlu1 %v1030_v7, %s7774_s4  ;;  %v5670_v63 = vpop.permute.xlu1 %565  ;;  %v1370_v7 = vmul.f32 %v1368_v48, %v5517_v39  ;;  %v431_v48 = vld [vmem:[%s7729_s1] sm:$0xff] }
 0x196   : > { %1489 = vrot.lane.b32.xlu0 %v1485_v16, %s7774_s4  ;;  %v1826_v16 = vmul.f32 %v1825_v59, %v5474_v35 }
 0x198   : > { %1055 = vrot.lane.b32.xlu1 %v1050_v6, %s7773_s0  ;;  %v5683_v29 = vpop.permute.xlu1 %570  ;;  %v1839_v6 = vstv %s5747_s18  ;;  %s6065_s18 = sld [smem:[#allocation4 + $0x33]] }
 0x199   : > { %v5688_v25 = vpop.permute.xlu0 %602 }
 0x19a   : > { %1509 = vrot.lane.b32.xlu0 %v1505_v28, %s7773_s0  ;;  %v1384_v28 = vmul.f32 %v1382_v51, %v5517_v39  ;;  %v1404_v51 = vmul.f32 %v1402_v0, %v5617_v60 }
 0x19c   : > { %1069 = vrot.lane.b32.xlu1 %v1064_v21, %s7774_s4 }
 0x19d   : > { %v587_v9 = vpop.permute.xlu1 %586 }
 0x19e   : > { %1523 = vrot.lane.b32.xlu0 %v1519_v26, %s7774_s4  ;;  %v5707_v22 = vpop.permute.xlu0 %630  ;;  %v1840_v26 = vmul.f32 %v1839_v6, %v5474_v35 }
 0x1a0   : > { %1089 = vrot.lane.b32.xlu1 %v1084_v32, %s7773_s0 }
 0x1a2   : > { %1762 = vrot.lane.b32.xlu0 %v1758_v23, %s7773_s0  ;;  %v5720_v12 = vpop.permute.xlu1 %598  ;;  %v1859_v23 = vstv %s5760_s22  ;;  %s6079_s22 = sld [smem:[#allocation4 + $0x48]] }
 0x1a3   : > { %v5725_v13 = vpop.permute.xlu0 %650  ;;  %v1860_v0 = vmul.f32 %v1859_v23, %v5498_v62 }
 0x1a4   : > { %1103 = vrot.lane.b32.xlu1 %v1098_v54, %s7774_s4  ;;  %v5795_v54 = vrot.slane %v431_v48, %v5338_v37  ;;  %v1418_v37 = vmul.f32 %v1416_v47, %v5617_v60 }
 0x1a6   : > { %1776 = vrot.lane.b32.xlu0 %v1772_v44, %s7774_s4 }
 0x1a7   : > { %v5738_v42 = vpop.permute.xlu1 %614 }
 0x1a8   : > { %v5740_v11 = vpop.permute.xlu0 %678  ;;  %1341 = vrot.lane.b32.xlu1 %v1336_v57, %s7773_s0  ;;  %v5801_v57 = vrot.slane %v431_v48, %v5340_v38  ;;  %v5817_v38 = vrot.slane %v431_v48, %v5345_v41  ;;  %v7746_v41 = vstv %s5789_s3 }
 0x1aa   : > { %1796 = vrot.lane.b32.xlu0 %v1792_v40, %s7773_s0  ;;  %v594_v40 = vmul.f32 %v5795_v54, %v587_v9 }
 0x1ab   : > { %v619_v1 = vpop.permute.xlu1 %618 }
 0x1ac   : > { %1355 = vrot.lane.b32.xlu1 %v1350_v46, %s7774_s4  ;;  %v1873_v46 = vstv %s5771_s19  ;;  %s6087_s19 = sld [smem:[#allocation7 + $0x2]] }
 0x1ad   : > { %v5757_v2 = vpop.permute.xlu0 %777  ;;  %v1874_v47 = vmul.f32 %v1873_v46, %v5498_v62 }
 0x1ae   : > { %1810 = vrot.lane.b32.xlu0 %v1806_v55, %s7774_s4  ;;  %v578_v55 = vmul.f32 %v5801_v57, %v5683_v29  ;;  %v1438_v29 = vmul.f32 %v1436_v61, %v5641_v50  ;;  %v1894_v61 = vmul.f32 %v7746_v41, %v5522_v18 }
 0x1b0   : > { %1375 = vrot.lane.b32.xlu1 %v1370_v7, %s7773_s0  ;;  %v635_v58 = vpop.permute.xlu1 %634  ;;  %v596_v7 = vadd.f32 %v594_v40, %v578_v55  ;;  %v5858_v55 = vrot.slane %v431_v48, %v5363_v56  ;;  %v1472_v56 = vmul.f32 %v1470_v27, %v5665_v34 }
 0x1b2   : > { %1830 = vrot.lane.b32.xlu0 %v1826_v16, %s7773_s0  ;;  %v5777_v21 = vpop.permute.xlu0 %797  ;;  %v5823_v16 = vrot.slane %v431_v48, %v5351_v45  ;;  %v610_v45 = vmul.f32 %v5817_v38, %v5688_v25  ;;  %v1907_v25 = vstv %s5809_s14  ;;  %s6129_s14 = sld [smem:[#allocation4 + $0x51]] }
 0x1b4   : > { %1389 = vrot.lane.b32.xlu1 %v1384_v28, %s7774_s4 }
 0x1b5   : > { %v5786_v32 = vpop.permute.xlu1 %646 }
 0x1b6   : > { %1844 = vrot.lane.b32.xlu0 %v1840_v26, %s7774_s4  ;;  %v5840_v26 = vrot.slane %v431_v48, %v5359_v52 }
 0x1b7   : > { %v5798_v44 = vpop.permute.xlu0 %813 }
 0x1b8   : > { %1409 = vrot.lane.b32.xlu1 %v1404_v51, %s7773_s0  ;;  %v626_v51 = vmul.f32 %v5823_v16, %v619_v1  ;;  %v1452_v1 = vmul.f32 %v1450_v8, %v5641_v50  ;;  %v1927_v8 = vstv %s5832_s5  ;;  %s6138_s5 = sld [smem:[#allocation4 + $0x54]] }
 0x1ba   : > { %1864 = vrot.lane.b32.xlu0 %v1860_v0, %s7773_s0  ;;  %v5820_v9 = vpop.permute.xlu1 %662  ;;  %v612_v0 = vadd.f32 %v610_v45, %v596_v7  ;;  %v1908_v45 = vmul.f32 %v1907_v25, %v5522_v18 }
 0x1bc   : > { %v5825_v28 = vpop.permute.xlu0 %833  ;;  %1423 = vrot.lane.b32.xlu1 %v1418_v37, %s7774_s4  ;;  %v642_v37 = vmul.f32 %v5840_v26, %v635_v58  ;;  %v628_v7 = vadd.f32 %v626_v51, %v612_v0  ;;  %v658_v51 = vmul.f32 %v5858_v55, %v5725_v13  ;;  %v5875_v0 = vrot.slane %v431_v48, %v5378_v19 }
 0x1bd   : > { %v1928_v19 = vmul.f32 %v1927_v8, %v5546_v3 }
 0x1be   : > { %1878 = vrot.lane.b32.xlu0 %v1874_v47, %s7774_s4  ;;  %v667_v40 = vpop.permute.xlu1 %666  ;;  %v644_v47 = vadd.f32 %v642_v37, %v628_v7  ;;  %v974_v37 = vstv %s5844_s24  ;;  %s6147_s24 = sld [smem:[#allocation4 + $0x57]] }
 0x1c0   : > { %1443 = vrot.lane.b32.xlu1 %v1438_v29, %s7773_s0  ;;  %v5862_v29 = vrot.slane %v431_v48, %v5371_v4 }
 0x1c1   : > { %v5851_v52 = vpop.permute.xlu0 %849 }
 0x1c2   : > { %1898 = vrot.lane.b32.xlu0 %v1894_v61, %s7773_s0  ;;  %v674_v4 = vmul.f32 %v5862_v29, %v667_v40  ;;  %v660_v61 = vadd.f32 %v658_v51, %v644_v47  ;;  %v1486_v40 = vmul.f32 %v1484_v5, %v5665_v34  ;;  %v1506_v51 = vmul.f32 %v1504_v17, %v5697_v33 }
 0x1c3   : > { %v683_v58 = vpop.permute.xlu1 %682  ;;  %v1008_v5 = vstv %s5880_s6  ;;  %s4445_s6 = sld [smem:[#allocation4 + $0x13]] }
 0x1c4   : > { %1457 = vrot.lane.b32.xlu1 %v1452_v1, %s7774_s4  ;;  %v690_v1 = vmul.f32 %v5875_v0, %v683_v58  ;;  %v676_v7 = vadd.f32 %v674_v4, %v660_v61  ;;  %v975_v58 = vmul.f32 %v974_v37, %v5474_v35  ;;  %v1009_v17 = vmul.f32 %v1008_v5, %v5498_v62 }
 0x1c5   : > { %v952_v41 = vpop.permute.xlu0 %951 }
 0x1c6   : > { %1912 = vrot.lane.b32.xlu0 %v1908_v45, %s7774_s4  ;;  %v957_v27 = vadd.f32 %v952_v41, %v5527_v10  ;;  %v692_v10 = vadd.f32 %v690_v1, %v676_v7  ;;  %v1759_v7 = vmul.f32 %v1757_v30, %v5309_v24 }
 0x1c8   : > { %1477 = vrot.lane.b32.xlu1 %v1472_v56, %s7773_s0  ;;  %v773_v13 = vpop.permute.xlu1 %772 }
 0x1c9   : > { %v966_v48 = vpop.permute.xlu0 %965 }
 0x1ca   : > { %v971_v45 = vadd.f32 %v966_v48, %v957_v27  ;;  %1932 = vrot.lane.b32.xlu0 %v1928_v19, %s7773_s0  ;;  %v1520_v27 = vmul.f32 %v1518_v31, %v5697_v33 }
 0x1cc   : > { %1491 = vrot.lane.b32.xlu1 %v1486_v40, %s7774_s4  ;;  %v977_v41 = vadd.f32 %v975_v58, %v971_v45  ;;  %v1042_v58 = vstv %s5901_s17  ;;  %s4446_s17 = sld [smem:[#allocation4 + $0x14]] }
 0x1cd   : > { %v986_v47 = vpop.permute.xlu0 %985  ;;  %v786_v56 = vpop.permute.xlu1 %785 }
 0x1ce   : > { %697 = vrot.lane.b32.xlu0 %v692_v10, %s7775_s7  ;;  %v991_v4 = vadd.f32 %v986_v47, %v977_v41  ;;  %v1773_v41 = vmul.f32 %v1771_v14, %v5309_v24 }
 0x1d0   : > { %1511 = vrot.lane.b32.xlu1 %v1506_v51, %s7773_s0  ;;  %v1043_v51 = vmul.f32 %v1042_v58, %v5522_v18 }
 0x1d1   : > { %v1000_v61 = vpop.permute.xlu0 %999  ;;  %v5904_v1 = vpop.permute.xlu1 %789 }
 0x1d2   : > { %v1005_v19 = vadd.f32 %v1000_v61, %v991_v4 }
 0x1d4   : > { %1525 = vrot.lane.b32.xlu1 %v1520_v27, %s7774_s4  ;;  %v1011_v48 = vadd.f32 %v1009_v17, %v1005_v19  ;;  %v1793_v27 = vmul.f32 %v1791_v49, %v5517_v39  ;;  %v1076_v19 = vstv %s5919_s20  ;;  %v780_v49 = vmul.f32 %v773_v13, %v5801_v57  ;;  %s4448_s20 = sld [smem:[#allocation4 + $0x16]] }
 0x1d5   : > { %v1020_v40 = vpop.permute.xlu0 %1019  ;;  %v804_v13 = vmul.f32 %v5777_v21, %v5817_v38  ;;  %v1326_v21 = vstv %s5943_s23  ;;  %s4449_s23 = sld [smem:[#allocation4 + $0x17]] }
 0x1d6   : > { %v5916_v45 = vpop.permute.xlu1 %801  ;;  %v1025_v10 = vadd.f32 %v1020_v40, %v1011_v48  ;;  %v1807_v48 = vmul.f32 %v1805_v53, %v5517_v39  ;;  %v792_v40 = vmul.f32 %v786_v56, %v5795_v54  ;;  %v1827_v56 = vmul.f32 %v1825_v59, %v5617_v60 }
 0x1d7   : > { %v1841_v59 = vmul.f32 %v1839_v6, %v5617_v60  ;;  %v1861_v6 = vmul.f32 %v1859_v23, %v5641_v50 }
 0x1d8   : > { %1764 = vrot.lane.b32.xlu1 %v1759_v7, %s7773_s0 }
 0x1d9   : > { %v1034_v31 = vpop.permute.xlu0 %1033 }
 0x1da   : > { %v1039_v47 = vadd.f32 %v1034_v31, %v1025_v10  ;;  %v1077_v10 = vmul.f32 %v1076_v19, %v5546_v3 }
 0x1db   : > { %v810_v30 = vpop.permute.xlu1 %809 }
 0x1dc   : > { %1778 = vrot.lane.b32.xlu1 %v1773_v41, %s7774_s4  ;;  %v1045_v4 = vadd.f32 %v1043_v51, %v1039_v47  ;;  %v794_v47 = vadd.f32 %v792_v40, %v780_v49  ;;  %v1328_v51 = vstv %s5933_s26  ;;  %s4444_s26 = sld [smem:[#allocation4 + $0x12]] }
 0x1dd   : > { %v1054_v61 = vpop.permute.xlu0 %1053 }
 0x1de   : > { %v1059_v17 = vadd.f32 %v1054_v61, %v1045_v4  ;;  %v816_v4 = vmul.f32 %v810_v30, %v5823_v16  ;;  %v593_v30 = vmul.f32 %v5795_v54, %v5667_v15  ;;  %v840_v15 = vmul.f32 %v5825_v28, %v5858_v55 }
 0x1e0   : > { %1798 = vrot.lane.b32.xlu1 %v1793_v27, %s7773_s0  ;;  %v822_v24 = vpop.permute.xlu1 %821 }
 0x1e1   : > { %v1068_v14 = vpop.permute.xlu0 %1067 }
 0x1e2   : > { %v1073_v7 = vadd.f32 %v1068_v14, %v1059_v17  ;;  %v806_v17 = vadd.f32 %v804_v13, %v794_v47  ;;  %v828_v14 = vmul.f32 %v822_v24, %v5840_v26  ;;  %v1362_v47 = vstv %s5957_s10  ;;  %s6201_s10 = sld [smem:[#allocation4 + $0x36]] }
 0x1e4   : > { %1812 = vrot.lane.b32.xlu1 %v1807_v48, %s7774_s4  ;;  %v5947_v31 = vpop.permute.xlu1 %825  ;;  %v5949_v41 = vadd.f32 %v1077_v10, %v1073_v7  ;;  %v1329_v48 = vmul.f32 %v1328_v51, %v5304_v20  ;;  %v818_v40 = vadd.f32 %v816_v4, %v806_v17  ;;  %v577_v7 = vmul.f32 %v5801_v57, %v5670_v63 }
 0x1e5   : > { %v5951_v53 = vpop.permute.xlu0 %1087  ;;  %v609_v20 = vmul.f32 %v5817_v38, %v5720_v12  ;;  %v625_v4 = vmul.f32 %v5823_v16, %v5738_v42  ;;  %v1875_v17 = vmul.f32 %v1873_v46, %v5641_v50  ;;  %v793_v12 = vmul.f32 %v5904_v1, %v5795_v54 }
 0x1e6   : > { %v830_v49 = vadd.f32 %v828_v14, %v818_v40  ;;  %v1331_v24 = vadd.f32 %v1329_v48, %v1326_v21  ;;  %v595_v23 = vadd.f32 %v593_v30, %v577_v7  ;;  %v1363_v48 = vmul.f32 %v1362_v47, %v5449_v36 }
 0x1e7   : > { %v781_v30 = vmul.f32 %v5757_v2, %v5801_v57  ;;  %v805_v42 = vmul.f32 %v5916_v45, %v5817_v38  ;;  %v1941_v57 = vstv %s5985_s21  ;;  %v641_v38 = vmul.f32 %v5840_v26, %v5707_v22  ;;  %s6207_s21 = sld [smem:[#allocation4 + $0x19]] }
 0x1e8   : > { %1832 = vrot.lane.b32.xlu1 %v1827_v56, %s7773_s0  ;;  %v842_v14 = vadd.f32 %v840_v15, %v830_v49  ;;  %v611_v40 = vadd.f32 %v609_v20, %v595_v23  ;;  %v657_v45 = vmul.f32 %v5858_v55, %v5786_v32  ;;  %v1396_v15 = vstv %s5990_s25  ;;  %s6211_s25 = sld [smem:[#allocation4 + $0x1a]] }
 0x1e9   : > { %v5963_v61 = vpop.permute.xlu0 %1101  ;;  %v5965_v27 = vpop.permute.xlu1 %837  ;;  %v795_v49 = vadd.f32 %v793_v12, %v781_v30  ;;  %v1909_v22 = vmul.f32 %v1907_v25, %v5665_v34  ;;  %v817_v32 = vmul.f32 %v5798_v44, %v5823_v16  ;;  %v829_v12 = vmul.f32 %v5947_v31, %v5840_v26 }
 0x1ea   : > { %v627_v1 = vadd.f32 %v625_v4, %v611_v40  ;;  %v673_v4 = vmul.f32 %v5862_v29, %v5820_v9  ;;  %v841_v25 = vmul.f32 %v5965_v27, %v5858_v55 }
 0x1ec   : > { %1846 = vrot.lane.b32.xlu1 %v1841_v59, %s7774_s4  ;;  %v643_v23 = vadd.f32 %v641_v38, %v627_v1  ;;  %v976_v1 = vmul.f32 %v974_v37, %v5617_v60 }
 0x1ed   : > { %v1340_v10 = vpop.permute.xlu0 %1339 }
 0x1ee   : > { %v846_v56 = vpop.permute.xlu1 %845  ;;  %v1345_v63 = vadd.f32 %v1340_v10, %v1331_v24  ;;  %v659_v9 = vadd.f32 %v657_v45, %v643_v23 }
 0x1ef   : > { %v852_v13 = vmul.f32 %v846_v56, %v5862_v29  ;;  %v7776_v56 = vstv %s5789_s3  ;;  %s6116_s3 = sld [smem:[#allocation4 + $0x4e]] }
 0x1f0   : > { %1866 = vrot.lane.b32.xlu1 %v1861_v6, %s7773_s0  ;;  %v1895_v2 = vmul.f32 %v7776_v56, %v5665_v34  ;;  %v675_v16 = vadd.f32 %v673_v4, %v659_v9  ;;  %v1464_v4 = vstv %s6051_s13  ;;  %s6241_s13 = sld [smem:[#allocation4 + $0x1c]] }
 0x1f1   : > { %v1354_v59 = vpop.permute.xlu0 %1353  ;;  %v854_v46 = vadd.f32 %v852_v13, %v842_v14 }
 0x1f2   : > { %v1359_v28 = vadd.f32 %v1354_v59, %v1345_v63  ;;  %v807_v63 = vadd.f32 %v805_v42, %v795_v49  ;;  %v1430_v42 = vstv %s6016_s12  ;;  %s6219_s12 = sld [smem:[#allocation4 + $0x5a]] }
 0x1f3   : > { %v858_v7 = vpop.permute.xlu1 %857 }
 0x1f4   : > { %v864_v10 = vmul.f32 %v858_v7, %v5875_v0  ;;  %1880 = vrot.lane.b32.xlu1 %v1875_v17, %s7774_s4  ;;  %v1365_v54 = vadd.f32 %v1363_v48, %v1359_v28  ;;  %v1942_v17 = vmul.f32 %v1941_v57, %v5546_v3  ;;  %v1397_v28 = vmul.f32 %v1396_v15, %v5474_v35 }
 0x1f5   : > { %v1374_v6 = vpop.permute.xlu0 %1373  ;;  %v819_v40 = vadd.f32 %v817_v32, %v807_v63  ;;  %v1929_v7 = vmul.f32 %v1927_v8, %v5697_v33  ;;  %v1431_v8 = vmul.f32 %v1430_v42, %v5498_v62  ;;  %v1465_v32 = vmul.f32 %v1464_v4, %v5522_v18 }
 0x1f6   : > { %v866_v24 = vadd.f32 %v864_v10, %v854_v46  ;;  %v1379_v13 = vadd.f32 %v1374_v6, %v1365_v54  ;;  %v689_v46 = vmul.f32 %v5875_v0, %v5740_v11  ;;  %v853_v11 = vmul.f32 %v5851_v52, %v5862_v29 }
 0x1f7   : > { %v862_v20 = vpop.permute.xlu1 %861  ;;  %v831_v26 = vadd.f32 %v829_v12, %v819_v40  ;;  %v1498_v40 = vstv %s6065_s18  ;;  %s4455_s18 = sld [smem:[#allocation4 + $0x1d]] }
 0x1f8   : > { %1900 = vrot.lane.b32.xlu1 %v1895_v2, %s7773_s0  ;;  %870 = vrot.lane.b32.xlu0 %v866_v24, %s7775_s7  ;;  %v865_v49 = vmul.f32 %v862_v20, %v5875_v0  ;;  %v1010_v0 = vmul.f32 %v1008_v5, %v5641_v50 }
 0x1f9   : > { %v1388_v59 = vpop.permute.xlu0 %1387  ;;  %v843_v27 = vadd.f32 %v841_v25, %v831_v26  ;;  %v1499_v26 = vmul.f32 %v1498_v40, %v5546_v3 }
 0x1fa   : > { %v1393_v14 = vadd.f32 %v1388_v59, %v1379_v13 }
 0x1fb   : > { %v954_v48 = vpop.permute.xlu1 %953  ;;  %v855_v38 = vadd.f32 %v853_v11, %v843_v27 }
 0x1fc   : > { %1914 = vrot.lane.b32.xlu1 %v1909_v22, %s7774_s4  ;;  %1946 = vrot.lane.b32.xlu0 %v1942_v17, %s7774_s4  ;;  %v1399_v44 = vadd.f32 %v1397_v28, %v1393_v14  ;;  %v958_v31 = vadd.f32 %v954_v48, %v5539_v43  ;;  %v691_v43 = vadd.f32 %v689_v46, %v675_v16 }
 0x1fd   : > { %v1408_v30 = vpop.permute.xlu0 %1407  ;;  %v867_v63 = vadd.f32 %v865_v49, %v855_v38  ;;  %v1943_v17 = vmul.f32 %v1941_v57, %v5697_v33  ;;  %v1044_v57 = vmul.f32 %v1042_v58, %v5665_v34  ;;  %v1749_v49 = vstv %s6087_s19  ;;  %s4458_s19 = sld [smem:[#allocation4 + $0x20]] }
 0x1fe   : > { %v1413_v10 = vadd.f32 %v1408_v30, %v1399_v44 }
 0x1ff   : > { %v968_v55 = vpop.permute.xlu1 %967 }
 0x200   : > { %v972_v54 = vadd.f32 %v968_v55, %v958_v31  ;;  %1934 = vrot.lane.b32.xlu1 %v1929_v7, %s7773_s0 }
 0x201   : > { %v1422_v6 = vpop.permute.xlu0 %1421 }
 0x202   : > { %v1427_v24 = vadd.f32 %v1422_v6, %v1413_v10  ;;  %v978_v56 = vadd.f32 %v976_v1, %v972_v54  ;;  %v1751_v10 = vstv %s6079_s22  ;;  %v1078_v54 = vmul.f32 %v1076_v19, %v5697_v33  ;;  %v6103_v6 = vld [vmem:[#allocation2] sm:$0xff]  ;;  %s4457_s22 = sld [smem:[#allocation4 + $0x1f]] }
 0x203   : > { %v988_v2 = vpop.permute.xlu1 %987  ;;  %v1785_v19 = vstv %s6094_s2  ;;  %s4460_s2 = sld [smem:[#allocation4 + $0x22]] }
 0x204   : > { %695 = vrot.lane.b32.xlu1 %v691_v43, %s7775_s7  ;;  %v1433_v37 = vadd.f32 %v1431_v8, %v1427_v24  ;;  %v992_v13 = vadd.f32 %v988_v2, %v978_v56  ;;  %v1752_v8 = vmul.f32 %v6103_v6, %v1751_v10 }
 0x205   : > { %v1442_v45 = vpop.permute.xlu0 %1441 }
 0x206   : > { %v1447_v52 = vadd.f32 %v1442_v45, %v1433_v37  ;;  %v1754_v56 = vadd.f32 %v1752_v8, %v1749_v49  ;;  %v6118_v37 = vld [vmem:[#allocation2 + $0x8] sm:$0xff] }
 0x207   : > { %v1002_v23 = vpop.permute.xlu1 %1001  ;;  %v1330_v45 = vmul.f32 %v6118_v37, %v1328_v51 }
 0x208   : > { %v1006_v29 = vadd.f32 %v1002_v23, %v992_v13  ;;  %872 = vrot.lane.b32.xlu1 %v867_v63, %s7775_s7  ;;  %v1786_v23 = vmul.f32 %v1785_v19, %v5449_v36 }
 0x209   : > { %v1456_v20 = vpop.permute.xlu0 %1455 }
 0x20a   : > { %v1461_v59 = vadd.f32 %v1456_v20, %v1447_v52  ;;  %v1012_v22 = vadd.f32 %v1010_v0, %v1006_v29  ;;  %v1332_v29 = vadd.f32 %v1330_v45, %v1326_v21 }
 0x20b   : > { %v1022_v12 = vpop.permute.xlu1 %1021 }
 0x20c   : > { %1948 = vrot.lane.b32.xlu1 %v1943_v17, %s7774_s4  ;;  %v1467_v14 = vadd.f32 %v1465_v32, %v1461_v59  ;;  %v1026_v9 = vadd.f32 %v1022_v12, %v1012_v22  ;;  %v1819_v17 = vstv %s6116_s3  ;;  %v1364_v12 = vmul.f32 %v1362_v47, %v5517_v39  ;;  %s4461_s3 = sld [smem:[#allocation4 + $0x23]] }
 0x20d   : > { %v1476_v28 = vpop.permute.xlu0 %1475  ;;  %v1820_v21 = vmul.f32 %v1819_v17, %v5474_v35  ;;  %v1398_v47 = vmul.f32 %v1396_v15, %v5617_v60  ;;  %v1432_v15 = vmul.f32 %v1430_v42, %v5641_v50 }
 0x20e   : > { %v1481_v5 = vadd.f32 %v1476_v28, %v1467_v14 }
 0x20f   : > { %v1036_v48 = vpop.permute.xlu1 %1035 }
 0x210   : > { %v1040_v25 = vadd.f32 %v1036_v48, %v1026_v9 }
 0x211   : > { %v1490_v44 = vpop.permute.xlu0 %1489 }
 0x212   : > { %v1495_v16 = vadd.f32 %v1490_v44, %v1481_v5  ;;  %v1046_v30 = vadd.f32 %v1044_v57, %v1040_v25  ;;  %v1853_v44 = vstv %s6129_s14  ;;  %s4482_s14 = sld [smem:[#allocation4 + $0x37]] }
 0x213   : > { %v1056_v31 = vpop.permute.xlu1 %1055  ;;  %v1854_v35 = vmul.f32 %v1853_v44, %v5498_v62 }
 0x214   : > { %v6089_v7 = vadd.f32 %v1499_v26, %v1495_v16  ;;  %v1060_v55 = vadd.f32 %v1056_v31, %v1046_v30 }
 0x215   : > { %v6091_v46 = vpop.permute.xlu0 %1509 }
 0x217   : > { %v1070_v27 = vpop.permute.xlu1 %1069 }
 0x218   : > { %v1074_v58 = vadd.f32 %v1070_v27, %v1060_v55 }
 0x219   : > { %v6099_v1 = vpop.permute.xlu0 %1523 }
 0x21a   : > { %v6101_v43 = vadd.f32 %v1078_v54, %v1074_v58 }
 0x21b   : > { %v6108_v11 = vpop.permute.xlu1 %1089 }
 0x21d   : > { %v1763_v24 = vpop.permute.xlu0 %1762 }
 0x21e   : > { %v1768_v38 = vadd.f32 %v1763_v24, %v1754_v56  ;;  %v1887_v56 = vstv %s6138_s5  ;;  %s4483_s5 = sld [smem:[#allocation4 + $0x38]] }
 0x21f   : > { %v6113_v2 = vpop.permute.xlu1 %1103  ;;  %v1888_v62 = vmul.f32 %v1887_v56, %v5522_v18 }
 0x221   : > { %v1777_v63 = vpop.permute.xlu0 %1776 }
 0x222   : > { %v1782_v13 = vadd.f32 %v1777_v63, %v1768_v38 }
 0x223   : > { %v1342_v52 = vpop.permute.xlu1 %1341 }
 0x224   : > { %v1788_v0 = vadd.f32 %v1786_v23, %v1782_v13  ;;  %v1346_v59 = vadd.f32 %v1342_v52, %v1332_v29 }
 0x225   : > { %v1797_v20 = vpop.permute.xlu0 %1796 }
 0x226   : > { %v1802_v32 = vadd.f32 %v1797_v20, %v1788_v0 }
 0x227   : > { %v1356_v22 = vpop.permute.xlu1 %1355 }
 0x228   : > { %v1360_v51 = vadd.f32 %v1356_v22, %v1346_v59  ;;  %v1921_v22 = vstv %s6147_s24  ;;  %s4485_s24 = sld [smem:[#allocation4 + $0x3a]] }
 0x229   : > { %v1811_v14 = vpop.permute.xlu0 %1810 }
 0x22a   : > { %v1816_v28 = vadd.f32 %v1811_v14, %v1802_v32  ;;  %v1366_v36 = vadd.f32 %v1364_v12, %v1360_v51  ;;  %v1466_v12 = vmul.f32 %v1464_v4, %v5665_v34 }
 0x22b   : > { %v1376_v9 = vpop.permute.xlu1 %1375 }
 0x22c   : > { %v1822_v48 = vadd.f32 %v1820_v21, %v1816_v28  ;;  %v1380_v25 = vadd.f32 %v1376_v9, %v1366_v36  ;;  %v1922_v36 = vmul.f32 %v1921_v22, %v5546_v3 }
 0x22d   : > { %v1831_v5 = vpop.permute.xlu0 %1830 }
 0x22e   : > { %v1836_v16 = vadd.f32 %v1831_v5, %v1822_v48 }
 0x22f   : > { %v1390_v57 = vpop.permute.xlu1 %1389 }
 0x230   : > { %v1394_v30 = vadd.f32 %v1390_v57, %v1380_v25  ;;  %v1500_v57 = vmul.f32 %v1498_v40, %v5697_v33 }
 0x231   : > { %v1845_v26 = vpop.permute.xlu0 %1844 }
 0x232   : > { %v1850_v31 = vadd.f32 %v1845_v26, %v1836_v16  ;;  %v1400_v55 = vadd.f32 %v1398_v47, %v1394_v30  ;;  %v1753_v47 = vmul.f32 %v6118_v37, %v1751_v10 }
 0x233   : > { %v1410_v27 = vpop.permute.xlu1 %1409 }
 0x234   : > { %v1856_v58 = vadd.f32 %v1854_v35, %v1850_v31  ;;  %v1414_v8 = vadd.f32 %v1410_v27, %v1400_v55  ;;  %v1755_v31 = vadd.f32 %v1753_v47, %v1749_v49  ;;  %v1787_v27 = vmul.f32 %v1785_v19, %v5517_v39 }
 0x235   : > { %v1865_v54 = vpop.permute.xlu0 %1864  ;;  %v1093_v47 = vadd.f32 %v5951_v53, %v5949_v41 }
 0x236   : > { %v1870_v38 = vadd.f32 %v1865_v54, %v1856_v58 }
 0x237   : > { %v1424_v24 = vpop.permute.xlu1 %1423 }
 0x238   : > { %v1428_v45 = vadd.f32 %v1424_v24, %v1414_v8 }
 0x239   : > { %v1879_v63 = vpop.permute.xlu0 %1878 }
 0x23a   : > { %v1884_v13 = vadd.f32 %v1879_v63, %v1870_v38  ;;  %v1434_v23 = vadd.f32 %v1432_v15, %v1428_v45  ;;  %v1821_v45 = vmul.f32 %v1819_v17, %v5617_v60 }
 0x23b   : > { %v1444_v52 = vpop.permute.xlu1 %1443 }
 0x23c   : > { %v1890_v29 = vadd.f32 %v1888_v62, %v1884_v13  ;;  %v1448_v20 = vadd.f32 %v1444_v52, %v1434_v23  ;;  %v1855_v23 = vmul.f32 %v1853_v44, %v5641_v50 }
 0x23d   : > { %v1899_v0 = vpop.permute.xlu0 %1898 }
 0x23e   : > { %v1904_v32 = vadd.f32 %v1899_v0, %v1890_v29 }
 0x23f   : > { %v1458_v59 = vpop.permute.xlu1 %1457 }
 0x240   : > { %v1462_v51 = vadd.f32 %v1458_v59, %v1448_v20  ;;  %v1889_v20 = vmul.f32 %v1887_v56, %v5665_v34 }
 0x241   : > { %v1913_v14 = vpop.permute.xlu0 %1912 }
 0x242   : > { %v1918_v42 = vadd.f32 %v1913_v14, %v1904_v32  ;;  %v1468_v28 = vadd.f32 %v1466_v12, %v1462_v51  ;;  %v1923_v12 = vmul.f32 %v1921_v22, %v5697_v33  ;;  %v1130_v22 = vstv %s4446_s17  ;;  %s4488_s17 = sld [smem:[#allocation4 + $0x3d]] }
 0x243   : > { %v1478_v18 = vpop.permute.xlu1 %1477 }
 0x244   : > { %v6158_v21 = vadd.f32 %v1922_v36, %v1918_v42  ;;  %v1482_v48 = vadd.f32 %v1478_v18, %v1468_v28  ;;  %v1116_v28 = vstv %s4445_s6  ;;  %s4486_s6 = sld [smem:[#allocation4 + $0x3b]] }
 0x245   : > { %v6160_v9 = vpop.permute.xlu0 %1932 }
 0x247   : > { %v1492_v5 = vpop.permute.xlu1 %1491 }
 0x248   : > { %v1496_v25 = vadd.f32 %v1492_v5, %v1482_v48 }
 0x249   : > { %v698_v4 = vpop.permute.xlu0 %697 }
 0x24a   : > { %703 = vst.msk [vmem:[#allocation2 + $0x39] sm:$0xff] %vm412_vm2, %v698_v4  ;;  %v6166_v16 = vadd.f32 %v1500_v57, %v1496_v25  ;;  %v1150_v57 = vstv %s4448_s20  ;;  %v1110_v4 = vstv %s4444_s26  ;;  %s4489_s20 = sld [smem:[#allocation4 + $0x3e]] }
 0x24b   : > { %v6168_v30 = vpop.permute.xlu1 %1511  ;;  %s4491_s26 = sld [smem:[#allocation4 + $0x40]] }
 0x24f   : > { %v6170_v3 = vpop.permute.xlu1 %1525 }
 0x251   : > { %v6203_v5 = vld [vmem:[#allocation2 + $0x39] sm:$0xff] }
 0x253   : > { %v1765_v26 = vpop.permute.xlu1 %1764 }
 0x254   : > { %v1769_v55 = vadd.f32 %v1765_v26, %v1755_v31  ;;  %v1152_v26 = vmul.f32 %v1150_v57, %v6203_v5 }
 0x257   : > { %v1779_v35 = vpop.permute.xlu1 %1778 }
 0x258   : > { %v1783_v40 = vadd.f32 %v1779_v35, %v1769_v55  ;;  %v1094_v55 = vadd.f32 %v6108_v11, %v6101_v43  ;;  %v1164_v35 = vstv %s4449_s23  ;;  %s4492_s23 = sld [smem:[#allocation4 + $0x41]] }
 0x25a   : > { %v1789_v58 = vadd.f32 %v1787_v27, %v1783_v40  ;;  %v1107_v40 = vadd.f32 %v5963_v61, %v1093_v47  ;;  %v1108_v41 = vadd.f32 %v6113_v2, %v1094_v55  ;;  %v1515_v61 = vadd.f32 %v6091_v46, %v6089_v7 }
 0x25b   : > { %v1799_v54 = vpop.permute.xlu1 %1798  ;;  %v1184_v2 = vstv %s6207_s21  ;;  %s4495_s21 = sld [smem:[#allocation4 + $0x44]] }
 0x25c   : > { %v1803_v8 = vadd.f32 %v1799_v54, %v1789_v58  ;;  %v1166_v58 = vmul.f32 %v1164_v35, %v6203_v5  ;;  %v1532_v54 = vstv %s6201_s10  ;;  %s4494_s10 = sld [smem:[#allocation4 + $0x43]] }
 0x25f   : > { %v1813_v24 = vpop.permute.xlu1 %1812 }
 0x260   : > { %v1817_v38 = vadd.f32 %v1813_v24, %v1803_v8  ;;  %v6234_v8 = vld [vmem:[#allocation2 + $0x3a] sm:$0xff]  ;;  %v1516_v24 = vadd.f32 %v6168_v30, %v6166_v16 }
 0x262   : > { %v1823_v15 = vadd.f32 %v1821_v45, %v1817_v38  ;;  %v1530_v7 = vadd.f32 %v6170_v3, %v1516_v24  ;;  %v1572_v24 = vstv %s4485_s24  ;;  %s6376_s24 = sld [smem:[#allocation4 + $0x65]] }
 0x263   : > { %v1833_v10 = vpop.permute.xlu1 %1832 }
 0x264   : > { %v1837_v63 = vadd.f32 %v1833_v10, %v1823_v15  ;;  %v1529_v15 = vadd.f32 %v6099_v1, %v1515_v61  ;;  %v1198_v10 = vstv %s6211_s25  ;;  %v1938_v1 = vadd.f32 %v6160_v9, %v6158_v21  ;;  %s4497_s25 = sld [smem:[#allocation4 + $0x46]] }
 0x265   : > { %v1218_v21 = vstv %s6241_s13  ;;  %s4519_s13 = sld [smem:[#allocation4 + $0x5b]] }
 0x267   : > { %v1847_v13 = vpop.permute.xlu1 %1846 }
 0x268   : > { %v1851_v49 = vadd.f32 %v1847_v13, %v1837_v63  ;;  %v1186_v63 = vmul.f32 %v1184_v2, %v6234_v8 }
 0x26a   : > { %v871_v62 = vpop.permute.xlu0 %870  ;;  %v1857_v52 = vadd.f32 %v1855_v23, %v1851_v49 }
 0x26b   : > { %877 = vst.msk [vmem:[#allocation2 + $0x49] sm:$0xff] %vm412_vm2, %v871_v62  ;;  %v1867_v39 = vpop.permute.xlu1 %1866 }
 0x26c   : > { %v1871_v19 = vadd.f32 %v1867_v39, %v1857_v52  ;;  %v1955_v52 = vstv %s6219_s12  ;;  %s4498_s12 = sld [smem:[#allocation4 + $0x47]] }
 0x26e   : > { %v1947_v23 = vpop.permute.xlu0 %1946 }
 0x26f   : > { %v1881_v29 = vpop.permute.xlu1 %1880 }
 0x270   : > { %v1885_v0 = vadd.f32 %v1881_v29, %v1871_v19  ;;  %v1200_v19 = vmul.f32 %v1198_v10, %v6234_v8  ;;  %v1952_v29 = vadd.f32 %v1947_v23, %v1938_v1 }
 0x272   : > { %v1891_v59 = vadd.f32 %v1889_v20, %v1885_v0 }
 0x273   : > { %v1901_v60 = vpop.permute.xlu1 %1900 }
 0x274   : > { %v1905_v17 = vadd.f32 %v1901_v60, %v1891_v59  ;;  %v6267_v60 = vld [vmem:[#allocation2 + $0x48] sm:$0xff] }
 0x277   : > { %v1915_v32 = vpop.permute.xlu1 %1914 }
 0x278   : > { %v1919_v51 = vadd.f32 %v1915_v32, %v1905_v17 }
 0x27a   : > { %v1925_v14 = vadd.f32 %v1923_v12, %v1919_v51  ;;  %v1219_v51 = vmul.f32 %v1218_v21, %v6267_v60 }
 0x27b   : > { %v1935_v42 = vpop.permute.xlu1 %1934 }
 0x27c   : > { %v1939_v30 = vadd.f32 %v1935_v42, %v1925_v14  ;;  %v1232_v14 = vstv %s4455_s18  ;;  %s4520_s18 = sld [smem:[#allocation4 + $0x5c]] }
 0x27d   : > { %v1233_v42 = vmul.f32 %v1232_v14, %v6267_v60 }
 0x27f   : > { %v696_v50 = vpop.permute.xlu1 %695 }
 0x280   : > { %702 = vst.msk [vmem:[#allocation2 + $0x31] sm:$0xff] %vm412_vm2, %v696_v50 }
 0x283   : > { %v873_v44 = vpop.permute.xlu1 %872 }
 0x284   : > { %878 = vst.msk [vmem:[#allocation2 + $0x51] sm:$0xff] %vm412_vm2, %v873_v44  ;;  %v6284_v44 = vld [vmem:[#allocation2 + $0x49] sm:$0xff] }
 0x287   : > { %v6191_v34 = vld [vmem:[#allocation2 + $0x30] sm:$0xff]  ;;  %v6193_v56 = vld [vmem:[#allocation2 + $0x38] sm:$0xff]  ;;  %v1949_v46 = vpop.permute.xlu1 %1948 }
 0x288   : > { %v1118_v36 = vmul.f32 %v1116_v28, %v6193_v56  ;;  %v1117_v33 = vmul.f32 %v1116_v28, %v6191_v34  ;;  %v1132_v18 = vmul.f32 %v1130_v22, %v6193_v56  ;;  %v1131_v48 = vmul.f32 %v1130_v22, %v6191_v34  ;;  %v6205_v25 = vld [vmem:[#allocation2 + $0x31] sm:$0xff] }
 0x289   : > { %v1151_v31 = vmul.f32 %v1150_v57, %v6205_v25  ;;  %v1111_v27 = vmul.f32 %v1110_v4, %v6191_v34  ;;  %v1112_v53 = vmul.f32 %v1110_v4, %v6193_v56  ;;  %v1165_v43 = vmul.f32 %v1164_v35, %v6205_v25  ;;  %v6238_v38 = vld [vmem:[#allocation2 + $0x32] sm:$0xff] }
 0x28a   : > { %1123 = vrot.lane.b32.xlu1 %v1118_v36, %s7773_s0  ;;  %1121 = vrot.lane.b32.xlu0 %v1117_v33, %s7773_s0  ;;  %v1533_v16 = vmul.f32 %v1532_v54, %v6191_v34  ;;  %v1185_v13 = vmul.f32 %v1184_v2, %v6238_v38  ;;  %v1534_v49 = vmul.f32 %v1532_v54, %v6193_v56  ;;  %v1252_v36 = vstv %s4457_s22  ;;  %s4522_s22 = sld [smem:[#allocation4 + $0x5e]] }
 0x28b   : > { %v6229_v11 = vadd.f32 %v1111_v27, %v1107_v40  ;;  %v6243_v45 = vadd.f32 %v1112_v53, %v1108_v41  ;;  %v1953_v3 = vadd.f32 %v1949_v46, %v1939_v30  ;;  %v1199_v0 = vmul.f32 %v1198_v10, %v6238_v38  ;;  %v6269_v17 = vld [vmem:[#allocation2 + $0x50] sm:$0xff] }
 0x28c   : > { %v6254_v62 = vadd.f32 %v1533_v16, %v1529_v15  ;;  %v6261_v39 = vadd.f32 %v1534_v49, %v1530_v7  ;;  %v1956_v20 = vmul.f32 %v1955_v52, %v6191_v34  ;;  %v1957_v59 = vmul.f32 %v1955_v52, %v6193_v56  ;;  %v6286_v28 = vld [vmem:[#allocation2 + $0x51] sm:$0xff] }
 0x28d   : > { %v1220_v12 = vmul.f32 %v1218_v21, %v6269_v17  ;;  %v1234_v50 = vmul.f32 %v1232_v14, %v6269_v17  ;;  %v1253_v33 = vmul.f32 %v1252_v36, %v6284_v44  ;;  %v1254_v22 = vmul.f32 %v1252_v36, %v6286_v28  ;;  %v6296_v4 = vld [vmem:[#allocation2 + $0x4a] sm:$0xff]  ;;  %v6298_v47 = vld [vmem:[#allocation2 + $0x52] sm:$0xff] }
 0x28e   : > { %1137 = vrot.lane.b32.xlu1 %v1132_v18, %s7774_s4  ;;  %1135 = vrot.lane.b32.xlu0 %v1131_v48, %s7774_s4  ;;  %v6274_v9 = vadd.f32 %v1956_v20, %v1952_v29  ;;  %v6276_v32 = vadd.f32 %v1957_v59, %v1953_v3  ;;  %v1266_v18 = vstv %s4458_s19  ;;  %v1300_v35 = vstv %s4461_s3  ;;  %s4523_s19 = sld [smem:[#allocation4 + $0x5f]] }
 0x28f   : > { %v1267_v48 = vmul.f32 %v1266_v18, %v6284_v44  ;;  %v1268_v57 = vmul.f32 %v1266_v18, %v6286_v28  ;;  %v1301_v40 = vmul.f32 %v1300_v35, %v6296_v4  ;;  %v1302_v27 = vmul.f32 %v1300_v35, %v6298_v47  ;;  %s4526_s3 = sld [smem:[#allocation4 + $0x62]] }
 0x290   : > { %v1538_v41 = vstv %s4482_s14  ;;  %v1573_v2 = vmul.f32 %v1572_v24, %v6205_v25  ;;  %v1574_v15 = vmul.f32 %v1572_v24, %v6203_v5  ;;  %v1586_v7 = vstv %s4486_s6  ;;  %s4528_s14 = sld [smem:[#allocation4 + $0x64]] }
 0x291   : > { %v1539_v53 = vmul.f32 %v1538_v41, %v6191_v34  ;;  %v1587_v46 = vmul.f32 %v1586_v7, %v6205_v25  ;;  %v1588_v10 = vmul.f32 %v1586_v7, %v6203_v5  ;;  %v1606_v16 = vstv %s4488_s17  ;;  %s6382_s6 = sld [smem:[#allocation4 + $0x67]] }
 0x292   : > { %1157 = vrot.lane.b32.xlu1 %v1152_v26, %s7773_s0  ;;  %1155 = vrot.lane.b32.xlu0 %v1151_v31, %s7773_s0  ;;  %v1286_v26 = vstv %s4460_s2  ;;  %v1607_v30 = vmul.f32 %v1606_v16, %v6238_v38  ;;  %v1640_v52 = vstv %s4491_s26  ;;  %s4525_s2 = sld [smem:[#allocation4 + $0x61]] }
 0x293   : > { %v1287_v31 = vmul.f32 %v1286_v26, %v6296_v4  ;;  %v1288_v55 = vmul.f32 %v1286_v26, %v6298_v47  ;;  %v1641_v1 = vmul.f32 %v1640_v52, %v6267_v60  ;;  %v1642_v3 = vmul.f32 %v1640_v52, %v6269_v17  ;;  %s6386_s17 = sld [smem:[#allocation4 + $0x18]] }
 0x294   : > { %v1674_v20 = vstv %s4494_s10  ;;  %s6402_s26 = sld [smem:[#allocation4 + $0x6a]] }
 0x295   : > { %v1675_v59 = vmul.f32 %v1674_v20, %v6284_v44  ;;  %v1676_v21 = vmul.f32 %v1674_v20, %v6286_v28  ;;  %s6412_s10 = sld [smem:[#allocation4 + $0x6b]] }
 0x296   : > { %1171 = vrot.lane.b32.xlu1 %v1166_v58, %s7774_s4  ;;  %1169 = vrot.lane.b32.xlu0 %v1165_v43, %s7774_s4  ;;  %v1540_v58 = vmul.f32 %v1538_v41, %v6193_v56  ;;  %v1552_v43 = vstv %s4483_s5  ;;  %s4447_s5 = sld [smem:[#allocation4 + $0x15]] }
 0x297   : > { %v1553_v54 = vmul.f32 %v1552_v43, %v6191_v34  ;;  %v1554_v61 = vmul.f32 %v1552_v43, %v6193_v56 }
 0x29a   : > { %1191 = vrot.lane.b32.xlu1 %v1186_v63, %s7773_s0  ;;  %1189 = vrot.lane.b32.xlu0 %v1185_v13, %s7773_s0  ;;  %v1608_v63 = vmul.f32 %v1606_v16, %v6234_v8  ;;  %v1620_v13 = vstv %s4489_s20  ;;  %v2063_v16 = vstv %s4528_s14  ;;  %s6393_s20 = sld [smem:[#allocation4 + $0x68]] }
 0x29b   : > { %v1621_v49 = vmul.f32 %v1620_v13, %v6238_v38  ;;  %v1622_v23 = vmul.f32 %v1620_v13, %v6234_v8  ;;  %v2064_v52 = vmul.f32 %v2063_v16, %v6267_v60  ;;  %s6490_s14 = sld [smem:[#allocation4 + $0x39]] }
 0x29e   : > { %1205 = vrot.lane.b32.xlu1 %v1200_v19, %s7774_s4  ;;  %1203 = vrot.lane.b32.xlu0 %v1199_v0, %s7774_s4  ;;  %v1654_v19 = vstv %s4492_s23  ;;  %s6407_s23 = sld [smem:[#allocation4 + $0x1b]] }
 0x29f   : > { %v1655_v29 = vmul.f32 %v1654_v19, %v6267_v60  ;;  %v1656_v0 = vmul.f32 %v1654_v19, %v6269_v17 }
 0x2a2   : > { %1223 = vrot.lane.b32.xlu0 %v1219_v51, %s7773_s0  ;;  %1225 = vrot.lane.b32.xlu1 %v1220_v12, %s7773_s0  ;;  %v1688_v51 = vstv %s4495_s21  ;;  %s6421_s21 = sld [smem:[#allocation4 + $0x6d]] }
 0x2a3   : > { %v1689_v12 = vmul.f32 %v1688_v51, %v6284_v44  ;;  %v1690_v14 = vmul.f32 %v1688_v51, %v6286_v28 }
 0x2a6   : > { %1237 = vrot.lane.b32.xlu0 %v1233_v42, %s7774_s4  ;;  %1239 = vrot.lane.b32.xlu1 %v1234_v50, %s7774_s4  ;;  %v1708_v42 = vstv %s4497_s25  ;;  %s6426_s25 = sld [smem:[#allocation4 + $0x1e]] }
 0x2a7   : > { %v1709_v50 = vmul.f32 %v1708_v42, %v6296_v4  ;;  %v1710_v36 = vmul.f32 %v1708_v42, %v6298_v47  ;;  %v1178_v42 = vstv %s6386_s17  ;;  %s6525_s17 = sld [smem:[#allocation4 + $0x7a]] }
 0x2aa   : > { %1257 = vrot.lane.b32.xlu0 %v1253_v33, %s7773_s0  ;;  %1259 = vrot.lane.b32.xlu1 %v1254_v22, %s7773_s0  ;;  %v1722_v33 = vstv %s4498_s12  ;;  %s6431_s12 = sld [smem:[#allocation4 + $0x6e]] }
 0x2ab   : > { %v1723_v22 = vmul.f32 %v1722_v33, %v6296_v4  ;;  %v1724_v18 = vmul.f32 %v1722_v33, %v6298_v47 }
 0x2ae   : > { %1271 = vrot.lane.b32.xlu0 %v1267_v48, %s7774_s4  ;;  %1273 = vrot.lane.b32.xlu1 %v1268_v57, %s7774_s4  ;;  %v1961_v48 = vstv %s4519_s13  ;;  %s6440_s13 = sld [smem:[#allocation4 + $0x70]] }
 0x2af   : > { %v1962_v57 = vmul.f32 %v1961_v48, %v6191_v34  ;;  %v1963_v26 = vmul.f32 %v1961_v48, %v6193_v56 }
 0x2b2   : > { %1291 = vrot.lane.b32.xlu0 %v1287_v31, %s7773_s0  ;;  %1293 = vrot.lane.b32.xlu1 %v1288_v55, %s7773_s0  ;;  %v1975_v31 = vstv %s4520_s18  ;;  %s6445_s18 = sld [smem:[#allocation4 + $0x21]] }
 0x2b3   : > { %v1976_v55 = vmul.f32 %v1975_v31, %v6191_v34  ;;  %v1977_v35 = vmul.f32 %v1975_v31, %v6193_v56 }
 0x2b6   : > { %1305 = vrot.lane.b32.xlu0 %v1301_v40, %s7774_s4  ;;  %1307 = vrot.lane.b32.xlu1 %v1302_v27, %s7774_s4  ;;  %v1995_v40 = vstv %s4522_s22  ;;  %s6450_s22 = sld [smem:[#allocation4 + $0x71]] }
 0x2b7   : > { %v1996_v27 = vmul.f32 %v1995_v40, %v6205_v25  ;;  %v1997_v41 = vmul.f32 %v1995_v40, %v6203_v5 }
 0x2ba   : > { %1543 = vrot.lane.b32.xlu0 %v1539_v53, %s7773_s0  ;;  %1545 = vrot.lane.b32.xlu1 %v1540_v58, %s7773_s0  ;;  %v2009_v53 = vstv %s4523_s19  ;;  %s6459_s19 = sld [smem:[#allocation4 + $0x73]] }
 0x2bb   : > { %v2010_v58 = vmul.f32 %v2009_v53, %v6205_v25  ;;  %v2011_v43 = vmul.f32 %v2009_v53, %v6203_v5 }
 0x2be   : > { %1557 = vrot.lane.b32.xlu0 %v1553_v54, %s7774_s4  ;;  %1559 = vrot.lane.b32.xlu1 %v1554_v61, %s7774_s4  ;;  %v2029_v54 = vstv %s4525_s2  ;;  %s4545_s2 = sld [smem:[#allocation4 + $0x74]] }
 0x2bf   : > { %v2030_v61 = vmul.f32 %v2029_v54, %v6238_v38  ;;  %v2031_v24 = vmul.f32 %v2029_v54, %v6234_v8  ;;  %v2131_v54 = vstv %s6402_s26  ;;  %s6539_s26 = sld [smem:[#allocation4 + $0x3f]] }
 0x2c2   : > { %1577 = vrot.lane.b32.xlu0 %v1573_v2, %s7773_s0  ;;  %1579 = vrot.lane.b32.xlu1 %v1574_v15, %s7773_s0  ;;  %v2043_v2 = vstv %s4526_s3  ;;  %s6486_s3 = sld [smem:[#allocation4 + $0x76]] }
 0x2c6   : > { %1591 = vrot.lane.b32.xlu0 %v1587_v46, %s7774_s4  ;;  %1593 = vrot.lane.b32.xlu1 %v1588_v10, %s7774_s4  ;;  %v2044_v46 = vmul.f32 %v2043_v2, %v6238_v38  ;;  %v2045_v10 = vmul.f32 %v2043_v2, %v6234_v8 }
 0x2ca   : > { %1611 = vrot.lane.b32.xlu0 %v1607_v30, %s7773_s0  ;;  %1613 = vrot.lane.b32.xlu1 %v1608_v63, %s7773_s0  ;;  %v1144_v30 = vstv %s4447_s5  ;;  %s6502_s5 = sld [smem:[#allocation4 + $0x77]] }
 0x2cb   : > { %v1146_v20 = vmul.f32 %v1144_v30, %v6203_v5 }
 0x2ce   : > { %1625 = vrot.lane.b32.xlu0 %v1621_v49, %s7774_s4  ;;  %1627 = vrot.lane.b32.xlu1 %v1622_v23, %s7774_s4 }
 0x2d2   : > { %1645 = vrot.lane.b32.xlu0 %v1641_v1, %s7773_s0  ;;  %1647 = vrot.lane.b32.xlu1 %v1642_v3, %s7773_s0  ;;  %v2065_v1 = vmul.f32 %v2063_v16, %v6269_v17  ;;  %v2077_v3 = vstv %s6376_s24  ;;  %v2145_v16 = vstv %s6412_s10  ;;  %s6509_s24 = sld [smem:[#allocation4 + $0x79]] }
 0x2d3   : > { %v2078_v51 = vmul.f32 %v2077_v3, %v6267_v60  ;;  %s6557_s10 = sld [smem:[#allocation4 + $0x7f]] }
 0x2d6   : > { %1659 = vrot.lane.b32.xlu0 %v1655_v29, %s7774_s4  ;;  %1661 = vrot.lane.b32.xlu1 %v1656_v0, %s7774_s4  ;;  %v1145_v0 = vmul.f32 %v1144_v30, %v6205_v25 }
 0x2da   : > { %1679 = vrot.lane.b32.xlu0 %v1675_v59, %s7773_s0  ;;  %1681 = vrot.lane.b32.xlu1 %v1676_v21, %s7773_s0 }
 0x2de   : > { %1693 = vrot.lane.b32.xlu0 %v1689_v12, %s7774_s4  ;;  %1695 = vrot.lane.b32.xlu1 %v1690_v14, %s7774_s4  ;;  %v2079_v12 = vmul.f32 %v2077_v3, %v6269_v17  ;;  %v2097_v14 = vstv %s6382_s6  ;;  %s6514_s6 = sld [smem:[#allocation4 + $0x3c]] }
 0x2df   : > { %v2099_v48 = vmul.f32 %v2097_v14, %v6286_v28 }
 0x2e2   : > { %1713 = vrot.lane.b32.xlu0 %v1709_v50, %s7773_s0  ;;  %1715 = vrot.lane.b32.xlu1 %v1710_v36, %s7773_s0 }
 0x2e6   : > { %1727 = vrot.lane.b32.xlu0 %v1723_v22, %s7774_s4  ;;  %1729 = vrot.lane.b32.xlu1 %v1724_v18, %s7774_s4  ;;  %v2098_v18 = vmul.f32 %v2097_v14, %v6284_v44  ;;  %v2194_v14 = vstv %s6431_s12  ;;  %s6580_s12 = sld [smem:[#allocation4 + $0x82]] }
 0x2ea   : > { %1966 = vrot.lane.b32.xlu0 %v1962_v57, %s7773_s0  ;;  %1968 = vrot.lane.b32.xlu1 %v1963_v26, %s7773_s0  ;;  %v2111_v57 = vstv %s6393_s20  ;;  %s6534_s20 = sld [smem:[#allocation4 + $0x7c]] }
 0x2ee   : > { %1980 = vrot.lane.b32.xlu0 %v1976_v55, %s7774_s4  ;;  %1982 = vrot.lane.b32.xlu1 %v1977_v35, %s7774_s4  ;;  %v1179_v55 = vmul.f32 %v1178_v42, %v6238_v38  ;;  %v1180_v35 = vmul.f32 %v1178_v42, %v6234_v8 }
 0x2f2   : > { %2000 = vrot.lane.b32.xlu0 %v1996_v27, %s7773_s0  ;;  %2002 = vrot.lane.b32.xlu1 %v1997_v41, %s7773_s0 }
 0x2f6   : > { %2014 = vrot.lane.b32.xlu0 %v2010_v58, %s7774_s4  ;;  %2016 = vrot.lane.b32.xlu1 %v2011_v43, %s7774_s4  ;;  %v2112_v58 = vmul.f32 %v2111_v57, %v6284_v44  ;;  %v2113_v43 = vmul.f32 %v2111_v57, %v6286_v28 }
 0x2fa   : > { %2034 = vrot.lane.b32.xlu0 %v2030_v61, %s7773_s0  ;;  %2036 = vrot.lane.b32.xlu1 %v2031_v24, %s7773_s0  ;;  %v1212_v61 = vstv %s6407_s23  ;;  %s6548_s23 = sld [smem:[#allocation4 + $0x7d]] }
 0x2fc   : > { %v1122_v15 = vpop.permute.xlu0 %1121  ;;  %v1124_v7 = vpop.permute.xlu1 %1123 }
 0x2fd   : > { %v1127_v63 = vadd.f32 %v1122_v15, %v6229_v11  ;;  %v1128_v13 = vadd.f32 %v1124_v7, %v6243_v45 }
 0x2fe   : > { %2048 = vrot.lane.b32.xlu0 %v2044_v46, %s7774_s4  ;;  %2050 = vrot.lane.b32.xlu1 %v2045_v10, %s7774_s4  ;;  %v2132_v46 = vmul.f32 %v2131_v54, %v6296_v4  ;;  %v2133_v10 = vmul.f32 %v2131_v54, %v6298_v47  ;;  %v6467_v54 = vld [vmem:[#allocation2 + $0x9] sm:$0xff] }
 0x300   : > { %v1136_v49 = vpop.permute.xlu0 %1135  ;;  %v1138_v23 = vpop.permute.xlu1 %1137 }
 0x301   : > { %v1141_v19 = vadd.f32 %v1136_v49, %v1127_v63  ;;  %v1142_v29 = vadd.f32 %v1138_v23, %v1128_v13  ;;  %v1213_v13 = vmul.f32 %v1212_v61, %v6267_v60  ;;  %v1214_v49 = vmul.f32 %v1212_v61, %v6269_v17 }
 0x302   : > { %2068 = vrot.lane.b32.xlu0 %v2064_v52, %s7773_s0  ;;  %2070 = vrot.lane.b32.xlu1 %v2065_v1, %s7773_s0 }
 0x303   : > { %v1147_v11 = vadd.f32 %v1145_v0, %v1141_v19  ;;  %v1148_v45 = vadd.f32 %v1146_v20, %v1142_v29  ;;  %v2146_v19 = vmul.f32 %v2145_v16, %v6296_v4  ;;  %v2147_v29 = vmul.f32 %v2145_v16, %v6298_v47 }
 0x304   : > { %v1156_v59 = vpop.permute.xlu0 %1155  ;;  %v1158_v21 = vpop.permute.xlu1 %1157  ;;  %v2180_v0 = vstv %s6421_s21  ;;  %v1246_v20 = vstv %s6426_s25  ;;  %s6562_s21 = sld [smem:[#allocation4 + $0x42]] }
 0x305   : > { %v1161_v50 = vadd.f32 %v1156_v59, %v1147_v11  ;;  %v1162_v36 = vadd.f32 %v1158_v21, %v1148_v45  ;;  %s6571_s25 = sld [smem:[#allocation4 + $0x80]] }
 0x306   : > { %2082 = vrot.lane.b32.xlu0 %v2078_v51, %s7774_s4  ;;  %2084 = vrot.lane.b32.xlu1 %v2079_v12, %s7774_s4  ;;  %v2181_v51 = vmul.f32 %v6103_v6, %v2180_v0  ;;  %v2182_v12 = vmul.f32 %v6118_v37, %v2180_v0 }
 0x308   : > { %v1170_v33 = vpop.permute.xlu0 %1169  ;;  %v1172_v22 = vpop.permute.xlu1 %1171 }
 0x309   : > { %v1175_v26 = vadd.f32 %v1170_v33, %v1161_v50  ;;  %v1176_v31 = vadd.f32 %v1172_v22, %v1162_v36  ;;  %v1247_v36 = vmul.f32 %v1246_v20, %v6284_v44  ;;  %v1248_v33 = vmul.f32 %v1246_v20, %v6286_v28 }
 0x30a   : > { %2102 = vrot.lane.b32.xlu0 %v2098_v18, %s7773_s0  ;;  %2104 = vrot.lane.b32.xlu1 %v2099_v48, %s7773_s0 }
 0x30b   : > { %v1181_v40 = vadd.f32 %v1179_v55, %v1175_v26  ;;  %v1182_v27 = vadd.f32 %v1180_v35, %v1176_v31  ;;  %v2195_v26 = vmul.f32 %v6103_v6, %v2194_v14  ;;  %v2196_v31 = vmul.f32 %v6118_v37, %v2194_v14 }
 0x30c   : > { %v1190_v41 = vpop.permute.xlu0 %1189  ;;  %v1192_v53 = vpop.permute.xlu1 %1191  ;;  %v2214_v55 = vstv %s6440_s13  ;;  %v1280_v35 = vstv %s6445_s18  ;;  %v2228_v37 = vstv %s6450_s22  ;;  %s6585_s13 = sld [smem:[#allocation4 + $0x45]] }
 0x30d   : > { %v1195_v24 = vadd.f32 %v1190_v41, %v1181_v40  ;;  %v1196_v2 = vadd.f32 %v1192_v53, %v1182_v27  ;;  %v2216_v6 = vmul.f32 %v6467_v54, %v2214_v55  ;;  %s6590_s18 = sld [smem:[#allocation4 + $0x83]] }
 0x30e   : > { %2116 = vrot.lane.b32.xlu0 %v2112_v58, %s7774_s4  ;;  %2118 = vrot.lane.b32.xlu1 %v2113_v43, %s7774_s4  ;;  %v6464_v58 = vld [vmem:[#allocation2 + $0x1] sm:$0xff]  ;;  %s6599_s22 = sld [smem:[#allocation4 + $0x85]] }
 0x30f   : > { %v2215_v43 = vmul.f32 %v6464_v58, %v2214_v55 }
 0x310   : > { %v1204_v15 = vpop.permute.xlu0 %1203  ;;  %v1206_v7 = vpop.permute.xlu1 %1205 }
 0x311   : > { %v1209_v30 = vadd.f32 %v1204_v15, %v1195_v24  ;;  %v1210_v63 = vadd.f32 %v1206_v7, %v1196_v2  ;;  %v1281_v2 = vmul.f32 %v1280_v35, %v6296_v4  ;;  %v1282_v15 = vmul.f32 %v1280_v35, %v6298_v47 }
 0x312   : > { %2136 = vrot.lane.b32.xlu0 %v2132_v46, %s7773_s0  ;;  %2138 = vrot.lane.b32.xlu1 %v2133_v10, %s7773_s0 }
 0x313   : > { %v1215_v23 = vadd.f32 %v1213_v13, %v1209_v30  ;;  %v1216_v52 = vadd.f32 %v1214_v49, %v1210_v63  ;;  %v2229_v30 = vmul.f32 %v6464_v58, %v2228_v37  ;;  %v2230_v63 = vmul.f32 %v6467_v54, %v2228_v37 }
 0x314   : > { %v1224_v1 = vpop.permute.xlu0 %1223  ;;  %v1226_v3 = vpop.permute.xlu1 %1225  ;;  %v2248_v13 = vstv %s6459_s19  ;;  %s4563_s19 = sld [smem:[#allocation4 + $0x86]] }
 0x315   : > { %v1229_v11 = vadd.f32 %v1224_v1, %v1215_v23  ;;  %v1230_v45 = vadd.f32 %v1226_v3, %v1216_v52  ;;  %v6496_v52 = vld [vmem:[#allocation2 + $0x2] sm:$0xff]  ;;  %v6499_v3 = vld [vmem:[#allocation2 + $0xa] sm:$0xff] }
 0x316   : > { %2150 = vrot.lane.b32.xlu0 %v2146_v19, %s7774_s4  ;;  %2152 = vrot.lane.b32.xlu1 %v2147_v29, %s7774_s4  ;;  %v2249_v1 = vmul.f32 %v6496_v52, %v2248_v13  ;;  %v2250_v19 = vmul.f32 %v6499_v3, %v2248_v13  ;;  %v2262_v29 = vstv %s4545_s2  ;;  %s4565_s2 = sld [smem:[#allocation4 + $0x88]] }
 0x318   : > { %v1238_v59 = vpop.permute.xlu0 %1237  ;;  %v1240_v21 = vpop.permute.xlu1 %1239 }
 0x319   : > { %v1243_v42 = vadd.f32 %v1238_v59, %v1229_v11  ;;  %v1244_v50 = vadd.f32 %v1240_v21, %v1230_v45  ;;  %v2263_v11 = vmul.f32 %v6496_v52, %v2262_v29  ;;  %v2264_v45 = vmul.f32 %v6499_v3, %v2262_v29 }
 0x31a   : > { %2185 = vrot.lane.b32.xlu0 %v2181_v51, %s7773_s0  ;;  %2187 = vrot.lane.b32.xlu1 %v2182_v12, %s7773_s0  ;;  %v2282_v59 = vstv %s6486_s3  ;;  %v1566_v21 = vstv %s6490_s14  ;;  %s6624_s3 = sld [smem:[#allocation4 + $0x5d]] }
 0x31b   : > { %v1249_v22 = vadd.f32 %v1247_v36, %v1243_v42  ;;  %v1250_v18 = vadd.f32 %v1248_v33, %v1244_v50  ;;  %v6518_v50 = vld [vmem:[#allocation2 + $0x18] sm:$0xff]  ;;  %v6521_v33 = vld [vmem:[#allocation2 + $0x20] sm:$0xff]  ;;  %s6632_s14 = sld [smem:[#allocation4 + $0x89]] }
 0x31c   : > { %v1258_v48 = vpop.permute.xlu0 %1257  ;;  %v1260_v57 = vpop.permute.xlu1 %1259  ;;  %v2283_v36 = vmul.f32 %v6518_v50, %v2282_v59 }
 0x31d   : > { %v1263_v40 = vadd.f32 %v1258_v48, %v1249_v22  ;;  %v1264_v27 = vadd.f32 %v1260_v57, %v1250_v18  ;;  %v2284_v22 = vmul.f32 %v6521_v33, %v2282_v59  ;;  %v2296_v18 = vstv %s6502_s5  ;;  %s6638_s5 = sld [smem:[#allocation4 + $0x8b]] }
 0x31e   : > { %2199 = vrot.lane.b32.xlu0 %v2195_v26, %s7774_s4  ;;  %2201 = vrot.lane.b32.xlu1 %v2196_v31, %s7774_s4 }
 0x320   : > { %v1272_v41 = vpop.permute.xlu0 %1271  ;;  %v1274_v53 = vpop.permute.xlu1 %1273 }
 0x321   : > { %v1277_v61 = vadd.f32 %v1272_v41, %v1263_v40  ;;  %v1278_v24 = vadd.f32 %v1274_v53, %v1264_v27  ;;  %v2297_v40 = vmul.f32 %v6518_v50, %v2296_v18  ;;  %v2298_v27 = vmul.f32 %v6521_v33, %v2296_v18  ;;  %v6564_v18 = vld [vmem:[#allocation2 + $0x1a] sm:$0xff] }
 0x322   : > { %2219 = vrot.lane.b32.xlu0 %v2215_v43, %s7773_s0  ;;  %2221 = vrot.lane.b32.xlu1 %v2216_v6, %s7773_s0  ;;  %v2316_v41 = vstv %s6509_s24  ;;  %v1600_v53 = vstv %s6514_s6  ;;  %s6643_s24 = sld [smem:[#allocation4 + $0x60]] }
 0x323   : > { %v6475_v7 = vadd.f32 %v1281_v2, %v1277_v61  ;;  %v6477_v46 = vadd.f32 %v1282_v15, %v1278_v24  ;;  %v6541_v24 = vld [vmem:[#allocation2 + $0x19] sm:$0xff]  ;;  %v6544_v15 = vld [vmem:[#allocation2 + $0x21] sm:$0xff]  ;;  %v1602_v29 = vmul.f32 %v1600_v53, %v6234_v8  ;;  %s6650_s6 = sld [smem:[#allocation4 + $0x8c]] }
 0x324   : > { %v6479_v10 = vpop.permute.xlu0 %1291  ;;  %v6481_v16 = vpop.permute.xlu1 %1293  ;;  %v2317_v2 = vmul.f32 %v6541_v24, %v2316_v41 }
 0x326   : > { %2233 = vrot.lane.b32.xlu0 %v2229_v30, %s7774_s4  ;;  %2235 = vrot.lane.b32.xlu1 %v2230_v63, %s7774_s4  ;;  %v2318_v30 = vmul.f32 %v6544_v15, %v2316_v41  ;;  %v2330_v63 = vstv %s6525_s17  ;;  %s6663_s17 = sld [smem:[#allocation4 + $0x8e]] }
 0x327   : > { %v2331_v59 = vmul.f32 %v6541_v24, %v2330_v63 }
 0x328   : > { %v6492_v49 = vpop.permute.xlu0 %1305  ;;  %v6494_v23 = vpop.permute.xlu1 %1307 }
 0x32a   : > { %2253 = vrot.lane.b32.xlu0 %v2249_v1, %s7773_s0  ;;  %2255 = vrot.lane.b32.xlu1 %v2250_v19, %s7773_s0  ;;  %v1601_v19 = vmul.f32 %v1600_v53, %v6238_v38 }
 0x32c   : > { %v1544_v0 = vpop.permute.xlu0 %1543  ;;  %v1546_v20 = vpop.permute.xlu1 %1545 }
 0x32d   : > { %v1549_v51 = vadd.f32 %v1544_v0, %v6254_v62  ;;  %v1550_v12 = vadd.f32 %v1546_v20, %v6261_v39  ;;  %v1567_v62 = vmul.f32 %v1566_v21, %v6205_v25  ;;  %v1568_v39 = vmul.f32 %v1566_v21, %v6203_v5 }
 0x32e   : > { %2267 = vrot.lane.b32.xlu0 %v2263_v11, %s7774_s4  ;;  %2269 = vrot.lane.b32.xlu1 %v2264_v45, %s7774_s4  ;;  %v2332_v21 = vmul.f32 %v6544_v15, %v2330_v63 }
 0x330   : > { %v1558_v14 = vpop.permute.xlu0 %1557  ;;  %v1560_v42 = vpop.permute.xlu1 %1559 }
 0x331   : > { %v1563_v48 = vadd.f32 %v1558_v14, %v1549_v51  ;;  %v1564_v57 = vadd.f32 %v1560_v42, %v1550_v12  ;;  %v2350_v51 = vstv %s6534_s20  ;;  %v1634_v12 = vstv %s6539_s26  ;;  %s6668_s20 = sld [smem:[#allocation4 + $0x63]] }
 0x332   : > { %2287 = vrot.lane.b32.xlu0 %v2283_v36, %s7773_s0  ;;  %2289 = vrot.lane.b32.xlu1 %v2284_v22, %s7773_s0  ;;  %s6673_s26 = sld [smem:[#allocation4 + $0x8f]] }
 0x333   : > { %v1569_v26 = vadd.f32 %v1567_v62, %v1563_v48  ;;  %v1570_v31 = vadd.f32 %v1568_v39, %v1564_v57  ;;  %v2351_v48 = vmul.f32 %v6564_v18, %v2350_v51  ;;  %v6567_v57 = vld [vmem:[#allocation2 + $0x22] sm:$0xff]  ;;  %v2364_v39 = vstv %s6548_s23  ;;  %s6689_s23 = sld [smem:[#allocation4 + $0x66]] }
 0x334   : > { %v1578_v55 = vpop.permute.xlu0 %1577  ;;  %v1580_v35 = vpop.permute.xlu1 %1579  ;;  %v2352_v62 = vmul.f32 %v6567_v57, %v2350_v51 }
 0x335   : > { %v1583_v43 = vadd.f32 %v1578_v55, %v1569_v26  ;;  %v1584_v6 = vadd.f32 %v1580_v35, %v1570_v31  ;;  %v1635_v55 = vmul.f32 %v1634_v12, %v6267_v60  ;;  %v1636_v35 = vmul.f32 %v1634_v12, %v6269_v17 }
 0x336   : > { %2301 = vrot.lane.b32.xlu0 %v2297_v40, %s7774_s4  ;;  %2303 = vrot.lane.b32.xlu1 %v2298_v27, %s7774_s4 }
 0x338   : > { %v1592_v37 = vpop.permute.xlu0 %1591  ;;  %v1594_v61 = vpop.permute.xlu1 %1593 }
 0x339   : > { %v1597_v13 = vadd.f32 %v1592_v37, %v1583_v43  ;;  %v1598_v1 = vadd.f32 %v1594_v61, %v1584_v6  ;;  %v2365_v43 = vmul.f32 %v6564_v18, %v2364_v39  ;;  %v2366_v6 = vmul.f32 %v6567_v57, %v2364_v39 }
 0x33a   : > { %2321 = vrot.lane.b32.xlu0 %v2317_v2, %s7773_s0  ;;  %2323 = vrot.lane.b32.xlu1 %v2318_v30, %s7773_s0  ;;  %v2384_v37 = vstv %s6557_s10  ;;  %v1668_v61 = vstv %s6562_s21  ;;  %s6717_s10 = sld [smem:[#allocation4 + $0x69]] }
 0x33b   : > { %v1603_v0 = vadd.f32 %v1601_v19, %v1597_v13  ;;  %v1604_v20 = vadd.f32 %v1602_v29, %v1598_v1  ;;  %v2385_v1 = vmul.f32 %v2384_v37, %v6191_v34  ;;  %v2386_v19 = vmul.f32 %v2384_v37, %v6193_v56  ;;  %s4537_s21 = sld [smem:[#allocation4 + $0x6c]] }
 0x33c   : > { %v1612_v11 = vpop.permute.xlu0 %1611  ;;  %v1614_v45 = vpop.permute.xlu1 %1613  ;;  %v2398_v29 = vstv %s6571_s25  ;;  %s4536_s25 = sld [smem:[#allocation7 + $0x3]] }
 0x33d   : > { %v1617_v14 = vadd.f32 %v1612_v11, %v1603_v0  ;;  %v1618_v42 = vadd.f32 %v1614_v45, %v1604_v20  ;;  %v1669_v11 = vmul.f32 %v1668_v61, %v6284_v44  ;;  %v1670_v45 = vmul.f32 %v1668_v61, %v6286_v28 }
 0x33e   : > { %2335 = vrot.lane.b32.xlu0 %v2331_v59, %s7774_s4  ;;  %2337 = vrot.lane.b32.xlu1 %v2332_v21, %s7774_s4 }
 0x340   : > { %v1626_v36 = vpop.permute.xlu0 %1625  ;;  %v1628_v22 = vpop.permute.xlu1 %1627 }
 0x341   : > { %v1631_v26 = vadd.f32 %v1626_v36, %v1617_v14  ;;  %v1632_v31 = vadd.f32 %v1628_v22, %v1618_v42  ;;  %v2399_v14 = vmul.f32 %v2398_v29, %v6191_v34  ;;  %v2400_v42 = vmul.f32 %v2398_v29, %v6193_v56 }
 0x342   : > { %2355 = vrot.lane.b32.xlu0 %v2351_v48, %s7773_s0  ;;  %2357 = vrot.lane.b32.xlu1 %v2352_v62, %s7773_s0  ;;  %v2418_v36 = vstv %s6580_s12  ;;  %v1702_v22 = vstv %s6585_s13  ;;  %s4540_s12 = sld [smem:[#allocation4 + $0x6f]] }
 0x343   : > { %v1637_v40 = vadd.f32 %v1635_v55, %v1631_v26  ;;  %v1638_v27 = vadd.f32 %v1636_v35, %v1632_v31  ;;  %v2419_v31 = vmul.f32 %v2418_v36, %v6205_v25  ;;  %v2420_v55 = vmul.f32 %v2418_v36, %v6203_v5  ;;  %v6652_v36 = vld [vmem:[#allocation2 + $0x31] sm:$0xff]  ;;  %s4543_s13 = sld [smem:[#allocation4 + $0x72]] }
 0x344   : > { %v1646_v41 = vpop.permute.xlu0 %1645  ;;  %v1648_v53 = vpop.permute.xlu1 %1647  ;;  %v2432_v34 = vstv %s6590_s18  ;;  %s4546_s18 = sld [smem:[#allocation4 + $0x75]] }
 0x345   : > { %v1651_v2 = vadd.f32 %v1646_v41, %v1637_v40  ;;  %v1652_v30 = vadd.f32 %v1648_v53, %v1638_v27  ;;  %v1703_v40 = vmul.f32 %v1702_v22, %v6296_v4  ;;  %v1704_v27 = vmul.f32 %v1702_v22, %v6298_v47 }
 0x346   : > { %2369 = vrot.lane.b32.xlu0 %v2365_v43, %s7774_s4  ;;  %2371 = vrot.lane.b32.xlu1 %v2366_v6, %s7774_s4  ;;  %v2433_v37 = vmul.f32 %v2432_v34, %v6205_v25  ;;  %v2434_v61 = vmul.f32 %v2432_v34, %v6203_v5  ;;  %v2466_v5 = vstv %s4563_s19  ;;  %v2520_v34 = vstv %s6638_s5  ;;  %s4552_s19 = sld [smem:[#allocation4 + $0x7b]] }
 0x347   : > { %v2467_v29 = vmul.f32 %v2466_v5, %v6238_v38  ;;  %s4564_s5 = sld [smem:[#allocation4 + $0x87]] }
 0x348   : > { %v1660_v63 = vpop.permute.xlu0 %1659  ;;  %v1662_v13 = vpop.permute.xlu1 %1661 }
 0x349   : > { %v1665_v0 = vadd.f32 %v1660_v63, %v1651_v2  ;;  %v1666_v20 = vadd.f32 %v1662_v13, %v1652_v30  ;;  %v2452_v2 = vstv %s6599_s22  ;;  %s4549_s22 = sld [smem:[#allocation4 + $0x78]] }
 0x34a   : > { %2389 = vrot.lane.b32.xlu0 %v2385_v1, %s7773_s0  ;;  %2391 = vrot.lane.b32.xlu1 %v2386_v19, %s7773_s0  ;;  %v2453_v13 = vmul.f32 %v2452_v2, %v6238_v38  ;;  %v2454_v1 = vmul.f32 %v2452_v2, %v6234_v8  ;;  %v2534_v2 = vstv %s6650_s6  ;;  %s4570_s6 = sld [smem:[#allocation4 + $0x8d]] }
 0x34b   : > { %v1671_v59 = vadd.f32 %v1669_v11, %v1665_v0  ;;  %v1672_v21 = vadd.f32 %v1670_v45, %v1666_v20  ;;  %v2468_v0 = vmul.f32 %v2466_v5, %v6234_v8  ;;  %v2486_v20 = vstv %s4565_s2  ;;  %s4555_s2 = sld [smem:[#allocation4 + $0x7e]] }
 0x34c   : > { %v1680_v51 = vpop.permute.xlu0 %1679  ;;  %v1682_v12 = vpop.permute.xlu1 %1681  ;;  %v1989_v11 = vstv %s6624_s3  ;;  %v2487_v38 = vmul.f32 %v2486_v20, %v6267_v60  ;;  %v2488_v8 = vmul.f32 %v2486_v20, %v6269_v17  ;;  %s4558_s3 = sld [smem:[#allocation4 + $0x81]] }
 0x34d   : > { %v1685_v48 = vadd.f32 %v1680_v51, %v1671_v59  ;;  %v1686_v62 = vadd.f32 %v1682_v12, %v1672_v21  ;;  %v2500_v12 = vstv %s6632_s14  ;;  %v1990_v22 = vmul.f32 %v6652_v36, %v1989_v11  ;;  %s4561_s14 = sld [smem:[#allocation4 + $0x84]] }
 0x34e   : > { %2403 = vrot.lane.b32.xlu0 %v2399_v14, %s7774_s4  ;;  %2405 = vrot.lane.b32.xlu1 %v2400_v42, %s7774_s4 }
 0x350   : > { %v1694_v39 = vpop.permute.xlu0 %1693  ;;  %v1696_v26 = vpop.permute.xlu1 %1695 }
 0x351   : > { %v1699_v35 = vadd.f32 %v1694_v39, %v1685_v48  ;;  %v1700_v56 = vadd.f32 %v1696_v26, %v1686_v62 }
 0x352   : > { %2423 = vrot.lane.b32.xlu0 %v2419_v31, %s7773_s0  ;;  %2425 = vrot.lane.b32.xlu1 %v2420_v55, %s7773_s0  ;;  %v2501_v31 = vmul.f32 %v2500_v12, %v6267_v60  ;;  %v2502_v55 = vmul.f32 %v2500_v12, %v6269_v17  ;;  %v2522_v60 = vmul.f32 %v2520_v34, %v6286_v28 }
 0x353   : > { %v6611_v41 = vadd.f32 %v1703_v40, %v1699_v35  ;;  %v6613_v53 = vadd.f32 %v1704_v27, %v1700_v56  ;;  %v2023_v35 = vstv %s6643_s24  ;;  %s4567_s24 = sld [smem:[#allocation4 + $0x8a]] }
 0x354   : > { %v6615_v43 = vpop.permute.xlu0 %1713  ;;  %v6617_v6 = vpop.permute.xlu1 %1715 }
 0x356   : > { %2437 = vrot.lane.b32.xlu0 %v2433_v37, %s7774_s4  ;;  %2439 = vrot.lane.b32.xlu1 %v2434_v61, %s7774_s4  ;;  %v2521_v61 = vmul.f32 %v2520_v34, %v6284_v44 }
 0x358   : > { %v6626_v30 = vpop.permute.xlu0 %1727  ;;  %v6628_v63 = vpop.permute.xlu1 %1729 }
 0x35a   : > { %2457 = vrot.lane.b32.xlu0 %v2453_v13, %s7773_s0  ;;  %2459 = vrot.lane.b32.xlu1 %v2454_v1, %s7773_s0  ;;  %v6675_v1 = vld [vmem:[#allocation2 + $0x32] sm:$0xff] }
 0x35b   : > { %v2024_v5 = vmul.f32 %v6675_v1, %v2023_v35 }
 0x35c   : > { %v1967_v25 = vpop.permute.xlu0 %1966  ;;  %v1969_v19 = vpop.permute.xlu1 %1968 }
 0x35d   : > { %v1972_v45 = vadd.f32 %v1967_v25, %v6274_v9  ;;  %v1973_v59 = vadd.f32 %v1969_v19, %v6276_v32  ;;  %v6655_v9 = vld [vmem:[#allocation2 + $0x39] sm:$0xff] }
 0x35e   : > { %2471 = vrot.lane.b32.xlu0 %v2467_v29, %s7774_s4  ;;  %2473 = vrot.lane.b32.xlu1 %v2468_v0, %s7774_s4  ;;  %v1991_v32 = vmul.f32 %v6655_v9, %v1989_v11  ;;  %v6678_v25 = vld [vmem:[#allocation2 + $0x3a] sm:$0xff] }
 0x35f   : > { %v2025_v19 = vmul.f32 %v6678_v25, %v2023_v35 }
 0x360   : > { %v1981_v21 = vpop.permute.xlu0 %1980  ;;  %v1983_v51 = vpop.permute.xlu1 %1982 }
 0x361   : > { %v1986_v14 = vadd.f32 %v1981_v21, %v1972_v45  ;;  %v1987_v42 = vadd.f32 %v1983_v51, %v1973_v59  ;;  %v2535_v45 = vmul.f32 %v2534_v2, %v6284_v44  ;;  %v2536_v59 = vmul.f32 %v2534_v2, %v6286_v28  ;;  %v6694_v28 = vld [vmem:[#allocation2 + $0x48] sm:$0xff] }
 0x362   : > { %2491 = vrot.lane.b32.xlu0 %v2487_v38, %s7773_s0  ;;  %2493 = vrot.lane.b32.xlu1 %v2488_v8, %s7773_s0  ;;  %v2554_v21 = vstv %s6663_s17  ;;  %v2057_v51 = vstv %s6668_s20  ;;  %s4573_s17 = sld [smem:[#allocation9 + $0x1]] }
 0x363   : > { %v1992_v48 = vadd.f32 %v1990_v22, %v1986_v14  ;;  %v1993_v62 = vadd.f32 %v1991_v32, %v1987_v42  ;;  %v2555_v42 = vmul.f32 %v2554_v21, %v6296_v4  ;;  %v2556_v22 = vmul.f32 %v2554_v21, %v6298_v47  ;;  %s4574_s20 = sld [smem:[#allocation9 + $0x2]] }
 0x364   : > { %v2001_v39 = vpop.permute.xlu0 %2000  ;;  %v2003_v26 = vpop.permute.xlu1 %2002  ;;  %v2568_v32 = vstv %s6673_s26  ;;  %s4576_s26 = sld [smem:[#allocation9 + $0x4]] }
 0x365   : > { %v2006_v56 = vadd.f32 %v2001_v39, %v1992_v48  ;;  %v2007_v40 = vadd.f32 %v2003_v26, %v1993_v62  ;;  %v2058_v62 = vmul.f32 %v6694_v28, %v2057_v51  ;;  %v6697_v39 = vld [vmem:[#allocation2 + $0x50] sm:$0xff] }
 0x366   : > { %2505 = vrot.lane.b32.xlu0 %v2501_v31, %s7774_s4  ;;  %2507 = vrot.lane.b32.xlu1 %v2502_v55, %s7774_s4  ;;  %v2059_v26 = vmul.f32 %v6697_v39, %v2057_v51  ;;  %v1297_v31 = vadd.f32 %v6479_v10, %v6475_v7  ;;  %v1298_v55 = vadd.f32 %v6481_v16, %v6477_v46  ;;  %v2091_v16 = vstv %s6689_s23  ;;  %s4577_s23 = sld [smem:[#allocation9 + $0x5]] }
 0x367   : > { %v2570_v7 = vmul.f32 %v2568_v32, %v6298_v47  ;;  %v1719_v10 = vadd.f32 %v6615_v43, %v6611_v41  ;;  %v1720_v46 = vadd.f32 %v6617_v6, %v6613_v53  ;;  %v6721_v6 = vld [vmem:[#allocation2 + $0x49] sm:$0xff] }
 0x368   : > { %v2015_v27 = vpop.permute.xlu0 %2014  ;;  %v2017_v37 = vpop.permute.xlu1 %2016 }
 0x369   : > { %v2020_v17 = vadd.f32 %v2015_v27, %v2006_v56  ;;  %v2021_v13 = vadd.f32 %v2017_v37, %v2007_v40  ;;  %v1311_v56 = vadd.f32 %v6492_v49, %v1297_v31  ;;  %v1312_v40 = vadd.f32 %v6494_v23, %v1298_v55 }
 0x36a   : > { %2525 = vrot.lane.b32.xlu0 %v2521_v61, %s7773_s0  ;;  %2527 = vrot.lane.b32.xlu1 %v2522_v60, %s7773_s0  ;;  %v2569_v61 = vmul.f32 %v2568_v32, %v6296_v4  ;;  %v1733_v4 = vadd.f32 %v6626_v30, %v1719_v10  ;;  %v1734_v47 = vadd.f32 %v6628_v63, %v1720_v46  ;;  %v2174_v31 = vstv %s4537_s21  ;;  %s4582_s21 = sld [smem:[#allocation9 + $0xa]] }
 0x36b   : > { %v2026_v29 = vadd.f32 %v2024_v5, %v2020_v17  ;;  %v2027_v0 = vadd.f32 %v2025_v19, %v2021_v13  ;;  %v1313_v60 = vmax.f32 %v1311_v56, 0.0  ;;  %v1314_v2 = vmax.f32 %v1312_v40, 0.0  ;;  %v6724_v5 = vld [vmem:[#allocation2 + $0x51] sm:$0xff] }
 0x36c   : > { %v2035_v20 = vpop.permute.xlu0 %2034  ;;  %v2037_v11 = vpop.permute.xlu1 %2036  ;;  %v2092_v13 = vmul.f32 %v6721_v6, %v2091_v16  ;;  %v2093_v19 = vmul.f32 %v6724_v5, %v2091_v16  ;;  %v1735_v63 = vmax.f32 %v1733_v4, 0.0  ;;  %v2172_v46 = vstv %s4536_s25  ;;  %s4583_s25 = sld [smem:[#allocation9 + $0xb]] }
 0x36d   : > { %v2040_v38 = vadd.f32 %v2035_v20, %v2026_v29  ;;  %v2041_v8 = vadd.f32 %v2037_v11, %v2027_v0  ;;  %v1736_v0 = vmax.f32 %v1734_v47, 0.0  ;;  %v2208_v47 = vstv %s4540_s12  ;;  %s4585_s12 = sld [smem:[#allocation9 + $0xd]] }
 0x36e   : > { %2539 = vrot.lane.b32.xlu0 %v2535_v45, %s7774_s4  ;;  %2541 = vrot.lane.b32.xlu1 %v2536_v59, %s7774_s4  ;;  %v2125_v45 = vstv %s6717_s10  ;;  %s4580_s10 = sld [smem:[#allocation9 + $0x8]] }
 0x370   : > { %v2049_v12 = vpop.permute.xlu0 %2048  ;;  %v2051_v14 = vpop.permute.xlu1 %2050 }
 0x371   : > { %v2054_v44 = vadd.f32 %v2049_v12, %v2040_v38  ;;  %v2055_v48 = vadd.f32 %v2051_v14, %v2041_v8  ;;  %v6732_v14 = vld [vmem:[#allocation2 + $0x4a] sm:$0xff] }
 0x372   : > { %2559 = vrot.lane.b32.xlu0 %v2555_v42, %s7773_s0  ;;  %2561 = vrot.lane.b32.xlu1 %v2556_v22, %s7773_s0  ;;  %v2126_v42 = vmul.f32 %v6732_v14, %v2125_v45  ;;  %v6735_v22 = vld [vmem:[#allocation2 + $0x52] sm:$0xff] }
 0x373   : > { %v2060_v34 = vadd.f32 %v2058_v62, %v2054_v44  ;;  %v2061_v35 = vadd.f32 %v2059_v26, %v2055_v48  ;;  %v2127_v32 = vmul.f32 %v6735_v22, %v2125_v45  ;;  %v2242_v45 = vstv %s4543_s13  ;;  %s4586_s13 = sld [smem:[#allocation9 + $0xe]] }
 0x374   : > { %v2069_v27 = vpop.permute.xlu0 %2068  ;;  %v2071_v37 = vpop.permute.xlu1 %2070 }
 0x375   : > { %v2074_v49 = vadd.f32 %v2069_v27, %v2060_v34  ;;  %v2075_v23 = vadd.f32 %v2071_v37, %v2061_v35  ;;  %v4889_v37 = vld [vmem:[#allocation2] sm:$0xff] }
 0x376   : > { %2573 = vrot.lane.b32.xlu0 %v2569_v61, %s7774_s4  ;;  %2575 = vrot.lane.b32.xlu1 %v2570_v7, %s7774_s4  ;;  %v2175_v61 = vmul.f32 %v4889_v37, %v2174_v31  ;;  %v4890_v7 = vld [vmem:[#allocation2 + $0x8] sm:$0xff] }
 0x377   : > { %v2176_v10 = vmul.f32 %v4890_v7, %v2174_v31  ;;  %v2310_v7 = vstv %s4549_s22  ;;  %s4589_s22 = sld [smem:[#allocation9 + $0x11]] }
 0x378   : > { %v2083_v17 = vpop.permute.xlu0 %2082  ;;  %v2085_v41 = vpop.permute.xlu1 %2084 }
 0x379   : > { %v2088_v43 = vadd.f32 %v2083_v17, %v2074_v49  ;;  %v2089_v53 = vadd.f32 %v2085_v41, %v2075_v23  ;;  %v2178_v4 = vadd.f32 %v2176_v10, %v2172_v46 }
 0x37a   : > { %1317 = vrot.lane.b32.xlu0 %v1313_v60, %s7775_s7  ;;  %1319 = vrot.lane.b32.xlu1 %v1314_v2, %s7775_s7  ;;  %v2177_v2 = vadd.f32 %v2175_v61, %v2172_v46 }
 0x37b   : > { %v2094_v30 = vadd.f32 %v2092_v13, %v2088_v43  ;;  %v2095_v29 = vadd.f32 %v2093_v19, %v2089_v53 }
 0x37c   : > { %v2103_v20 = vpop.permute.xlu0 %2102  ;;  %v2105_v11 = vpop.permute.xlu1 %2104 }
 0x37d   : > { %v2108_v59 = vadd.f32 %v2103_v20, %v2094_v30  ;;  %v2109_v21 = vadd.f32 %v2105_v11, %v2095_v29  ;;  %v2209_v30 = vmul.f32 %v6464_v58, %v2208_v47  ;;  %v2210_v29 = vmul.f32 %v6467_v54, %v2208_v47 }
 0x37e   : > { %1739 = vrot.lane.b32.xlu0 %v1735_v63, %s7775_s7  ;;  %1741 = vrot.lane.b32.xlu1 %v1736_v0, %s7775_s7 }
 0x380   : > { %v2117_v51 = vpop.permute.xlu0 %2116  ;;  %v2119_v38 = vpop.permute.xlu1 %2118 }
 0x381   : > { %v2122_v8 = vadd.f32 %v2117_v51, %v2108_v59  ;;  %v2123_v12 = vadd.f32 %v2119_v38, %v2109_v21 }
 0x383   : > { %v2128_v44 = vadd.f32 %v2126_v42, %v2122_v8  ;;  %v2129_v48 = vadd.f32 %v2127_v32, %v2123_v12  ;;  %v2243_v42 = vmul.f32 %v6496_v52, %v2242_v45  ;;  %v2244_v32 = vmul.f32 %v6499_v3, %v2242_v45 }
 0x384   : > { %v2137_v62 = vpop.permute.xlu0 %2136  ;;  %v2139_v26 = vpop.permute.xlu1 %2138  ;;  %v2378_v45 = vstv %s4555_s2  ;;  %s4592_s2 = sld [smem:[#allocation9 + $0x14]] }
 0x385   : > { %v2142_v55 = vadd.f32 %v2137_v62, %v2128_v44  ;;  %v2143_v34 = vadd.f32 %v2139_v26, %v2129_v48  ;;  %v2276_v62 = vstv %s4546_s18  ;;  %s4588_s18 = sld [smem:[#allocation9 + $0x10]] }
 0x388   : > { %v2151_v35 = vpop.permute.xlu0 %2150  ;;  %v2153_v56 = vpop.permute.xlu1 %2152 }
 0x389   : > { %v2156_v40 = vadd.f32 %v2151_v35, %v2142_v55  ;;  %v2157_v27 = vadd.f32 %v2153_v56, %v2143_v34 }
 0x38b   : > { %v2158_v16 = vmax.f32 %v2156_v40, 0.0  ;;  %v2159_v49 = vmax.f32 %v2157_v27, 0.0  ;;  %v2277_v40 = vmul.f32 %v6518_v50, %v2276_v62  ;;  %v2278_v27 = vmul.f32 %v6521_v33, %v2276_v62 }
 0x38c   : > { %v2186_v23 = vpop.permute.xlu0 %2185  ;;  %v2188_v60 = vpop.permute.xlu1 %2187  ;;  %v2412_v62 = vstv %s4558_s3  ;;  %s4594_s3 = sld [smem:[#allocation9 + $0x16]] }
 0x38d   : > { %2162 = vrot.lane.b32.xlu0 %v2158_v16, %s7775_s7  ;;  %2164 = vrot.lane.b32.xlu1 %v2159_v49, %s7775_s7  ;;  %v2191_v17 = vadd.f32 %v2186_v23, %v2177_v2  ;;  %v2192_v41 = vadd.f32 %v2188_v60, %v2178_v4  ;;  %v2311_v2 = vmul.f32 %v6541_v24, %v2310_v7 }
 0x38e   : > { %v2312_v4 = vmul.f32 %v6544_v15, %v2310_v7  ;;  %v2446_v7 = vstv %s4561_s14  ;;  %s4595_s14 = sld [smem:[#allocation9 + $0x17]] }
 0x390   : > { %v2200_v43 = vpop.permute.xlu0 %2199  ;;  %v2202_v53 = vpop.permute.xlu1 %2201 }
 0x391   : > { %v2205_v13 = vadd.f32 %v2200_v43, %v2191_v17  ;;  %v2206_v19 = vadd.f32 %v2202_v53, %v2192_v41  ;;  %v2344_v41 = vstv %s4552_s19  ;;  %s4591_s19 = sld [smem:[#allocation9 + $0x13]] }
 0x393   : > { %v2211_v63 = vadd.f32 %v2209_v30, %v2205_v13  ;;  %v2212_v0 = vadd.f32 %v2210_v29, %v2206_v19 }
 0x394   : > { %v2220_v20 = vpop.permute.xlu0 %2219  ;;  %v2222_v11 = vpop.permute.xlu1 %2221 }
 0x395   : > { %v2225_v59 = vadd.f32 %v2220_v20, %v2211_v63  ;;  %v2226_v21 = vadd.f32 %v2222_v11, %v2212_v0  ;;  %v2345_v63 = vmul.f32 %v6564_v18, %v2344_v41  ;;  %v2346_v0 = vmul.f32 %v6567_v57, %v2344_v41 }
 0x398   : > { %v2234_v51 = vpop.permute.xlu0 %2233  ;;  %v2236_v38 = vpop.permute.xlu1 %2235 }
 0x399   : > { %v2239_v8 = vadd.f32 %v2234_v51, %v2225_v59  ;;  %v2240_v12 = vadd.f32 %v2236_v38, %v2226_v21 }
 0x39b   : > { %v2245_v44 = vadd.f32 %v2243_v42, %v2239_v8  ;;  %v2246_v58 = vadd.f32 %v2244_v32, %v2240_v12  ;;  %v4891_v42 = vld [vmem:[#allocation2 + $0x30] sm:$0xff] }
 0x39c   : > { %v2254_v48 = vpop.permute.xlu0 %2253  ;;  %v2256_v54 = vpop.permute.xlu1 %2255  ;;  %v2379_v32 = vmul.f32 %v4891_v42, %v2378_v45  ;;  %v2548_v42 = vstv %s4570_s6  ;;  %s2620_s6 = sld [smem:[#allocation9]] }
 0x39d   : > { %v2259_v26 = vadd.f32 %v2254_v48, %v2245_v44  ;;  %v2260_v31 = vadd.f32 %v2256_v54, %v2246_v58  ;;  %v4892_v44 = vld [vmem:[#allocation2 + $0x38] sm:$0xff] }
 0x39e   : > { %v2380_v58 = vmul.f32 %v4892_v44, %v2378_v45 }
 0x3a0   : > { %v2268_v55 = vpop.permute.xlu0 %2267  ;;  %v2270_v34 = vpop.permute.xlu1 %2269 }
 0x3a1   : > { %v2273_v35 = vadd.f32 %v2268_v55, %v2259_v26  ;;  %v2274_v56 = vadd.f32 %v2270_v34, %v2260_v31 }
 0x3a3   : > { %v2279_v37 = vadd.f32 %v2277_v40, %v2273_v35  ;;  %v2280_v52 = vadd.f32 %v2278_v27, %v2274_v56  ;;  %v2413_v40 = vmul.f32 %v6652_v36, %v2412_v62  ;;  %v2414_v27 = vmul.f32 %v6655_v9, %v2412_v62 }
 0x3a4   : > { %v2288_v61 = vpop.permute.xlu0 %2287  ;;  %v2290_v3 = vpop.permute.xlu1 %2289  ;;  %v2550_v62 = vmul.f32 %v6735_v22, %v2548_v42 }
 0x3a5   : > { %v2293_v10 = vadd.f32 %v2288_v61, %v2279_v37  ;;  %v2294_v46 = vadd.f32 %v2290_v3, %v2280_v52 }
 0x3a8   : > { %v2302_v16 = vpop.permute.xlu0 %2301  ;;  %v2304_v49 = vpop.permute.xlu1 %2303 }
 0x3a9   : > { %v2307_v23 = vadd.f32 %v2302_v16, %v2293_v10  ;;  %v2308_v60 = vadd.f32 %v2304_v49, %v2294_v46 }
 0x3ab   : > { %v2313_v47 = vadd.f32 %v2311_v2, %v2307_v23  ;;  %v2314_v50 = vadd.f32 %v2312_v4, %v2308_v60  ;;  %v2447_v2 = vmul.f32 %v6675_v1, %v2446_v7  ;;  %v2448_v4 = vmul.f32 %v6678_v25, %v2446_v7 }
 0x3ac   : > { %v2322_v17 = vpop.permute.xlu0 %2321  ;;  %v2324_v33 = vpop.permute.xlu1 %2323  ;;  %v2627_v7 = vstv %s4573_s17  ;;  %s4600_s17 = sld [smem:[#allocation9 + $0x1c]] }
 0x3ad   : > { %v2327_v43 = vadd.f32 %v2322_v17, %v2313_v47  ;;  %v2328_v53 = vadd.f32 %v2324_v33, %v2314_v50  ;;  %v2480_v17 = vstv %s4564_s5  ;;  %s4597_s5 = sld [smem:[#allocation9 + $0x19]] }
 0x3b0   : > { %v2336_v13 = vpop.permute.xlu0 %2335  ;;  %v2338_v19 = vpop.permute.xlu1 %2337 }
 0x3b1   : > { %v2341_v30 = vadd.f32 %v2336_v13, %v2327_v43  ;;  %v2342_v29 = vadd.f32 %v2338_v19, %v2328_v53 }
 0x3b3   : > { %v2347_v20 = vadd.f32 %v2345_v63, %v2341_v30  ;;  %v2348_v24 = vadd.f32 %v2346_v0, %v2342_v29  ;;  %v2481_v30 = vmul.f32 %v6694_v28, %v2480_v17  ;;  %v2482_v29 = vmul.f32 %v6697_v39, %v2480_v17 }
 0x3b4   : > { %v2356_v11 = vpop.permute.xlu0 %2355  ;;  %v2358_v15 = vpop.permute.xlu1 %2357  ;;  %v2675_v17 = vstv %s4577_s23  ;;  %s6878_s23 = sld [smem:[#allocation9 + $0x3]] }
 0x3b5   : > { %v2361_v59 = vadd.f32 %v2356_v11, %v2347_v20  ;;  %v2362_v21 = vadd.f32 %v2358_v15, %v2348_v24  ;;  %v2514_v20 = vstv %s4567_s24  ;;  %s4598_s24 = sld [smem:[#allocation9 + $0x1a]] }
 0x3b8   : > { %v2370_v51 = vpop.permute.xlu0 %2369  ;;  %v2372_v38 = vpop.permute.xlu1 %2371 }
 0x3b9   : > { %v2375_v8 = vadd.f32 %v2370_v51, %v2361_v59  ;;  %v2376_v12 = vadd.f32 %v2372_v38, %v2362_v21  ;;  %v2515_v51 = vmul.f32 %v6721_v6, %v2514_v20  ;;  %v2516_v38 = vmul.f32 %v6724_v5, %v2514_v20 }
 0x3bb   : > { %v2381_v48 = vadd.f32 %v2379_v32, %v2375_v8  ;;  %v2382_v18 = vadd.f32 %v2380_v58, %v2376_v12 }
 0x3bc   : > { %v2390_v54 = vpop.permute.xlu0 %2389  ;;  %v2392_v57 = vpop.permute.xlu1 %2391 }
 0x3bd   : > { %v2395_v26 = vadd.f32 %v2390_v54, %v2381_v48  ;;  %v2396_v31 = vadd.f32 %v2392_v57, %v2382_v18  ;;  %v2549_v57 = vmul.f32 %v6732_v14, %v2548_v42  ;;  %v2777_v42 = vstv %s4586_s13  ;;  %s6918_s13 = sld [smem:[#allocation9 + $0x9]] }
 0x3c0   : > { %v2404_v55 = vpop.permute.xlu0 %2403  ;;  %v2406_v34 = vpop.permute.xlu1 %2405 }
 0x3c1   : > { %v2409_v35 = vadd.f32 %v2404_v55, %v2395_v26  ;;  %v2410_v56 = vadd.f32 %v2406_v34, %v2396_v31 }
 0x3c3   : > { %v2415_v37 = vadd.f32 %v2413_v40, %v2409_v35  ;;  %v2416_v52 = vadd.f32 %v2414_v27, %v2410_v56 }
 0x3c4   : > { %v2424_v61 = vpop.permute.xlu0 %2423  ;;  %v2426_v3 = vpop.permute.xlu1 %2425 }
 0x3c5   : > { %v2429_v10 = vadd.f32 %v2424_v61, %v2415_v37  ;;  %v2430_v46 = vadd.f32 %v2426_v3, %v2416_v52 }
 0x3c8   : > { %v2438_v16 = vpop.permute.xlu0 %2437  ;;  %v2440_v49 = vpop.permute.xlu1 %2439 }
 0x3c9   : > { %v2443_v23 = vadd.f32 %v2438_v16, %v2429_v10  ;;  %v2444_v60 = vadd.f32 %v2440_v49, %v2430_v46 }
 0x3cb   : > { %v2449_v47 = vadd.f32 %v2447_v2, %v2443_v23  ;;  %v2450_v36 = vadd.f32 %v2448_v4, %v2444_v60  ;;  %v2641_v23 = vstv %s4574_s20  ;;  %s2618_s20 = sld [smem:[#allocation10]] }
 0x3cc   : > { %v2458_v50 = vpop.permute.xlu0 %2457  ;;  %v2460_v9 = vpop.permute.xlu1 %2459 }
 0x3cd   : > { %v2463_v33 = vadd.f32 %v2458_v50, %v2449_v47  ;;  %v2464_v41 = vadd.f32 %v2460_v9, %v2450_v36  ;;  %v2661_v36 = vstv %s4576_s26  ;;  %s4601_s26 = sld [smem:[#allocation9 + $0x1d]] }
 0x3d0   : > { %v2472_v43 = vpop.permute.xlu0 %2471  ;;  %v2474_v53 = vpop.permute.xlu1 %2473 }
 0x3d1   : > { %v2477_v13 = vadd.f32 %v2472_v43, %v2463_v33  ;;  %v2478_v19 = vadd.f32 %v2474_v53, %v2464_v41 }
 0x3d3   : > { %v2483_v63 = vadd.f32 %v2481_v30, %v2477_v13  ;;  %v2484_v1 = vadd.f32 %v2482_v29, %v2478_v19 }
 0x3d4   : > { %v2492_v0 = vpop.permute.xlu0 %2491  ;;  %v2494_v25 = vpop.permute.xlu1 %2493 }
 0x3d5   : > { %v2497_v24 = vadd.f32 %v2492_v0, %v2483_v63  ;;  %v2498_v11 = vadd.f32 %v2494_v25, %v2484_v1  ;;  %v2709_v1 = vstv %s4580_s10  ;;  %s6890_s10 = sld [smem:[#allocation9 + $0x20]] }
 0x3d8   : > { %v2506_v15 = vpop.permute.xlu0 %2505  ;;  %v2508_v45 = vpop.permute.xlu1 %2507 }
 0x3d9   : > { %v2511_v59 = vadd.f32 %v2506_v15, %v2497_v24  ;;  %v2512_v21 = vadd.f32 %v2508_v45, %v2498_v11  ;;  %v2729_v11 = vstv %s4582_s21  ;;  %s6895_s21 = sld [smem:[#allocation9 + $0x6]] }
 0x3db   : > { %v2517_v8 = vadd.f32 %v2515_v51, %v2511_v59  ;;  %v2518_v28 = vadd.f32 %v2516_v38, %v2512_v21  ;;  %v2743_v59 = vstv %s4583_s25  ;;  %s6905_s25 = sld [smem:[#allocation9 + $0x22]] }
 0x3dc   : > { %v2526_v12 = vpop.permute.xlu0 %2525  ;;  %v2528_v39 = vpop.permute.xlu1 %2527 }
 0x3dd   : > { %v2531_v32 = vadd.f32 %v2526_v12, %v2517_v8  ;;  %v2532_v44 = vadd.f32 %v2528_v39, %v2518_v28  ;;  %v2763_v28 = vstv %s4585_s12  ;;  %s6913_s12 = sld [smem:[#allocation9 + $0x23]] }
 0x3e0   : > { %v2540_v58 = vpop.permute.xlu0 %2539  ;;  %v2542_v48 = vpop.permute.xlu1 %2541 }
 0x3e1   : > { %v2545_v18 = vadd.f32 %v2540_v58, %v2531_v32  ;;  %v2546_v54 = vadd.f32 %v2542_v48, %v2532_v44 }
 0x3e3   : > { %v2551_v26 = vadd.f32 %v2549_v57, %v2545_v18  ;;  %v2552_v31 = vadd.f32 %v2550_v62, %v2546_v54  ;;  %v2797_v18 = vstv %s4588_s18  ;;  %v2811_v62 = vstv %s4589_s22  ;;  %s6928_s18 = sld [smem:[#allocation9 + $0x25]] }
 0x3e4   : > { %v2560_v6 = vpop.permute.xlu0 %2559  ;;  %v2562_v55 = vpop.permute.xlu1 %2561  ;;  %s6936_s22 = sld [smem:[#allocation9 + $0x26]] }
 0x3e5   : > { %v2565_v5 = vadd.f32 %v2560_v6, %v2551_v26  ;;  %v2566_v34 = vadd.f32 %v2562_v55, %v2552_v31 }
 0x3e8   : > { %v2574_v35 = vpop.permute.xlu0 %2573  ;;  %v2576_v56 = vpop.permute.xlu1 %2575 }
 0x3e9   : > { %v2579_v40 = vadd.f32 %v2574_v35, %v2565_v5  ;;  %v2580_v27 = vadd.f32 %v2576_v56, %v2566_v34  ;;  %v2831_v5 = vstv %s4591_s19  ;;  %v2845_v56 = vstv %s4592_s2  ;;  %s6941_s19 = sld [smem:[#allocation9 + $0xc]] }
 0x3ea   : > { %s6947_s2 = sld [smem:[#allocation9 + $0x28]] }
 0x3eb   : > { %v2581_v37 = vmax.f32 %v2579_v40, 0.0  ;;  %v2582_v52 = vmax.f32 %v2580_v27, 0.0 }
 0x3ec   : > { %v1318_v61 = vpop.permute.xlu0 %1317  ;;  %v1320_v3 = vpop.permute.xlu1 %1319 }
 0x3ed   : > { %1323 = vst.msk [vmem:[#allocation3 + $0x1] sm:$0xff] %vm412_vm2, %v1318_v61  ;;  %1324 = vst.msk [vmem:[#allocation3 + $0x9] sm:$0xff] %vm412_vm2, %v1320_v3  ;;  %2585 = vrot.lane.b32.xlu0 %v2581_v37, %s7775_s7  ;;  %2587 = vrot.lane.b32.xlu1 %v2582_v52, %s7775_s7  ;;  %s4579_s7 = sld [smem:[#allocation9 + $0x7]]  ;;  %v2865_v61 = vstv %s4594_s3 }
 0x3ee   : > { %s6955_s3 = sld [smem:[#allocation9 + $0x29]] }
 0x3f0   : > { %v1740_v14 = vpop.permute.xlu0 %1739  ;;  %v1742_v22 = vpop.permute.xlu1 %1741 }
 0x3f1   : > { %1746 = vst.msk [vmem:[#allocation3 + $0x19] sm:$0xff] %vm412_vm2, %v1740_v14  ;;  %1747 = vst.msk [vmem:[#allocation3 + $0x21] sm:$0xff] %vm412_vm2, %v1742_v22  ;;  %v2879_v22 = vstv %s4595_s14  ;;  %s6960_s14 = sld [smem:[#allocation9 + $0xf]] }
 0x3f3   : > { %v2695_v30 = vstv %s4579_s7  ;;  %s6880_s7 = sld [smem:[#allocation9 + $0x1f]] }
 0x3f4   : > { %v6766_v10 = vld [vmem:[#allocation3] sm:$0xff]  ;;  %v6768_v46 = vld [vmem:[#allocation3 + $0x8] sm:$0xff] }
 0x3f5   : > { %v2628_v16 = vmul.f32 %v2627_v7, %v6766_v10  ;;  %v2629_v49 = vmul.f32 %v2627_v7, %v6768_v46  ;;  %v2642_v60 = vmul.f32 %v2641_v23, %v6766_v10  ;;  %v2643_v2 = vmul.f32 %v2641_v23, %v6768_v46  ;;  %v6776_v4 = vld [vmem:[#allocation3 + $0x1] sm:$0xff]  ;;  %v6778_v47 = vld [vmem:[#allocation3 + $0x9] sm:$0xff] }
 0x3f6   : > { %v2662_v50 = vmul.f32 %v2661_v36, %v6776_v4  ;;  %v2663_v9 = vmul.f32 %v2661_v36, %v6778_v47  ;;  %v2676_v43 = vmul.f32 %v2675_v17, %v6776_v4  ;;  %v2677_v53 = vmul.f32 %v2675_v17, %v6778_v47  ;;  %v6790_v13 = vld [vmem:[#allocation3 + $0x2] sm:$0xff]  ;;  %v6792_v19 = vld [vmem:[#allocation3 + $0xa] sm:$0xff] }
 0x3f7   : > { %2632 = vrot.lane.b32.xlu0 %v2628_v16, %s7773_s0  ;;  %2634 = vrot.lane.b32.xlu1 %v2629_v49, %s7773_s0  ;;  %v2696_v29 = vmul.f32 %v2695_v30, %v6790_v13  ;;  %v2697_v63 = vmul.f32 %v2695_v30, %v6792_v19  ;;  %v2710_v0 = vmul.f32 %v2709_v1, %v6790_v13 }
 0x3f8   : > { %v2711_v25 = vmul.f32 %v2709_v1, %v6792_v19  ;;  %v6802_v20 = vld [vmem:[#allocation3 + $0x18] sm:$0xff]  ;;  %v6804_v24 = vld [vmem:[#allocation3 + $0x20] sm:$0xff] }
 0x3f9   : > { %v2730_v15 = vmul.f32 %v2729_v11, %v6802_v20  ;;  %v2731_v45 = vmul.f32 %v2729_v11, %v6804_v24  ;;  %v2744_v21 = vmul.f32 %v2743_v59, %v6802_v20  ;;  %v2745_v51 = vmul.f32 %v2743_v59, %v6804_v24  ;;  %v6814_v38 = vld [vmem:[#allocation3 + $0x19] sm:$0xff]  ;;  %v6816_v8 = vld [vmem:[#allocation3 + $0x21] sm:$0xff] }
 0x3fa   : > { %v2764_v12 = vmul.f32 %v2763_v28, %v6814_v38  ;;  %v2765_v39 = vmul.f32 %v2763_v28, %v6816_v8  ;;  %v2778_v32 = vmul.f32 %v2777_v42, %v6814_v38  ;;  %v2779_v44 = vmul.f32 %v2777_v42, %v6816_v8  ;;  %v6826_v58 = vld [vmem:[#allocation3 + $0x1a] sm:$0xff]  ;;  %v6828_v48 = vld [vmem:[#allocation3 + $0x22] sm:$0xff] }
 0x3fb   : > { %2646 = vrot.lane.b32.xlu0 %v2642_v60, %s7774_s4  ;;  %2648 = vrot.lane.b32.xlu1 %v2643_v2, %s7774_s4  ;;  %v2798_v54 = vmul.f32 %v2797_v18, %v6826_v58  ;;  %v2799_v57 = vmul.f32 %v2797_v18, %v6828_v48  ;;  %v2812_v26 = vmul.f32 %v2811_v62, %v6826_v58  ;;  %v2899_v60 = vstv %s4597_s5  ;;  %s6966_s5 = sld [smem:[#allocation9 + $0x2b]] }
 0x3fc   : > { %v2813_v31 = vmul.f32 %v2811_v62, %v6828_v48  ;;  %v2947_v59 = vstv %s4601_s26  ;;  %v2655_v28 = vstv %s6878_s23  ;;  %s6998_s26 = sld [smem:[#allocation9 + $0x15]] }
 0x3fd   : > { %v2656_v62 = vmul.f32 %v2655_v28, %v6776_v4  ;;  %s7004_s23 = sld [smem:[#allocation9 + $0x31]] }
 0x3ff   : > { %2666 = vrot.lane.b32.xlu0 %v2662_v50, %s7773_s0  ;;  %v2163_v33 = vpop.permute.xlu0 %2162  ;;  %2668 = vrot.lane.b32.xlu1 %v2663_v9, %s7773_s0  ;;  %v2165_v41 = vpop.permute.xlu1 %2164  ;;  %v2913_v50 = vstv %s4598_s24  ;;  %s6974_s24 = sld [smem:[#allocation9 + $0x2c]] }
 0x400   : > { %2169 = vst.msk [vmem:[#allocation3 + $0x31] sm:$0xff] %vm412_vm2, %v2163_v33  ;;  %2170 = vst.msk [vmem:[#allocation3 + $0x39] sm:$0xff] %vm412_vm2, %v2165_v41 }
 0x403   : > { %2680 = vrot.lane.b32.xlu0 %v2676_v43, %s7774_s4  ;;  %2682 = vrot.lane.b32.xlu1 %v2677_v53, %s7774_s4  ;;  %v2621_v43 = vstv %s2620_s6  ;;  %v2933_v53 = vstv %s4600_s17  ;;  %s6979_s6 = sld [smem:[#allocation9 + $0x12]] }
 0x404   : > { %v2622_v30 = vmul.f32 %v2621_v43, %v6766_v10  ;;  %s6985_s17 = sld [smem:[#allocation9 + $0x2e]] }
 0x407   : > { %2700 = vrot.lane.b32.xlu0 %v2696_v29, %s7773_s0  ;;  %2702 = vrot.lane.b32.xlu1 %v2697_v63, %s7773_s0  ;;  %v6838_v6 = vld [vmem:[#allocation3 + $0x30] sm:$0xff]  ;;  %v6840_v55 = vld [vmem:[#allocation3 + $0x38] sm:$0xff]  ;;  %v2623_v29 = vmul.f32 %v2621_v43, %v6768_v46 }
 0x408   : > { %v2832_v34 = vmul.f32 %v2831_v5, %v6838_v6  ;;  %v2833_v35 = vmul.f32 %v2831_v5, %v6840_v55  ;;  %v2846_v40 = vmul.f32 %v2845_v56, %v6838_v6  ;;  %v2847_v27 = vmul.f32 %v2845_v56, %v6840_v55  ;;  %v6850_v37 = vld [vmem:[#allocation3 + $0x31] sm:$0xff]  ;;  %v6852_v52 = vld [vmem:[#allocation3 + $0x39] sm:$0xff] }
 0x409   : > { %v2866_v3 = vmul.f32 %v2865_v61, %v6850_v37  ;;  %v2867_v14 = vmul.f32 %v2865_v61, %v6852_v52  ;;  %v2880_v7 = vmul.f32 %v2879_v22, %v6850_v37  ;;  %v2881_v16 = vmul.f32 %v2879_v22, %v6852_v52  ;;  %v6862_v49 = vld [vmem:[#allocation3 + $0x32] sm:$0xff]  ;;  %v6864_v23 = vld [vmem:[#allocation3 + $0x3a] sm:$0xff] }
 0x40a   : > { %v2900_v2 = vmul.f32 %v2899_v60, %v6862_v49  ;;  %v2901_v36 = vmul.f32 %v2899_v60, %v6864_v23  ;;  %v2914_v9 = vmul.f32 %v2913_v50, %v6862_v49  ;;  %v2915_v17 = vmul.f32 %v2913_v50, %v6864_v23 }
 0x40b   : > { %2714 = vrot.lane.b32.xlu0 %v2710_v0, %s7774_s4  ;;  %2716 = vrot.lane.b32.xlu1 %v2711_v25, %s7774_s4  ;;  %v2619_v0 = vstv %s2618_s20  ;;  %v2689_v22 = vstv %s6895_s21  ;;  %s6993_s20 = sld [smem:[#allocation9 + $0x2f]] }
 0x40c   : > { %s7023_s21 = sld [smem:[#allocation9 + $0x34]] }
 0x40f   : > { %2734 = vrot.lane.b32.xlu0 %v2730_v15, %s7773_s0  ;;  %2736 = vrot.lane.b32.xlu1 %v2731_v45, %s7773_s0 }
 0x413   : > { %2748 = vrot.lane.b32.xlu0 %v2744_v21, %s7774_s4  ;;  %2750 = vrot.lane.b32.xlu1 %v2745_v51, %s7774_s4  ;;  %v2624_v21 = vadd.f32 %v2622_v30, %v2619_v0  ;;  %v2625_v51 = vadd.f32 %v2623_v29, %v2619_v0  ;;  %v2691_v30 = vmul.f32 %v2689_v22, %v6792_v19 }
 0x417   : > { %2768 = vrot.lane.b32.xlu0 %v2764_v12, %s7773_s0  ;;  %2770 = vrot.lane.b32.xlu1 %v2765_v39, %s7773_s0 }
 0x41b   : > { %2782 = vrot.lane.b32.xlu0 %v2778_v32, %s7774_s4  ;;  %2784 = vrot.lane.b32.xlu1 %v2779_v44, %s7774_s4 }
 0x41f   : > { %2802 = vrot.lane.b32.xlu0 %v2798_v54, %s7773_s0  ;;  %2804 = vrot.lane.b32.xlu1 %v2799_v57, %s7773_s0 }
 0x423   : > { %2816 = vrot.lane.b32.xlu0 %v2812_v26, %s7774_s4  ;;  %2818 = vrot.lane.b32.xlu1 %v2813_v31, %s7774_s4  ;;  %v2967_v26 = vstv %s6880_s7  ;;  %s7012_s7 = sld [smem:[#allocation9 + $0x32]] }
 0x427   : > { %2836 = vrot.lane.b32.xlu0 %v2832_v34, %s7773_s0  ;;  %2838 = vrot.lane.b32.xlu1 %v2833_v35, %s7773_s0  ;;  %v2657_v34 = vmul.f32 %v2655_v28, %v6778_v47 }
 0x42b   : > { %2850 = vrot.lane.b32.xlu0 %v2846_v40, %s7774_s4  ;;  %2852 = vrot.lane.b32.xlu1 %v2847_v27, %s7774_s4 }
 0x42f   : > { %2870 = vrot.lane.b32.xlu0 %v2866_v3, %s7773_s0  ;;  %2872 = vrot.lane.b32.xlu1 %v2867_v14, %s7773_s0  ;;  %v2981_v14 = vstv %s6890_s10  ;;  %s7017_s10 = sld [smem:[#allocation9 + $0x18]] }
 0x433   : > { %2884 = vrot.lane.b32.xlu0 %v2880_v7, %s7774_s4  ;;  %2886 = vrot.lane.b32.xlu1 %v2881_v16, %s7774_s4 }
 0x437   : > { %2904 = vrot.lane.b32.xlu0 %v2900_v2, %s7773_s0  ;;  %2906 = vrot.lane.b32.xlu1 %v2901_v36, %s7773_s0 }
 0x43b   : > { %2918 = vrot.lane.b32.xlu0 %v2914_v9, %s7774_s4  ;;  %2920 = vrot.lane.b32.xlu1 %v2915_v17, %s7774_s4 }
 0x45f   : > { %v2586_v33 = vpop.permute.xlu0 %2585  ;;  %v2588_v41 = vpop.permute.xlu1 %2587 }
 0x460   : > { %2592 = vst.msk [vmem:[#allocation3 + $0x49] sm:$0xff] %vm412_vm2, %v2586_v33  ;;  %2593 = vst.msk [vmem:[#allocation3 + $0x51] sm:$0xff] %vm412_vm2, %v2588_v41  ;;  %v2690_v33 = vmul.f32 %v2689_v22, %v6790_v13  ;;  %v3001_v41 = vstv %s6905_s25  ;;  %s7031_s25 = sld [smem:[#allocation9 + $0x35]] }
 0x467   : > { %v6884_v63 = vld [vmem:[#allocation3 + $0x48] sm:$0xff]  ;;  %v6886_v1 = vld [vmem:[#allocation3 + $0x50] sm:$0xff] }
 0x468   : > { %v2934_v25 = vmul.f32 %v2933_v53, %v6884_v63  ;;  %v2935_v11 = vmul.f32 %v2933_v53, %v6886_v1  ;;  %v2948_v42 = vmul.f32 %v2947_v59, %v6884_v63  ;;  %v2949_v32 = vmul.f32 %v2947_v59, %v6886_v1  ;;  %v6899_v44 = vld [vmem:[#allocation3 + $0x49] sm:$0xff]  ;;  %v6901_v18 = vld [vmem:[#allocation3 + $0x51] sm:$0xff] }
 0x469   : > { %v2633_v15 = vpop.permute.xlu0 %2632  ;;  %v2635_v45 = vpop.permute.xlu1 %2634  ;;  %v2968_v40 = vmul.f32 %v2967_v26, %v6899_v44  ;;  %v2969_v27 = vmul.f32 %v2967_v26, %v6901_v18  ;;  %v2982_v60 = vmul.f32 %v2981_v14, %v6899_v44  ;;  %v2983_v2 = vmul.f32 %v2981_v14, %v6901_v18  ;;  %v6922_v36 = vld [vmem:[#allocation3 + $0x4a] sm:$0xff]  ;;  %v6924_v50 = vld [vmem:[#allocation3 + $0x52] sm:$0xff] }
 0x46a   : > { %2938 = vrot.lane.b32.xlu0 %v2934_v25, %s7773_s0  ;;  %2940 = vrot.lane.b32.xlu1 %v2935_v11, %s7773_s0  ;;  %v2638_v12 = vadd.f32 %v2633_v15, %v2624_v21  ;;  %v2639_v39 = vadd.f32 %v2635_v45, %v2625_v51  ;;  %v3002_v25 = vmul.f32 %v3001_v41, %v6922_v36  ;;  %v3015_v59 = vstv %s6913_s12  ;;  %s7036_s12 = sld [smem:[#allocation9 + $0x1b]] }
 0x46b   : > { %v3003_v11 = vmul.f32 %v3001_v41, %v6924_v50  ;;  %v2723_v21 = vstv %s6918_s13  ;;  %s7042_s13 = sld [smem:[#allocation9 + $0x37]] }
 0x46d   : > { %v2647_v54 = vpop.permute.xlu0 %2646  ;;  %v2649_v57 = vpop.permute.xlu1 %2648 }
 0x46e   : > { %v2652_v31 = vadd.f32 %v2647_v54, %v2638_v12  ;;  %v2653_v5 = vadd.f32 %v2649_v57, %v2639_v39  ;;  %2952 = vrot.lane.b32.xlu0 %v2948_v42, %s7774_s4  ;;  %2954 = vrot.lane.b32.xlu1 %v2949_v32, %s7774_s4  ;;  %v3016_v12 = vmul.f32 %v3015_v59, %v6922_v36  ;;  %v3042_v57 = vstv %s6928_s18  ;;  %s4629_s18 = sld [smem:[#allocation9 + $0x38]] }
 0x46f   : > { %v3017_v39 = vmul.f32 %v3015_v59, %v6924_v50  ;;  %v2724_v54 = vmul.f32 %v2723_v21, %v6802_v20 }
 0x470   : > { %v2658_v35 = vadd.f32 %v2656_v62, %v2652_v31  ;;  %v2659_v56 = vadd.f32 %v2657_v34, %v2653_v5  ;;  %v2725_v31 = vmul.f32 %v2723_v21, %v6804_v24 }
 0x471   : > { %v2667_v61 = vpop.permute.xlu0 %2666  ;;  %v2669_v3 = vpop.permute.xlu1 %2668 }
 0x472   : > { %2972 = vrot.lane.b32.xlu0 %v2968_v40, %s7773_s0  ;;  %2974 = vrot.lane.b32.xlu1 %v2969_v27, %s7773_s0  ;;  %v2672_v7 = vadd.f32 %v2667_v61, %v2658_v35  ;;  %v2673_v16 = vadd.f32 %v2669_v3, %v2659_v56  ;;  %v3043_v35 = vmul.f32 %v3042_v57, %v6766_v10  ;;  %v3056_v61 = vstv %s6936_s22  ;;  %s4631_s22 = sld [smem:[#allocation9 + $0x3a]] }
 0x473   : > { %v3044_v56 = vmul.f32 %v3042_v57, %v6768_v46  ;;  %v2757_v3 = vstv %s6941_s19  ;;  %s4632_s19 = sld [smem:[#allocation9 + $0x3b]] }
 0x475   : > { %v2681_v9 = vpop.permute.xlu0 %2680  ;;  %v2683_v17 = vpop.permute.xlu1 %2682 }
 0x476   : > { %v2686_v43 = vadd.f32 %v2681_v9, %v2672_v7  ;;  %v2687_v53 = vadd.f32 %v2683_v17, %v2673_v16  ;;  %2986 = vrot.lane.b32.xlu0 %v2982_v60, %s7774_s4  ;;  %2988 = vrot.lane.b32.xlu1 %v2983_v2, %s7774_s4  ;;  %v3057_v7 = vmul.f32 %v3056_v61, %v6766_v10  ;;  %v3076_v17 = vstv %s6947_s2  ;;  %s4634_s2 = sld [smem:[#allocation9 + $0x3d]] }
 0x477   : > { %v3058_v16 = vmul.f32 %v3056_v61, %v6768_v46  ;;  %v2758_v9 = vmul.f32 %v2757_v3, %v6814_v38 }
 0x478   : > { %v2692_v29 = vadd.f32 %v2690_v33, %v2686_v43  ;;  %v2693_v0 = vadd.f32 %v2691_v30, %v2687_v53  ;;  %v2759_v43 = vmul.f32 %v2757_v3, %v6816_v8 }
 0x479   : > { %v2701_v15 = vpop.permute.xlu0 %2700  ;;  %v2703_v45 = vpop.permute.xlu1 %2702 }
 0x47a   : > { %3006 = vrot.lane.b32.xlu0 %v3002_v25, %s7773_s0  ;;  %3008 = vrot.lane.b32.xlu1 %v3003_v11, %s7773_s0  ;;  %v2706_v51 = vadd.f32 %v2701_v15, %v2692_v29  ;;  %v2707_v28 = vadd.f32 %v2703_v45, %v2693_v0  ;;  %v3077_v29 = vmul.f32 %v3076_v17, %v6776_v4  ;;  %v3090_v15 = vstv %s6955_s3  ;;  %s4635_s3 = sld [smem:[#allocation9 + $0x3e]] }
 0x47b   : > { %v3078_v0 = vmul.f32 %v3076_v17, %v6778_v47  ;;  %v2791_v45 = vstv %s6960_s14  ;;  %s4637_s14 = sld [smem:[#allocation9 + $0x40]] }
 0x47d   : > { %v2715_v42 = vpop.permute.xlu0 %2714  ;;  %v2717_v32 = vpop.permute.xlu1 %2716 }
 0x47e   : > { %v2720_v62 = vadd.f32 %v2715_v42, %v2706_v51  ;;  %v2721_v26 = vadd.f32 %v2717_v32, %v2707_v28  ;;  %3020 = vrot.lane.b32.xlu0 %v3016_v12, %s7774_s4  ;;  %3022 = vrot.lane.b32.xlu1 %v3017_v39, %s7774_s4  ;;  %v3091_v51 = vmul.f32 %v3090_v15, %v6776_v4  ;;  %v3110_v32 = vstv %s6966_s5  ;;  %s4638_s5 = sld [smem:[#allocation9 + $0x41]] }
 0x47f   : > { %v3092_v28 = vmul.f32 %v3090_v15, %v6778_v47  ;;  %v2792_v42 = vmul.f32 %v2791_v45, %v6826_v58 }
 0x480   : > { %v2726_v5 = vadd.f32 %v2724_v54, %v2720_v62  ;;  %v2727_v34 = vadd.f32 %v2725_v31, %v2721_v26  ;;  %v2793_v62 = vmul.f32 %v2791_v45, %v6828_v48 }
 0x481   : > { %v2735_v40 = vpop.permute.xlu0 %2734  ;;  %v2737_v27 = vpop.permute.xlu1 %2736 }
 0x482   : > { %3047 = vrot.lane.b32.xlu0 %v3043_v35, %s7773_s0  ;;  %3049 = vrot.lane.b32.xlu1 %v3044_v56, %s7773_s0  ;;  %v2740_v14 = vadd.f32 %v2735_v40, %v2726_v5  ;;  %v2741_v22 = vadd.f32 %v2737_v27, %v2727_v34  ;;  %v3111_v5 = vmul.f32 %v3110_v32, %v6790_v13  ;;  %v3124_v40 = vstv %s6974_s24  ;;  %s4640_s24 = sld [smem:[#allocation9 + $0x43]] }
 0x483   : > { %v3112_v34 = vmul.f32 %v3110_v32, %v6792_v19  ;;  %v2825_v27 = vstv %s6979_s6  ;;  %s4641_s6 = sld [smem:[#allocation9 + $0x44]] }
 0x485   : > { %v2749_v60 = vpop.permute.xlu0 %2748  ;;  %v2751_v2 = vpop.permute.xlu1 %2750 }
 0x486   : > { %v2754_v33 = vadd.f32 %v2749_v60, %v2740_v14  ;;  %v2755_v41 = vadd.f32 %v2751_v2, %v2741_v22  ;;  %3061 = vrot.lane.b32.xlu0 %v3057_v7, %s7774_s4  ;;  %3063 = vrot.lane.b32.xlu1 %v3058_v16, %s7774_s4  ;;  %v3125_v14 = vmul.f32 %v3124_v40, %v6790_v13  ;;  %v3144_v2 = vstv %s6985_s17  ;;  %s4643_s17 = sld [smem:[#allocation9 + $0x46]] }
 0x487   : > { %v3126_v22 = vmul.f32 %v3124_v40, %v6792_v19  ;;  %v2826_v60 = vmul.f32 %v2825_v27, %v6838_v6 }
 0x488   : > { %v2760_v53 = vadd.f32 %v2758_v9, %v2754_v33  ;;  %v2761_v30 = vadd.f32 %v2759_v43, %v2755_v41  ;;  %v2827_v33 = vmul.f32 %v2825_v27, %v6840_v55 }
 0x489   : > { %v2769_v25 = vpop.permute.xlu0 %2768  ;;  %v2771_v11 = vpop.permute.xlu1 %2770 }
 0x48a   : > { %3081 = vrot.lane.b32.xlu0 %v3077_v29, %s7773_s0  ;;  %3083 = vrot.lane.b32.xlu1 %v3078_v0, %s7773_s0  ;;  %v2774_v59 = vadd.f32 %v2769_v25, %v2760_v53  ;;  %v2775_v21 = vadd.f32 %v2771_v11, %v2761_v30  ;;  %v3145_v53 = vmul.f32 %v3144_v2, %v6802_v20  ;;  %v3158_v25 = vstv %s6993_s20  ;;  %s4644_s20 = sld [smem:[#allocation9 + $0x47]] }
 0x48b   : > { %v3146_v30 = vmul.f32 %v3144_v2, %v6804_v24  ;;  %v2859_v11 = vstv %s6998_s26  ;;  %s4649_s26 = sld [smem:[#allocation9 + $0x49]] }
 0x48d   : > { %v2783_v12 = vpop.permute.xlu0 %2782  ;;  %v2785_v39 = vpop.permute.xlu1 %2784 }
 0x48e   : > { %v2788_v54 = vadd.f32 %v2783_v12, %v2774_v59  ;;  %v2789_v57 = vadd.f32 %v2785_v39, %v2775_v21  ;;  %3095 = vrot.lane.b32.xlu0 %v3091_v51, %s7774_s4  ;;  %3097 = vrot.lane.b32.xlu1 %v3092_v28, %s7774_s4  ;;  %v3159_v59 = vmul.f32 %v3158_v25, %v6802_v20  ;;  %v3178_v39 = vstv %s7004_s23  ;;  %s4602_s23 = sld [smem:[#allocation9 + $0x1e]] }
 0x48f   : > { %v3160_v21 = vmul.f32 %v3158_v25, %v6804_v24  ;;  %v2860_v12 = vmul.f32 %v2859_v11, %v6850_v37 }
 0x490   : > { %v2794_v26 = vadd.f32 %v2792_v42, %v2788_v54  ;;  %v2795_v31 = vadd.f32 %v2793_v62, %v2789_v57  ;;  %v2861_v54 = vmul.f32 %v2859_v11, %v6852_v52 }
 0x491   : > { %v2803_v35 = vpop.permute.xlu0 %2802  ;;  %v2805_v56 = vpop.permute.xlu1 %2804 }
 0x492   : > { %3115 = vrot.lane.b32.xlu0 %v3111_v5, %s7773_s0  ;;  %3117 = vrot.lane.b32.xlu1 %v3112_v34, %s7773_s0  ;;  %v2808_v61 = vadd.f32 %v2803_v35, %v2794_v26  ;;  %v2809_v3 = vadd.f32 %v2805_v56, %v2795_v31  ;;  %v3179_v26 = vmul.f32 %v3178_v39, %v6814_v38  ;;  %v3192_v35 = vstv %s7012_s7  ;;  %s7106_s7 = sld [smem:[#allocation9 + $0x4a]] }
 0x493   : > { %v3180_v31 = vmul.f32 %v3178_v39, %v6816_v8  ;;  %v2893_v56 = vstv %s7017_s10  ;;  %s7112_s10 = sld [smem:[#allocation9 + $0x4c]] }
 0x495   : > { %v2817_v7 = vpop.permute.xlu0 %2816  ;;  %v2819_v16 = vpop.permute.xlu1 %2818 }
 0x496   : > { %v2822_v9 = vadd.f32 %v2817_v7, %v2808_v61  ;;  %v2823_v17 = vadd.f32 %v2819_v16, %v2809_v3  ;;  %3129 = vrot.lane.b32.xlu0 %v3125_v14, %s7774_s4  ;;  %3131 = vrot.lane.b32.xlu1 %v3126_v22, %s7774_s4  ;;  %v3193_v61 = vmul.f32 %v3192_v35, %v6814_v38  ;;  %v3212_v16 = vstv %s7023_s21  ;;  %s7116_s21 = sld [smem:[#allocation9 + $0x21]] }
 0x497   : > { %v3194_v3 = vmul.f32 %v3192_v35, %v6816_v8  ;;  %v2894_v7 = vmul.f32 %v2893_v56, %v6862_v49  ;;  %v3213_v8 = vmul.f32 %v3212_v16, %v6826_v58 }
 0x498   : > { %v2828_v41 = vadd.f32 %v2826_v60, %v2822_v9  ;;  %v2829_v43 = vadd.f32 %v2827_v33, %v2823_v17  ;;  %v2895_v9 = vmul.f32 %v2893_v56, %v6864_v23  ;;  %v3214_v33 = vmul.f32 %v3212_v16, %v6828_v48 }
 0x499   : > { %v2837_v29 = vpop.permute.xlu0 %2836  ;;  %v2839_v0 = vpop.permute.xlu1 %2838 }
 0x49a   : > { %3149 = vrot.lane.b32.xlu0 %v3145_v53, %s7773_s0  ;;  %3151 = vrot.lane.b32.xlu1 %v3146_v30, %s7773_s0  ;;  %v2842_v15 = vadd.f32 %v2837_v29, %v2828_v41  ;;  %v2843_v45 = vadd.f32 %v2839_v0, %v2829_v43  ;;  %v3226_v53 = vstv %s7031_s25  ;;  %v2927_v30 = vstv %s7036_s12  ;;  %s7123_s25 = sld [smem:[#allocation9 + $0x4d]] }
 0x49b   : > { %v3227_v25 = vmul.f32 %v3226_v53, %v6826_v58  ;;  %v3228_v11 = vmul.f32 %v3226_v53, %v6828_v48  ;;  %v3457_v53 = vstv %s4649_s26  ;;  %s7132_s12 = sld [smem:[#allocation9 + $0x4f]] }
 0x49c   : > { %s7213_s26 = sld [smem:[#allocation9 + $0x58]] }
 0x49d   : > { %v2851_v51 = vpop.permute.xlu0 %2850  ;;  %v2853_v28 = vpop.permute.xlu1 %2852 }
 0x49e   : > { %v2856_v42 = vadd.f32 %v2851_v51, %v2842_v15  ;;  %v2857_v32 = vadd.f32 %v2853_v28, %v2843_v45  ;;  %3163 = vrot.lane.b32.xlu0 %v3159_v59, %s7774_s4  ;;  %3165 = vrot.lane.b32.xlu1 %v3160_v21, %s7774_s4  ;;  %v3246_v59 = vstv %s7042_s13  ;;  %v2928_v21 = vmul.f32 %v2927_v30, %v6884_v63  ;;  %s7137_s13 = sld [smem:[#allocation9 + $0x24]] }
 0x49f   : > { %v3247_v39 = vmul.f32 %v3246_v59, %v6838_v6  ;;  %v3248_v58 = vmul.f32 %v3246_v59, %v6840_v55  ;;  %v3471_v59 = vstv %s7106_s7  ;;  %s7227_s7 = sld [smem:[#allocation9 + $0x59]] }
 0x4a0   : > { %v2862_v57 = vadd.f32 %v2860_v12, %v2856_v42  ;;  %v2863_v62 = vadd.f32 %v2861_v54, %v2857_v32  ;;  %v2929_v12 = vmul.f32 %v2927_v30, %v6886_v1  ;;  %v3260_v32 = vstv %s4629_s18  ;;  %s7142_s18 = sld [smem:[#allocation9 + $0x50]] }
 0x4a1   : > { %v2871_v5 = vpop.permute.xlu0 %2870  ;;  %v2873_v34 = vpop.permute.xlu1 %2872  ;;  %v3261_v54 = vmul.f32 %v3260_v32, %v6838_v6  ;;  %v2961_v30 = vstv %s4602_s23  ;;  %s7218_s23 = sld [smem:[#allocation9 + $0x2d]] }
 0x4a2   : > { %3183 = vrot.lane.b32.xlu0 %v3179_v26, %s7773_s0  ;;  %3185 = vrot.lane.b32.xlu1 %v3180_v31, %s7773_s0  ;;  %v2876_v40 = vadd.f32 %v2871_v5, %v2862_v57  ;;  %v2877_v27 = vadd.f32 %v2873_v34, %v2863_v62  ;;  %v3262_v57 = vmul.f32 %v3260_v32, %v6840_v55  ;;  %v3280_v62 = vstv %s4631_s22  ;;  %s7148_s22 = sld [smem:[#allocation10 + $0x1]] }
 0x4a3   : > { %v3281_v26 = vmul.f32 %v3280_v62, %v6850_v37  ;;  %v3282_v31 = vmul.f32 %v3280_v62, %v6852_v52  ;;  %v3294_v5 = vstv %s4632_s19  ;;  %v3314_v34 = vstv %s4634_s2  ;;  %s363_s19 = sand.u32 1, %s5057_s28   ;;  %s7154_s2 = sld [smem:[#allocation9 + $0x52]] }
 0x4a4   : > { %v3295_v6 = vmul.f32 %v3294_v5, %v6850_v37  ;;  %v3296_v55 = vmul.f32 %v3294_v5, %v6852_v52  ;;  %v3315_v35 = vmul.f32 %v3314_v34, %v6862_v49  ;;  %v3316_v56 = vmul.f32 %v3314_v34, %v6864_v23 }
 0x4a5   : > { %v2885_v14 = vpop.permute.xlu0 %2884  ;;  %v2887_v22 = vpop.permute.xlu1 %2886  ;;  %v3472_v32 = vmul.f32 %v3471_v59, %v6766_v10 }
 0x4a6   : > { %v2890_v60 = vadd.f32 %v2885_v14, %v2876_v40  ;;  %v2891_v2 = vadd.f32 %v2887_v22, %v2877_v27  ;;  %3197 = vrot.lane.b32.xlu0 %v3193_v61, %s7774_s4  ;;  %3199 = vrot.lane.b32.xlu1 %v3194_v3, %s7774_s4  ;;  %v3328_v40 = vstv %s4635_s3  ;;  %v3348_v27 = vstv %s4637_s14  ;;  %s7159_s3 = sld [smem:[#allocation9 + $0x27]]  ;;  %s4419_s14 = sshll.u32 %s363_s19, 6 }
 0x4a7   : > { %v3329_v37 = vmul.f32 %v3328_v40, %v6862_v49  ;;  %v3330_v52 = vmul.f32 %v3328_v40, %v6864_v23  ;;  %v3349_v61 = vmul.f32 %v3348_v27, %v6884_v63  ;;  %v3350_v3 = vmul.f32 %v3348_v27, %v6886_v1 }
 0x4a8   : > { %v2896_v38 = vadd.f32 %v2894_v7, %v2890_v60  ;;  %v2897_v17 = vadd.f32 %v2895_v9, %v2891_v2  ;;  %v3362_v14 = vstv %s4638_s5  ;;  %v3382_v22 = vstv %s4640_s24  ;;  %s7166_s5 = sld [smem:[#allocation9 + $0x53]]  ;;  %s7179_s24 = scalar_lea.vmem [#allocation12], %s4419_s14 }
 0x4a9   : > { %v2905_v41 = vpop.permute.xlu0 %2904  ;;  %v2907_v43 = vpop.permute.xlu1 %2906  ;;  %v3363_v49 = vmul.f32 %v3362_v14, %v6884_v63  ;;  %v3364_v23 = vmul.f32 %v3362_v14, %v6886_v1  ;;  %v3383_v7 = vmul.f32 %v3382_v22, %v6899_v44  ;;  %v3384_v16 = vmul.f32 %v3382_v22, %v6901_v18  ;;  %s7303_s14 = sld [smem:[#allocation9 + $0x70]] }
 0x4aa   : > { %3217 = vrot.lane.b32.xlu0 %v3213_v8, %s7773_s0  ;;  %3219 = vrot.lane.b32.xlu1 %v3214_v33, %s7773_s0  ;;  %v2910_v29 = vadd.f32 %v2905_v41, %v2896_v38  ;;  %v2911_v0 = vadd.f32 %v2907_v43, %v2897_v17  ;;  %v3396_v60 = vstv %s4641_s6  ;;  %v3416_v2 = vstv %s4643_s17  ;;  %s7186_s6 = sld [smem:[#allocation9 + $0x55]] }
 0x4ab   : > { %v3397_v63 = vmul.f32 %v3396_v60, %v6899_v44  ;;  %v3398_v1 = vmul.f32 %v3396_v60, %v6901_v18  ;;  %v3417_v9 = vmul.f32 %v3416_v2, %v6922_v36  ;;  %v3418_v38 = vmul.f32 %v3416_v2, %v6924_v50  ;;  %v7168_v60 = vld [vmem:[#allocation3] sm:$0xff]  ;;  %s7191_s17 = sld [smem:[#allocation9 + $0x2a]] }
 0x4ac   : > { %v3430_v17 = vstv %s4644_s20  ;;  %v3539_v22 = vstv %s7142_s18  ;;  %s7196_s20 = sld [smem:[#allocation9 + $0x56]] }
 0x4ad   : > { %v2919_v15 = vpop.permute.xlu0 %2918  ;;  %v2921_v45 = vpop.permute.xlu1 %2920  ;;  %v3431_v41 = vmul.f32 %v3430_v17, %v6922_v36  ;;  %v3432_v43 = vmul.f32 %v3430_v17, %v6924_v50  ;;  %s7270_s18 = sld [smem:[#allocation9 + $0x5f]] }
 0x4ae   : > { %v2924_v51 = vadd.f32 %v2919_v15, %v2910_v29  ;;  %v2925_v28 = vadd.f32 %v2921_v45, %v2911_v0  ;;  %3231 = vrot.lane.b32.xlu0 %v3227_v25, %s7774_s4  ;;  %3233 = vrot.lane.b32.xlu1 %v3228_v11, %s7774_s4  ;;  %v3458_v15 = vmul.f32 %v3457_v53, %v6766_v10 }
 0x4af   : > { %v3459_v45 = vmul.f32 %v3457_v53, %v6768_v46 }
 0x4b0   : > { %v7062_v42 = vadd.f32 %v2928_v21, %v2924_v51  ;;  %v7064_v48 = vadd.f32 %v2929_v12, %v2925_v28  ;;  %v2962_v28 = vmul.f32 %v2961_v30, %v6899_v44  ;;  %v2963_v12 = vmul.f32 %v2961_v30, %v6901_v18 }
 0x4b1   : > { %v2995_v44 = vstv %s7116_s21  ;;  %s7245_s21 = sld [smem:[#allocation9 + $0x30]] }
 0x4b2   : > { %3251 = vrot.lane.b32.xlu0 %v3247_v39, %s7773_s0  ;;  %3253 = vrot.lane.b32.xlu1 %v3248_v58, %s7773_s0  ;;  %v2996_v34 = vmul.f32 %v2995_v44, %v6922_v36  ;;  %v3525_v36 = vstv %s7132_s12  ;;  %s7263_s12 = sld [smem:[#allocation9 + $0x5e]] }
 0x4b6   : > { %3265 = vrot.lane.b32.xlu0 %v3261_v54, %s7774_s4  ;;  %3267 = vrot.lane.b32.xlu1 %v3262_v57, %s7774_s4  ;;  %v3473_v54 = vmul.f32 %v3471_v59, %v6768_v46  ;;  %v3491_v57 = vstv %s7112_s10  ;;  %v3505_v46 = vstv %s7123_s25  ;;  %s7240_s10 = sld [smem:[#allocation9 + $0x5b]] }
 0x4b7   : > { %v3492_v5 = vmul.f32 %v3491_v57, %v6776_v4  ;;  %v3493_v10 = vmul.f32 %v3491_v57, %v6778_v47  ;;  %v3506_v27 = vmul.f32 %v3505_v46, %v6776_v4  ;;  %v3573_v59 = vstv %s7166_s5  ;;  %v7209_v57 = vld [vmem:[#allocation3 + $0x20] sm:$0xff]  ;;  %s7254_s25 = sld [smem:[#allocation9 + $0x5c]] }
 0x4b8   : > { %s7314_s5 = sld [smem:[#allocation9 + $0x71]] }
 0x4ba   : > { %3285 = vrot.lane.b32.xlu0 %v3281_v26, %s7773_s0  ;;  %3287 = vrot.lane.b32.xlu1 %v3282_v31, %s7773_s0 }
 0x4be   : > { %3299 = vrot.lane.b32.xlu0 %v3295_v6, %s7774_s4  ;;  %3301 = vrot.lane.b32.xlu1 %v3296_v55, %s7774_s4 }
 0x4c2   : > { %3319 = vrot.lane.b32.xlu0 %v3315_v35, %s7773_s0  ;;  %3321 = vrot.lane.b32.xlu1 %v3316_v56, %s7773_s0  ;;  %v2997_v35 = vmul.f32 %v2995_v44, %v6924_v50  ;;  %v3036_v50 = vstv %s7137_s13  ;;  %v3575_v44 = vmul.f32 %v7209_v57, %v3573_v59  ;;  %s7268_s13 = sld [smem:[#allocation9 + $0x33]] }
 0x4c6   : > { %3333 = vrot.lane.b32.xlu0 %v3329_v37, %s7774_s4  ;;  %3335 = vrot.lane.b32.xlu1 %v3330_v52, %s7774_s4 }
 0x4ca   : > { %3353 = vrot.lane.b32.xlu0 %v3349_v61, %s7773_s0  ;;  %3355 = vrot.lane.b32.xlu1 %v3350_v3, %s7773_s0  ;;  %v3507_v61 = vmul.f32 %v3505_v46, %v6778_v47  ;;  %v3526_v47 = vmul.f32 %v3525_v36, %v6790_v13  ;;  %v7220_v46 = vld [vmem:[#allocation3 + $0x19] sm:$0xff] }
 0x4ce   : > { %3367 = vrot.lane.b32.xlu0 %v3363_v49, %s7774_s4  ;;  %3369 = vrot.lane.b32.xlu1 %v3364_v23, %s7774_s4  ;;  %v3527_v23 = vmul.f32 %v3525_v36, %v6792_v19 }
 0x4d2   : > { %3387 = vrot.lane.b32.xlu0 %v3383_v7, %s7773_s0  ;;  %3389 = vrot.lane.b32.xlu1 %v3384_v16, %s7773_s0 }
 0x4d6   : > { %3401 = vrot.lane.b32.xlu0 %v3397_v63, %s7774_s4  ;;  %3403 = vrot.lane.b32.xlu1 %v3398_v1, %s7774_s4  ;;  %v3037_v63 = vmul.f32 %v7168_v60, %v3036_v50  ;;  %v7171_v1 = vld [vmem:[#allocation3 + $0x8] sm:$0xff] }
 0x4d7   : > { %v3038_v2 = vmul.f32 %v7171_v1, %v3036_v50 }
 0x4da   : > { %3421 = vrot.lane.b32.xlu0 %v3417_v9, %s7773_s0  ;;  %3423 = vrot.lane.b32.xlu1 %v3418_v38, %s7773_s0  ;;  %v3034_v9 = vstv %s7148_s22  ;;  %s7279_s22 = sld [smem:[#allocation9 + $0x6d]] }
 0x4db   : > { %v3039_v53 = vadd.f32 %v3037_v63, %v3034_v9  ;;  %v3040_v30 = vadd.f32 %v3038_v2, %v3034_v9  ;;  %v7247_v2 = vld [vmem:[#allocation3 + $0x1a] sm:$0xff] }
 0x4dc   : > { %v2939_v8 = vpop.permute.xlu0 %2938  ;;  %v2941_v33 = vpop.permute.xlu1 %2940 }
 0x4dd   : > { %v2944_v29 = vadd.f32 %v2939_v8, %v7062_v42  ;;  %v2945_v0 = vadd.f32 %v2941_v33, %v7064_v48 }
 0x4de   : > { %3435 = vrot.lane.b32.xlu0 %v3431_v41, %s7774_s4  ;;  %3437 = vrot.lane.b32.xlu1 %v3432_v43, %s7774_s4  ;;  %v3540_v41 = vmul.f32 %v3539_v22, %v6790_v13  ;;  %v3541_v43 = vmul.f32 %v3539_v22, %v6792_v19  ;;  %v3070_v13 = vstv %s7159_s3  ;;  %s7293_s3 = sld [smem:[#allocation9 + $0x36]] }
 0x4e0   : > { %v2953_v25 = vpop.permute.xlu0 %2952  ;;  %v2955_v11 = vpop.permute.xlu1 %2954 }
 0x4e1   : > { %v2958_v21 = vadd.f32 %v2953_v25, %v2944_v29  ;;  %v2959_v51 = vadd.f32 %v2955_v11, %v2945_v0  ;;  %v3559_v29 = vstv %s7154_s2  ;;  %s7288_s2 = sld [smem:[#allocation9 + $0x6e]] }
 0x4e2   : > { %3462 = vrot.lane.b32.xlu0 %v3458_v15, %s7773_s0  ;;  %3464 = vrot.lane.b32.xlu1 %v3459_v45, %s7773_s0  ;;  %v3560_v15 = vmul.f32 %v3559_v29, %v6802_v20  ;;  %v3561_v45 = vmul.f32 %v3559_v29, %v6804_v24 }
 0x4e3   : > { %v2964_v39 = vadd.f32 %v2962_v28, %v2958_v21  ;;  %v2965_v58 = vadd.f32 %v2963_v12, %v2959_v51  ;;  %v7198_v28 = vld [vmem:[#allocation3 + $0x1] sm:$0xff] }
 0x4e4   : > { %v2973_v42 = vpop.permute.xlu0 %2972  ;;  %v2975_v48 = vpop.permute.xlu1 %2974  ;;  %v3071_v12 = vmul.f32 %v7198_v28, %v3070_v13 }
 0x4e5   : > { %v2978_v18 = vadd.f32 %v2973_v42, %v2964_v39  ;;  %v2979_v62 = vadd.f32 %v2975_v48, %v2965_v58  ;;  %v7201_v39 = vld [vmem:[#allocation3 + $0x9] sm:$0xff] }
 0x4e6   : > { %3476 = vrot.lane.b32.xlu0 %v3472_v32, %s7774_s4  ;;  %3478 = vrot.lane.b32.xlu1 %v3473_v54, %s7774_s4  ;;  %v3072_v58 = vmul.f32 %v7201_v39, %v3070_v13  ;;  %v7206_v32 = vld [vmem:[#allocation3 + $0x18] sm:$0xff] }
 0x4e7   : > { %v3574_v54 = vmul.f32 %v7206_v32, %v3573_v59 }
 0x4e8   : > { %v2987_v26 = vpop.permute.xlu0 %2986  ;;  %v2989_v31 = vpop.permute.xlu1 %2988 }
 0x4e9   : > { %v2992_v6 = vadd.f32 %v2987_v26, %v2978_v18  ;;  %v2993_v55 = vadd.f32 %v2989_v31, %v2979_v62  ;;  %v3593_v18 = vstv %s7186_s6  ;;  %v3104_v62 = vstv %s7191_s17  ;;  %s7319_s6 = sld [smem:[#allocation9 + $0x39]] }
 0x4ea   : > { %3496 = vrot.lane.b32.xlu0 %v3492_v5, %s7773_s0  ;;  %3498 = vrot.lane.b32.xlu1 %v3493_v10, %s7773_s0  ;;  %s7324_s17 = sld [smem:[#allocation9 + $0x73]] }
 0x4eb   : > { %v2998_v56 = vadd.f32 %v2996_v34, %v2992_v6  ;;  %v2999_v40 = vadd.f32 %v2997_v35, %v2993_v55  ;;  %v3594_v6 = vmul.f32 %v7220_v46, %v3593_v18  ;;  %v7223_v55 = vld [vmem:[#allocation3 + $0x21] sm:$0xff]  ;;  %v3607_v35 = vstv %s7196_s20  ;;  %s7333_s20 = sld [smem:[#allocation9 + $0x74]] }
 0x4ec   : > { %v3007_v37 = vpop.permute.xlu0 %3006  ;;  %v3009_v52 = vpop.permute.xlu1 %3008  ;;  %v3595_v34 = vmul.f32 %v7223_v55, %v3593_v18 }
 0x4ed   : > { %v3012_v3 = vadd.f32 %v3007_v37, %v2998_v56  ;;  %v3013_v14 = vadd.f32 %v3009_v52, %v2999_v40  ;;  %v7229_v37 = vld [vmem:[#allocation3 + $0x2] sm:$0xff] }
 0x4ee   : > { %3510 = vrot.lane.b32.xlu0 %v3506_v27, %s7774_s4  ;;  %3512 = vrot.lane.b32.xlu1 %v3507_v61, %s7774_s4  ;;  %v3105_v52 = vmul.f32 %v7229_v37, %v3104_v62  ;;  %v7232_v27 = vld [vmem:[#allocation3 + $0xa] sm:$0xff] }
 0x4ef   : > { %v3106_v61 = vmul.f32 %v7232_v27, %v3104_v62 }
 0x4f0   : > { %v3021_v4 = vpop.permute.xlu0 %3020  ;;  %v3023_v49 = vpop.permute.xlu1 %3022 }
 0x4f1   : > { %v3026_v7 = vadd.f32 %v3021_v4, %v3012_v3  ;;  %v3027_v16 = vadd.f32 %v3023_v49, %v3013_v14  ;;  %v3608_v4 = vmul.f32 %v7220_v46, %v3607_v35  ;;  %v3609_v49 = vmul.f32 %v7223_v55, %v3607_v35 }
 0x4f2   : > { %3530 = vrot.lane.b32.xlu0 %v3526_v47, %s7773_s0  ;;  %3532 = vrot.lane.b32.xlu1 %v3527_v23, %s7773_s0  ;;  %v3627_v47 = vstv %s7213_s26  ;;  %v3138_v23 = vstv %s7218_s23  ;;  %s7338_s26 = sld [smem:[#allocation9 + $0x3c]] }
 0x4f3   : > { %v3028_v38 = vmax.f32 %v3026_v7, 0.0  ;;  %v3029_v17 = vmax.f32 %v3027_v16, 0.0  ;;  %v3628_v9 = vmul.f32 %v7247_v2, %v3627_v47  ;;  %v3206_v35 = vstv %s7268_s13  ;;  %s7343_s23 = sld [smem:[#allocation9 + $0x76]] }
 0x4f4   : > { %v3048_v8 = vpop.permute.xlu0 %3047  ;;  %v3050_v33 = vpop.permute.xlu1 %3049  ;;  %s7385_s13 = sld [smem:[#allocation9 + $0x7c]] }
 0x4f5   : > { %3031 = vst.msk [vmem:[%s7179_s24] sm:$0xff] %vm3030_vm3, %v3028_v38  ;;  %3032 = vst.msk [vmem:[%s7179_s24 + $0x8] sm:$0xff] %vm3030_vm3, %v3029_v17  ;;  %v3053_v19 = vadd.f32 %v3048_v8, %v3039_v53  ;;  %v3054_v0 = vadd.f32 %v3050_v33, %v3040_v30  ;;  %v7250_v38 = vld [vmem:[#allocation3 + $0x22] sm:$0xff]  ;;  %v3641_v8 = vstv %s7227_s7  ;;  %v3140_v53 = vmul.f32 %v7209_v57, %v3138_v23  ;;  %s7352_s7 = sld [smem:[#allocation9 + $0x77]] }
 0x4f6   : > { %3544 = vrot.lane.b32.xlu0 %v3540_v41, %s7774_s4  ;;  %3546 = vrot.lane.b32.xlu1 %v3541_v43, %s7774_s4  ;;  %v3629_v17 = vmul.f32 %v7250_v38, %v3627_v47  ;;  %v3139_v43 = vmul.f32 %v7206_v32, %v3138_v23 }
 0x4f8   : > { %v3062_v25 = vpop.permute.xlu0 %3061  ;;  %v3064_v11 = vpop.permute.xlu1 %3063 }
 0x4f9   : > { %v3067_v21 = vadd.f32 %v3062_v25, %v3053_v19  ;;  %v3068_v51 = vadd.f32 %v3064_v11, %v3054_v0  ;;  %v3642_v0 = vmul.f32 %v7247_v2, %v3641_v8  ;;  %v3643_v25 = vmul.f32 %v7250_v38, %v3641_v8 }
 0x4fa   : > { %3564 = vrot.lane.b32.xlu0 %v3560_v15, %s7773_s0  ;;  %3566 = vrot.lane.b32.xlu1 %v3561_v45, %s7773_s0  ;;  %v3661_v11 = vstv %s7240_s10  ;;  %v3172_v15 = vstv %s7245_s21  ;;  %s7357_s10 = sld [smem:[#allocation9 + $0x3f]] }
 0x4fb   : > { %v3073_v20 = vadd.f32 %v3071_v12, %v3067_v21  ;;  %v3074_v24 = vadd.f32 %v3072_v58, %v3068_v51  ;;  %v7272_v12 = vld [vmem:[#allocation3 + $0x30] sm:$0xff]  ;;  %v3174_v18 = vmul.f32 %v7223_v55, %v3172_v15  ;;  %s7362_s21 = sld [smem:[#allocation9 + $0x79]] }
 0x4fc   : > { %v3082_v42 = vpop.permute.xlu0 %3081  ;;  %v3084_v48 = vpop.permute.xlu1 %3083  ;;  %v3662_v58 = vmul.f32 %v7272_v12, %v3661_v11 }
 0x4fd   : > { %v3087_v26 = vadd.f32 %v3082_v42, %v3073_v20  ;;  %v3088_v31 = vadd.f32 %v3084_v48, %v3074_v24  ;;  %v7275_v20 = vld [vmem:[#allocation3 + $0x38] sm:$0xff]  ;;  %v3675_v42 = vstv %s7254_s25  ;;  %s7375_s25 = sld [smem:[#allocation9 + $0x7a]] }
 0x4fe   : > { %3578 = vrot.lane.b32.xlu0 %v3574_v54, %s7774_s4  ;;  %3580 = vrot.lane.b32.xlu1 %v3575_v44, %s7774_s4  ;;  %v3663_v24 = vmul.f32 %v7275_v20, %v3661_v11  ;;  %v3173_v44 = vmul.f32 %v7220_v46, %v3172_v15 }
 0x500   : > { %v3096_v5 = vpop.permute.xlu0 %3095  ;;  %v3098_v10 = vpop.permute.xlu1 %3097 }
 0x501   : > { %v3101_v56 = vadd.f32 %v3096_v5, %v3087_v26  ;;  %v3102_v40 = vadd.f32 %v3098_v10, %v3088_v31  ;;  %v3676_v10 = vmul.f32 %v7272_v12, %v3675_v42 }
 0x502   : > { %3598 = vrot.lane.b32.xlu0 %v3594_v6, %s7773_s0  ;;  %3600 = vrot.lane.b32.xlu1 %v3595_v34, %s7773_s0  ;;  %v3677_v6 = vmul.f32 %v7275_v20, %v3675_v42  ;;  %v3695_v34 = vstv %s7263_s12  ;;  %s7380_s12 = sld [smem:[#allocation9 + $0x42]] }
 0x503   : > { %v3107_v36 = vadd.f32 %v3105_v52, %v3101_v56  ;;  %v3108_v50 = vadd.f32 %v3106_v61, %v3102_v40 }
 0x504   : > { %v3116_v3 = vpop.permute.xlu0 %3115  ;;  %v3118_v14 = vpop.permute.xlu1 %3117 }
 0x505   : > { %v3121_v22 = vadd.f32 %v3116_v3, %v3107_v36  ;;  %v3122_v7 = vadd.f32 %v3118_v14, %v3108_v50  ;;  %v7295_v36 = vld [vmem:[#allocation3 + $0x31] sm:$0xff]  ;;  %v7298_v3 = vld [vmem:[#allocation3 + $0x39] sm:$0xff] }
 0x506   : > { %3612 = vrot.lane.b32.xlu0 %v3608_v4, %s7774_s4  ;;  %3614 = vrot.lane.b32.xlu1 %v3609_v49, %s7774_s4  ;;  %v3696_v50 = vmul.f32 %v7295_v36, %v3695_v34  ;;  %v3697_v14 = vmul.f32 %v7298_v3, %v3695_v34  ;;  %v3709_v4 = vstv %s7270_s18  ;;  %v3872_v49 = vstv %s7279_s22  ;;  %s7398_s22 = sld [smem:[#allocation9 + $0x7d]] }
 0x507   : > { %v3710_v8 = vmul.f32 %v7295_v36, %v3709_v4  ;;  %s7488_s18 = sld [smem:[#allocation9 + $0x62]] }
 0x508   : > { %v3130_v16 = vpop.permute.xlu0 %3129  ;;  %v3132_v63 = vpop.permute.xlu1 %3131 }
 0x509   : > { %v3135_v33 = vadd.f32 %v3130_v16, %v3121_v22  ;;  %v3136_v41 = vadd.f32 %v3132_v63, %v3122_v7  ;;  %v3207_v22 = vmul.f32 %v7247_v2, %v3206_v35  ;;  %v3208_v7 = vmul.f32 %v7250_v38, %v3206_v35 }
 0x50a   : > { %3632 = vrot.lane.b32.xlu0 %v3628_v9, %s7773_s0  ;;  %3634 = vrot.lane.b32.xlu1 %v3629_v17, %s7773_s0 }
 0x50b   : > { %v3141_v30 = vadd.f32 %v3139_v43, %v3135_v33  ;;  %v3142_v29 = vadd.f32 %v3140_v53, %v3136_v41  ;;  %v3873_v33 = vmul.f32 %v7168_v60, %v3872_v49  ;;  %v3886_v41 = vstv %s7288_s2  ;;  %s7403_s2 = sld [smem:[#allocation9 + $0x45]] }
 0x50c   : > { %v3150_v13 = vpop.permute.xlu0 %3149  ;;  %v3152_v19 = vpop.permute.xlu1 %3151  ;;  %v3240_v43 = vstv %s7293_s3  ;;  %v3888_v42 = vmul.f32 %v7171_v1, %v3886_v41  ;;  %s7408_s3 = sld [smem:[#allocation9 + $0x7f]] }
 0x50d   : > { %v3155_v45 = vadd.f32 %v3150_v13, %v3141_v30  ;;  %v3156_v59 = vadd.f32 %v3152_v19, %v3142_v29  ;;  %v3874_v19 = vmul.f32 %v7171_v1, %v3872_v49 }
 0x50e   : > { %3646 = vrot.lane.b32.xlu0 %v3642_v0, %s7774_s4  ;;  %3648 = vrot.lane.b32.xlu1 %v3643_v25, %s7774_s4  ;;  %v3887_v0 = vmul.f32 %v7168_v60, %v3886_v41  ;;  %v3906_v25 = vstv %s7303_s14  ;;  %s7420_s14 = sld [smem:[#allocation9 + $0x48]] }
 0x510   : > { %v3164_v21 = vpop.permute.xlu0 %3163  ;;  %v3166_v51 = vpop.permute.xlu1 %3165 }
 0x511   : > { %v3169_v48 = vadd.f32 %v3164_v21, %v3155_v45  ;;  %v3170_v54 = vadd.f32 %v3166_v51, %v3156_v59  ;;  %v3241_v45 = vmul.f32 %v7272_v12, %v3240_v43  ;;  %v3242_v59 = vmul.f32 %v7275_v20, %v3240_v43 }
 0x512   : > { %3666 = vrot.lane.b32.xlu0 %v3662_v58, %s7773_s0  ;;  %3668 = vrot.lane.b32.xlu1 %v3663_v24, %s7773_s0 }
 0x513   : > { %v3175_v62 = vadd.f32 %v3173_v44, %v3169_v48  ;;  %v3176_v26 = vadd.f32 %v3174_v18, %v3170_v54  ;;  %v3907_v48 = vmul.f32 %v7198_v28, %v3906_v25  ;;  %v3920_v54 = vstv %s7314_s5  ;;  %s7423_s5 = sld [smem:[#allocation9 + $0x80]] }
 0x514   : > { %v3184_v31 = vpop.permute.xlu0 %3183  ;;  %v3186_v5 = vpop.permute.xlu1 %3185  ;;  %v3274_v44 = vstv %s7319_s6  ;;  %v3922_v49 = vmul.f32 %v7201_v39, %v3920_v54  ;;  %s7431_s6 = sld [smem:[#allocation10 + $0x2]] }
 0x515   : > { %v3189_v56 = vadd.f32 %v3184_v31, %v3175_v62  ;;  %v3190_v40 = vadd.f32 %v3186_v5, %v3176_v26  ;;  %v3908_v5 = vmul.f32 %v7201_v39, %v3906_v25 }
 0x516   : > { %3680 = vrot.lane.b32.xlu0 %v3676_v10, %s7774_s4  ;;  %3682 = vrot.lane.b32.xlu1 %v3677_v6, %s7774_s4  ;;  %v3921_v10 = vmul.f32 %v7198_v28, %v3920_v54  ;;  %v3940_v6 = vstv %s7324_s17  ;;  %s7439_s17 = sld [smem:[#allocation9 + $0x82]] }
 0x518   : > { %v3198_v52 = vpop.permute.xlu0 %3197  ;;  %v3200_v61 = vpop.permute.xlu1 %3199 }
 0x519   : > { %v3203_v47 = vadd.f32 %v3198_v52, %v3189_v56  ;;  %v3204_v23 = vadd.f32 %v3200_v61, %v3190_v40  ;;  %v3275_v56 = vmul.f32 %v7295_v36, %v3274_v44  ;;  %v3276_v40 = vmul.f32 %v7298_v3, %v3274_v44 }
 0x51a   : > { %3700 = vrot.lane.b32.xlu0 %v3696_v50, %s7773_s0  ;;  %3702 = vrot.lane.b32.xlu1 %v3697_v14, %s7773_s0  ;;  %v4008_v44 = vstv %s7362_s21  ;;  %s7493_s21 = sld [smem:[#allocation9 + $0x51]] }
 0x51b   : > { %v3209_v16 = vadd.f32 %v3207_v22, %v3203_v47  ;;  %v3210_v63 = vadd.f32 %v3208_v7, %v3204_v23  ;;  %v3941_v47 = vmul.f32 %v7229_v37, %v3940_v6  ;;  %v3954_v23 = vstv %s7333_s20  ;;  %s7449_s20 = sld [smem:[#allocation9 + $0x4b]] }
 0x51c   : > { %v3218_v9 = vpop.permute.xlu0 %3217  ;;  %v3220_v17 = vpop.permute.xlu1 %3219  ;;  %v3308_v22 = vstv %s7338_s26  ;;  %s7456_s26 = sld [smem:[#allocation9 + $0x83]] }
 0x51d   : > { %v3223_v53 = vadd.f32 %v3218_v9, %v3209_v16  ;;  %v3224_v30 = vadd.f32 %v3220_v17, %v3210_v63  ;;  %v3942_v17 = vmul.f32 %v7232_v27, %v3940_v6 }
 0x51e   : > { %3714 = vrot.lane.b32.xlu0 %v3710_v8, %s7774_s4  ;;  %3877 = vrot.lane.b32.xlu1 %v3873_v33, %s7773_s0  ;;  %v3955_v8 = vmul.f32 %v7229_v37, %v3954_v23  ;;  %v3974_v33 = vstv %s7343_s23  ;;  %s7467_s23 = sld [smem:[#allocation9 + $0x61]] }
 0x520   : > { %v3232_v29 = vpop.permute.xlu0 %3231  ;;  %v3234_v13 = vpop.permute.xlu1 %3233 }
 0x521   : > { %v3237_v11 = vadd.f32 %v3232_v29, %v3223_v53  ;;  %v3238_v15 = vadd.f32 %v3234_v13, %v3224_v30  ;;  %v7364_v53 = vld [vmem:[#allocation3 + $0x32] sm:$0xff]  ;;  %v7367_v29 = vld [vmem:[#allocation3 + $0x3a] sm:$0xff] }
 0x522   : > { %3879 = vrot.lane.b32.xlu0 %v3874_v19, %s7773_s0  ;;  %3891 = vrot.lane.b32.xlu1 %v3887_v0, %s7774_s4  ;;  %v3309_v30 = vmul.f32 %v7364_v53, %v3308_v22  ;;  %v3310_v13 = vmul.f32 %v7367_v29, %v3308_v22  ;;  %v4010_v22 = vmul.f32 %v7223_v55, %v4008_v44 }
 0x523   : > { %v3243_v21 = vadd.f32 %v3241_v45, %v3237_v11  ;;  %v3244_v51 = vadd.f32 %v3242_v59, %v3238_v15  ;;  %v3956_v15 = vmul.f32 %v7232_v27, %v3954_v23  ;;  %v3975_v45 = vmul.f32 %v7206_v32, %v3974_v33 }
 0x524   : > { %v3252_v58 = vpop.permute.xlu0 %3251  ;;  %v3254_v24 = vpop.permute.xlu1 %3253  ;;  %v3988_v59 = vstv %s7352_s7  ;;  %s7472_s7 = sld [smem:[#allocation9 + $0x4e]] }
 0x525   : > { %v3257_v18 = vadd.f32 %v3252_v58, %v3243_v21  ;;  %v3258_v62 = vadd.f32 %v3254_v24, %v3244_v51  ;;  %v3342_v21 = vstv %s7357_s10  ;;  %v3989_v54 = vmul.f32 %v7206_v32, %v3988_v59  ;;  %s7479_s10 = sld [smem:[#allocation9 + $0x85]] }
 0x526   : > { %3893 = vrot.lane.b32.xlu0 %v3888_v42, %s7774_s4  ;;  %3911 = vrot.lane.b32.xlu1 %v3907_v48, %s7773_s0  ;;  %v3976_v48 = vmul.f32 %v7209_v57, %v3974_v33  ;;  %v7413_v33 = vld [vmem:[#allocation3 + $0x51] sm:$0xff] }
 0x528   : > { %v3266_v26 = vpop.permute.xlu0 %3265  ;;  %v3268_v31 = vpop.permute.xlu1 %3267 }
 0x529   : > { %v3271_v34 = vadd.f32 %v3266_v26, %v3257_v18  ;;  %v3272_v35 = vadd.f32 %v3268_v31, %v3258_v62  ;;  %v7387_v26 = vld [vmem:[#allocation3 + $0x48] sm:$0xff] }
 0x52a   : > { %3913 = vrot.lane.b32.xlu0 %v3908_v5, %s7773_s0  ;;  %3925 = vrot.lane.b32.xlu1 %v3921_v10, %s7774_s4  ;;  %v3343_v31 = vmul.f32 %v7387_v26, %v3342_v21  ;;  %v7390_v5 = vld [vmem:[#allocation3 + $0x50] sm:$0xff] }
 0x52b   : > { %v3277_v52 = vadd.f32 %v3275_v56, %v3271_v34  ;;  %v3278_v61 = vadd.f32 %v3276_v40, %v3272_v35  ;;  %v3344_v10 = vmul.f32 %v7390_v5, %v3342_v21  ;;  %v3990_v40 = vmul.f32 %v7209_v57, %v3988_v59 }
 0x52c   : > { %v3286_v50 = vpop.permute.xlu0 %3285  ;;  %v3288_v14 = vpop.permute.xlu1 %3287 }
 0x52d   : > { %v3291_v7 = vadd.f32 %v3286_v50, %v3277_v52  ;;  %v3292_v16 = vadd.f32 %v3288_v14, %v3278_v61  ;;  %v4009_v52 = vmul.f32 %v7220_v46, %v4008_v44  ;;  %v4022_v61 = vstv %s7375_s25  ;;  %v7433_v44 = vld [vmem:[#allocation3 + $0x4a] sm:$0xff]  ;;  %s7498_s25 = sld [smem:[#allocation9 + $0x86]] }
 0x52e   : > { %3927 = vrot.lane.b32.xlu0 %v3922_v49, %s7774_s4  ;;  %3945 = vrot.lane.b32.xlu1 %v3941_v47, %s7773_s0  ;;  %v3376_v50 = vstv %s7380_s12  ;;  %s7507_s12 = sld [smem:[#allocation9 + $0x64]] }
 0x530   : > { %v3300_v63 = vpop.permute.xlu0 %3299  ;;  %v3302_v9 = vpop.permute.xlu1 %3301 }
 0x531   : > { %v3305_v41 = vadd.f32 %v3300_v63, %v3291_v7  ;;  %v3306_v43 = vadd.f32 %v3302_v9, %v3292_v16  ;;  %v4023_v7 = vmul.f32 %v7220_v46, %v4022_v61  ;;  %v4042_v16 = vstv %s7385_s13  ;;  %s7512_s13 = sld [smem:[#allocation9 + $0x54]] }
 0x532   : > { %3947 = vrot.lane.b32.xlu0 %v3942_v17, %s7773_s0  ;;  %3959 = vrot.lane.b32.xlu1 %v3955_v8, %s7774_s4  ;;  %v7410_v17 = vld [vmem:[#allocation3 + $0x49] sm:$0xff] }
 0x533   : > { %v3311_v19 = vadd.f32 %v3309_v30, %v3305_v41  ;;  %v3312_v0 = vadd.f32 %v3310_v13, %v3306_v43  ;;  %v3377_v8 = vmul.f32 %v7410_v17, %v3376_v50  ;;  %v3378_v41 = vmul.f32 %v7413_v33, %v3376_v50 }
 0x534   : > { %v3320_v25 = vpop.permute.xlu0 %3319  ;;  %v3322_v11 = vpop.permute.xlu1 %3321 }
 0x535   : > { %v3325_v51 = vadd.f32 %v3320_v25, %v3311_v19  ;;  %v3326_v58 = vadd.f32 %v3322_v11, %v3312_v0  ;;  %v4024_v0 = vmul.f32 %v7223_v55, %v4022_v61  ;;  %v4043_v25 = vmul.f32 %v7247_v2, %v4042_v16 }
 0x536   : > { %3961 = vrot.lane.b32.xlu0 %v3956_v15, %s7774_s4  ;;  %3979 = vrot.lane.b32.xlu1 %v3975_v45, %s7773_s0  ;;  %v4056_v11 = vstv %s7398_s22  ;;  %v3410_v15 = vstv %s7403_s2  ;;  %s7517_s22 = sld [smem:[#allocation9 + $0x88]] }
 0x537   : > { %v4090_v61 = vstv %s7423_s5  ;;  %s7525_s2 = sld [smem:[#allocation9 + $0x57]] }
 0x538   : > { %v3334_v24 = vpop.permute.xlu0 %3333  ;;  %v3336_v42 = vpop.permute.xlu1 %3335  ;;  %s7546_s5 = sld [smem:[#allocation9 + $0x67]] }
 0x539   : > { %v3339_v18 = vadd.f32 %v3334_v24, %v3325_v51  ;;  %v3340_v62 = vadd.f32 %v3336_v42, %v3326_v58  ;;  %v4044_v58 = vmul.f32 %v7250_v38, %v4042_v16  ;;  %v4057_v24 = vmul.f32 %v7247_v2, %v4056_v11 }
 0x53a   : > { %3981 = vrot.lane.b32.xlu0 %v3976_v48, %s7773_s0  ;;  %3993 = vrot.lane.b32.xlu1 %v3989_v54, %s7774_s4  ;;  %v4076_v42 = vstv %s7408_s3  ;;  %v4091_v16 = vmul.f32 %v7272_v12, %v4090_v61  ;;  %s7528_s3 = sld [smem:[#allocation9 + $0x65]] }
 0x53b   : > { %v3345_v6 = vadd.f32 %v3343_v31, %v3339_v18  ;;  %v3346_v34 = vadd.f32 %v3344_v10, %v3340_v62  ;;  %v3411_v18 = vmul.f32 %v7433_v44, %v3410_v15  ;;  %v7436_v62 = vld [vmem:[#allocation3 + $0x52] sm:$0xff] }
 0x53c   : > { %v3354_v35 = vpop.permute.xlu0 %3353  ;;  %v3356_v56 = vpop.permute.xlu1 %3355  ;;  %v3412_v31 = vmul.f32 %v7436_v62, %v3410_v15 }
 0x53d   : > { %v3359_v14 = vadd.f32 %v3354_v35, %v3345_v6  ;;  %v3360_v49 = vadd.f32 %v3356_v56, %v3346_v34  ;;  %v4058_v56 = vmul.f32 %v7250_v38, %v4056_v11 }
 0x53e   : > { %3995 = vrot.lane.b32.xlu0 %v3990_v40, %s7774_s4  ;;  %4013 = vrot.lane.b32.xlu1 %v4009_v52, %s7773_s0  ;;  %v4077_v40 = vmul.f32 %v7272_v12, %v4076_v42  ;;  %v3451_v52 = vstv %s7420_s14  ;;  %s7538_s14 = sld [smem:[#allocation9 + $0x89]] }
 0x540   : > { %v3368_v47 = vpop.permute.xlu0 %3367  ;;  %v3370_v23 = vpop.permute.xlu1 %3369 }
 0x541   : > { %v3373_v63 = vadd.f32 %v3368_v47, %v3359_v14  ;;  %v3374_v9 = vadd.f32 %v3370_v23, %v3360_v49  ;;  %v3452_v49 = vmul.f32 %v7168_v60, %v3451_v52  ;;  %v3453_v47 = vmul.f32 %v7171_v1, %v3451_v52 }
 0x542   : > { %4015 = vrot.lane.b32.xlu0 %v4010_v22, %s7773_s0  ;;  %4027 = vrot.lane.b32.xlu1 %v4023_v7, %s7774_s4  ;;  %v4078_v7 = vmul.f32 %v7275_v20, %v4076_v42  ;;  %v3729_v52 = vstv %s7467_s23  ;;  %s7576_s23 = sld [smem:[#allocation9 + $0x8c]] }
 0x543   : > { %v3379_v43 = vadd.f32 %v3377_v8, %v3373_v63  ;;  %v3380_v30 = vadd.f32 %v3378_v41, %v3374_v9  ;;  %v3449_v63 = vstv %s7431_s6  ;;  %v4110_v41 = vstv %s7439_s17  ;;  %s7550_s6 = sld [smem:[#allocation9 + $0x5a]] }
 0x544   : > { %v3388_v13 = vpop.permute.xlu0 %3387  ;;  %v3390_v19 = vpop.permute.xlu1 %3389  ;;  %s7555_s17 = sld [smem:[#allocation9 + $0x8b]] }
 0x545   : > { %v3393_v45 = vadd.f32 %v3388_v13, %v3379_v43  ;;  %v3394_v59 = vadd.f32 %v3390_v19, %v3380_v30  ;;  %v3454_v43 = vadd.f32 %v3452_v49, %v3449_v63  ;;  %v3455_v30 = vadd.f32 %v3453_v47, %v3449_v63 }
 0x546   : > { %4029 = vrot.lane.b32.xlu0 %v4024_v0, %s7774_s4  ;;  %4047 = vrot.lane.b32.xlu1 %v4043_v25, %s7773_s0  ;;  %v4092_v0 = vmul.f32 %v7275_v20, %v4090_v61  ;;  %v4111_v25 = vmul.f32 %v7295_v36, %v4110_v41  ;;  %v4144_v49 = vstv %s7479_s10  ;;  %s7584_s10 = sld [smem:[#allocation10 + $0x3]] }
 0x548   : > { %v3402_v21 = vpop.permute.xlu0 %3401  ;;  %v3404_v51 = vpop.permute.xlu1 %3403 }
 0x549   : > { %v3407_v48 = vadd.f32 %v3402_v21, %v3393_v45  ;;  %v3408_v54 = vadd.f32 %v3404_v51, %v3394_v59  ;;  %v3485_v45 = vstv %s7449_s20  ;;  %v4112_v51 = vmul.f32 %v7298_v3, %v4110_v41  ;;  %s7563_s20 = sld [smem:[#allocation9 + $0x5d]] }
 0x54a   : > { %4049 = vrot.lane.b32.xlu0 %v4044_v58, %s7773_s0  ;;  %4061 = vrot.lane.b32.xlu1 %v4057_v24, %s7774_s4  ;;  %v3711_v58 = vmul.f32 %v7298_v3, %v3709_v4  ;;  %v4124_v24 = vstv %s7456_s26  ;;  %v4145_v41 = vmul.f32 %v7364_v53, %v4144_v49  ;;  %s7566_s26 = sld [smem:[#allocation9 + $0x68]] }
 0x54b   : > { %v3413_v10 = vadd.f32 %v3411_v18, %v3407_v48  ;;  %v3414_v6 = vadd.f32 %v3412_v31, %v3408_v54  ;;  %v3486_v54 = vmul.f32 %v7198_v28, %v3485_v45  ;;  %v3487_v18 = vmul.f32 %v7201_v39, %v3485_v45 }
 0x54c   : > { %v3422_v34 = vpop.permute.xlu0 %3421  ;;  %v3424_v35 = vpop.permute.xlu1 %3423  ;;  %v3519_v28 = vstv %s7472_s7  ;;  %s7580_s7 = sld [smem:[#allocation9 + $0x6c]] }
 0x54d   : > { %v3427_v50 = vadd.f32 %v3422_v34, %v3413_v10  ;;  %v3428_v14 = vadd.f32 %v3424_v35, %v3414_v6  ;;  %v4125_v34 = vmul.f32 %v7295_v36, %v4124_v24  ;;  %v4126_v35 = vmul.f32 %v7298_v3, %v4124_v24 }
 0x54e   : > { %4063 = vrot.lane.b32.xlu0 %v4058_v56, %s7774_s4  ;;  %4081 = vrot.lane.b32.xlu1 %v4077_v40, %s7773_s0 }
 0x550   : > { %v3436_v23 = vpop.permute.xlu0 %3435  ;;  %v3438_v22 = vpop.permute.xlu1 %3437 }
 0x551   : > { %v3441_v9 = vadd.f32 %v3436_v23, %v3427_v50  ;;  %v3442_v8 = vadd.f32 %v3438_v22, %v3428_v14  ;;  %v3730_v50 = vmul.f32 %v7364_v53, %v3729_v52  ;;  %v3731_v14 = vmul.f32 %v7367_v29, %v3729_v52 }
 0x552   : > { %4083 = vrot.lane.b32.xlu0 %v4078_v7, %s7773_s0  ;;  %4095 = vrot.lane.b32.xlu1 %v4091_v16, %s7774_s4  ;;  %v3520_v22 = vmul.f32 %v7229_v37, %v3519_v28  ;;  %v3521_v7 = vmul.f32 %v7232_v27, %v3519_v28  ;;  %v3553_v37 = vstv %s7493_s21  ;;  %s7592_s21 = sld [smem:[#allocation9 + $0x60]] }
 0x553   : > { %v3443_v60 = vmax.f32 %v3441_v9, 0.0  ;;  %v3444_v1 = vmax.f32 %v3442_v8, 0.0  ;;  %v3554_v45 = vmul.f32 %v7206_v32, %v3553_v37 }
 0x554   : > { %v3463_v13 = vpop.permute.xlu0 %3462  ;;  %v3465_v19 = vpop.permute.xlu1 %3464 }
 0x555   : > { %4645 = vst.msk [vmem:[%s7179_s24 + $0x10] sm:$0xff] %vm3030_vm3, %v3443_v60  ;;  %4646 = vst.msk [vmem:[%s7179_s24 + $0x18] sm:$0xff] %vm3030_vm3, %v3444_v1  ;;  %v3468_v11 = vadd.f32 %v3463_v13, %v3454_v43  ;;  %v3469_v15 = vadd.f32 %v3465_v19, %v3455_v30  ;;  %v4146_v60 = vmul.f32 %v7367_v29, %v4144_v49  ;;  %v3743_v30 = vstv %s7488_s18  ;;  %s7588_s18 = sld [smem:[#allocation9 + $0x6a]] }
 0x556   : > { %4097 = vrot.lane.b32.xlu0 %v4092_v0, %s7774_s4  ;;  %4115 = vrot.lane.b32.xlu1 %v4111_v25, %s7773_s0  ;;  %v3744_v19 = vmul.f32 %v7364_v53, %v3743_v30  ;;  %v3745_v0 = vmul.f32 %v7367_v29, %v3743_v30  ;;  %v4158_v25 = vstv %s7498_s25  ;;  %s7597_s25 = sld [smem:[#allocation9 + $0x8e]] }
 0x558   : > { %v3477_v59 = vpop.permute.xlu0 %3476  ;;  %v3479_v21 = vpop.permute.xlu1 %3478 }
 0x559   : > { %v3482_v42 = vadd.f32 %v3477_v59, %v3468_v11  ;;  %v3483_v48 = vadd.f32 %v3479_v21, %v3469_v15  ;;  %v3555_v59 = vmul.f32 %v7209_v57, %v3553_v37  ;;  %v3587_v57 = vstv %s7512_s13  ;;  %s7611_s13 = sld [smem:[#allocation9 + $0x6b]] }
 0x55a   : > { %4117 = vrot.lane.b32.xlu0 %v4112_v51, %s7773_s0  ;;  %3716 = vrot.lane.b32.xlu1 %v3711_v58, %s7774_s4  ;;  %v3589_v52 = vmul.f32 %v7223_v55, %v3587_v57 }
 0x55b   : > { %v3488_v31 = vadd.f32 %v3486_v54, %v3482_v42  ;;  %v3489_v10 = vadd.f32 %v3487_v18, %v3483_v48  ;;  %v4159_v42 = vmul.f32 %v7364_v53, %v4158_v25  ;;  %v4160_v48 = vmul.f32 %v7367_v29, %v4158_v25 }
 0x55c   : > { %v3497_v6 = vpop.permute.xlu0 %3496  ;;  %v3499_v4 = vpop.permute.xlu1 %3498  ;;  %v3763_v18 = vstv %s7507_s12  ;;  %v3655_v25 = vstv %s7550_s6  ;;  %s7604_s12 = sld [smem:[#allocation9 + $0x6f]] }
 0x55d   : > { %v3502_v56 = vadd.f32 %v3497_v6, %v3488_v31  ;;  %v3503_v40 = vadd.f32 %v3499_v4, %v3489_v10  ;;  %v3764_v6 = vmul.f32 %v7387_v26, %v3763_v18  ;;  %v3765_v4 = vmul.f32 %v7390_v5, %v3763_v18  ;;  %s4711_s6 = sld [smem:[#allocation9 + $0x84]] }
 0x55e   : > { %4129 = vrot.lane.b32.xlu0 %v4125_v34, %s7774_s4  ;;  %4131 = vrot.lane.b32.xlu1 %v4126_v35, %s7774_s4  ;;  %v4178_v34 = vstv %s7517_s22  ;;  %s7620_s22 = sld [smem:[#allocation9 + $0x8f]] }
 0x55f   : > { %v4180_v49 = vmul.f32 %v7390_v5, %v4178_v34 }
 0x560   : > { %v3511_v39 = vpop.permute.xlu0 %3510  ;;  %v3513_v61 = vpop.permute.xlu1 %3512 }
 0x561   : > { %v3516_v47 = vadd.f32 %v3511_v39, %v3502_v56  ;;  %v3517_v23 = vadd.f32 %v3513_v61, %v3503_v40  ;;  %v3588_v40 = vmul.f32 %v7220_v46, %v3587_v57  ;;  %v3777_v46 = vstv %s7528_s3  ;;  %s7643_s3 = sld [smem:[#allocation9 + $0x75]] }
 0x562   : > { %3734 = vrot.lane.b32.xlu0 %v3730_v50, %s7773_s0  ;;  %3736 = vrot.lane.b32.xlu1 %v3731_v14, %s7773_s0  ;;  %v4179_v14 = vmul.f32 %v7387_v26, %v4178_v34 }
 0x563   : > { %v3522_v16 = vadd.f32 %v3520_v22, %v3516_v47  ;;  %v3523_v63 = vadd.f32 %v3521_v7, %v3517_v23  ;;  %v3621_v22 = vstv %s7525_s2  ;;  %s7628_s2 = sld [smem:[#allocation9 + $0x72]] }
 0x564   : > { %v3531_v9 = vpop.permute.xlu0 %3530  ;;  %v3533_v8 = vpop.permute.xlu1 %3532 }
 0x565   : > { %v3536_v1 = vadd.f32 %v3531_v9, %v3522_v16  ;;  %v3537_v43 = vadd.f32 %v3533_v8, %v3523_v63  ;;  %v3778_v16 = vmul.f32 %v7387_v26, %v3777_v46  ;;  %v3779_v63 = vmul.f32 %v7390_v5, %v3777_v46 }
 0x566   : > { %4149 = vrot.lane.b32.xlu0 %v4145_v41, %s7773_s0  ;;  %4151 = vrot.lane.b32.xlu1 %v4146_v60, %s7773_s0  ;;  %v3622_v9 = vmul.f32 %v7247_v2, %v3621_v22  ;;  %v3623_v60 = vmul.f32 %v7250_v38, %v3621_v22  ;;  %v3797_v38 = vstv %s7546_s5  ;;  %s4708_s5 = sld [smem:[#allocation9 + $0x81]] }
 0x568   : > { %v3545_v27 = vpop.permute.xlu0 %3544  ;;  %v3547_v13 = vpop.permute.xlu1 %3546 }
 0x569   : > { %v3550_v11 = vadd.f32 %v3545_v27, %v3536_v1  ;;  %v3551_v15 = vadd.f32 %v3547_v13, %v3537_v43  ;;  %v4192_v1 = vstv %s7538_s14  ;;  %s4705_s14 = sld [smem:[#allocation9 + $0x7e]] }
 0x56a   : > { %3748 = vrot.lane.b32.xlu0 %v3744_v19, %s7774_s4  ;;  %3750 = vrot.lane.b32.xlu1 %v3745_v0, %s7774_s4  ;;  %v4193_v2 = vmul.f32 %v7387_v26, %v4192_v1  ;;  %v4194_v13 = vmul.f32 %v7390_v5, %v4192_v1 }
 0x56b   : > { %v3556_v21 = vadd.f32 %v3554_v45, %v3550_v11  ;;  %v3557_v51 = vadd.f32 %v3555_v59, %v3551_v15  ;;  %v3798_v45 = vmul.f32 %v7410_v17, %v3797_v38  ;;  %v3799_v59 = vmul.f32 %v7413_v33, %v3797_v38 }
 0x56c   : > { %v3565_v58 = vpop.permute.xlu0 %3564  ;;  %v3567_v24 = vpop.permute.xlu1 %3566 }
 0x56d   : > { %v3570_v54 = vadd.f32 %v3565_v58, %v3556_v21  ;;  %v3571_v32 = vadd.f32 %v3567_v24, %v3557_v51  ;;  %v4212_v21 = vstv %s7555_s17  ;;  %v3656_v24 = vmul.f32 %v7272_v12, %v3655_v25  ;;  %s4675_s17 = sld [smem:[#allocation9 + $0x63]] }
 0x56e   : > { %4163 = vrot.lane.b32.xlu0 %v4159_v42, %s7774_s4  ;;  %4165 = vrot.lane.b32.xlu1 %v4160_v48, %s7774_s4  ;;  %v3657_v42 = vmul.f32 %v7275_v20, %v3655_v25  ;;  %v4213_v57 = vmul.f32 %v7410_v17, %v4212_v21 }
 0x570   : > { %v3579_v31 = vpop.permute.xlu0 %3578  ;;  %v3581_v10 = vpop.permute.xlu1 %3580 }
 0x571   : > { %v3584_v35 = vadd.f32 %v3579_v31, %v3570_v54  ;;  %v3585_v56 = vadd.f32 %v3581_v10, %v3571_v32  ;;  %v4214_v31 = vmul.f32 %v7413_v33, %v4212_v21  ;;  %v3811_v10 = vstv %s7566_s26  ;;  %s4678_s26 = sld [smem:[#allocation9 + $0x66]] }
 0x572   : > { %3768 = vrot.lane.b32.xlu0 %v3764_v6, %s7773_s0  ;;  %3770 = vrot.lane.b32.xlu1 %v3765_v4, %s7773_s0  ;;  %v3689_v6 = vstv %s7563_s20  ;;  %s4714_s20 = sld [smem:[#allocation9 + $0x87]] }
 0x573   : > { %v3590_v28 = vadd.f32 %v3588_v40, %v3584_v35  ;;  %v3591_v39 = vadd.f32 %v3589_v52, %v3585_v56  ;;  %v3812_v35 = vmul.f32 %v7410_v17, %v3811_v10  ;;  %v3813_v56 = vmul.f32 %v7413_v33, %v3811_v10 }
 0x574   : > { %v3599_v61 = vpop.permute.xlu0 %3598  ;;  %v3601_v50 = vpop.permute.xlu1 %3600  ;;  %v3690_v40 = vmul.f32 %v7295_v36, %v3689_v6  ;;  %v4260_v10 = vstv %s7620_s22 }
 0x575   : > { %v3604_v47 = vadd.f32 %v3599_v61, %v3590_v28  ;;  %v3605_v23 = vadd.f32 %v3601_v50, %v3591_v39  ;;  %v3691_v39 = vmul.f32 %v7298_v3, %v3689_v6  ;;  %v4226_v61 = vstv %s7576_s23  ;;  %s4717_s23 = sld [smem:[#allocation9 + $0x8a]] }
 0x576   : > { %4183 = vrot.lane.b32.xlu0 %v4179_v14, %s7773_s0  ;;  %4185 = vrot.lane.b32.xlu1 %v4180_v49, %s7773_s0  ;;  %v3866_v50 = vstv %s7580_s7  ;;  %v4228_v3 = vmul.f32 %v7413_v33, %v4226_v61  ;;  %v3934_v6 = vstv %s7628_s2  ;;  %s4681_s7 = sld [smem:[#allocation9 + $0x69]]  ;;  %s5083_s2 = smov [#allocation12]  }
 0x578   : > { %v3613_v55 = vpop.permute.xlu0 %3612  ;;  %v3615_v7 = vpop.permute.xlu1 %3614 }
 0x579   : > { %v3618_v8 = vadd.f32 %v3613_v55, %v3604_v47  ;;  %v3619_v41 = vadd.f32 %v3615_v7, %v3605_v23  ;;  %v4227_v23 = vmul.f32 %v7410_v17, %v4226_v61  ;;  %v4917_v55 = vld [vmem:[#allocation3] sm:$0xff] }
 0x57a   : > { %3782 = vrot.lane.b32.xlu0 %v3778_v16, %s7774_s4  ;;  %3784 = vrot.lane.b32.xlu1 %v3779_v63, %s7774_s4  ;;  %v3867_v7 = vmul.f32 %v4917_v55, %v3866_v50  ;;  %v3831_v16 = vstv %s7588_s18  ;;  %v3864_v63 = vstv %s7584_s10  ;;  %s4720_s10 = sld [smem:[#allocation9 + $0x8d]]  ;;  %s4732_s18 = sshll.u32 %s5152_s9, 10 }
 0x57b   : > { %v3624_v43 = vadd.f32 %v3622_v9, %v3618_v8  ;;  %v3625_v30 = vadd.f32 %v3623_v60, %v3619_v41  ;;  %v3723_v9 = vstv %s7592_s21  ;;  %v3832_v60 = vmul.f32 %v7433_v44, %v3831_v16  ;;  %s4292_s21 = sshll.u32 %s7179_s24, 4  ;;  %s7688_s9 = scalar_lea.sflag [#allocation5], %s363_s19  ;;  %s7680_s21 = int_to_ptr.vmem [resolvable:$true] %s4292_s21 }
 0x57c   : > { %v3633_v37 = vpop.permute.xlu0 %3632  ;;  %v3635_v27 = vpop.permute.xlu1 %3634  ;;  %v3833_v1 = vmul.f32 %v7436_v62, %v3831_v16  ;;  %s4993_s22 = scalar_lea.vmem %s7680_s21, 1024 }
 0x57d   : > { %v3638_v19 = vadd.f32 %v3633_v37, %v3624_v43  ;;  %v3639_v0 = vadd.f32 %v3635_v27, %v3625_v30  ;;  %v4246_v43 = vstv %s7597_s25  ;;  %v3869_v37 = vadd.f32 %v3867_v7, %v3864_v63  ;;  %v4918_v27 = vld [vmem:[#allocation3 + $0x8] sm:$0xff]  ;;  %p4994_p8 = scmp.ne.s32.totalorder %s7680_s21, %s4993_s22 }
 0x57e   : > { %4197 = vrot.lane.b32.xlu0 %v4193_v2, %s7774_s4  ;;  %4199 = vrot.lane.b32.xlu1 %v4194_v13, %s7774_s4  ;;  %v3868_v2 = vmul.f32 %v4918_v27, %v3866_v50  ;;  %v3724_v13 = vmul.f32 %v7364_v53, %v3723_v9 }
 0x57f   : > { %p4995_p13 = pnand %p4994_p8, %p7777_p11 }
 0x580   : > { %v3647_v11 = vpop.permute.xlu0 %3646  ;;  %v3649_v15 = vpop.permute.xlu1 %3648 }
 0x581   : > { %v3652_v51 = vadd.f32 %v3647_v11, %v3638_v19  ;;  %v3653_v58 = vadd.f32 %v3649_v15, %v3639_v0  ;;  %v3900_v19 = vstv %s7604_s12  ;;  %v4247_v15 = vmul.f32 %v7433_v44, %v4246_v43  ;;  %p4996_p1 = pneg %p4995_p13 }
 0x582   : > { %3802 = vrot.lane.b32.xlu0 %v3798_v45, %s7773_s0  ;;  %3804 = vrot.lane.b32.xlu1 %v3799_v59, %s7773_s0  ;;  %v4248_v45 = vmul.f32 %v7436_v62, %v4246_v43  ;;  %v3870_v59 = vadd.f32 %v3868_v2, %v3864_v63  ;;  %v4924_v2 = vld [vmem:[#allocation3 + $0x20] sm:$0xff] }
 0x583   : > { %v3658_v48 = vadd.f32 %v3656_v24, %v3652_v51  ;;  %v3659_v54 = vadd.f32 %v3657_v42, %v3653_v58  ;;  %v4919_v51 = vld [vmem:[#allocation3 + $0x1] sm:$0xff]  ;;  %v3845_v24 = vstv %s7611_s13  ;;  %s7678_s13 = scalar_lea.hbm %s7736_s8, %s4732_s18 }
 0x584   : > { %v3667_v32 = vpop.permute.xlu0 %3666  ;;  %v3669_v18 = vpop.permute.xlu1 %3668  ;;  %v3901_v58 = vmul.f32 %v4919_v51, %v3900_v19 }
 0x585   : > { %v3672_v12 = vadd.f32 %v3667_v32, %v3658_v48  ;;  %v3673_v20 = vadd.f32 %v3669_v18, %v3659_v54  ;;  %v3846_v18 = vmul.f32 %v7433_v44, %v3845_v24 }
 0x586   : > { %4217 = vrot.lane.b32.xlu0 %v4213_v57, %s7773_s0  ;;  %4219 = vrot.lane.b32.xlu1 %v4214_v31, %s7773_s0  ;;  %v3847_v57 = vmul.f32 %v7436_v62, %v3845_v24 }
 0x588   : > { %v3681_v4 = vpop.permute.xlu0 %3680  ;;  %v3683_v34 = vpop.permute.xlu1 %3682 }
 0x589   : > { %v3686_v52 = vadd.f32 %v3681_v4, %v3672_v12  ;;  %v3687_v28 = vadd.f32 %v3683_v34, %v3673_v20  ;;  %v4920_v12 = vld [vmem:[#allocation3 + $0x9] sm:$0xff] }
 0x58a   : > { %3816 = vrot.lane.b32.xlu0 %v3812_v35, %s7774_s4  ;;  %3818 = vrot.lane.b32.xlu1 %v3813_v56, %s7774_s4  ;;  %v3902_v20 = vmul.f32 %v4920_v12, %v3900_v19 }
 0x58b   : > { %v3692_v14 = vadd.f32 %v3690_v40, %v3686_v52  ;;  %v3693_v49 = vadd.f32 %v3691_v39, %v3687_v28  ;;  %v4261_v40 = vmul.f32 %v7433_v44, %v4260_v10  ;;  %v4262_v52 = vmul.f32 %v7436_v62, %v4260_v10  ;;  %v4921_v39 = vld [vmem:[#allocation3 + $0x2] sm:$0xff] }
 0x58c   : > { %v3701_v36 = vpop.permute.xlu0 %3700  ;;  %v3703_v47 = vpop.permute.xlu1 %3702  ;;  %v3935_v61 = vmul.f32 %v4921_v39, %v3934_v6 }
 0x58d   : > { %v3706_v46 = vadd.f32 %v3701_v36, %v3692_v14  ;;  %v7608_v22 = vadd.f32 %v3703_v47, %v3693_v49 }
 0x58e   : > { %4231 = vrot.lane.b32.xlu0 %v4227_v23, %s7774_s4  ;;  %4233 = vrot.lane.b32.xlu1 %v4228_v3, %s7774_s4  ;;  %v4922_v23 = vld [vmem:[#allocation3 + $0xa] sm:$0xff] }
 0x58f   : > { %v3936_v3 = vmul.f32 %v4922_v23, %v3934_v6  ;;  %v4927_v6 = vld [vmem:[#allocation3 + $0x1a] sm:$0xff]  ;;  %v4929_v23 = vld [vmem:[#allocation3 + $0x30] sm:$0xff] }
 0x590   : > { %v3715_v8 = vpop.permute.xlu0 %3714  ;;  %v3878_v41 = vpop.permute.xlu1 %3877 }
 0x591   : > { %v3720_v30 = vadd.f32 %v3715_v8, %v3706_v46  ;;  %v3883_v0 = vadd.f32 %v3878_v41, %v3869_v37  ;;  %v3968_v46 = vstv %s7643_s3  ;;  %v4923_v41 = vld [vmem:[#allocation3 + $0x18] sm:$0xff]  ;;  %s4997_s3 = sshll.u32 %s5083_s2, 4  ;;  %s4998_s3 = int_to_ptr.vmem [resolvable:$false] %s4997_s3 }
 0x592   : > { %3836 = vrot.lane.b32.xlu0 %v3832_v60, %s7773_s0  ;;  %3838 = vrot.lane.b32.xlu1 %v3833_v1, %s7773_s0  ;;  %v3969_v60 = vmul.f32 %v4923_v41, %v3968_v46  ;;  %p5000_p2 = scmp.lt.s32.totalorder %s7680_s21, %s4998_s3 }
 0x593   : > { %v7630_v38 = vadd.f32 %v3724_v13, %v3720_v30  ;;  %v3970_v13 = vmul.f32 %v4924_v2, %v3968_v46  ;;  %v4931_v2 = vld [vmem:[#allocation3 + $0x31] sm:$0xff] }
 0x594   : > { %v3880_v25 = vpop.permute.xlu0 %3879  ;;  %v3892_v11 = vpop.permute.xlu1 %3891 }
 0x595   : > { %v3897_v21 = vadd.f32 %v3892_v11, %v3883_v0  ;;  %v3884_v42 = vadd.f32 %v3880_v25, %v3870_v59  ;;  %v4925_v59 = vld [vmem:[#allocation3 + $0x19] sm:$0xff] }
 0x596   : > { %4251 = vrot.lane.b32.xlu0 %v4247_v15, %s7773_s0  ;;  %4253 = vrot.lane.b32.xlu1 %v4248_v45, %s7773_s0  ;;  %s4699_s0 = sld [smem:[#allocation9 + $0x78]] }
 0x597   : > { %v3903_v48 = vadd.f32 %v3901_v58, %v3897_v21 }
 0x598   : > { %v3894_v54 = vpop.permute.xlu0 %3893  ;;  %v3912_v32 = vpop.permute.xlu1 %3911 }
 0x599   : > { %v3898_v31 = vadd.f32 %v3894_v54, %v3884_v42  ;;  %v3917_v4 = vadd.f32 %v3912_v32, %v3903_v48  ;;  %v4926_v54 = vld [vmem:[#allocation3 + $0x21] sm:$0xff] }
 0x59a   : > { %3850 = vrot.lane.b32.xlu0 %v3846_v18, %s7774_s4  ;;  %3852 = vrot.lane.b32.xlu1 %v3847_v57, %s7774_s4 }
 0x59b   : > { %v3904_v34 = vadd.f32 %v3902_v20, %v3898_v31 }
 0x59c   : > { %v3914_v35 = vpop.permute.xlu0 %3913  ;;  %v3926_v56 = vpop.permute.xlu1 %3925  ;;  %v4002_v19 = vstv %s4699_s0  ;;  %s4999_s0 = scalar_lea.vmem %s4998_s3, 2048 }
 0x59d   : > { %v3931_v28 = vadd.f32 %v3926_v56, %v3917_v4  ;;  %v3918_v50 = vadd.f32 %v3914_v35, %v3904_v34  ;;  %v4003_v21 = vmul.f32 %v4925_v59, %v4002_v19  ;;  %v4004_v32 = vmul.f32 %v4926_v54, %v4002_v19  ;;  %p5001_p3 = scmp.lt.s32.totalorder %s4999_s0, %s4993_s22 }
 0x59e   : > { %4265 = vrot.lane.b32.xlu0 %v4261_v40, %s7774_s4  ;;  %4267 = vrot.lane.b32.xlu1 %v4262_v52, %s7774_s4  ;;  %s4702_s4 = sld [smem:[#allocation9 + $0x7b]] }
 0x59f   : > { %v3937_v14 = vadd.f32 %v3935_v61, %v3931_v28  ;;  %v4928_v28 = vld [vmem:[#allocation3 + $0x22] sm:$0xff]  ;;  %v4070_v61 = vstv %s4705_s14  ;;  %p5002_p4 = por %p5001_p3, %p5000_p2 }
 0x5a0   : > { %v3928_v49 = vpop.permute.xlu0 %3927  ;;  %v3946_v36 = vpop.permute.xlu1 %3945 }
 0x5a1   : > { %v3932_v47 = vadd.f32 %v3928_v49, %v3918_v50  ;;  %v3951_v55 = vadd.f32 %v3946_v36, %v3937_v14  ;;  %p5003_p9 = pnand %p5002_p4, %p4996_p1 }
 0x5a3   : > { %v3938_v7 = vadd.f32 %v3936_v3, %v3932_v47  ;;  %v4071_v3 = vmul.f32 %v4929_v23, %v4070_v61 }
 0x5a4   : > { %v3948_v16 = vpop.permute.xlu0 %3947  ;;  %v3960_v63 = vpop.permute.xlu1 %3959  ;;  %v4036_v18 = vstv %s4702_s4 }
 0x5a5   : > { %v3965_v8 = vadd.f32 %v3960_v63, %v3951_v55  ;;  %v3952_v1 = vadd.f32 %v3948_v16, %v3938_v7  ;;  %v4037_v4 = vmul.f32 %v4927_v6, %v4036_v18  ;;  %v4038_v39 = vmul.f32 %v4928_v28, %v4036_v18 }
 0x5a7   : > { %v3971_v43 = vadd.f32 %v3969_v60, %v3965_v8  ;;  %v4930_v8 = vld [vmem:[#allocation3 + $0x38] sm:$0xff]  ;;  %v4104_v60 = vstv %s4708_s5 }
 0x5a8   : > { %v3962_v30 = vpop.permute.xlu0 %3961  ;;  %v3980_v37 = vpop.permute.xlu1 %3979  ;;  %v4072_v41 = vmul.f32 %v4930_v8, %v4070_v61 }
 0x5a9   : > { %v3966_v27 = vadd.f32 %v3962_v30, %v3952_v1  ;;  %v3985_v0 = vadd.f32 %v3980_v37, %v3971_v43 }
 0x5ab   : > { %v3972_v25 = vadd.f32 %v3970_v13, %v3966_v27  ;;  %v4105_v13 = vmul.f32 %v4931_v2, %v4104_v60 }
 0x5ac   : > { %v3982_v11 = vpop.permute.xlu0 %3981  ;;  %v3994_v15 = vpop.permute.xlu1 %3993 }
 0x5ad   : > { %v3999_v45 = vadd.f32 %v3994_v15, %v3985_v0  ;;  %v3986_v51 = vadd.f32 %v3982_v11, %v3972_v25 }
 0x5af   : > { %v4005_v58 = vadd.f32 %v4003_v21, %v3999_v45  ;;  %v4932_v45 = vld [vmem:[#allocation3 + $0x39] sm:$0xff] }
 0x5b0   : > { %v3996_v24 = vpop.permute.xlu0 %3995  ;;  %v4014_v42 = vpop.permute.xlu1 %4013  ;;  %v4106_v59 = vmul.f32 %v4932_v45, %v4104_v60 }
 0x5b1   : > { %v4000_v48 = vadd.f32 %v3996_v24, %v3986_v51  ;;  %v4019_v57 = vadd.f32 %v4014_v42, %v4005_v58  ;;  %v3725_v42 = vmul.f32 %v7367_v29, %v3723_v9 }
 0x5b3   : > { %v4006_v31 = vadd.f32 %v4004_v32, %v4000_v48  ;;  %v4138_v48 = vstv %s4711_s6 }
 0x5b4   : > { %v4016_v12 = vpop.permute.xlu0 %4015  ;;  %v4028_v20 = vpop.permute.xlu1 %4027  ;;  %v4140_v6 = vmul.f32 %v7367_v29, %v4138_v48 }
 0x5b5   : > { %v4033_v10 = vadd.f32 %v4028_v20, %v4019_v57  ;;  %v4020_v34 = vadd.f32 %v4016_v12, %v4006_v31 }
 0x5b7   : > { %v4039_v35 = vadd.f32 %v4037_v4, %v4033_v10  ;;  %v4139_v10 = vmul.f32 %v7364_v53, %v4138_v48 }
 0x5b8   : > { %v4030_v56 = vpop.permute.xlu0 %4029  ;;  %v4048_v40 = vpop.permute.xlu1 %4047 }
 0x5b9   : > { %v4034_v52 = vadd.f32 %v4030_v56, %v4020_v34  ;;  %v4053_v50 = vadd.f32 %v4048_v40, %v4039_v35  ;;  %v3757_v40 = vstv %s4675_s17 }
 0x5ba   : > { %v3758_v53 = vmul.f32 %v7387_v26, %v3757_v40  ;;  %v3759_v29 = vmul.f32 %v7390_v5, %v3757_v40 }
 0x5bb   : > { %v4040_v14 = vadd.f32 %v4038_v39, %v4034_v52 }
 0x5bc   : > { %v4050_v49 = vpop.permute.xlu0 %4049  ;;  %v4062_v36 = vpop.permute.xlu1 %4061 }
 0x5bd   : > { %v4067_v47 = vadd.f32 %v4062_v36, %v4053_v50  ;;  %v4054_v46 = vadd.f32 %v4050_v49, %v4040_v14  ;;  %v4172_v49 = vstv %s4714_s20 }
 0x5bf   : > { %v4073_v55 = vadd.f32 %v4071_v3, %v4067_v47 }
 0x5c0   : > { %v4064_v7 = vpop.permute.xlu0 %4063  ;;  %v4082_v16 = vpop.permute.xlu1 %4081 }
 0x5c1   : > { %v4068_v63 = vadd.f32 %v4064_v7, %v4054_v46  ;;  %v4087_v1 = vadd.f32 %v4082_v16, %v4073_v55 }
 0x5c3   : > { %v4074_v43 = vadd.f32 %v4072_v41, %v4068_v63  ;;  %v4174_v63 = vmul.f32 %v7390_v5, %v4172_v49  ;;  %v4206_v5 = vstv %s4717_s23 }
 0x5c4   : > { %v4084_v30 = vpop.permute.xlu0 %4083  ;;  %v4096_v37 = vpop.permute.xlu1 %4095  ;;  %v4207_v48 = vmul.f32 %v7410_v17, %v4206_v5 }
 0x5c5   : > { %v4101_v27 = vadd.f32 %v4096_v37, %v4087_v1  ;;  %v4088_v19 = vadd.f32 %v4084_v30, %v4074_v43  ;;  %v3791_v37 = vstv %s4678_s26 }
 0x5c7   : > { %v4107_v0 = vadd.f32 %v4105_v13, %v4101_v27 }
 0x5c8   : > { %v4098_v25 = vpop.permute.xlu0 %4097  ;;  %v4116_v11 = vpop.permute.xlu1 %4115 }
 0x5c9   : > { %v4102_v15 = vadd.f32 %v4098_v25, %v4088_v19  ;;  %v4121_v54 = vadd.f32 %v4116_v11, %v4107_v0  ;;  %v3792_v11 = vmul.f32 %v7410_v17, %v3791_v37 }
 0x5cb   : > { %v4108_v21 = vadd.f32 %v4106_v59, %v4102_v15 }
 0x5cc   : > { %v4118_v51 = vpop.permute.xlu0 %4117  ;;  %v3717_v58 = vpop.permute.xlu1 %3716 }
 0x5cd   : > { %v3721_v24 = vadd.f32 %v3717_v58, %v7608_v22  ;;  %v4122_v32 = vadd.f32 %v4118_v51, %v4108_v21 }
 0x5cf   : > { %v3727_v18 = vadd.f32 %v3725_v42, %v3721_v24 }
 0x5d0   : > { %v4130_v57 = vpop.permute.xlu0 %4129  ;;  %v4132_v31 = vpop.permute.xlu1 %4131 }
 0x5d1   : > { %v4135_v12 = vadd.f32 %v4130_v57, %v4121_v54  ;;  %v4136_v20 = vadd.f32 %v4132_v31, %v4122_v32  ;;  %v4208_v54 = vmul.f32 %v7413_v33, %v4206_v5 }
 0x5d3   : > { %v4141_v4 = vadd.f32 %v4139_v10, %v4135_v12  ;;  %v4142_v34 = vadd.f32 %v4140_v6, %v4136_v20  ;;  %v3825_v10 = vstv %s4681_s7 }
 0x5d4   : > { %v3735_v35 = vpop.permute.xlu0 %3734  ;;  %v3737_v22 = vpop.permute.xlu1 %3736  ;;  %v3827_v17 = vmul.f32 %v7436_v62, %v3825_v10 }
 0x5d5   : > { %v3740_v52 = vadd.f32 %v3735_v35, %v7630_v38  ;;  %v3741_v28 = vadd.f32 %v3737_v22, %v3727_v18  ;;  %v4173_v38 = vmul.f32 %v7387_v26, %v4172_v49  ;;  %v3793_v26 = vmul.f32 %v7413_v33, %v3791_v37 }
 0x5d6   : > { %v4240_v33 = vstv %s4720_s10 }
 0x5d7   : > { %v4242_v49 = vmul.f32 %v7436_v62, %v4240_v33 }
 0x5d8   : > { %v4150_v56 = vpop.permute.xlu0 %4149  ;;  %v4152_v9 = vpop.permute.xlu1 %4151 }
 0x5d9   : > { %v4155_v36 = vadd.f32 %v4150_v56, %v4141_v4  ;;  %v4156_v47 = vadd.f32 %v4152_v9, %v4142_v34  ;;  %v3826_v9 = vmul.f32 %v7433_v44, %v3825_v10 }
 0x5dc   : > { %v3749_v39 = vpop.permute.xlu0 %3748  ;;  %v3751_v61 = vpop.permute.xlu1 %3750 }
 0x5dd   : > { %v3754_v50 = vadd.f32 %v3749_v39, %v3740_v52  ;;  %v3755_v14 = vadd.f32 %v3751_v61, %v3741_v28 }
 0x5df   : > { %v3760_v23 = vadd.f32 %v3758_v53, %v3754_v50  ;;  %v3761_v3 = vadd.f32 %v3759_v29, %v3755_v14  ;;  %v4241_v29 = vmul.f32 %v7433_v44, %v4240_v33 }
 0x5e0   : > { %v4164_v46 = vpop.permute.xlu0 %4163  ;;  %v4166_v55 = vpop.permute.xlu1 %4165 }
 0x5e1   : > { %v4169_v7 = vadd.f32 %v4164_v46, %v4155_v36  ;;  %v4170_v16 = vadd.f32 %v4166_v55, %v4156_v47 }
 0x5e3   : > { %v4175_v8 = vadd.f32 %v4173_v38, %v4169_v7  ;;  %v4176_v41 = vadd.f32 %v4174_v63, %v4170_v16 }
 0x5e4   : > { %v3769_v60 = vpop.permute.xlu0 %3768  ;;  %v3771_v1 = vpop.permute.xlu1 %3770 }
 0x5e5   : > { %v3774_v27 = vadd.f32 %v3769_v60, %v3760_v23  ;;  %v3775_v2 = vadd.f32 %v3771_v1, %v3761_v3 }
 0x5e8   : > { %v4184_v43 = vpop.permute.xlu0 %4183  ;;  %v4186_v30 = vpop.permute.xlu1 %4185 }
 0x5e9   : > { %v4189_v15 = vadd.f32 %v4184_v43, %v4175_v8  ;;  %v4190_v45 = vadd.f32 %v4186_v30, %v4176_v41 }
 0x5ec   : > { %v3783_v13 = vpop.permute.xlu0 %3782  ;;  %v3785_v19 = vpop.permute.xlu1 %3784 }
 0x5ed   : > { %v3788_v0 = vadd.f32 %v3783_v13, %v3774_v27  ;;  %v3789_v25 = vadd.f32 %v3785_v19, %v3775_v2 }
 0x5ef   : > { %v3794_v59 = vadd.f32 %v3792_v11, %v3788_v0  ;;  %v3795_v21 = vadd.f32 %v3793_v26, %v3789_v25 }
 0x5f0   : > { %v4198_v51 = vpop.permute.xlu0 %4197  ;;  %v4200_v58 = vpop.permute.xlu1 %4199 }
 0x5f1   : > { %v4203_v24 = vadd.f32 %v4198_v51, %v4189_v15  ;;  %v4204_v42 = vadd.f32 %v4200_v58, %v4190_v45 }
 0x5f3   : > { %v4209_v32 = vadd.f32 %v4207_v48, %v4203_v24  ;;  %v4210_v18 = vadd.f32 %v4208_v54, %v4204_v42 }
 0x5f4   : > { %v3803_v57 = vpop.permute.xlu0 %3802  ;;  %v3805_v31 = vpop.permute.xlu1 %3804 }
 0x5f5   : > { %v3808_v6 = vadd.f32 %v3803_v57, %v3794_v59  ;;  %v3809_v4 = vadd.f32 %v3805_v31, %v3795_v21 }
 0x5f8   : > { %v4218_v12 = vpop.permute.xlu0 %4217  ;;  %v4220_v20 = vpop.permute.xlu1 %4219 }
 0x5f9   : > { %v4223_v40 = vadd.f32 %v4218_v12, %v4209_v32  ;;  %v4224_v52 = vadd.f32 %v4220_v20, %v4210_v18 }
 0x5fc   : > { %v3817_v34 = vpop.permute.xlu0 %3816  ;;  %v3819_v35 = vpop.permute.xlu1 %3818 }
 0x5fd   : > { %v3822_v22 = vadd.f32 %v3817_v34, %v3808_v6  ;;  %v3823_v56 = vadd.f32 %v3819_v35, %v3809_v4 }
 0x5ff   : > { %v3828_v28 = vadd.f32 %v3826_v9, %v3822_v22  ;;  %v3829_v39 = vadd.f32 %v3827_v17, %v3823_v56 }
 0x600   : > { %v4232_v61 = vpop.permute.xlu0 %4231  ;;  %v4234_v50 = vpop.permute.xlu1 %4233 }
 0x601   : > { %v4237_v14 = vadd.f32 %v4232_v61, %v4223_v40  ;;  %v4238_v53 = vadd.f32 %v4234_v50, %v4224_v52 }
 0x603   : > { %v4243_v36 = vadd.f32 %v4241_v29, %v4237_v14  ;;  %v4244_v47 = vadd.f32 %v4242_v49, %v4238_v53 }
 0x604   : > { %v3837_v23 = vpop.permute.xlu0 %3836  ;;  %v3839_v3 = vpop.permute.xlu1 %3838 }
 0x605   : > { %v3842_v7 = vadd.f32 %v3837_v23, %v3828_v28  ;;  %v3843_v16 = vadd.f32 %v3839_v3, %v3829_v39 }
 0x608   : > { %v4252_v46 = vpop.permute.xlu0 %4251  ;;  %v4254_v55 = vpop.permute.xlu1 %4253 }
 0x609   : > { %v4257_v60 = vadd.f32 %v4252_v46, %v4243_v36  ;;  %v4258_v44 = vadd.f32 %v4254_v55, %v4244_v47 }
 0x60c   : > { %v3851_v38 = vpop.permute.xlu0 %3850  ;;  %v3853_v63 = vpop.permute.xlu1 %3852 }
 0x60d   : > { %v3856_v8 = vadd.f32 %v3851_v38, %v3842_v7  ;;  %v3857_v41 = vadd.f32 %v3853_v63, %v3843_v16 }
 0x60f   : > { %v3858_v62 = vmax.f32 %v3856_v8, 0.0  ;;  %v3859_v1 = vmax.f32 %v3857_v41, 0.0 }
 0x610   : > { %v4266_v43 = vpop.permute.xlu0 %4265  ;;  %v4268_v30 = vpop.permute.xlu1 %4267 }
 0x611   : > { %4684 = vst.msk [vmem:[%s7179_s24 + $0x20] sm:$0xff] %vm3030_vm3, %v3858_v62  ;;  %4685 = vst.msk [vmem:[%s7179_s24 + $0x28] sm:$0xff] %vm3030_vm3, %v3859_v1  ;;  %v4271_v37 = vadd.f32 %v4266_v43, %v4257_v60  ;;  %v4272_v27 = vadd.f32 %v4268_v30, %v4258_v44 }
 0x613   : > { %v4273_v2 = vmax.f32 %v4271_v37, 0.0  ;;  %v4274_v13 = vmax.f32 %v4272_v27, 0.0 }
 0x615   : > { %4723 = vst.msk [vmem:[%s7179_s24 + $0x30] sm:$0xff] %vm3030_vm3, %v4273_v2  ;;  %4724 = vst.msk [vmem:[%s7179_s24 + $0x38] sm:$0xff] %vm3030_vm3, %v4274_v13 }
 0x616   : > { %5006 = shalt.err (!%p5003_p9)
}
 0x617   : > { %s5007_s19 = scalar_lea.hbm %s7678_s13, 1024  ;;  %s5011_s14 = scalar_lea.hbm %s7736_s8, 2048 }
 0x618   : > { %p5008_p7 = scmp.ne.s32.totalorder %s7678_s13, %s5007_s19  ;;  %p5012_p6 = scmp.lt.s32.totalorder %s7678_s13, %s7736_s8 }
 0x619   : > { %p5013_p12 = scmp.lt.s32.totalorder %s5011_s14, %s5007_s19 }
 0x61a   : > { %p5009_p0 = pnand %p5008_p7, %p7777_p11 }
 0x61b   : > { %p5014_p10 = por %p5013_p12, %p5012_p6 }
 0x61c   : > { %p5010_p5 = pneg %p5009_p0 }
 0x61e   : > { %p5015_p8 = pnand %p5014_p10, %p5010_p5 }
 0x620   : > { %5018 = shalt.err (!%p5015_p8)
}
 0x621   : > { %s5084_s17 = smov 128   ;;  %s5085_s20 = smov 8  }
 0x622   : > { %4749 = dma.vmem_to_hbm [thread:$0]  (%p7777_p11), %s7680_s21, 1024, %s7678_s13, %s7688_s9, %s5084_s17, %s5084_s17, %s5085_s20  }
 0x623 PF: > { %p4776_p13 = scmp.ge.s32.totalorder %s5065_s30, 2  ;;  %s4307_s26 = sand.u32 1, %s5053_s27  }
 0x624   : > { %p7778_p1 = scmp.ne.s32.totalorder %s7756_s16, 0  ;;  %s4308_s23 = scalar_lea.sflag [#allocation5], %s4307_s26 }
 0x626   : > { %p4765_p2 = pnand %p4776_p13, %p7778_p1 }
 0x628   : > { %p4766_p3 = pneg %p4765_p2 }
 0x62a   : > { %5048 = dma.done.wait (%p4766_p3), %s4308_s23, 1024  }
 0x62b   : > { %5050 = vsyncadd (%p4766_p3), %s4308_s23, 4294966272  ;;  %s7779_s7 = sld [smem:[#allocation17_spill]]  ;;  %p21_p4 = scmp.ge.s32.totalorder %s5156_s11, 4  }
 0x62c   : > { %s7780_s27 = smov %s5057_s28  ;;  %s7781_s28 = smov %s5061_s29 }
 0x62d   : > { %s7783_s30 = smov %s5156_s11  ;;  %23 = sbr.rel (!%p21_p4) target bundleno = 14 (0xe), region = 118 }
 0x631   : > { %s7782_s29 = smov %s7779_s7 }
 0x632   :  { %4313 = vsyncpa [#allocation5], 1 }
 0x633   :  { %4315 = vsyncpa [#allocation5 + $0x1], 1 }
 0x634   :  { %4316 = vsyncpa [#allocation6], 1 }
 0x635   :  { %4318 = vsyncpa [#allocation6 + $0x1], 1 }
 0x636   :  { %4319 = vsyncpa [#allocation8], 1 }
 0x637   :  { %4320 = vsyncpa [#allocation11], 1 }

</bundles_post_ra>
